<compile_context>
chip_gen: v7x
topology: tpu7x:2x2x1
jax: 0.10.0
libtpu: 0.0.40
codegen_flags: <defaults>
</compile_context>

<pallas_src>
import jax
import jax.numpy as jnp
from jax.experimental import pallas as pl
from jax.experimental.pallas import tpu as pltpu


def _conv3x3_valid(x, w):
    """VALID conv, stride 1.  x: (H, W, Cin) f32, w: (KH, KW, Cin, Cout) f32 -> (Ho, Wo, Cout) f32.

    Channel counts are tiny (3/4/16), so an unrolled broadcast-FMA on the VPU is used;
    weight taps are sliced from the hoisted in-register `w`, never re-read from the ref.
    """
    H, W, Cin = x.shape
    KH, KW, _, Cout = w.shape
    Ho, Wo = H - KH + 1, W - KW + 1
    acc = jnp.zeros((Ho, Wo, Cout), jnp.float32)
    for kh in range(KH):
        for kw in range(KW):
            for ci in range(Cin):
                patch = x[kh:kh + Ho, kw:kw + Wo, ci:ci + 1]       # (Ho, Wo, 1)
                wvec = w[kh, kw, ci:ci + 1, :]                      # (1, Cout) in-register slice
                acc = acc + patch * wvec                            # (Ho, Wo, Cout)
    return acc


def _relu_avgpool2(y):
    """ReLU + AvgPool2d(kernel=2, stride=2, floor).  y: (Ho, Wo, C) f32 -> (Hp, Wp, C) f32."""
    Ho, Wo, C = y.shape
    Hp, Wp = Ho // 2, Wo // 2
    y = jnp.maximum(y, 0.0)

    # ---- H pool: crop odd tail, split the *leading* dim (layout-safe reshape), add halves.
    yr = y[: 2 * Hp].reshape(Hp, 2, Wo, C)
    yh = yr[:, 0] + yr[:, 1]                                        # (Hp, Wo, C)

    # ---- W pool: one batched matmul with a 0.25-weighted pooling matrix.
    # pw[p, w] = 0.25 iff w in {2p, 2p+1}; trailing odd column (if any) gets no weight.
    r = jax.lax.broadcasted_iota(jnp.int32, (Wp, Wo), 0)
    c = jax.lax.broadcasted_iota(jnp.int32, (Wp, Wo), 1)
    pw = jnp.where((c == 2 * r) | (c == 2 * r + 1), 0.25, 0.0).astype(jnp.float32)
    pw_b = jnp.broadcast_to(pw[None], (Hp, Wp, Wo))                 # batch over pooled rows
    # Canonical batched-matmul form ('bqk,bkd->bqd'): contract the W (sublane) axis.
    return jnp.einsum("bpw,bwc->bpc", pw_b, yh,
                      precision=jax.lax.Precision.HIGHEST,
                      preferred_element_type=jnp.float32)           # (Hp, Wp, C)


def _cnn_fused_kernel(x_ref, w1_ref, b1_ref, w2_ref, b2_ref, o_ref):
    """One batch element: conv1+ReLU+pool1 -> conv2+ReLU+pool2, single bulk store."""
    # Hoist every ref read once (no per-tap loads inside the unrolled loops).
    x = x_ref[0].astype(jnp.float32)        # (H, W, Cin)
    w1 = w1_ref[...].astype(jnp.float32)    # (3, 3, Cin, C1)  HWIO
    b1 = b1_ref[0].astype(jnp.float32)      # (C1,)
    w2 = w2_ref[...].astype(jnp.float32)    # (3, 3, C1, C2)
    b2 = b2_ref[0].astype(jnp.float32)      # (C2,)

    h1 = _relu_avgpool2(_conv3x3_valid(x, w1) + b1)    # (Hp1, Wp1, C1) stays in registers
    h2 = _relu_avgpool2(_conv3x3_valid(h1, w2) + b2)   # (Hp2, Wp2, C2)

    o_ref[0] = h2.astype(o_ref.dtype)                   # single full-tile store


def cnn_fused(x_nhwc, w1, b1, w2, b2):
    N, H, W, Cin = x_nhwc.shape
    KH, KW, _, C1 = w1.shape
    _, _, _, C2 = w2.shape
    Hp1, Wp1 = (H - KH + 1) // 2, (W - KW + 1) // 2
    Hp2, Wp2 = (Hp1 - KH + 1) // 2, (Wp1 - KW + 1) // 2
    return pl.pallas_call(
        _cnn_fused_kernel,
        out_shape=jax.ShapeDtypeStruct((N, Hp2, Wp2, C2), x_nhwc.dtype),
        grid=(N,),
        in_specs=[
            pl.BlockSpec((1, H, W, Cin), lambda n: (n, 0, 0, 0)),
            pl.BlockSpec((KH, KW, Cin, C1), lambda n: (0, 0, 0, 0)),
            pl.BlockSpec((1, C1), lambda n: (0, 0)),
            pl.BlockSpec((KH, KW, C1, C2), lambda n: (0, 0, 0, 0)),
            pl.BlockSpec((1, C2), lambda n: (0, 0)),
        ],
        out_specs=pl.BlockSpec((1, Hp2, Wp2, C2), lambda n: (n, 0, 0, 0)),
        # Keep a parallel batch axis: on v7x each TensorCore takes one image.
        compiler_params=pltpu.CompilerParams(dimension_semantics=("parallel",)),
    )(x_nhwc, w1, b1, w2, b2)


def init_params(key):
    k1, k2, k3, k4 = jax.random.split(key, 4)
    return {
        # Conv weights stored HWIO (kernel-friendly); PyTorch shapes were (4,3,3,3)/(16,4,3,3) OIHW.
        "w1": 0.1 * jax.random.normal(k1, (3, 3, 3, 4), jnp.float32),
        "b1": 0.1 * jax.random.normal(k2, (1, 4), jnp.float32),
        "w2": 0.1 * jax.random.normal(k3, (3, 3, 4, 16), jnp.float32),
        "b2": 0.1 * jax.random.normal(k4, (1, 16), jnp.float32),
    }


def cnn_forward(x_nchw, params):
    # One tiny transpose on each side is kept as layout plumbing (NCHW <-> NHWC);
    # everything between them is a single fused pallas_call.
    x = jnp.transpose(x_nchw, (0, 2, 3, 1))                               # NCHW -> NHWC
    y = cnn_fused(x, params["w1"], params["b1"], params["w2"], params["b2"])
    return jnp.transpose(y, (0, 3, 1, 2))                                 # NHWC -> NCHW


def cnn_forward_ref(x_nchw, params):
    """Pure-JAX reference (same math) for correctness checking."""
    def block(x, w, b):
        y = jax.lax.conv_general_dilated(
            x, w, window_strides=(1, 1), padding="VALID",
            dimension_numbers=("NHWC", "HWIO", "NHWC"))
        y = jnp.maximum(y + b.reshape(1, 1, 1, -1), 0.0)
        y = jax.lax.reduce_window(y, 0.0, jax.lax.add,
                                  (1, 2, 2, 1), (1, 2, 2, 1), "VALID") * 0.25
        return y
    x = jnp.transpose(x_nchw, (0, 2, 3, 1))
    x = block(x, params["w1"], params["b1"])
    x = block(x, params["w2"], params["b2"])
    return jnp.transpose(x, (0, 3, 1, 2))


if __name__ == "__main__":
    key = jax.random.PRNGKey(0)
    kx, kp = jax.random.split(key)

    # PyTorch-style NCHW input, 3 input channels as required by Conv2d(3, 4, ...)
    x = jax.random.normal(kx, (2, 3, 16, 16), jnp.float32)
    params = init_params(kp)

    out = jax.block_until_ready(cnn_forward(x, params))
    assert out.shape == (2, 16, 2, 2), out.shape

    ref = jax.block_until_ready(cnn_forward_ref(x, params))
    assert jnp.allclose(out, ref, atol=1e-4, rtol=1e-4), float(jnp.max(jnp.abs(out - ref)))

    print("KERNEL_OK")
</pallas_src>

<mosaic_0001>
module attributes {stable_mosaic.version = 11 : i64} {
  func.func @_cnn_fused_kernel(%arg0: i32, %arg1: memref<1x16x16x3xf32, #tpu.memory_space<vmem>>, %arg2: memref<3x3x3x4xf32, #tpu.memory_space<vmem>>, %arg3: memref<1x4xf32, #tpu.memory_space<vmem>>, %arg4: memref<3x3x4x16xf32, #tpu.memory_space<vmem>>, %arg5: memref<1x16xf32, #tpu.memory_space<vmem>>, %arg6: memref<1x2x2x16xf32, #tpu.memory_space<vmem>>) attributes {dimension_semantics = [#tpu.dimension_semantics<parallel>], iteration_bounds = array<i64: 2>, scalar_prefetch = 0 : i64, scratch_operands = 0 : i64, tpu.core_type = #tpu.core_type<tc>, window_params = [{transform_indices = @transform_0, window_bounds = array<i64: 1, 16, 16, 3>}, {pipeline_mode = #tpu.pipeline_mode<synchronous>, transform_indices = @transform_1, window_bounds = array<i64: 3, 3, 3, 4>}, {pipeline_mode = #tpu.pipeline_mode<synchronous>, transform_indices = @transform_2, window_bounds = array<i64: 1, 4>}, {pipeline_mode = #tpu.pipeline_mode<synchronous>, transform_indices = @transform_3, window_bounds = array<i64: 3, 3, 4, 16>}, {pipeline_mode = #tpu.pipeline_mode<synchronous>, transform_indices = @transform_4, window_bounds = array<i64: 1, 16>}, {transform_indices = @transform_5, window_bounds = array<i64: 1, 2, 2, 16>}]} {
    %c0 = arith.constant 0 : index
    %c0_0 = arith.constant 0 : index
    %c0_1 = arith.constant 0 : index
    %c0_2 = arith.constant 0 : index
    %0 = vector.load %arg1[%c0, %c0_0, %c0_1, %c0_2] : memref<1x16x16x3xf32, #tpu.memory_space<vmem>>, vector<1x16x16x3xf32>
    %1 = vector.shape_cast %0 : vector<1x16x16x3xf32> to vector<16x16x3xf32>
    %c0_3 = arith.constant 0 : index
    %c0_4 = arith.constant 0 : index
    %c0_5 = arith.constant 0 : index
    %c0_6 = arith.constant 0 : index
    %2 = vector.load %arg2[%c0_3, %c0_4, %c0_5, %c0_6] : memref<3x3x3x4xf32, #tpu.memory_space<vmem>>, vector<3x3x3x4xf32>
    %c0_7 = arith.constant 0 : index
    %c0_8 = arith.constant 0 : index
    %3 = vector.load %arg3[%c0_7, %c0_8] : memref<1x4xf32, #tpu.memory_space<vmem>>, vector<1x4xf32>
    %4 = vector.shape_cast %3 : vector<1x4xf32> to vector<4xf32>
    %c0_9 = arith.constant 0 : index
    %c0_10 = arith.constant 0 : index
    %c0_11 = arith.constant 0 : index
    %c0_12 = arith.constant 0 : index
    %5 = vector.load %arg4[%c0_9, %c0_10, %c0_11, %c0_12] : memref<3x3x4x16xf32, #tpu.memory_space<vmem>>, vector<3x3x4x16xf32>
    %c0_13 = arith.constant 0 : index
    %c0_14 = arith.constant 0 : index
    %6 = vector.load %arg5[%c0_13, %c0_14] : memref<1x16xf32, #tpu.memory_space<vmem>>, vector<1x16xf32>
    %7 = vector.shape_cast %6 : vector<1x16xf32> to vector<16xf32>
    %cst = arith.constant 0.000000e+00 : f32
    %8 = vector.broadcast %cst : f32 to vector<14x14x4xf32>
    %9 = vector.extract_strided_slice %1 {offsets = [0, 0, 0], sizes = [14, 14, 1], strides = [1, 1, 1]} : vector<16x16x3xf32> to vector<14x14x1xf32>
    %10 = vector.extract_strided_slice %2 {offsets = [0, 0, 0, 0], sizes = [1, 1, 1, 4], strides = [1, 1, 1, 1]} : vector<3x3x3x4xf32> to vector<1x1x1x4xf32>
    %11 = vector.shape_cast %10 : vector<1x1x1x4xf32> to vector<1x4xf32>
    %12 = vector.shape_cast %11 : vector<1x4xf32> to vector<1x1x4xf32>
    %13 = vector.broadcast %9 : vector<14x14x1xf32> to vector<14x14x4xf32>
    %14 = vector.broadcast %12 : vector<1x1x4xf32> to vector<14x14x4xf32>
    %15 = arith.mulf %13, %14 : vector<14x14x4xf32>
    %16 = arith.addf %8, %15 : vector<14x14x4xf32>
    %17 = vector.extract_strided_slice %1 {offsets = [0, 0, 1], sizes = [14, 14, 1], strides = [1, 1, 1]} : vector<16x16x3xf32> to vector<14x14x1xf32>
    %18 = vector.extract_strided_slice %2 {offsets = [0, 0, 1, 0], sizes = [1, 1, 1, 4], strides = [1, 1, 1, 1]} : vector<3x3x3x4xf32> to vector<1x1x1x4xf32>
    %19 = vector.shape_cast %18 : vector<1x1x1x4xf32> to vector<1x4xf32>
    %20 = vector.shape_cast %19 : vector<1x4xf32> to vector<1x1x4xf32>
    %21 = vector.broadcast %17 : vector<14x14x1xf32> to vector<14x14x4xf32>
    %22 = vector.broadcast %20 : vector<1x1x4xf32> to vector<14x14x4xf32>
    %23 = arith.mulf %21, %22 : vector<14x14x4xf32>
    %24 = arith.addf %16, %23 : vector<14x14x4xf32>
    %25 = vector.extract_strided_slice %1 {offsets = [0, 0, 2], sizes = [14, 14, 1], strides = [1, 1, 1]} : vector<16x16x3xf32> to vector<14x14x1xf32>
    %26 = vector.extract_strided_slice %2 {offsets = [0, 0, 2, 0], sizes = [1, 1, 1, 4], strides = [1, 1, 1, 1]} : vector<3x3x3x4xf32> to vector<1x1x1x4xf32>
    %27 = vector.shape_cast %26 : vector<1x1x1x4xf32> to vector<1x4xf32>
    %28 = vector.shape_cast %27 : vector<1x4xf32> to vector<1x1x4xf32>
    %29 = vector.broadcast %25 : vector<14x14x1xf32> to vector<14x14x4xf32>
    %30 = vector.broadcast %28 : vector<1x1x4xf32> to vector<14x14x4xf32>
    %31 = arith.mulf %29, %30 : vector<14x14x4xf32>
    %32 = arith.addf %24, %31 : vector<14x14x4xf32>
    %33 = vector.extract_strided_slice %1 {offsets = [0, 1, 0], sizes = [14, 14, 1], strides = [1, 1, 1]} : vector<16x16x3xf32> to vector<14x14x1xf32>
    %34 = vector.extract_strided_slice %2 {offsets = [0, 1, 0, 0], sizes = [1, 1, 1, 4], strides = [1, 1, 1, 1]} : vector<3x3x3x4xf32> to vector<1x1x1x4xf32>
    %35 = vector.shape_cast %34 : vector<1x1x1x4xf32> to vector<1x4xf32>
    %36 = vector.shape_cast %35 : vector<1x4xf32> to vector<1x1x4xf32>
    %37 = vector.broadcast %33 : vector<14x14x1xf32> to vector<14x14x4xf32>
    %38 = vector.broadcast %36 : vector<1x1x4xf32> to vector<14x14x4xf32>
    %39 = arith.mulf %37, %38 : vector<14x14x4xf32>
    %40 = arith.addf %32, %39 : vector<14x14x4xf32>
    %41 = vector.extract_strided_slice %1 {offsets = [0, 1, 1], sizes = [14, 14, 1], strides = [1, 1, 1]} : vector<16x16x3xf32> to vector<14x14x1xf32>
    %42 = vector.extract_strided_slice %2 {offsets = [0, 1, 1, 0], sizes = [1, 1, 1, 4], strides = [1, 1, 1, 1]} : vector<3x3x3x4xf32> to vector<1x1x1x4xf32>
    %43 = vector.shape_cast %42 : vector<1x1x1x4xf32> to vector<1x4xf32>
    %44 = vector.shape_cast %43 : vector<1x4xf32> to vector<1x1x4xf32>
    %45 = vector.broadcast %41 : vector<14x14x1xf32> to vector<14x14x4xf32>
    %46 = vector.broadcast %44 : vector<1x1x4xf32> to vector<14x14x4xf32>
    %47 = arith.mulf %45, %46 : vector<14x14x4xf32>
    %48 = arith.addf %40, %47 : vector<14x14x4xf32>
    %49 = vector.extract_strided_slice %1 {offsets = [0, 1, 2], sizes = [14, 14, 1], strides = [1, 1, 1]} : vector<16x16x3xf32> to vector<14x14x1xf32>
    %50 = vector.extract_strided_slice %2 {offsets = [0, 1, 2, 0], sizes = [1, 1, 1, 4], strides = [1, 1, 1, 1]} : vector<3x3x3x4xf32> to vector<1x1x1x4xf32>
    %51 = vector.shape_cast %50 : vector<1x1x1x4xf32> to vector<1x4xf32>
    %52 = vector.shape_cast %51 : vector<1x4xf32> to vector<1x1x4xf32>
    %53 = vector.broadcast %49 : vector<14x14x1xf32> to vector<14x14x4xf32>
    %54 = vector.broadcast %52 : vector<1x1x4xf32> to vector<14x14x4xf32>
    %55 = arith.mulf %53, %54 : vector<14x14x4xf32>
    %56 = arith.addf %48, %55 : vector<14x14x4xf32>
    %57 = vector.extract_strided_slice %1 {offsets = [0, 2, 0], sizes = [14, 14, 1], strides = [1, 1, 1]} : vector<16x16x3xf32> to vector<14x14x1xf32>
    %58 = vector.extract_strided_slice %2 {offsets = [0, 2, 0, 0], sizes = [1, 1, 1, 4], strides = [1, 1, 1, 1]} : vector<3x3x3x4xf32> to vector<1x1x1x4xf32>
    %59 = vector.shape_cast %58 : vector<1x1x1x4xf32> to vector<1x4xf32>
    %60 = vector.shape_cast %59 : vector<1x4xf32> to vector<1x1x4xf32>
    %61 = vector.broadcast %57 : vector<14x14x1xf32> to vector<14x14x4xf32>
    %62 = vector.broadcast %60 : vector<1x1x4xf32> to vector<14x14x4xf32>
    %63 = arith.mulf %61, %62 : vector<14x14x4xf32>
    %64 = arith.addf %56, %63 : vector<14x14x4xf32>
    %65 = vector.extract_strided_slice %1 {offsets = [0, 2, 1], sizes = [14, 14, 1], strides = [1, 1, 1]} : vector<16x16x3xf32> to vector<14x14x1xf32>
    %66 = vector.extract_strided_slice %2 {offsets = [0, 2, 1, 0], sizes = [1, 1, 1, 4], strides = [1, 1, 1, 1]} : vector<3x3x3x4xf32> to vector<1x1x1x4xf32>
    %67 = vector.shape_cast %66 : vector<1x1x1x4xf32> to vector<1x4xf32>
    %68 = vector.shape_cast %67 : vector<1x4xf32> to vector<1x1x4xf32>
    %69 = vector.broadcast %65 : vector<14x14x1xf32> to vector<14x14x4xf32>
    %70 = vector.broadcast %68 : vector<1x1x4xf32> to vector<14x14x4xf32>
    %71 = arith.mulf %69, %70 : vector<14x14x4xf32>
    %72 = arith.addf %64, %71 : vector<14x14x4xf32>
    %73 = vector.extract_strided_slice %1 {offsets = [0, 2, 2], sizes = [14, 14, 1], strides = [1, 1, 1]} : vector<16x16x3xf32> to vector<14x14x1xf32>
    %74 = vector.extract_strided_slice %2 {offsets = [0, 2, 2, 0], sizes = [1, 1, 1, 4], strides = [1, 1, 1, 1]} : vector<3x3x3x4xf32> to vector<1x1x1x4xf32>
    %75 = vector.shape_cast %74 : vector<1x1x1x4xf32> to vector<1x4xf32>
    %76 = vector.shape_cast %75 : vector<1x4xf32> to vector<1x1x4xf32>
    %77 = vector.broadcast %73 : vector<14x14x1xf32> to vector<14x14x4xf32>
    %78 = vector.broadcast %76 : vector<1x1x4xf32> to vector<14x14x4xf32>
    %79 = arith.mulf %77, %78 : vector<14x14x4xf32>
    %80 = arith.addf %72, %79 : vector<14x14x4xf32>
    %81 = vector.extract_strided_slice %1 {offsets = [1, 0, 0], sizes = [14, 14, 1], strides = [1, 1, 1]} : vector<16x16x3xf32> to vector<14x14x1xf32>
    %82 = vector.extract_strided_slice %2 {offsets = [1, 0, 0, 0], sizes = [1, 1, 1, 4], strides = [1, 1, 1, 1]} : vector<3x3x3x4xf32> to vector<1x1x1x4xf32>
    %83 = vector.shape_cast %82 : vector<1x1x1x4xf32> to vector<1x4xf32>
    %84 = vector.shape_cast %83 : vector<1x4xf32> to vector<1x1x4xf32>
    %85 = vector.broadcast %81 : vector<14x14x1xf32> to vector<14x14x4xf32>
    %86 = vector.broadcast %84 : vector<1x1x4xf32> to vector<14x14x4xf32>
    %87 = arith.mulf %85, %86 : vector<14x14x4xf32>
    %88 = arith.addf %80, %87 : vector<14x14x4xf32>
    %89 = vector.extract_strided_slice %1 {offsets = [1, 0, 1], sizes = [14, 14, 1], strides = [1, 1, 1]} : vector<16x16x3xf32> to vector<14x14x1xf32>
    %90 = vector.extract_strided_slice %2 {offsets = [1, 0, 1, 0], sizes = [1, 1, 1, 4], strides = [1, 1, 1, 1]} : vector<3x3x3x4xf32> to vector<1x1x1x4xf32>
    %91 = vector.shape_cast %90 : vector<1x1x1x4xf32> to vector<1x4xf32>
    %92 = vector.shape_cast %91 : vector<1x4xf32> to vector<1x1x4xf32>
    %93 = vector.broadcast %89 : vector<14x14x1xf32> to vector<14x14x4xf32>
    %94 = vector.broadcast %92 : vector<1x1x4xf32> to vector<14x14x4xf32>
    %95 = arith.mulf %93, %94 : vector<14x14x4xf32>
    %96 = arith.addf %88, %95 : vector<14x14x4xf32>
    %97 = vector.extract_strided_slice %1 {offsets = [1, 0, 2], sizes = [14, 14, 1], strides = [1, 1, 1]} : vector<16x16x3xf32> to vector<14x14x1xf32>
    %98 = vector.extract_strided_slice %2 {offsets = [1, 0, 2, 0], sizes = [1, 1, 1, 4], strides = [1, 1, 1, 1]} : vector<3x3x3x4xf32> to vector<1x1x1x4xf32>
    %99 = vector.shape_cast %98 : vector<1x1x1x4xf32> to vector<1x4xf32>
    %100 = vector.shape_cast %99 : vector<1x4xf32> to vector<1x1x4xf32>
    %101 = vector.broadcast %97 : vector<14x14x1xf32> to vector<14x14x4xf32>
    %102 = vector.broadcast %100 : vector<1x1x4xf32> to vector<14x14x4xf32>
    %103 = arith.mulf %101, %102 : vector<14x14x4xf32>
    %104 = arith.addf %96, %103 : vector<14x14x4xf32>
    %105 = vector.extract_strided_slice %1 {offsets = [1, 1, 0], sizes = [14, 14, 1], strides = [1, 1, 1]} : vector<16x16x3xf32> to vector<14x14x1xf32>
    %106 = vector.extract_strided_slice %2 {offsets = [1, 1, 0, 0], sizes = [1, 1, 1, 4], strides = [1, 1, 1, 1]} : vector<3x3x3x4xf32> to vector<1x1x1x4xf32>
    %107 = vector.shape_cast %106 : vector<1x1x1x4xf32> to vector<1x4xf32>
    %108 = vector.shape_cast %107 : vector<1x4xf32> to vector<1x1x4xf32>
    %109 = vector.broadcast %105 : vector<14x14x1xf32> to vector<14x14x4xf32>
    %110 = vector.broadcast %108 : vector<1x1x4xf32> to vector<14x14x4xf32>
    %111 = arith.mulf %109, %110 : vector<14x14x4xf32>
    %112 = arith.addf %104, %111 : vector<14x14x4xf32>
    %113 = vector.extract_strided_slice %1 {offsets = [1, 1, 1], sizes = [14, 14, 1], strides = [1, 1, 1]} : vector<16x16x3xf32> to vector<14x14x1xf32>
    %114 = vector.extract_strided_slice %2 {offsets = [1, 1, 1, 0], sizes = [1, 1, 1, 4], strides = [1, 1, 1, 1]} : vector<3x3x3x4xf32> to vector<1x1x1x4xf32>
    %115 = vector.shape_cast %114 : vector<1x1x1x4xf32> to vector<1x4xf32>
    %116 = vector.shape_cast %115 : vector<1x4xf32> to vector<1x1x4xf32>
    %117 = vector.broadcast %113 : vector<14x14x1xf32> to vector<14x14x4xf32>
    %118 = vector.broadcast %116 : vector<1x1x4xf32> to vector<14x14x4xf32>
    %119 = arith.mulf %117, %118 : vector<14x14x4xf32>
    %120 = arith.addf %112, %119 : vector<14x14x4xf32>
    %121 = vector.extract_strided_slice %1 {offsets = [1, 1, 2], sizes = [14, 14, 1], strides = [1, 1, 1]} : vector<16x16x3xf32> to vector<14x14x1xf32>
    %122 = vector.extract_strided_slice %2 {offsets = [1, 1, 2, 0], sizes = [1, 1, 1, 4], strides = [1, 1, 1, 1]} : vector<3x3x3x4xf32> to vector<1x1x1x4xf32>
    %123 = vector.shape_cast %122 : vector<1x1x1x4xf32> to vector<1x4xf32>
    %124 = vector.shape_cast %123 : vector<1x4xf32> to vector<1x1x4xf32>
    %125 = vector.broadcast %121 : vector<14x14x1xf32> to vector<14x14x4xf32>
    %126 = vector.broadcast %124 : vector<1x1x4xf32> to vector<14x14x4xf32>
    %127 = arith.mulf %125, %126 : vector<14x14x4xf32>
    %128 = arith.addf %120, %127 : vector<14x14x4xf32>
    %129 = vector.extract_strided_slice %1 {offsets = [1, 2, 0], sizes = [14, 14, 1], strides = [1, 1, 1]} : vector<16x16x3xf32> to vector<14x14x1xf32>
    %130 = vector.extract_strided_slice %2 {offsets = [1, 2, 0, 0], sizes = [1, 1, 1, 4], strides = [1, 1, 1, 1]} : vector<3x3x3x4xf32> to vector<1x1x1x4xf32>
    %131 = vector.shape_cast %130 : vector<1x1x1x4xf32> to vector<1x4xf32>
    %132 = vector.shape_cast %131 : vector<1x4xf32> to vector<1x1x4xf32>
    %133 = vector.broadcast %129 : vector<14x14x1xf32> to vector<14x14x4xf32>
    %134 = vector.broadcast %132 : vector<1x1x4xf32> to vector<14x14x4xf32>
    %135 = arith.mulf %133, %134 : vector<14x14x4xf32>
    %136 = arith.addf %128, %135 : vector<14x14x4xf32>
    %137 = vector.extract_strided_slice %1 {offsets = [1, 2, 1], sizes = [14, 14, 1], strides = [1, 1, 1]} : vector<16x16x3xf32> to vector<14x14x1xf32>
    %138 = vector.extract_strided_slice %2 {offsets = [1, 2, 1, 0], sizes = [1, 1, 1, 4], strides = [1, 1, 1, 1]} : vector<3x3x3x4xf32> to vector<1x1x1x4xf32>
    %139 = vector.shape_cast %138 : vector<1x1x1x4xf32> to vector<1x4xf32>
    %140 = vector.shape_cast %139 : vector<1x4xf32> to vector<1x1x4xf32>
    %141 = vector.broadcast %137 : vector<14x14x1xf32> to vector<14x14x4xf32>
    %142 = vector.broadcast %140 : vector<1x1x4xf32> to vector<14x14x4xf32>
    %143 = arith.mulf %141, %142 : vector<14x14x4xf32>
    %144 = arith.addf %136, %143 : vector<14x14x4xf32>
    %145 = vector.extract_strided_slice %1 {offsets = [1, 2, 2], sizes = [14, 14, 1], strides = [1, 1, 1]} : vector<16x16x3xf32> to vector<14x14x1xf32>
    %146 = vector.extract_strided_slice %2 {offsets = [1, 2, 2, 0], sizes = [1, 1, 1, 4], strides = [1, 1, 1, 1]} : vector<3x3x3x4xf32> to vector<1x1x1x4xf32>
    %147 = vector.shape_cast %146 : vector<1x1x1x4xf32> to vector<1x4xf32>
    %148 = vector.shape_cast %147 : vector<1x4xf32> to vector<1x1x4xf32>
    %149 = vector.broadcast %145 : vector<14x14x1xf32> to vector<14x14x4xf32>
    %150 = vector.broadcast %148 : vector<1x1x4xf32> to vector<14x14x4xf32>
    %151 = arith.mulf %149, %150 : vector<14x14x4xf32>
    %152 = arith.addf %144, %151 : vector<14x14x4xf32>
    %153 = vector.extract_strided_slice %1 {offsets = [2, 0, 0], sizes = [14, 14, 1], strides = [1, 1, 1]} : vector<16x16x3xf32> to vector<14x14x1xf32>
    %154 = vector.extract_strided_slice %2 {offsets = [2, 0, 0, 0], sizes = [1, 1, 1, 4], strides = [1, 1, 1, 1]} : vector<3x3x3x4xf32> to vector<1x1x1x4xf32>
    %155 = vector.shape_cast %154 : vector<1x1x1x4xf32> to vector<1x4xf32>
    %156 = vector.shape_cast %155 : vector<1x4xf32> to vector<1x1x4xf32>
    %157 = vector.broadcast %153 : vector<14x14x1xf32> to vector<14x14x4xf32>
    %158 = vector.broadcast %156 : vector<1x1x4xf32> to vector<14x14x4xf32>
    %159 = arith.mulf %157, %158 : vector<14x14x4xf32>
    %160 = arith.addf %152, %159 : vector<14x14x4xf32>
    %161 = vector.extract_strided_slice %1 {offsets = [2, 0, 1], sizes = [14, 14, 1], strides = [1, 1, 1]} : vector<16x16x3xf32> to vector<14x14x1xf32>
    %162 = vector.extract_strided_slice %2 {offsets = [2, 0, 1, 0], sizes = [1, 1, 1, 4], strides = [1, 1, 1, 1]} : vector<3x3x3x4xf32> to vector<1x1x1x4xf32>
    %163 = vector.shape_cast %162 : vector<1x1x1x4xf32> to vector<1x4xf32>
    %164 = vector.shape_cast %163 : vector<1x4xf32> to vector<1x1x4xf32>
    %165 = vector.broadcast %161 : vector<14x14x1xf32> to vector<14x14x4xf32>
    %166 = vector.broadcast %164 : vector<1x1x4xf32> to vector<14x14x4xf32>
    %167 = arith.mulf %165, %166 : vector<14x14x4xf32>
    %168 = arith.addf %160, %167 : vector<14x14x4xf32>
    %169 = vector.extract_strided_slice %1 {offsets = [2, 0, 2], sizes = [14, 14, 1], strides = [1, 1, 1]} : vector<16x16x3xf32> to vector<14x14x1xf32>
    %170 = vector.extract_strided_slice %2 {offsets = [2, 0, 2, 0], sizes = [1, 1, 1, 4], strides = [1, 1, 1, 1]} : vector<3x3x3x4xf32> to vector<1x1x1x4xf32>
    %171 = vector.shape_cast %170 : vector<1x1x1x4xf32> to vector<1x4xf32>
    %172 = vector.shape_cast %171 : vector<1x4xf32> to vector<1x1x4xf32>
    %173 = vector.broadcast %169 : vector<14x14x1xf32> to vector<14x14x4xf32>
    %174 = vector.broadcast %172 : vector<1x1x4xf32> to vector<14x14x4xf32>
    %175 = arith.mulf %173, %174 : vector<14x14x4xf32>
    %176 = arith.addf %168, %175 : vector<14x14x4xf32>
    %177 = vector.extract_strided_slice %1 {offsets = [2, 1, 0], sizes = [14, 14, 1], strides = [1, 1, 1]} : vector<16x16x3xf32> to vector<14x14x1xf32>
    %178 = vector.extract_strided_slice %2 {offsets = [2, 1, 0, 0], sizes = [1, 1, 1, 4], strides = [1, 1, 1, 1]} : vector<3x3x3x4xf32> to vector<1x1x1x4xf32>
    %179 = vector.shape_cast %178 : vector<1x1x1x4xf32> to vector<1x4xf32>
    %180 = vector.shape_cast %179 : vector<1x4xf32> to vector<1x1x4xf32>
    %181 = vector.broadcast %177 : vector<14x14x1xf32> to vector<14x14x4xf32>
    %182 = vector.broadcast %180 : vector<1x1x4xf32> to vector<14x14x4xf32>
    %183 = arith.mulf %181, %182 : vector<14x14x4xf32>
    %184 = arith.addf %176, %183 : vector<14x14x4xf32>
    %185 = vector.extract_strided_slice %1 {offsets = [2, 1, 1], sizes = [14, 14, 1], strides = [1, 1, 1]} : vector<16x16x3xf32> to vector<14x14x1xf32>
    %186 = vector.extract_strided_slice %2 {offsets = [2, 1, 1, 0], sizes = [1, 1, 1, 4], strides = [1, 1, 1, 1]} : vector<3x3x3x4xf32> to vector<1x1x1x4xf32>
    %187 = vector.shape_cast %186 : vector<1x1x1x4xf32> to vector<1x4xf32>
    %188 = vector.shape_cast %187 : vector<1x4xf32> to vector<1x1x4xf32>
    %189 = vector.broadcast %185 : vector<14x14x1xf32> to vector<14x14x4xf32>
    %190 = vector.broadcast %188 : vector<1x1x4xf32> to vector<14x14x4xf32>
    %191 = arith.mulf %189, %190 : vector<14x14x4xf32>
    %192 = arith.addf %184, %191 : vector<14x14x4xf32>
    %193 = vector.extract_strided_slice %1 {offsets = [2, 1, 2], sizes = [14, 14, 1], strides = [1, 1, 1]} : vector<16x16x3xf32> to vector<14x14x1xf32>
    %194 = vector.extract_strided_slice %2 {offsets = [2, 1, 2, 0], sizes = [1, 1, 1, 4], strides = [1, 1, 1, 1]} : vector<3x3x3x4xf32> to vector<1x1x1x4xf32>
    %195 = vector.shape_cast %194 : vector<1x1x1x4xf32> to vector<1x4xf32>
    %196 = vector.shape_cast %195 : vector<1x4xf32> to vector<1x1x4xf32>
    %197 = vector.broadcast %193 : vector<14x14x1xf32> to vector<14x14x4xf32>
    %198 = vector.broadcast %196 : vector<1x1x4xf32> to vector<14x14x4xf32>
    %199 = arith.mulf %197, %198 : vector<14x14x4xf32>
    %200 = arith.addf %192, %199 : vector<14x14x4xf32>
    %201 = vector.extract_strided_slice %1 {offsets = [2, 2, 0], sizes = [14, 14, 1], strides = [1, 1, 1]} : vector<16x16x3xf32> to vector<14x14x1xf32>
    %202 = vector.extract_strided_slice %2 {offsets = [2, 2, 0, 0], sizes = [1, 1, 1, 4], strides = [1, 1, 1, 1]} : vector<3x3x3x4xf32> to vector<1x1x1x4xf32>
    %203 = vector.shape_cast %202 : vector<1x1x1x4xf32> to vector<1x4xf32>
    %204 = vector.shape_cast %203 : vector<1x4xf32> to vector<1x1x4xf32>
    %205 = vector.broadcast %201 : vector<14x14x1xf32> to vector<14x14x4xf32>
    %206 = vector.broadcast %204 : vector<1x1x4xf32> to vector<14x14x4xf32>
    %207 = arith.mulf %205, %206 : vector<14x14x4xf32>
    %208 = arith.addf %200, %207 : vector<14x14x4xf32>
    %209 = vector.extract_strided_slice %1 {offsets = [2, 2, 1], sizes = [14, 14, 1], strides = [1, 1, 1]} : vector<16x16x3xf32> to vector<14x14x1xf32>
    %210 = vector.extract_strided_slice %2 {offsets = [2, 2, 1, 0], sizes = [1, 1, 1, 4], strides = [1, 1, 1, 1]} : vector<3x3x3x4xf32> to vector<1x1x1x4xf32>
    %211 = vector.shape_cast %210 : vector<1x1x1x4xf32> to vector<1x4xf32>
    %212 = vector.shape_cast %211 : vector<1x4xf32> to vector<1x1x4xf32>
    %213 = vector.broadcast %209 : vector<14x14x1xf32> to vector<14x14x4xf32>
    %214 = vector.broadcast %212 : vector<1x1x4xf32> to vector<14x14x4xf32>
    %215 = arith.mulf %213, %214 : vector<14x14x4xf32>
    %216 = arith.addf %208, %215 : vector<14x14x4xf32>
    %217 = vector.extract_strided_slice %1 {offsets = [2, 2, 2], sizes = [14, 14, 1], strides = [1, 1, 1]} : vector<16x16x3xf32> to vector<14x14x1xf32>
    %218 = vector.extract_strided_slice %2 {offsets = [2, 2, 2, 0], sizes = [1, 1, 1, 4], strides = [1, 1, 1, 1]} : vector<3x3x3x4xf32> to vector<1x1x1x4xf32>
    %219 = vector.shape_cast %218 : vector<1x1x1x4xf32> to vector<1x4xf32>
    %220 = vector.shape_cast %219 : vector<1x4xf32> to vector<1x1x4xf32>
    %221 = vector.broadcast %217 : vector<14x14x1xf32> to vector<14x14x4xf32>
    %222 = vector.broadcast %220 : vector<1x1x4xf32> to vector<14x14x4xf32>
    %223 = arith.mulf %221, %222 : vector<14x14x4xf32>
    %224 = arith.addf %216, %223 : vector<14x14x4xf32>
    %225 = vector.shape_cast %4 : vector<4xf32> to vector<1x1x4xf32>
    %226 = vector.broadcast %225 : vector<1x1x4xf32> to vector<14x14x4xf32>
    %227 = arith.addf %224, %226 : vector<14x14x4xf32>
    %cst_15 = arith.constant 0.000000e+00 : f32
    %228 = vector.broadcast %cst_15 : f32 to vector<14x14x4xf32>
    %229 = arith.maximumf %227, %228 : vector<14x14x4xf32>
    %230 = vector.shape_cast %229 : vector<14x14x4xf32> to vector<7x2x14x4xf32>
    %231 = vector.extract_strided_slice %230 {offsets = [0, 0, 0, 0], sizes = [7, 1, 14, 4], strides = [1, 1, 1, 1]} : vector<7x2x14x4xf32> to vector<7x1x14x4xf32>
    %232 = vector.shape_cast %231 : vector<7x1x14x4xf32> to vector<7x14x4xf32>
    %233 = vector.extract_strided_slice %230 {offsets = [0, 1, 0, 0], sizes = [7, 1, 14, 4], strides = [1, 1, 1, 1]} : vector<7x2x14x4xf32> to vector<7x1x14x4xf32>
    %234 = vector.shape_cast %233 : vector<7x1x14x4xf32> to vector<7x14x4xf32>
    %235 = arith.addf %232, %234 : vector<7x14x4xf32>
    %236 = tpu.iota {dimensions = array<i32: 0>} : vector<7x14xi32>
    %237 = tpu.iota {dimensions = array<i32: 1>} : vector<7x14xi32>
    %c2_i32 = arith.constant 2 : i32
    %238 = vector.broadcast %c2_i32 : i32 to vector<7x14xi32>
    %239 = arith.muli %238, %236 : vector<7x14xi32>
    %240 = arith.cmpi eq, %237, %239 : vector<7x14xi32>
    %c2_i32_16 = arith.constant 2 : i32
    %241 = vector.broadcast %c2_i32_16 : i32 to vector<7x14xi32>
    %242 = arith.muli %241, %236 : vector<7x14xi32>
    %c1_i32 = arith.constant 1 : i32
    %243 = vector.broadcast %c1_i32 : i32 to vector<7x14xi32>
    %244 = arith.addi %242, %243 : vector<7x14xi32>
    %245 = arith.cmpi eq, %237, %244 : vector<7x14xi32>
    %246 = arith.ori %240, %245 : vector<7x14xi1>
    %cst_17 = arith.constant 2.500000e-01 : f32
    %cst_18 = arith.constant 0.000000e+00 : f32
    %247 = vector.broadcast %cst_17 : f32 to vector<7x14xf32>
    %248 = vector.broadcast %cst_18 : f32 to vector<7x14xf32>
    %249 = arith.select %246, %247, %248 : vector<7x14xi1>, vector<7x14xf32>
    %250 = vector.shape_cast %249 : vector<7x14xf32> to vector<1x7x14xf32>
    %251 = vector.shape_cast %250 : vector<1x7x14xf32> to vector<1x7x14xf32>
    %252 = vector.broadcast %251 : vector<1x7x14xf32> to vector<7x7x14xf32>
    "tpu.trace_start"() <{level = 10 : i32, message = "bpw,bwc->bpc"}> : () -> ()
    %cst_19 = arith.constant dense<0.000000e+00> : vector<7x7x4xf32>
    %253 = tpu.matmul %252, %235, %cst_19 {dimension_numbers = #tpu.dot_dimension_numbers<[2], [1], [1], [2], [0, 0, 0, 1, 1, 2], [0], [0]>, precision = #tpu.contract_precision<fp32>} : vector<7x7x14xf32>, vector<7x14x4xf32>, vector<7x7x4xf32> -> vector<7x7x4xf32>
    %cst_20 = arith.constant 0.000000e+00 : f32
    "tpu.trace_stop"() : () -> ()
    %254 = vector.broadcast %cst_20 : f32 to vector<5x5x16xf32>
    %255 = vector.extract_strided_slice %253 {offsets = [0, 0, 0], sizes = [5, 5, 1], strides = [1, 1, 1]} : vector<7x7x4xf32> to vector<5x5x1xf32>
    %256 = vector.extract_strided_slice %5 {offsets = [0, 0, 0, 0], sizes = [1, 1, 1, 16], strides = [1, 1, 1, 1]} : vector<3x3x4x16xf32> to vector<1x1x1x16xf32>
    %257 = vector.shape_cast %256 : vector<1x1x1x16xf32> to vector<1x16xf32>
    %258 = vector.shape_cast %257 : vector<1x16xf32> to vector<1x1x16xf32>
    %259 = vector.broadcast %255 : vector<5x5x1xf32> to vector<5x5x16xf32>
    %260 = vector.broadcast %258 : vector<1x1x16xf32> to vector<5x5x16xf32>
    %261 = arith.mulf %259, %260 : vector<5x5x16xf32>
    %262 = arith.addf %254, %261 : vector<5x5x16xf32>
    %263 = vector.extract_strided_slice %253 {offsets = [0, 0, 1], sizes = [5, 5, 1], strides = [1, 1, 1]} : vector<7x7x4xf32> to vector<5x5x1xf32>
    %264 = vector.extract_strided_slice %5 {offsets = [0, 0, 1, 0], sizes = [1, 1, 1, 16], strides = [1, 1, 1, 1]} : vector<3x3x4x16xf32> to vector<1x1x1x16xf32>
    %265 = vector.shape_cast %264 : vector<1x1x1x16xf32> to vector<1x16xf32>
    %266 = vector.shape_cast %265 : vector<1x16xf32> to vector<1x1x16xf32>
    %267 = vector.broadcast %263 : vector<5x5x1xf32> to vector<5x5x16xf32>
    %268 = vector.broadcast %266 : vector<1x1x16xf32> to vector<5x5x16xf32>
    %269 = arith.mulf %267, %268 : vector<5x5x16xf32>
    %270 = arith.addf %262, %269 : vector<5x5x16xf32>
    %271 = vector.extract_strided_slice %253 {offsets = [0, 0, 2], sizes = [5, 5, 1], strides = [1, 1, 1]} : vector<7x7x4xf32> to vector<5x5x1xf32>
    %272 = vector.extract_strided_slice %5 {offsets = [0, 0, 2, 0], sizes = [1, 1, 1, 16], strides = [1, 1, 1, 1]} : vector<3x3x4x16xf32> to vector<1x1x1x16xf32>
    %273 = vector.shape_cast %272 : vector<1x1x1x16xf32> to vector<1x16xf32>
    %274 = vector.shape_cast %273 : vector<1x16xf32> to vector<1x1x16xf32>
    %275 = vector.broadcast %271 : vector<5x5x1xf32> to vector<5x5x16xf32>
    %276 = vector.broadcast %274 : vector<1x1x16xf32> to vector<5x5x16xf32>
    %277 = arith.mulf %275, %276 : vector<5x5x16xf32>
    %278 = arith.addf %270, %277 : vector<5x5x16xf32>
    %279 = vector.extract_strided_slice %253 {offsets = [0, 0, 3], sizes = [5, 5, 1], strides = [1, 1, 1]} : vector<7x7x4xf32> to vector<5x5x1xf32>
    %280 = vector.extract_strided_slice %5 {offsets = [0, 0, 3, 0], sizes = [1, 1, 1, 16], strides = [1, 1, 1, 1]} : vector<3x3x4x16xf32> to vector<1x1x1x16xf32>
    %281 = vector.shape_cast %280 : vector<1x1x1x16xf32> to vector<1x16xf32>
    %282 = vector.shape_cast %281 : vector<1x16xf32> to vector<1x1x16xf32>
    %283 = vector.broadcast %279 : vector<5x5x1xf32> to vector<5x5x16xf32>
    %284 = vector.broadcast %282 : vector<1x1x16xf32> to vector<5x5x16xf32>
    %285 = arith.mulf %283, %284 : vector<5x5x16xf32>
    %286 = arith.addf %278, %285 : vector<5x5x16xf32>
    %287 = vector.extract_strided_slice %253 {offsets = [0, 1, 0], sizes = [5, 5, 1], strides = [1, 1, 1]} : vector<7x7x4xf32> to vector<5x5x1xf32>
    %288 = vector.extract_strided_slice %5 {offsets = [0, 1, 0, 0], sizes = [1, 1, 1, 16], strides = [1, 1, 1, 1]} : vector<3x3x4x16xf32> to vector<1x1x1x16xf32>
    %289 = vector.shape_cast %288 : vector<1x1x1x16xf32> to vector<1x16xf32>
    %290 = vector.shape_cast %289 : vector<1x16xf32> to vector<1x1x16xf32>
    %291 = vector.broadcast %287 : vector<5x5x1xf32> to vector<5x5x16xf32>
    %292 = vector.broadcast %290 : vector<1x1x16xf32> to vector<5x5x16xf32>
    %293 = arith.mulf %291, %292 : vector<5x5x16xf32>
    %294 = arith.addf %286, %293 : vector<5x5x16xf32>
    %295 = vector.extract_strided_slice %253 {offsets = [0, 1, 1], sizes = [5, 5, 1], strides = [1, 1, 1]} : vector<7x7x4xf32> to vector<5x5x1xf32>
    %296 = vector.extract_strided_slice %5 {offsets = [0, 1, 1, 0], sizes = [1, 1, 1, 16], strides = [1, 1, 1, 1]} : vector<3x3x4x16xf32> to vector<1x1x1x16xf32>
    %297 = vector.shape_cast %296 : vector<1x1x1x16xf32> to vector<1x16xf32>
    %298 = vector.shape_cast %297 : vector<1x16xf32> to vector<1x1x16xf32>
    %299 = vector.broadcast %295 : vector<5x5x1xf32> to vector<5x5x16xf32>
    %300 = vector.broadcast %298 : vector<1x1x16xf32> to vector<5x5x16xf32>
    %301 = arith.mulf %299, %300 : vector<5x5x16xf32>
    %302 = arith.addf %294, %301 : vector<5x5x16xf32>
    %303 = vector.extract_strided_slice %253 {offsets = [0, 1, 2], sizes = [5, 5, 1], strides = [1, 1, 1]} : vector<7x7x4xf32> to vector<5x5x1xf32>
    %304 = vector.extract_strided_slice %5 {offsets = [0, 1, 2, 0], sizes = [1, 1, 1, 16], strides = [1, 1, 1, 1]} : vector<3x3x4x16xf32> to vector<1x1x1x16xf32>
    %305 = vector.shape_cast %304 : vector<1x1x1x16xf32> to vector<1x16xf32>
    %306 = vector.shape_cast %305 : vector<1x16xf32> to vector<1x1x16xf32>
    %307 = vector.broadcast %303 : vector<5x5x1xf32> to vector<5x5x16xf32>
    %308 = vector.broadcast %306 : vector<1x1x16xf32> to vector<5x5x16xf32>
    %309 = arith.mulf %307, %308 : vector<5x5x16xf32>
    %310 = arith.addf %302, %309 : vector<5x5x16xf32>
    %311 = vector.extract_strided_slice %253 {offsets = [0, 1, 3], sizes = [5, 5, 1], strides = [1, 1, 1]} : vector<7x7x4xf32> to vector<5x5x1xf32>
    %312 = vector.extract_strided_slice %5 {offsets = [0, 1, 3, 0], sizes = [1, 1, 1, 16], strides = [1, 1, 1, 1]} : vector<3x3x4x16xf32> to vector<1x1x1x16xf32>
    %313 = vector.shape_cast %312 : vector<1x1x1x16xf32> to vector<1x16xf32>
    %314 = vector.shape_cast %313 : vector<1x16xf32> to vector<1x1x16xf32>
    %315 = vector.broadcast %311 : vector<5x5x1xf32> to vector<5x5x16xf32>
    %316 = vector.broadcast %314 : vector<1x1x16xf32> to vector<5x5x16xf32>
    %317 = arith.mulf %315, %316 : vector<5x5x16xf32>
    %318 = arith.addf %310, %317 : vector<5x5x16xf32>
    %319 = vector.extract_strided_slice %253 {offsets = [0, 2, 0], sizes = [5, 5, 1], strides = [1, 1, 1]} : vector<7x7x4xf32> to vector<5x5x1xf32>
    %320 = vector.extract_strided_slice %5 {offsets = [0, 2, 0, 0], sizes = [1, 1, 1, 16], strides = [1, 1, 1, 1]} : vector<3x3x4x16xf32> to vector<1x1x1x16xf32>
    %321 = vector.shape_cast %320 : vector<1x1x1x16xf32> to vector<1x16xf32>
    %322 = vector.shape_cast %321 : vector<1x16xf32> to vector<1x1x16xf32>
    %323 = vector.broadcast %319 : vector<5x5x1xf32> to vector<5x5x16xf32>
    %324 = vector.broadcast %322 : vector<1x1x16xf32> to vector<5x5x16xf32>
    %325 = arith.mulf %323, %324 : vector<5x5x16xf32>
    %326 = arith.addf %318, %325 : vector<5x5x16xf32>
    %327 = vector.extract_strided_slice %253 {offsets = [0, 2, 1], sizes = [5, 5, 1], strides = [1, 1, 1]} : vector<7x7x4xf32> to vector<5x5x1xf32>
    %328 = vector.extract_strided_slice %5 {offsets = [0, 2, 1, 0], sizes = [1, 1, 1, 16], strides = [1, 1, 1, 1]} : vector<3x3x4x16xf32> to vector<1x1x1x16xf32>
    %329 = vector.shape_cast %328 : vector<1x1x1x16xf32> to vector<1x16xf32>
    %330 = vector.shape_cast %329 : vector<1x16xf32> to vector<1x1x16xf32>
    %331 = vector.broadcast %327 : vector<5x5x1xf32> to vector<5x5x16xf32>
    %332 = vector.broadcast %330 : vector<1x1x16xf32> to vector<5x5x16xf32>
    %333 = arith.mulf %331, %332 : vector<5x5x16xf32>
    %334 = arith.addf %326, %333 : vector<5x5x16xf32>
    %335 = vector.extract_strided_slice %253 {offsets = [0, 2, 2], sizes = [5, 5, 1], strides = [1, 1, 1]} : vector<7x7x4xf32> to vector<5x5x1xf32>
    %336 = vector.extract_strided_slice %5 {offsets = [0, 2, 2, 0], sizes = [1, 1, 1, 16], strides = [1, 1, 1, 1]} : vector<3x3x4x16xf32> to vector<1x1x1x16xf32>
    %337 = vector.shape_cast %336 : vector<1x1x1x16xf32> to vector<1x16xf32>
    %338 = vector.shape_cast %337 : vector<1x16xf32> to vector<1x1x16xf32>
    %339 = vector.broadcast %335 : vector<5x5x1xf32> to vector<5x5x16xf32>
    %340 = vector.broadcast %338 : vector<1x1x16xf32> to vector<5x5x16xf32>
    %341 = arith.mulf %339, %340 : vector<5x5x16xf32>
    %342 = arith.addf %334, %341 : vector<5x5x16xf32>
    %343 = vector.extract_strided_slice %253 {offsets = [0, 2, 3], sizes = [5, 5, 1], strides = [1, 1, 1]} : vector<7x7x4xf32> to vector<5x5x1xf32>
    %344 = vector.extract_strided_slice %5 {offsets = [0, 2, 3, 0], sizes = [1, 1, 1, 16], strides = [1, 1, 1, 1]} : vector<3x3x4x16xf32> to vector<1x1x1x16xf32>
    %345 = vector.shape_cast %344 : vector<1x1x1x16xf32> to vector<1x16xf32>
    %346 = vector.shape_cast %345 : vector<1x16xf32> to vector<1x1x16xf32>
    %347 = vector.broadcast %343 : vector<5x5x1xf32> to vector<5x5x16xf32>
    %348 = vector.broadcast %346 : vector<1x1x16xf32> to vector<5x5x16xf32>
    %349 = arith.mulf %347, %348 : vector<5x5x16xf32>
    %350 = arith.addf %342, %349 : vector<5x5x16xf32>
    %351 = vector.extract_strided_slice %253 {offsets = [1, 0, 0], sizes = [5, 5, 1], strides = [1, 1, 1]} : vector<7x7x4xf32> to vector<5x5x1xf32>
    %352 = vector.extract_strided_slice %5 {offsets = [1, 0, 0, 0], sizes = [1, 1, 1, 16], strides = [1, 1, 1, 1]} : vector<3x3x4x16xf32> to vector<1x1x1x16xf32>
    %353 = vector.shape_cast %352 : vector<1x1x1x16xf32> to vector<1x16xf32>
    %354 = vector.shape_cast %353 : vector<1x16xf32> to vector<1x1x16xf32>
    %355 = vector.broadcast %351 : vector<5x5x1xf32> to vector<5x5x16xf32>
    %356 = vector.broadcast %354 : vector<1x1x16xf32> to vector<5x5x16xf32>
    %357 = arith.mulf %355, %356 : vector<5x5x16xf32>
    %358 = arith.addf %350, %357 : vector<5x5x16xf32>
    %359 = vector.extract_strided_slice %253 {offsets = [1, 0, 1], sizes = [5, 5, 1], strides = [1, 1, 1]} : vector<7x7x4xf32> to vector<5x5x1xf32>
    %360 = vector.extract_strided_slice %5 {offsets = [1, 0, 1, 0], sizes = [1, 1, 1, 16], strides = [1, 1, 1, 1]} : vector<3x3x4x16xf32> to vector<1x1x1x16xf32>
    %361 = vector.shape_cast %360 : vector<1x1x1x16xf32> to vector<1x16xf32>
    %362 = vector.shape_cast %361 : vector<1x16xf32> to vector<1x1x16xf32>
    %363 = vector.broadcast %359 : vector<5x5x1xf32> to vector<5x5x16xf32>
    %364 = vector.broadcast %362 : vector<1x1x16xf32> to vector<5x5x16xf32>
    %365 = arith.mulf %363, %364 : vector<5x5x16xf32>
    %366 = arith.addf %358, %365 : vector<5x5x16xf32>
    %367 = vector.extract_strided_slice %253 {offsets = [1, 0, 2], sizes = [5, 5, 1], strides = [1, 1, 1]} : vector<7x7x4xf32> to vector<5x5x1xf32>
    %368 = vector.extract_strided_slice %5 {offsets = [1, 0, 2, 0], sizes = [1, 1, 1, 16], strides = [1, 1, 1, 1]} : vector<3x3x4x16xf32> to vector<1x1x1x16xf32>
    %369 = vector.shape_cast %368 : vector<1x1x1x16xf32> to vector<1x16xf32>
    %370 = vector.shape_cast %369 : vector<1x16xf32> to vector<1x1x16xf32>
    %371 = vector.broadcast %367 : vector<5x5x1xf32> to vector<5x5x16xf32>
    %372 = vector.broadcast %370 : vector<1x1x16xf32> to vector<5x5x16xf32>
    %373 = arith.mulf %371, %372 : vector<5x5x16xf32>
    %374 = arith.addf %366, %373 : vector<5x5x16xf32>
    %375 = vector.extract_strided_slice %253 {offsets = [1, 0, 3], sizes = [5, 5, 1], strides = [1, 1, 1]} : vector<7x7x4xf32> to vector<5x5x1xf32>
    %376 = vector.extract_strided_slice %5 {offsets = [1, 0, 3, 0], sizes = [1, 1, 1, 16], strides = [1, 1, 1, 1]} : vector<3x3x4x16xf32> to vector<1x1x1x16xf32>
    %377 = vector.shape_cast %376 : vector<1x1x1x16xf32> to vector<1x16xf32>
    %378 = vector.shape_cast %377 : vector<1x16xf32> to vector<1x1x16xf32>
    %379 = vector.broadcast %375 : vector<5x5x1xf32> to vector<5x5x16xf32>
    %380 = vector.broadcast %378 : vector<1x1x16xf32> to vector<5x5x16xf32>
    %381 = arith.mulf %379, %380 : vector<5x5x16xf32>
    %382 = arith.addf %374, %381 : vector<5x5x16xf32>
    %383 = vector.extract_strided_slice %253 {offsets = [1, 1, 0], sizes = [5, 5, 1], strides = [1, 1, 1]} : vector<7x7x4xf32> to vector<5x5x1xf32>
    %384 = vector.extract_strided_slice %5 {offsets = [1, 1, 0, 0], sizes = [1, 1, 1, 16], strides = [1, 1, 1, 1]} : vector<3x3x4x16xf32> to vector<1x1x1x16xf32>
    %385 = vector.shape_cast %384 : vector<1x1x1x16xf32> to vector<1x16xf32>
    %386 = vector.shape_cast %385 : vector<1x16xf32> to vector<1x1x16xf32>
    %387 = vector.broadcast %383 : vector<5x5x1xf32> to vector<5x5x16xf32>
    %388 = vector.broadcast %386 : vector<1x1x16xf32> to vector<5x5x16xf32>
    %389 = arith.mulf %387, %388 : vector<5x5x16xf32>
    %390 = arith.addf %382, %389 : vector<5x5x16xf32>
    %391 = vector.extract_strided_slice %253 {offsets = [1, 1, 1], sizes = [5, 5, 1], strides = [1, 1, 1]} : vector<7x7x4xf32> to vector<5x5x1xf32>
    %392 = vector.extract_strided_slice %5 {offsets = [1, 1, 1, 0], sizes = [1, 1, 1, 16], strides = [1, 1, 1, 1]} : vector<3x3x4x16xf32> to vector<1x1x1x16xf32>
    %393 = vector.shape_cast %392 : vector<1x1x1x16xf32> to vector<1x16xf32>
    %394 = vector.shape_cast %393 : vector<1x16xf32> to vector<1x1x16xf32>
    %395 = vector.broadcast %391 : vector<5x5x1xf32> to vector<5x5x16xf32>
    %396 = vector.broadcast %394 : vector<1x1x16xf32> to vector<5x5x16xf32>
    %397 = arith.mulf %395, %396 : vector<5x5x16xf32>
    %398 = arith.addf %390, %397 : vector<5x5x16xf32>
    %399 = vector.extract_strided_slice %253 {offsets = [1, 1, 2], sizes = [5, 5, 1], strides = [1, 1, 1]} : vector<7x7x4xf32> to vector<5x5x1xf32>
    %400 = vector.extract_strided_slice %5 {offsets = [1, 1, 2, 0], sizes = [1, 1, 1, 16], strides = [1, 1, 1, 1]} : vector<3x3x4x16xf32> to vector<1x1x1x16xf32>
    %401 = vector.shape_cast %400 : vector<1x1x1x16xf32> to vector<1x16xf32>
    %402 = vector.shape_cast %401 : vector<1x16xf32> to vector<1x1x16xf32>
    %403 = vector.broadcast %399 : vector<5x5x1xf32> to vector<5x5x16xf32>
    %404 = vector.broadcast %402 : vector<1x1x16xf32> to vector<5x5x16xf32>
    %405 = arith.mulf %403, %404 : vector<5x5x16xf32>
    %406 = arith.addf %398, %405 : vector<5x5x16xf32>
    %407 = vector.extract_strided_slice %253 {offsets = [1, 1, 3], sizes = [5, 5, 1], strides = [1, 1, 1]} : vector<7x7x4xf32> to vector<5x5x1xf32>
    %408 = vector.extract_strided_slice %5 {offsets = [1, 1, 3, 0], sizes = [1, 1, 1, 16], strides = [1, 1, 1, 1]} : vector<3x3x4x16xf32> to vector<1x1x1x16xf32>
    %409 = vector.shape_cast %408 : vector<1x1x1x16xf32> to vector<1x16xf32>
    %410 = vector.shape_cast %409 : vector<1x16xf32> to vector<1x1x16xf32>
    %411 = vector.broadcast %407 : vector<5x5x1xf32> to vector<5x5x16xf32>
    %412 = vector.broadcast %410 : vector<1x1x16xf32> to vector<5x5x16xf32>
    %413 = arith.mulf %411, %412 : vector<5x5x16xf32>
    %414 = arith.addf %406, %413 : vector<5x5x16xf32>
    %415 = vector.extract_strided_slice %253 {offsets = [1, 2, 0], sizes = [5, 5, 1], strides = [1, 1, 1]} : vector<7x7x4xf32> to vector<5x5x1xf32>
    %416 = vector.extract_strided_slice %5 {offsets = [1, 2, 0, 0], sizes = [1, 1, 1, 16], strides = [1, 1, 1, 1]} : vector<3x3x4x16xf32> to vector<1x1x1x16xf32>
    %417 = vector.shape_cast %416 : vector<1x1x1x16xf32> to vector<1x16xf32>
    %418 = vector.shape_cast %417 : vector<1x16xf32> to vector<1x1x16xf32>
    %419 = vector.broadcast %415 : vector<5x5x1xf32> to vector<5x5x16xf32>
    %420 = vector.broadcast %418 : vector<1x1x16xf32> to vector<5x5x16xf32>
    %421 = arith.mulf %419, %420 : vector<5x5x16xf32>
    %422 = arith.addf %414, %421 : vector<5x5x16xf32>
    %423 = vector.extract_strided_slice %253 {offsets = [1, 2, 1], sizes = [5, 5, 1], strides = [1, 1, 1]} : vector<7x7x4xf32> to vector<5x5x1xf32>
    %424 = vector.extract_strided_slice %5 {offsets = [1, 2, 1, 0], sizes = [1, 1, 1, 16], strides = [1, 1, 1, 1]} : vector<3x3x4x16xf32> to vector<1x1x1x16xf32>
    %425 = vector.shape_cast %424 : vector<1x1x1x16xf32> to vector<1x16xf32>
    %426 = vector.shape_cast %425 : vector<1x16xf32> to vector<1x1x16xf32>
    %427 = vector.broadcast %423 : vector<5x5x1xf32> to vector<5x5x16xf32>
    %428 = vector.broadcast %426 : vector<1x1x16xf32> to vector<5x5x16xf32>
    %429 = arith.mulf %427, %428 : vector<5x5x16xf32>
    %430 = arith.addf %422, %429 : vector<5x5x16xf32>
    %431 = vector.extract_strided_slice %253 {offsets = [1, 2, 2], sizes = [5, 5, 1], strides = [1, 1, 1]} : vector<7x7x4xf32> to vector<5x5x1xf32>
    %432 = vector.extract_strided_slice %5 {offsets = [1, 2, 2, 0], sizes = [1, 1, 1, 16], strides = [1, 1, 1, 1]} : vector<3x3x4x16xf32> to vector<1x1x1x16xf32>
    %433 = vector.shape_cast %432 : vector<1x1x1x16xf32> to vector<1x16xf32>
    %434 = vector.shape_cast %433 : vector<1x16xf32> to vector<1x1x16xf32>
    %435 = vector.broadcast %431 : vector<5x5x1xf32> to vector<5x5x16xf32>
    %436 = vector.broadcast %434 : vector<1x1x16xf32> to vector<5x5x16xf32>
    %437 = arith.mulf %435, %436 : vector<5x5x16xf32>
    %438 = arith.addf %430, %437 : vector<5x5x16xf32>
    %439 = vector.extract_strided_slice %253 {offsets = [1, 2, 3], sizes = [5, 5, 1], strides = [1, 1, 1]} : vector<7x7x4xf32> to vector<5x5x1xf32>
    %440 = vector.extract_strided_slice %5 {offsets = [1, 2, 3, 0], sizes = [1, 1, 1, 16], strides = [1, 1, 1, 1]} : vector<3x3x4x16xf32> to vector<1x1x1x16xf32>
    %441 = vector.shape_cast %440 : vector<1x1x1x16xf32> to vector<1x16xf32>
    %442 = vector.shape_cast %441 : vector<1x16xf32> to vector<1x1x16xf32>
    %443 = vector.broadcast %439 : vector<5x5x1xf32> to vector<5x5x16xf32>
    %444 = vector.broadcast %442 : vector<1x1x16xf32> to vector<5x5x16xf32>
    %445 = arith.mulf %443, %444 : vector<5x5x16xf32>
    %446 = arith.addf %438, %445 : vector<5x5x16xf32>
    %447 = vector.extract_strided_slice %253 {offsets = [2, 0, 0], sizes = [5, 5, 1], strides = [1, 1, 1]} : vector<7x7x4xf32> to vector<5x5x1xf32>
    %448 = vector.extract_strided_slice %5 {offsets = [2, 0, 0, 0], sizes = [1, 1, 1, 16], strides = [1, 1, 1, 1]} : vector<3x3x4x16xf32> to vector<1x1x1x16xf32>
    %449 = vector.shape_cast %448 : vector<1x1x1x16xf32> to vector<1x16xf32>
    %450 = vector.shape_cast %449 : vector<1x16xf32> to vector<1x1x16xf32>
    %451 = vector.broadcast %447 : vector<5x5x1xf32> to vector<5x5x16xf32>
    %452 = vector.broadcast %450 : vector<1x1x16xf32> to vector<5x5x16xf32>
    %453 = arith.mulf %451, %452 : vector<5x5x16xf32>
    %454 = arith.addf %446, %453 : vector<5x5x16xf32>
    %455 = vector.extract_strided_slice %253 {offsets = [2, 0, 1], sizes = [5, 5, 1], strides = [1, 1, 1]} : vector<7x7x4xf32> to vector<5x5x1xf32>
    %456 = vector.extract_strided_slice %5 {offsets = [2, 0, 1, 0], sizes = [1, 1, 1, 16], strides = [1, 1, 1, 1]} : vector<3x3x4x16xf32> to vector<1x1x1x16xf32>
    %457 = vector.shape_cast %456 : vector<1x1x1x16xf32> to vector<1x16xf32>
    %458 = vector.shape_cast %457 : vector<1x16xf32> to vector<1x1x16xf32>
    %459 = vector.broadcast %455 : vector<5x5x1xf32> to vector<5x5x16xf32>
    %460 = vector.broadcast %458 : vector<1x1x16xf32> to vector<5x5x16xf32>
    %461 = arith.mulf %459, %460 : vector<5x5x16xf32>
    %462 = arith.addf %454, %461 : vector<5x5x16xf32>
    %463 = vector.extract_strided_slice %253 {offsets = [2, 0, 2], sizes = [5, 5, 1], strides = [1, 1, 1]} : vector<7x7x4xf32> to vector<5x5x1xf32>
    %464 = vector.extract_strided_slice %5 {offsets = [2, 0, 2, 0], sizes = [1, 1, 1, 16], strides = [1, 1, 1, 1]} : vector<3x3x4x16xf32> to vector<1x1x1x16xf32>
    %465 = vector.shape_cast %464 : vector<1x1x1x16xf32> to vector<1x16xf32>
    %466 = vector.shape_cast %465 : vector<1x16xf32> to vector<1x1x16xf32>
    %467 = vector.broadcast %463 : vector<5x5x1xf32> to vector<5x5x16xf32>
    %468 = vector.broadcast %466 : vector<1x1x16xf32> to vector<5x5x16xf32>
    %469 = arith.mulf %467, %468 : vector<5x5x16xf32>
    %470 = arith.addf %462, %469 : vector<5x5x16xf32>
    %471 = vector.extract_strided_slice %253 {offsets = [2, 0, 3], sizes = [5, 5, 1], strides = [1, 1, 1]} : vector<7x7x4xf32> to vector<5x5x1xf32>
    %472 = vector.extract_strided_slice %5 {offsets = [2, 0, 3, 0], sizes = [1, 1, 1, 16], strides = [1, 1, 1, 1]} : vector<3x3x4x16xf32> to vector<1x1x1x16xf32>
    %473 = vector.shape_cast %472 : vector<1x1x1x16xf32> to vector<1x16xf32>
    %474 = vector.shape_cast %473 : vector<1x16xf32> to vector<1x1x16xf32>
    %475 = vector.broadcast %471 : vector<5x5x1xf32> to vector<5x5x16xf32>
    %476 = vector.broadcast %474 : vector<1x1x16xf32> to vector<5x5x16xf32>
    %477 = arith.mulf %475, %476 : vector<5x5x16xf32>
    %478 = arith.addf %470, %477 : vector<5x5x16xf32>
    %479 = vector.extract_strided_slice %253 {offsets = [2, 1, 0], sizes = [5, 5, 1], strides = [1, 1, 1]} : vector<7x7x4xf32> to vector<5x5x1xf32>
    %480 = vector.extract_strided_slice %5 {offsets = [2, 1, 0, 0], sizes = [1, 1, 1, 16], strides = [1, 1, 1, 1]} : vector<3x3x4x16xf32> to vector<1x1x1x16xf32>
    %481 = vector.shape_cast %480 : vector<1x1x1x16xf32> to vector<1x16xf32>
    %482 = vector.shape_cast %481 : vector<1x16xf32> to vector<1x1x16xf32>
    %483 = vector.broadcast %479 : vector<5x5x1xf32> to vector<5x5x16xf32>
    %484 = vector.broadcast %482 : vector<1x1x16xf32> to vector<5x5x16xf32>
    %485 = arith.mulf %483, %484 : vector<5x5x16xf32>
    %486 = arith.addf %478, %485 : vector<5x5x16xf32>
    %487 = vector.extract_strided_slice %253 {offsets = [2, 1, 1], sizes = [5, 5, 1], strides = [1, 1, 1]} : vector<7x7x4xf32> to vector<5x5x1xf32>
    %488 = vector.extract_strided_slice %5 {offsets = [2, 1, 1, 0], sizes = [1, 1, 1, 16], strides = [1, 1, 1, 1]} : vector<3x3x4x16xf32> to vector<1x1x1x16xf32>
    %489 = vector.shape_cast %488 : vector<1x1x1x16xf32> to vector<1x16xf32>
    %490 = vector.shape_cast %489 : vector<1x16xf32> to vector<1x1x16xf32>
    %491 = vector.broadcast %487 : vector<5x5x1xf32> to vector<5x5x16xf32>
    %492 = vector.broadcast %490 : vector<1x1x16xf32> to vector<5x5x16xf32>
    %493 = arith.mulf %491, %492 : vector<5x5x16xf32>
    %494 = arith.addf %486, %493 : vector<5x5x16xf32>
    %495 = vector.extract_strided_slice %253 {offsets = [2, 1, 2], sizes = [5, 5, 1], strides = [1, 1, 1]} : vector<7x7x4xf32> to vector<5x5x1xf32>
    %496 = vector.extract_strided_slice %5 {offsets = [2, 1, 2, 0], sizes = [1, 1, 1, 16], strides = [1, 1, 1, 1]} : vector<3x3x4x16xf32> to vector<1x1x1x16xf32>
    %497 = vector.shape_cast %496 : vector<1x1x1x16xf32> to vector<1x16xf32>
    %498 = vector.shape_cast %497 : vector<1x16xf32> to vector<1x1x16xf32>
    %499 = vector.broadcast %495 : vector<5x5x1xf32> to vector<5x5x16xf32>
    %500 = vector.broadcast %498 : vector<1x1x16xf32> to vector<5x5x16xf32>
    %501 = arith.mulf %499, %500 : vector<5x5x16xf32>
    %502 = arith.addf %494, %501 : vector<5x5x16xf32>
    %503 = vector.extract_strided_slice %253 {offsets = [2, 1, 3], sizes = [5, 5, 1], strides = [1, 1, 1]} : vector<7x7x4xf32> to vector<5x5x1xf32>
    %504 = vector.extract_strided_slice %5 {offsets = [2, 1, 3, 0], sizes = [1, 1, 1, 16], strides = [1, 1, 1, 1]} : vector<3x3x4x16xf32> to vector<1x1x1x16xf32>
    %505 = vector.shape_cast %504 : vector<1x1x1x16xf32> to vector<1x16xf32>
    %506 = vector.shape_cast %505 : vector<1x16xf32> to vector<1x1x16xf32>
    %507 = vector.broadcast %503 : vector<5x5x1xf32> to vector<5x5x16xf32>
    %508 = vector.broadcast %506 : vector<1x1x16xf32> to vector<5x5x16xf32>
    %509 = arith.mulf %507, %508 : vector<5x5x16xf32>
    %510 = arith.addf %502, %509 : vector<5x5x16xf32>
    %511 = vector.extract_strided_slice %253 {offsets = [2, 2, 0], sizes = [5, 5, 1], strides = [1, 1, 1]} : vector<7x7x4xf32> to vector<5x5x1xf32>
    %512 = vector.extract_strided_slice %5 {offsets = [2, 2, 0, 0], sizes = [1, 1, 1, 16], strides = [1, 1, 1, 1]} : vector<3x3x4x16xf32> to vector<1x1x1x16xf32>
    %513 = vector.shape_cast %512 : vector<1x1x1x16xf32> to vector<1x16xf32>
    %514 = vector.shape_cast %513 : vector<1x16xf32> to vector<1x1x16xf32>
    %515 = vector.broadcast %511 : vector<5x5x1xf32> to vector<5x5x16xf32>
    %516 = vector.broadcast %514 : vector<1x1x16xf32> to vector<5x5x16xf32>
    %517 = arith.mulf %515, %516 : vector<5x5x16xf32>
    %518 = arith.addf %510, %517 : vector<5x5x16xf32>
    %519 = vector.extract_strided_slice %253 {offsets = [2, 2, 1], sizes = [5, 5, 1], strides = [1, 1, 1]} : vector<7x7x4xf32> to vector<5x5x1xf32>
    %520 = vector.extract_strided_slice %5 {offsets = [2, 2, 1, 0], sizes = [1, 1, 1, 16], strides = [1, 1, 1, 1]} : vector<3x3x4x16xf32> to vector<1x1x1x16xf32>
    %521 = vector.shape_cast %520 : vector<1x1x1x16xf32> to vector<1x16xf32>
    %522 = vector.shape_cast %521 : vector<1x16xf32> to vector<1x1x16xf32>
    %523 = vector.broadcast %519 : vector<5x5x1xf32> to vector<5x5x16xf32>
    %524 = vector.broadcast %522 : vector<1x1x16xf32> to vector<5x5x16xf32>
    %525 = arith.mulf %523, %524 : vector<5x5x16xf32>
    %526 = arith.addf %518, %525 : vector<5x5x16xf32>
    %527 = vector.extract_strided_slice %253 {offsets = [2, 2, 2], sizes = [5, 5, 1], strides = [1, 1, 1]} : vector<7x7x4xf32> to vector<5x5x1xf32>
    %528 = vector.extract_strided_slice %5 {offsets = [2, 2, 2, 0], sizes = [1, 1, 1, 16], strides = [1, 1, 1, 1]} : vector<3x3x4x16xf32> to vector<1x1x1x16xf32>
    %529 = vector.shape_cast %528 : vector<1x1x1x16xf32> to vector<1x16xf32>
    %530 = vector.shape_cast %529 : vector<1x16xf32> to vector<1x1x16xf32>
    %531 = vector.broadcast %527 : vector<5x5x1xf32> to vector<5x5x16xf32>
    %532 = vector.broadcast %530 : vector<1x1x16xf32> to vector<5x5x16xf32>
    %533 = arith.mulf %531, %532 : vector<5x5x16xf32>
    %534 = arith.addf %526, %533 : vector<5x5x16xf32>
    %535 = vector.extract_strided_slice %253 {offsets = [2, 2, 3], sizes = [5, 5, 1], strides = [1, 1, 1]} : vector<7x7x4xf32> to vector<5x5x1xf32>
    %536 = vector.extract_strided_slice %5 {offsets = [2, 2, 3, 0], sizes = [1, 1, 1, 16], strides = [1, 1, 1, 1]} : vector<3x3x4x16xf32> to vector<1x1x1x16xf32>
    %537 = vector.shape_cast %536 : vector<1x1x1x16xf32> to vector<1x16xf32>
    %538 = vector.shape_cast %537 : vector<1x16xf32> to vector<1x1x16xf32>
    %539 = vector.broadcast %535 : vector<5x5x1xf32> to vector<5x5x16xf32>
    %540 = vector.broadcast %538 : vector<1x1x16xf32> to vector<5x5x16xf32>
    %541 = arith.mulf %539, %540 : vector<5x5x16xf32>
    %542 = arith.addf %534, %541 : vector<5x5x16xf32>
    %543 = vector.shape_cast %7 : vector<16xf32> to vector<1x1x16xf32>
    %544 = vector.broadcast %543 : vector<1x1x16xf32> to vector<5x5x16xf32>
    %545 = arith.addf %542, %544 : vector<5x5x16xf32>
    %cst_21 = arith.constant 0.000000e+00 : f32
    %546 = vector.broadcast %cst_21 : f32 to vector<5x5x16xf32>
    %547 = arith.maximumf %545, %546 : vector<5x5x16xf32>
    %548 = vector.extract_strided_slice %547 {offsets = [0, 0, 0], sizes = [4, 5, 16], strides = [1, 1, 1]} : vector<5x5x16xf32> to vector<4x5x16xf32>
    %549 = vector.shape_cast %548 : vector<4x5x16xf32> to vector<2x2x5x16xf32>
    %550 = vector.extract_strided_slice %549 {offsets = [0, 0, 0, 0], sizes = [2, 1, 5, 16], strides = [1, 1, 1, 1]} : vector<2x2x5x16xf32> to vector<2x1x5x16xf32>
    %551 = vector.shape_cast %550 : vector<2x1x5x16xf32> to vector<2x5x16xf32>
    %552 = vector.extract_strided_slice %549 {offsets = [0, 1, 0, 0], sizes = [2, 1, 5, 16], strides = [1, 1, 1, 1]} : vector<2x2x5x16xf32> to vector<2x1x5x16xf32>
    %553 = vector.shape_cast %552 : vector<2x1x5x16xf32> to vector<2x5x16xf32>
    %554 = arith.addf %551, %553 : vector<2x5x16xf32>
    %555 = tpu.iota {dimensions = array<i32: 0>} : vector<2x5xi32>
    %556 = tpu.iota {dimensions = array<i32: 1>} : vector<2x5xi32>
    %c2_i32_22 = arith.constant 2 : i32
    %557 = vector.broadcast %c2_i32_22 : i32 to vector<2x5xi32>
    %558 = arith.muli %557, %555 : vector<2x5xi32>
    %559 = arith.cmpi eq, %556, %558 : vector<2x5xi32>
    %c2_i32_23 = arith.constant 2 : i32
    %560 = vector.broadcast %c2_i32_23 : i32 to vector<2x5xi32>
    %561 = arith.muli %560, %555 : vector<2x5xi32>
    %c1_i32_24 = arith.constant 1 : i32
    %562 = vector.broadcast %c1_i32_24 : i32 to vector<2x5xi32>
    %563 = arith.addi %561, %562 : vector<2x5xi32>
    %564 = arith.cmpi eq, %556, %563 : vector<2x5xi32>
    %565 = arith.ori %559, %564 : vector<2x5xi1>
    %cst_25 = arith.constant 2.500000e-01 : f32
    %cst_26 = arith.constant 0.000000e+00 : f32
    %566 = vector.broadcast %cst_25 : f32 to vector<2x5xf32>
    %567 = vector.broadcast %cst_26 : f32 to vector<2x5xf32>
    %568 = arith.select %565, %566, %567 : vector<2x5xi1>, vector<2x5xf32>
    %569 = vector.shape_cast %568 : vector<2x5xf32> to vector<1x2x5xf32>
    %570 = vector.shape_cast %569 : vector<1x2x5xf32> to vector<1x2x5xf32>
    %571 = vector.broadcast %570 : vector<1x2x5xf32> to vector<2x2x5xf32>
    "tpu.trace_start"() <{level = 10 : i32, message = "bpw,bwc->bpc"}> : () -> ()
    %cst_27 = arith.constant dense<0.000000e+00> : vector<2x2x16xf32>
    %572 = tpu.matmul %571, %554, %cst_27 {dimension_numbers = #tpu.dot_dimension_numbers<[2], [1], [1], [2], [0, 0, 0, 1, 1, 2], [0], [0]>, precision = #tpu.contract_precision<fp32>} : vector<2x2x5xf32>, vector<2x5x16xf32>, vector<2x2x16xf32> -> vector<2x2x16xf32>
    "tpu.trace_stop"() : () -> ()
    %c0_28 = arith.constant 0 : index
    %c0_29 = arith.constant 0 : index
    %c0_30 = arith.constant 0 : index
    %c0_31 = arith.constant 0 : index
    %573 = vector.load %arg6[%c0_28, %c0_29, %c0_30, %c0_31] : memref<1x2x2x16xf32, #tpu.memory_space<vmem>>, vector<1x2x2x16xf32>
    %574 = vector.shape_cast %573 : vector<1x2x2x16xf32> to vector<2x2x16xf32>
    %575 = vector.shape_cast %572 : vector<2x2x16xf32> to vector<1x2x2x16xf32>
    tpu.vector_store %arg6[%c0_28, %c0_29, %c0_30, %c0_31], %575 {strides = array<i32>} : memref<1x2x2x16xf32, #tpu.memory_space<vmem>>, vector<1x2x2x16xf32>,
    return
  }
  func.func @transform_0(%arg0: i32) -> (i32, i32, i32, i32) {
    %c0_i32 = arith.constant 0 : i32
    %c0_i32_0 = arith.constant 0 : i32
    %c0_i32_1 = arith.constant 0 : i32
    %c0_i32_2 = arith.constant 0 : i32
    return %arg0, %c0_i32, %c0_i32_0, %c0_i32_1 : i32, i32, i32, i32
  }
  func.func @transform_1(%arg0: i32) -> (i32, i32, i32, i32) {
    %c0_i32 = arith.constant 0 : i32
    %c0_i32_0 = arith.constant 0 : i32
    %c0_i32_1 = arith.constant 0 : i32
    %c0_i32_2 = arith.constant 0 : i32
    %c0_i32_3 = arith.constant 0 : i32
    return %c0_i32, %c0_i32_0, %c0_i32_1, %c0_i32_2 : i32, i32, i32, i32
  }
  func.func @transform_2(%arg0: i32) -> (i32, i32) {
    %c0_i32 = arith.constant 0 : i32
    %c0_i32_0 = arith.constant 0 : i32
    %c0_i32_1 = arith.constant 0 : i32
    return %c0_i32, %c0_i32_0 : i32, i32
  }
  func.func @transform_3(%arg0: i32) -> (i32, i32, i32, i32) {
    %c0_i32 = arith.constant 0 : i32
    %c0_i32_0 = arith.constant 0 : i32
    %c0_i32_1 = arith.constant 0 : i32
    %c0_i32_2 = arith.constant 0 : i32
    %c0_i32_3 = arith.constant 0 : i32
    return %c0_i32, %c0_i32_0, %c0_i32_1, %c0_i32_2 : i32, i32, i32, i32
  }
  func.func @transform_4(%arg0: i32) -> (i32, i32) {
    %c0_i32 = arith.constant 0 : i32
    %c0_i32_0 = arith.constant 0 : i32
    %c0_i32_1 = arith.constant 0 : i32
    return %c0_i32, %c0_i32_0 : i32, i32
  }
  func.func @transform_5(%arg0: i32) -> (i32, i32, i32, i32) {
    %c0_i32 = arith.constant 0 : i32
    %c0_i32_0 = arith.constant 0 : i32
    %c0_i32_1 = arith.constant 0 : i32
    %c0_i32_2 = arith.constant 0 : i32
    return %arg0, %c0_i32, %c0_i32_0, %c0_i32_1 : i32, i32, i32, i32
  }
}

</mosaic_0001>

<bundles_post_ra>
// kernel: tpu_custom_call.1
= control target key start
LH: loop header
LB: loop body
LE: loop exit
PB: predicated region body
PF: predicated region fallthrough
CT: control target
= control target key end

     0   :  { %10 = vsyncpa [#allocation3], 0  ;;  %s13693_s0 = inlined_call_operand.vmem [shape: f32[2,16,16,3], index: 0, kind: input, shape index: {}]   ;;  %s13694_s1 = inlined_call_operand.vmem [shape: f32[3,3,3,4], index: 1, kind: input, shape index: {}]   ;;  %s13695_s2 = inlined_call_operand.vmem [shape: f32[1,4], index: 2, kind: input, shape index: {}]   ;;  %s13696_s3 = inlined_call_operand.vmem [shape: f32[3,3,4,16], index: 3, kind: input, shape index: {}]   ;;  %s13697_s4 = inlined_call_operand.vmem [shape: f32[1,16], index: 4, kind: input, shape index: {}]   ;;  %s13698_s5 = inlined_call_operand.hbm [shape: f32[2,2,2,16], index: 5, kind: output, shape index: {}]  }
   0x1   :  { %12 = vsyncpa [#allocation3 + $0x1], 0  ;;  %s9131_s18 = smov 0   ;;  %s9133_s19 = smov 0  }
   0x2   :  { %s9135_s20 = smov 0   ;;  %s9137_s21 = smov 0  }
   0x3 LB: > { %s9152_s22 = sadd.s32 4294967295, %s9089_s21   ;;  %s8224_s23 = sadd.s32 4294967294, %s9089_s21   ;;  %s9089_s21 = sphi %s9137_s21, %s14924_s21   ;;  %s9085_s20 = sphi %s9135_s20, %s14923_s20   ;;  %s9081_s19 = sphi %s9133_s19, %s14922_s19   ;;  %s9077_s18 = sphi %s9131_s18, %s14921_s18  }
   0x4   : > { %s9156_s24 = sadd.s32 1, %s9089_s21   ;;  %s135_s25 = sadd.s32 1, %s9085_s20 }
   0x5   : > { %s132_s26 = ssub.s32 %s9089_s21, %s9156_s24  ;;  %p145_p0 = scmp.ne.s32.totalorder %s9085_s20, %s9081_s19 }
   0x6   : > { %p133_p1 = scmp.eq.s32.totalorder %s132_s26, 0  ;;  %p146_p2 = scmp.eq.s32.totalorder %s9152_s22, 1 }
   0x7   : > { %p151_p3 = scmp.ne.s32.totalorder %s9081_s19, %s9077_s18  ;;  %p152_p4 = scmp.eq.s32.totalorder %s8224_s23, 1 }
   0x8   : > { %s9167_s27 = scalar_select %p133_p1, %s9085_s20, %s135_s25  }
   0x9   : > { %p9169_p5 = por %p146_p2, %p145_p0  ;;  %p9173_p6 = por %p152_p4, %p151_p3 }
   0xa   : > { %p8227_p7 = scmp.ge.s32.totalorder %s9089_s21, 1  ;;  %p190_p8 = scmp.lt.s32.totalorder %s9089_s21, 3 }
   0xc   : > { %p191_p9 = pnand %p8227_p7, %p190_p8 }
   0xe   : > { %194 = sbr.rel (%p191_p9) target bundleno = 1416 (0x588), region = 40 }
  0x15   : > { %p218_p10 = scmp.lt.s32.totalorder %s9152_s22, 1  ;;  %v13703_v0 = vmov 1   ;;  %v13701_v4 = vmov 2   ;;  %v13706_v6 = vmov 0   ;;  %v13699_v25 = vlaneseq  ;;  %v252_v30 = vld [vmem:[%s13694_s1 + $0x4] sm:$0x7] }
  0x16   : > { %8946 = vset.pattern.permute.xlu0 %v13703_v0  ;;  %8944 = vset.pattern.permute.xlu1 %v13703_v0  ;;  %v253_v31 = vld [vmem:[%s13694_s1 + $0x8] sm:$0x7]  ;;  %v251_v32 = vld [vmem:[%s13694_s1] sm:$0x7]  ;;  %v255_v33 = vld [vmem:[%s13694_s1 + $0x10] sm:$0x7] }
  0x17   : > { %s219_s30 = scalar_select %p218_p10, %s9152_s22, 1  ;;  %v9269_v28 = vshrl.u32 %v13699_v25, 7  ;;  %v256_v35 = vld [vmem:[%s13694_s1 + $0x14] sm:$0x7]  ;;  %v254_v36 = vld [vmem:[%s13694_s1 + $0xc] sm:$0x7] }
  0x18   : > { %vm791_vm0 = vcmask 1046528   ;;  %vm1200_vm1 = vcmask 1045504   ;;  %v9345_v54 = vld [vmem:[%s13694_s1 + $0x18] sm:$0x7]  ;;  %v258_v55 = vld [vmem:[%s13694_s1 + $0x1c] sm:$0x7] }
  0x19   : > { %s8262_s6 = sshll.u32 %s219_s30, 8  ;;  %14082 = vst [vmem:[#allocation10_spill] sm:$0xff] %v9269_v28  ;;  %v9275_v29 = vsub.s32 1, %v9269_v28  ;;  %v9300_v37 = vsub.s32 0, %v9269_v28  ;;  %v9310_v40 = vsub.s32 2, %v9269_v28  ;;  %v13710_v25 = vmov 0.0|0.0  }
  0x1a   : > { %s9186_s9 = scalar_lea.vmem %s13693_s0, %s8262_s6  ;;  %8708 = vmatprep.subr.bf16.mxu0 %v13710_v25  ;;  %8726 = vmatprep.subr.bf16.mxu1 %v13710_v25  ;;  %vm9095_vm2 = vmmov 0   ;;  %vm3629_vm5 = vcmask 113664   ;;  %vm7243_vm7 = vcmask 39936   ;;  %vm7246_vm8 = vcmask 1044480   ;;  %s215_s11 = sand.u32 1, %s9081_s19  }
  0x1b   : > { %v224_v1 = vld [vmem:[%s9186_s9 + $0x8] sm:$0xff]  ;;  %v223_v2 = vld [vmem:[%s9186_s9] sm:$0xff]  ;;  %v226_v3 = vld [vmem:[%s9186_s9 + $0x18] sm:$0xff]  ;;  %14083 = vst [vmem:[#allocation11_spill] sm:$0xff] %v9275_v29  ;;  %v9291_v34 = vrot.slane %v252_v30, %v9275_v29  ;;  %v9303_v38 = vrot.slane %v253_v31, %v9275_v29  ;;  %v9307_v39 = vrot.slane %v251_v32, %v9275_v29  ;;  %v9314_v43 = vrot.slane %v255_v33, %v9275_v29  ;;  %s8228_s12 = sshll.u32 %s215_s11, 2  ;;  %s8263_s14 = sshll.u32 %s9152_s22, 6 }
  0x1c   : > { %448 = vperm.xlu1 %8944, %v224_v1   ;;  %444 = vperm.xlu0 %8946, %v223_v2   ;;  %v225_v5 = vld [vmem:[%s9186_s9 + $0x10] sm:$0xff]  ;;  %v228_v7 = vld [vmem:[%s9186_s9 + $0x28] sm:$0xff]  ;;  %v227_v8 = vld [vmem:[%s9186_s9 + $0x20] sm:$0xff]  ;;  %14085 = vst [vmem:[#allocation13_spill] sm:$0xff] %v9300_v37  ;;  %v9317_v44 = vrot.slane %v256_v35, %v9275_v29  ;;  %v9320_v45 = vrot.slane %v254_v36, %v9275_v29  ;;  %vm8145_vm9 = vcmask 123904   ;;  %s13650_s17 = scalar_lea.hbm %s13698_s5, %s8263_s14  ;;  %s13652_s23 = scalar_lea.sflag [#allocation3], %s215_s11 }
  0x1d   : > { %v229_v9 = vld [vmem:[%s9186_s9 + $0x30] sm:$0xff]  ;;  %v230_v10 = vld [vmem:[%s9186_s9 + $0x38] sm:$0xff]  ;;  %v232_v11 = vld [vmem:[%s9186_s9 + $0x48] sm:$0xff]  ;;  %14084 = vst [vmem:[#allocation12_spill] sm:$0xff] %v9291_v34  ;;  %v9326_v47 = vrot.slane %v251_v32, %v9300_v37  ;;  %v9329_v48 = vrot.slane %v252_v30, %v9300_v37  ;;  %v9332_v49 = vrot.slane %v253_v31, %v9300_v37  ;;  %v9340_v53 = vrot.slane %v254_v36, %v9300_v37  ;;  %s9098_s22 = smov [#allocation2]  }
  0x1e   : > { %v234_v12 = vld [vmem:[%s9186_s9 + $0x58] sm:$0xff]  ;;  %v231_v13 = vld [vmem:[%s9186_s9 + $0x40] sm:$0xff]  ;;  %v233_v14 = vld [vmem:[%s9186_s9 + $0x50] sm:$0xff]  ;;  %14086 = vst [vmem:[#allocation14_spill] sm:$0xff] %v9303_v38  ;;  %v9351_v56 = vrot.slane %v251_v32, %v9310_v40  ;;  %v9354_v57 = vrot.slane %v252_v30, %v9310_v40  ;;  %v9357_v58 = vrot.slane %v253_v31, %v9310_v40  ;;  %v9360_v59 = vrot.slane %v254_v36, %v9310_v40  ;;  %s9031_s26 = sshll.u32 %s9098_s22, 4  ;;  %s9032_s26 = int_to_ptr.vmem [resolvable:$false] %s9031_s26 }
  0x1f   : > { %v236_v15 = vld [vmem:[%s9186_s9 + $0x68] sm:$0xff]  ;;  %v9216_v16 = vld [vmem:[%s9186_s9 + $0x78] sm:$0xff]  ;;  %v235_v17 = vld [vmem:[%s9186_s9 + $0x60] sm:$0xff]  ;;  %14087 = vst [vmem:[#allocation15_spill] sm:$0xff] %v9307_v39  ;;  %v9364_v61 = vrot.slane %v255_v33, %v9310_v40  ;;  %v9367_v62 = vrot.slane %v256_v35, %v9310_v40  ;;  %v9370_v63 = vrot.slane %v255_v33, %v9300_v37  ;;  %s9033_s30 = scalar_lea.vmem %s9032_s26, 128 }
  0x20   : > { %456 = vperm.xlu1 %8944, %v226_v3   ;;  %8949 = vset.pattern.permute.xlu0 %v13701_v4  ;;  %v9223_v18 = vld [vmem:[%s9186_s9 + $0x70] sm:$0xff]  ;;  %v9228_v19 = vld [vmem:[%s9186_s9 + $0x88] sm:$0xff]  ;;  %v9234_v20 = vld [vmem:[%s9186_s9 + $0x98] sm:$0xff]  ;;  %14088 = vst [vmem:[#allocation16_spill] sm:$0xff] %v9310_v40 }
  0x21   : > { %604 = vperm.xlu0 %8949, %v226_v3   ;;  %v9239_v21 = vld [vmem:[%s9186_s9 + $0x80] sm:$0xff]  ;;  %v9244_v22 = vld [vmem:[%s9186_s9 + $0x90] sm:$0xff]  ;;  %v9254_v24 = vld [vmem:[%s9186_s9 + $0xa8] sm:$0xff]  ;;  %14089 = vst [vmem:[#allocation17_spill] sm:$0xff] %v9314_v43 }
  0x22   : > { %14077 = vst [vmem:[#allocation5_spill] sm:$0xff] %v9244_v22  ;;  %v9249_v23 = vld [vmem:[%s9186_s9 + $0xa0] sm:$0xff]  ;;  %14079 = vst [vmem:[#allocation7_spill] sm:$0xff] %v9254_v24  ;;  %v9262_v26 = vld [vmem:[%s9186_s9 + $0xb8] sm:$0xff] }
  0x23   : > { %14078 = vst [vmem:[#allocation6_spill] sm:$0xff] %v9249_v23  ;;  %14080 = vst [vmem:[#allocation8_spill] sm:$0xff] %v9262_v26  ;;  %v9266_v27 = vld [vmem:[%s9186_s9 + $0xb0] sm:$0xff] }
  0x24   : > { %8945 = vset.pattern.permute.xlu1 %v13706_v6  ;;  %14081 = vst [vmem:[#allocation9_spill] sm:$0xff] %v9266_v27  ;;  %14090 = vst [vmem:[#allocation18_spill] sm:$0xff] %v9317_v44 }
  0x25   : > { %283 = vperm.xlu1 %8945, %v225_v5   ;;  %8950 = vset.pattern.permute.xlu0 %v13706_v6  ;;  %14091 = vst [vmem:[#allocation19_spill] sm:$0xff] %v9320_v45  ;;  %14092 = vst [vmem:[#allocation20_spill] sm:$0xff] %v9326_v47 }
  0x26   : > { %278 = vperm.xlu0 %8950, %v224_v1   ;;  %14093 = vst [vmem:[#allocation21_spill] sm:$0xff] %v9329_v48  ;;  %14094 = vst [vmem:[#allocation22_spill] sm:$0xff] %v9332_v49 }
  0x27   : > { %14095 = vst [vmem:[#allocation23_spill] sm:$0xff] %v9340_v53  ;;  %14096 = vst [vmem:[#allocation24_spill] sm:$0xff] %v9351_v56 }
  0x28   : > { %14097 = vst [vmem:[#allocation25_spill] sm:$0xff] %v9354_v57  ;;  %14098 = vst [vmem:[#allocation26_spill] sm:$0xff] %v9357_v58 }
  0x29   : > { %8947 = vset.pattern.permute.xlu1 %v13703_v0  ;;  %14099 = vst [vmem:[#allocation27_spill] sm:$0xff] %v9360_v59  ;;  %14100 = vst [vmem:[#allocation28_spill] sm:$0xff] %v9367_v62 }
  0x2a   : > { %452 = vperm.xlu1 %8947, %v225_v5   ;;  %288 = vperm.xlu0 %8950, %v226_v3   ;;  %14101 = vst [vmem:[#allocation29_spill] sm:$0xff] %v9370_v63 }
  0x2e   : > { %8948 = vset.pattern.permute.xlu1 %v13701_v4  ;;  %273 = vperm.xlu0 %8950, %v223_v2  }
  0x2f   : > { %596 = vperm.xlu1 %8948, %v224_v1   ;;  %v9373_v1 = vrot.slane %v256_v35, %v9300_v37 }
  0x31   : > { %14102 = vst [vmem:[#allocation30_spill] sm:$0xff] %v9373_v1 }
  0x32   : > { %298 = vperm.xlu0 %8950, %v228_v7  }
  0x33   : > { %592 = vperm.xlu1 %8948, %v223_v2  }
  0x36   : > { %8953 = vset.pattern.permute.xlu0 %v13703_v0 }
  0x37   : > { %600 = vperm.xlu1 %8948, %v225_v5   ;;  %460 = vperm.xlu0 %8953, %v227_v8  }
  0x3b   : > { %8951 = vset.pattern.permute.xlu1 %v13706_v6  ;;  %468 = vperm.xlu0 %8953, %v229_v9  }
  0x3c   : > { %293 = vperm.xlu1 %8951, %v227_v8  }
  0x3f   : > { %8957 = vset.pattern.permute.xlu0 %v13706_v6 }
  0x40   : > { %8952 = vset.pattern.permute.xlu1 %v13703_v0  ;;  %308 = vperm.xlu0 %8957, %v230_v10  }
  0x41   : > { %464 = vperm.xlu1 %8952, %v228_v7  }
  0x44   : > { %318 = vperm.xlu0 %8957, %v232_v11  }
  0x45   : > { %8954 = vset.pattern.permute.xlu1 %v13701_v4 }
  0x46   : > { %612 = vperm.xlu1 %8954, %v228_v7   ;;  %v9379_v7 = vrot.slane %v9345_v54, %v9300_v37 }
  0x48   : > { %328 = vperm.xlu0 %8957, %v234_v12   ;;  %14103 = vst [vmem:[#allocation31_spill] sm:$0xff] %v9379_v7 }
  0x4a   : > { %608 = vperm.xlu1 %8954, %v227_v8   ;;  %v9382_v8 = vrot.slane %v258_v55, %v9300_v37 }
  0x4c   : > { %8962 = vset.pattern.permute.xlu0 %v13703_v0  ;;  %14104 = vst [vmem:[#allocation32_spill] sm:$0xff] %v9382_v8 }
  0x4d   : > { %476 = vperm.xlu0 %8962, %v231_v13  }
  0x4e   : > { %8955 = vset.pattern.permute.xlu1 %v13703_v0 }
  0x4f   : > { %472 = vperm.xlu1 %8955, %v230_v10  }
  0x51   : > { %484 = vperm.xlu0 %8962, %v233_v14  }
  0x53   : > { %8956 = vset.pattern.permute.xlu1 %v13706_v6 }
  0x54   : > { %303 = vperm.xlu1 %8956, %v229_v9  }
  0x55   : > { %8966 = vset.pattern.permute.xlu0 %v13706_v6 }
  0x56   : > { %338 = vperm.xlu0 %8966, %v236_v15  }
  0x58   : > { %8958 = vset.pattern.permute.xlu1 %v13701_v4 }
  0x59   : > { %620 = vperm.xlu1 %8958, %v230_v10  }
  0x5a   : > { %348 = vperm.xlu0 %8966, %v9216_v16  }
  0x5d   : > { %616 = vperm.xlu1 %8958, %v229_v9  }
  0x5e   : > { %8970 = vset.pattern.permute.xlu0 %v13703_v0 }
  0x5f   : > { %492 = vperm.xlu0 %8970, %v235_v17  }
  0x61   : > { %8959 = vset.pattern.permute.xlu1 %v13706_v6 }
  0x62   : > { %313 = vperm.xlu1 %8959, %v231_v13  }
  0x63   : > { %500 = vperm.xlu0 %8970, %v9223_v18  }
  0x66   : > { %8960 = vset.pattern.permute.xlu1 %v13703_v0 }
  0x67   : > { %480 = vperm.xlu1 %8960, %v232_v11   ;;  %8974 = vset.pattern.permute.xlu0 %v13706_v6 }
  0x68   : > { %358 = vperm.xlu0 %8974, %v9228_v19  }
  0x6b   : > { %8961 = vset.pattern.permute.xlu1 %v13701_v4 }
  0x6c   : > { %628 = vperm.xlu1 %8961, %v232_v11   ;;  %368 = vperm.xlu0 %8974, %v9234_v20   ;;  %v9387_v11 = vrot.slane %v9345_v54, %v9275_v29 }
  0x6e   : > { %14105 = vst [vmem:[#allocation33_spill] sm:$0xff] %v9387_v11 }
  0x70   : > { %624 = vperm.xlu1 %8961, %v231_v13   ;;  %8978 = vset.pattern.permute.xlu0 %v13703_v0 }
  0x71   : > { %508 = vperm.xlu0 %8978, %v9239_v21  }
  0x74   : > { %8963 = vset.pattern.permute.xlu1 %v13703_v0 }
  0x75   : > { %488 = vperm.xlu1 %8963, %v234_v12   ;;  %516 = vperm.xlu0 %8978, %v9244_v22  }
  0x79   : > { %8964 = vset.pattern.permute.xlu1 %v13706_v6  ;;  %524 = vperm.xlu0 %8978, %v9249_v23  }
  0x7a   : > { %323 = vperm.xlu1 %8964, %v233_v14  }
  0x7d   : > { %8984 = vset.pattern.permute.xlu0 %v13706_v6 }
  0x7e   : > { %8965 = vset.pattern.permute.xlu1 %v13701_v4  ;;  %378 = vperm.xlu0 %8984, %v9254_v24  }
  0x7f   : > { %636 = vperm.xlu1 %8965, %v234_v12   ;;  %v9390_v12 = vrot.slane %v258_v55, %v9275_v29 }
  0x81   : > { %14106 = vst [vmem:[#allocation34_spill] sm:$0xff] %v9390_v12 }
  0x82   : > { %388 = vperm.xlu0 %8984, %v9262_v26  }
  0x83   : > { %632 = vperm.xlu1 %8965, %v233_v14  }
  0x86   : > { %8988 = vset.pattern.permute.xlu0 %v13703_v0 }
  0x87   : > { %8967 = vset.pattern.permute.xlu1 %v13706_v6  ;;  %532 = vperm.xlu0 %8988, %v9266_v27  }
  0x88   : > { %333 = vperm.xlu1 %8967, %v235_v17  }
  0x8b   : > { %8990 = vset.pattern.permute.xlu0 %v13706_v6 }
  0x8c   : > { %8968 = vset.pattern.permute.xlu1 %v13703_v0 }
  0x8d   : > { %496 = vperm.xlu1 %8968, %v236_v15  }
  0x91   : > { %8969 = vset.pattern.permute.xlu1 %v13701_v4 }
  0x92   : > { %644 = vperm.xlu1 %8969, %v236_v15  }
  0x96   : > { %640 = vperm.xlu1 %8969, %v235_v17  }
  0x9a   : > { %8971 = vset.pattern.permute.xlu1 %v13703_v0 }
  0x9b   : > { %v449_v41 = vpop.permute.xlu1 %448  ;;  %504 = vperm.xlu1 %8971, %v9216_v16   ;;  %v445_v42 = vpop.permute.xlu0 %444 }
  0x9c   : > { %v9323_v46 = vmul.f32 %v9291_v34, %v449_v41  ;;  %v9335_v50 = vmul.f32 %v9303_v38, %v449_v41  ;;  %v880_v51 = vmul.f32 %v9291_v34, %v445_v42  ;;  %v1289_v52 = vmul.f32 %v9303_v38, %v445_v42 }
  0x9d   : > { %v544_v30 = vmul.f32 %v9307_v39, %v449_v41  ;;  %v9406_v31 = vmul.f32 %v9307_v39, %v445_v42 }
  0x9e   : > { %v13700_v2 = vrot.slane %v9323_v46, 1  ;;  %v928_v3 = vrot.slane %v880_v51, 1  ;;  %v13705_v9 = vrot.slane %v9335_v50, 2  ;;  %v1337_v10 = vrot.slane %v1289_v52, 2 }
  0x9f   : > { %v457_v60 = vpop.permute.xlu1 %456  ;;  %8972 = vset.pattern.permute.xlu1 %v13706_v6 }
  0xa0   : > { %343 = vperm.xlu1 %8972, %v9223_v18   ;;  %v605_v5 = vpop.permute.xlu0 %604  ;;  %v9393_v13 = vmul.f32 %v9291_v34, %v457_v60  ;;  %v9396_v14 = vmul.f32 %v9303_v38, %v457_v60  ;;  %v9399_v15 = vmul.f32 %v9314_v43, %v457_v60  ;;  %v9402_v17 = vmul.f32 %v9317_v44, %v457_v60 }
  0xa1   : > { %v546_v32 = vmul.f32 %v9307_v39, %v457_v60  ;;  %v9410_v33 = vmul.f32 %v9354_v57, %v605_v5  ;;  %v9415_v35 = vsel %vm791_vm0, %v928_v3, %v13700_v2  ;;  %v9418_v36 = vmul.f32 %v9357_v58, %v605_v5 }
  0xa2   : > { %14107 = vst [vmem:[#allocation35_spill] sm:$0xff] %v9399_v15  ;;  %v9421_v51 = vmul.f32 %v9364_v61, %v605_v5  ;;  %v9427_v42 = vsel %vm1200_vm1, %v1337_v10, %v13705_v9  ;;  %v694_v52 = vmul.f32 %v9351_v56, %v605_v5  ;;  %v9431_v55 = vmul.f32 %v9367_v62, %v605_v5 }
  0xa3   : > { %v9442_v6 = vmul.f32 %v9360_v59, %v605_v5  ;;  %v9456_v25 = vmul.f32 %v9320_v45, %v457_v60 }
  0xa4   : > { %14108 = vst [vmem:[#allocation36_spill] sm:$0xff] %v9421_v51  ;;  %v284_v41 = vpop.permute.xlu1 %283  ;;  %8973 = vset.pattern.permute.xlu1 %v13701_v4  ;;  %14109 = vst [vmem:[#allocation37_spill] sm:$0xff] %v9431_v55 }
  0xa5   : > { %652 = vperm.xlu1 %8973, %v9216_v16   ;;  %v279_v3 = vpop.permute.xlu0 %278  ;;  %v9445_v16 = vmul.f32 %v9329_v48, %v284_v41  ;;  %v9448_v28 = vmul.f32 %v9332_v49, %v284_v41  ;;  %v9453_v0 = vmul.f32 %v9370_v63, %v284_v41  ;;  %v397_v5 = vmul.f32 %v9326_v47, %v284_v41 }
  0xa6   : > { %v9461_v9 = vmul.f32 %v9340_v53, %v284_v41  ;;  %v9464_v29 = vmul.f32 %v9373_v1, %v284_v41  ;;  %v396_v2 = vmul.f32 %v9326_v47, %v279_v3  ;;  %v9471_v60 = vmul.f32 %v9329_v48, %v279_v3 }
  0xa7   : > { %v795_v24 = vrot.slane %v9445_v16, 1  ;;  %v9482_v12 = vmul.f32 %v9332_v49, %v279_v3  ;;  %v9491_v16 = vrot.slane %v9345_v54, %v9310_v40  ;;  %v14112_v3 = vmov 0  }
  0xa8   : > { %14110 = vst [vmem:[#allocation38_spill] sm:$0xff] %v9461_v9  ;;  %v568_v22 = vadd.f32 %v544_v30, %v396_v2  ;;  %v793_v8 = vrot.slane %v9471_v60, 1  ;;  %v14115_v60 = vrot.slane %v9393_v13, 1 }
  0xa9   : > { %v453_v27 = vpop.permute.xlu1 %452  ;;  %648 = vperm.xlu1 %8973, %v9223_v18   ;;  %v9467_v4 = vpop.permute.xlu0 %288  ;;  %14111 = vst [vmem:[#allocation39_spill] sm:$0xff] %v9491_v16 }
  0xaa   : > { %v882_v10 = vmul.f32 %v9291_v34, %v453_v27  ;;  %v1291_v26 = vmul.f32 %v9303_v38, %v453_v27  ;;  %v1879_v41 = vmul.f32 %v9314_v43, %v453_v27  ;;  %v398_v18 = vmul.f32 %v9326_v47, %v9467_v4  ;;  %v259_v38 = vld [vmem:[%s13694_s1 + $0x20] sm:$0x7] }
  0xab   : > { %v746_v7 = vmul.f32 %v9329_v48, %v9467_v4  ;;  %v545_v23 = vmul.f32 %v9307_v39, %v453_v27  ;;  %v9495_v34 = vmul.f32 %v9317_v44, %v453_v27  ;;  %v1155_v2 = vmul.f32 %v9332_v49, %v9467_v4 }
  0xac   : > { %v931_v43 = vrot.slane %v882_v10, 1  ;;  %v570_v11 = vadd.f32 %v546_v32, %v398_v18  ;;  %v1340_v9 = vrot.slane %v1291_v26, 2  ;;  %v1927_v54 = vrot.slane %v1879_v41, 1 }
  0xad   : > { %8975 = vset.pattern.permute.xlu1 %v14112_v3  ;;  %v796_v16 = vrot.slane %v746_v7, 1  ;;  %v274_v39 = vpop.permute.xlu0 %273  ;;  %v9502_v10 = vrot.slane %v259_v38, %v9300_v37  ;;  %v1202_v32 = vrot.slane %v9482_v12, 2  ;;  %v9506_v18 = vmul.f32 %v9320_v45, %v453_v27 }
  0xae   : > { %v597_v51 = vpop.permute.xlu1 %596  ;;  %353 = vperm.xlu1 %8975, %v9239_v21   ;;  %v718_v40 = vadd.f32 %v694_v52, %v570_v11  ;;  %v569_v30 = vadd.f32 %v545_v23, %v397_v5  ;;  %v933_v11 = vsel %vm791_vm0, %v931_v43, %v14115_v60  ;;  %v2335_v7 = vrot.slane %v9495_v34, 2 }
  0xaf   : > { %14113 = vst [vmem:[#allocation40_spill] sm:$0xff] %v9502_v10  ;;  %14114 = vst [vmem:[#allocation41_spill] sm:$0xff] %v9506_v18  ;;  %v692_v26 = vmul.f32 %v9351_v56, %v597_v51  ;;  %v14116_v38 = vrot.slane %v9396_v14, 2  ;;  %v1017_v41 = vmul.f32 %v9354_v57, %v597_v51  ;;  %v395_v55 = vmul.f32 %v9326_v47, %v274_v39 }
  0xb0   : > { %v855_v52 = vadd.f32 %v796_v16, %v718_v40  ;;  %v14117_v37 = vmov 1   ;;  %v14118_v5 = vrot.slane %v9399_v15, 1  ;;  %v14120_v34 = vmov %v14115_v60 }
  0xb1   : > { %v9518_v12 = vsel %vm1200_vm1, %v1340_v9, %v14116_v38  ;;  %v716_v27 = vadd.f32 %v692_v26, %v568_v22  ;;  %v1572_v9 = vmul.f32 %v9340_v53, %v9467_v4  ;;  %v743_v22 = vmul.f32 %v9329_v48, %v274_v39 }
  0xb2   : > { %8976 = vset.pattern.permute.xlu1 %v14117_v37  ;;  %v593_v23 = vpop.permute.xlu1 %592  ;;  %v9526_v43 = vsel %vm791_vm0, %v1927_v54, %v14118_v5  ;;  %v991_v40 = vadd.f32 %v14120_v34, %v855_v52  ;;  %v1205_v26 = vrot.slane %v1155_v2, 2  ;;  %v9536_v60 = vmul.f32 %v9370_v63, %v9467_v4 }
  0xb3   : > { %14119 = vst [vmem:[#allocation42_spill] sm:$0xff] %v9526_v43  ;;  %512 = vperm.xlu1 %8976, %v9228_v19   ;;  %v853_v38 = vadd.f32 %v793_v8, %v716_v27  ;;  %v567_v10 = vadd.f32 %v9406_v31, %v395_v55  ;;  %v9540_v54 = vmul.f32 %v9357_v58, %v597_v51  ;;  %v792_v13 = vrot.slane %v743_v22, 1 }
  0xb4   : > { %v1152_v52 = vmul.f32 %v9332_v49, %v274_v39  ;;  %v691_v5 = vmul.f32 %v9351_v56, %v593_v23  ;;  %v14121_v34 = vrot.slane %v9410_v33, 1  ;;  %v14122_v2 = vrot.slane %v9323_v46, 1 }
  0xb5   : > { %v1065_v43 = vrot.slane %v1017_v41, 1  ;;  %v1016_v15 = vmul.f32 %v9354_v57, %v593_v23  ;;  %v797_v31 = vsel %vm791_vm0, %v795_v24, %v796_v16  ;;  %v794_v51 = vsel %vm791_vm0, %v792_v13, %v793_v8 }
  0xb6   : > { %v1127_v44 = vadd.f32 %v14121_v34, %v991_v40  ;;  %v989_v45 = vadd.f32 %v14122_v2, %v853_v38  ;;  %v601_v27 = vpop.permute.xlu1 %600  ;;  %v1201_v55 = vrot.slane %v1152_v52, 2  ;;  %v715_v22 = vadd.f32 %v691_v5, %v567_v10 }
  0xb7   : > { %v14123_v18 = vmov 2   ;;  %v9554_v39 = vmul.f32 %v9373_v1, %v9467_v4  ;;  %v1064_v34 = vrot.slane %v1016_v15, 1  ;;  %v693_v46 = vmul.f32 %v9351_v56, %v601_v27 }
  0xb8   : > { %8977 = vset.pattern.permute.xlu1 %v14123_v18  ;;  %v1125_v40 = vadd.f32 %v1065_v43, %v989_v45  ;;  %v1792_v41 = vrot.slane %v9536_v60, 1  ;;  %v1474_v24 = vrot.slane %v9540_v54, 2  ;;  %v852_v16 = vadd.f32 %v794_v51, %v715_v22 }
  0xb9   : > { %660 = vperm.xlu1 %8977, %v9228_v19   ;;  %v1018_v8 = vmul.f32 %v9354_v57, %v601_v27  ;;  %v1264_v10 = vadd.f32 %v1205_v26, %v1127_v44  ;;  %v1425_v13 = vmul.f32 %v9357_v58, %v593_v23  ;;  %v717_v52 = vadd.f32 %v693_v46, %v569_v30 }
  0xba   : > { %v1262_v38 = vadd.f32 %v1202_v32, %v1125_v40  ;;  %v1203_v4 = vsel %vm1200_vm1, %v1201_v55, %v1202_v32  ;;  %v988_v45 = vadd.f32 %v9415_v35, %v852_v16  ;;  %v1427_v5 = vmul.f32 %v9357_v58, %v601_v27 }
  0xbb   : > { %v1067_v15 = vrot.slane %v1018_v8, 1  ;;  %v14124_v19 = vrot.slane %v9335_v50, 2  ;;  %v1066_v54 = vsel %vm791_vm0, %v1064_v34, %v1065_v43  ;;  %v854_v2 = vadd.f32 %v797_v31, %v717_v52 }
  0xbc   : > { %v2015_v51 = vmul.f32 %v9364_v61, %v601_v27  ;;  %v14125_v44 = vrot.slane %v9402_v17, 2  ;;  %v14126_v35 = vrot.slane %v9448_v28, 2  ;;  %v2200_v23 = vrot.slane %v9554_v39, 2 }
  0xbd   : > { %v1398_v60 = vadd.f32 %v14124_v19, %v1262_v38  ;;  %656 = vperm.xlu1 %8977, %v9239_v21   ;;  %v1124_v50 = vadd.f32 %v1066_v54, %v988_v45  ;;  %v14127_v55 = vrot.slane %v9396_v14, 2  ;;  %v1473_v22 = vrot.slane %v1425_v13, 2  ;;  %v9588_v14 = vpop.permute.xlu0 %298 }
  0xbe   : > { %v9573_v30 = vsel %vm1200_vm1, %v2335_v7, %v14125_v44  ;;  %v1206_v32 = vsel %vm1200_vm1, %v14126_v35, %v1205_v26  ;;  %v990_v40 = vadd.f32 %v933_v11, %v854_v2  ;;  %v14128_v21 = vrot.slane %v9410_v33, 1  ;;  %14130 = vst [vmem:[#allocation43_spill] sm:$0xff] %v9588_v14  ;;  %v14135_v44 = vld [vmem:[#allocation36_spill] sm:$0xff] }
  0xbf   : > { %v1400_v43 = vadd.f32 %v14127_v55, %v1264_v10  ;;  %v1534_v31 = vadd.f32 %v1474_v24, %v1398_v60  ;;  %v1261_v34 = vadd.f32 %v1203_v4, %v1124_v50  ;;  %v1476_v7 = vrot.slane %v1427_v5, 2  ;;  %v9612_v5 = vpop.permute.xlu1 %293 }
  0xc0   : > { %v1069_v46 = vsel %vm791_vm0, %v1067_v15, %v14128_v21  ;;  %v2423_v16 = vmul.f32 %v9367_v62, %v601_v27  ;;  %v14129_v28 = vrot.slane %v9453_v0, 1  ;;  %v2063_v52 = vrot.slane %v2015_v51, 1  ;;  %14133 = vst [vmem:[#allocation44_spill] sm:$0xff] %v9612_v5  ;;  %v14140_v21 = vld [vmem:[#allocation5_spill] sm:$0xff] }
  0xc1   : > { %v1596_v8 = vadd.f32 %v1572_v9, %v1534_v31  ;;  %v1126_v38 = vadd.f32 %v1069_v46, %v990_v40  ;;  %8979 = vset.pattern.permute.xlu1 %v14117_v37  ;;  %v14131_v33 = vrot.slane %v9464_v29, 2  ;;  %v1397_v10 = vadd.f32 %v9427_v42, %v1261_v34  ;;  %v14138_v40 = vld [vmem:[#allocation32_spill] sm:$0xff]  ;;  %v9648_v46 = vld [vmem:[%s9186_s9 + $0xc8] sm:$0xff] }
  0xc2   : > { %v1793_v26 = vsel %vm791_vm0, %v14129_v28, %v1792_v41  ;;  %v9601_v0 = vmul.f32 %v9326_v47, %v9588_v14  ;;  %v9605_v9 = vmul.f32 %v9329_v48, %v9588_v14  ;;  %520 = vperm.xlu1 %8979, %v9234_v20   ;;  %v14132_v13 = vrot.slane %v9418_v36, 2  ;;  %v14137_v36 = vld [vmem:[#allocation38_spill] sm:$0xff]  ;;  %v14143_v28 = vld [vmem:[#allocation37_spill] sm:$0xff]  ;;  %1564 = vperm.xlu0 %8990, %v9648_v46  }
  0xc3   : > { %v9596_v11 = vsel %vm1200_vm1, %v14131_v33, %v2200_v23  ;;  %v1656_v29 = vadd.f32 %v9456_v25, %v1596_v8  ;;  %v1475_v45 = vsel %vm1200_vm1, %v1473_v22, %v1474_v24  ;;  %v1263_v15 = vadd.f32 %v1206_v32, %v1126_v38  ;;  %14141 = vst [vmem:[#allocation38_spill] sm:$0xff] %v9648_v46 }
  0xc4   : > { %v1536_v4 = vadd.f32 %v14132_v13, %v1400_v43  ;;  %v1533_v42 = vadd.f32 %v1475_v45, %v1397_v10  ;;  %v14134_v19 = vmov %v14132_v13  ;;  %v1691_v54 = vmul.f32 %v9360_v59, %v601_v27  ;;  %v14147_v45 = vld [vmem:[#allocation31_spill] sm:$0xff] }
  0xc5   : > { %v1478_v60 = vsel %vm1200_vm1, %v1476_v7, %v14134_v19  ;;  %v2471_v2 = vrot.slane %v2423_v16, 2  ;;  %v1716_v51 = vadd.f32 %v9442_v6, %v1656_v29  ;;  %v14136_v35 = vrot.slane %v14135_v44, 1  ;;  %v14142_v7 = vld [vmem:[#allocation41_spill] sm:$0xff] }
  0xc6   : > { %v9624_v24 = vmul.f32 %v9332_v49, %v9588_v14  ;;  %v1574_v32 = vmul.f32 %v9340_v53, %v9588_v14  ;;  %v1595_v50 = vadd.f32 %v14137_v36, %v1533_v42  ;;  %v9632_v27 = vmul.f32 %v9370_v63, %v9588_v14  ;;  %8980 = vset.pattern.permute.xlu1 %v14112_v3  ;;  %v9674_v42 = vpop.permute.xlu1 %464 }
  0xc7   : > { %v2065_v25 = vsel %vm791_vm0, %v2063_v52, %v14136_v35  ;;  %v1156_v6 = vmul.f32 %v9332_v49, %v9612_v5  ;;  %v1852_v43 = vadd.f32 %v1792_v41, %v1716_v51  ;;  %v1399_v31 = vadd.f32 %v9518_v12, %v1263_v15  ;;  %363 = vperm.xlu1 %8980, %v14140_v21   ;;  %v14145_v52 = vld [vmem:[#allocation35_spill] sm:$0xff] }
  0xc8   : > { %v9640_v22 = vmul.f32 %v9373_v1, %v9588_v14  ;;  %v9644_v34 = vmul.f32 %v14138_v40, %v9588_v14  ;;  %v1655_v16 = vadd.f32 %v14142_v7, %v1595_v50  ;;  %v14144_v8 = vrot.slane %v14143_v28, 2  ;;  %14148 = vst [vmem:[#allocation5_spill] sm:$0xff] %v9674_v42  ;;  %8993 = vset.pattern.permute.xlu0 %v14117_v37 }
  0xc9   : > { %v9658_v12 = vmul.f32 %v9329_v48, %v9612_v5  ;;  %v9662_v38 = vmul.f32 %v9370_v63, %v9612_v5  ;;  %v14146_v33 = vrot.slane %v14145_v52, 1  ;;  %v13751_v13 = vrot.slane %v9624_v24, 2  ;;  %v14153_v52 = vld [vmem:[#allocation14_spill] sm:$0xff] }
  0xca   : > { %14139 = vst [vmem:[#allocation36_spill] sm:$0xff] %v9644_v34  ;;  %v9654_v41 = vsel %vm1200_vm1, %v2471_v2, %v14144_v8  ;;  %v9668_v29 = vadd.f32 %v1574_v32, %v1536_v4  ;;  %v9672_v15 = vmul.f32 %v14147_v45, %v9588_v14  ;;  %v1715_v19 = vadd.f32 %v1691_v54, %v1655_v16  ;;  %v9688_v8 = vpop.permute.xlu0 %460  ;;  %v14158_v54 = vld [vmem:[#allocation15_spill] sm:$0xff]  ;;  %v14162_v4 = vld [vmem:[#allocation18_spill] sm:$0xff] }
  0xcb   : > { %v1988_v10 = vadd.f32 %v14146_v33, %v1852_v43  ;;  %v1207_v51 = vrot.slane %v1156_v6, 2  ;;  %v2153_v35 = vmul.f32 %v9373_v1, %v9612_v5  ;;  %v14149_v36 = vrot.slane %v14135_v44, 1  ;;  %8981 = vset.pattern.permute.xlu1 %v14123_v18  ;;  %14150 = vst [vmem:[#allocation41_spill] sm:$0xff] %v9688_v8 }
  0xcc   : > { %v1535_v43 = vadd.f32 %v1478_v60, %v1399_v31  ;;  %v1851_v7 = vadd.f32 %v1793_v26, %v1715_v19  ;;  %v1573_v6 = vmul.f32 %v9340_v53, %v9612_v5  ;;  %668 = vperm.xlu1 %8981, %v9234_v20   ;;  %v9695_v44 = vmul.f32 %v14147_v45, %v9612_v5  ;;  %v14152_v26 = vld [vmem:[#allocation12_spill] sm:$0xff]  ;;  %v14155_v19 = vld [vmem:[#allocation42_spill] sm:$0xff] }
  0xcd   : > { %v2124_v50 = vadd.f32 %v14149_v36, %v1988_v10  ;;  %v884_v31 = vmul.f32 %v14152_v26, %v9688_v8  ;;  %v1293_v33 = vmul.f32 %v14153_v52, %v9688_v8  ;;  %v9702_v10 = vld [vmem:[%s9186_s9 + $0xc0] sm:$0xff]  ;;  %v9709_v20 = vsel %vm1200_vm1, %v1207_v51, %v13751_v13 }
  0xce   : > { %14151 = vst [vmem:[#allocation37_spill] sm:$0xff] %v9695_v44  ;;  %14154 = vst [vmem:[#allocation35_spill] sm:$0xff] %v9702_v10  ;;  %v1987_v36 = vadd.f32 %v14155_v19, %v1851_v7  ;;  %v2202_v39 = vrot.slane %v2153_v35, 2  ;;  %1620 = vperm.xlu0 %8993, %v9702_v10   ;;  %v1597_v16 = vadd.f32 %v1573_v6, %v1535_v43  ;;  %v9720_v19 = vpop.permute.xlu1 %612  ;;  %v14160_v35 = vld [vmem:[#allocation19_spill] sm:$0xff] }
  0xcf   : > { %v2260_v60 = vadd.f32 %v2200_v23, %v2124_v50  ;;  %14156 = vst [vmem:[#allocation42_spill] sm:$0xff] %v9709_v20  ;;  %v399_v23 = vmul.f32 %v9326_v47, %v9612_v5  ;;  %v14157_v50 = vrot.slane %v9402_v17, 2  ;;  %v547_v2 = vmul.f32 %v14158_v54, %v9688_v8  ;;  %14159 = vst [vmem:[#allocation45_spill] sm:$0xff] %v9720_v19  ;;  %v14165_v5 = vld [vmem:[#allocation34_spill] sm:$0xff] }
  0xd0   : > { %v548_v7 = vmul.f32 %v14158_v54, %v9674_v42  ;;  %v2123_v51 = vadd.f32 %v2065_v25, %v1987_v36  ;;  %v1633_v13 = vmul.f32 %v14160_v35, %v9688_v8  ;;  %v885_v55 = vmul.f32 %v14152_v26, %v9674_v42  ;;  %664 = vperm.xlu1 %8981, %v14140_v21  }
  0xd1   : > { %v2396_v32 = vadd.f32 %v14157_v50, %v2260_v60  ;;  %v9728_v17 = vmul.f32 %v14153_v52, %v9674_v42  ;;  %v934_v43 = vrot.slane %v884_v31, 1  ;;  %v1343_v6 = vrot.slane %v1293_v33, 2  ;;  %v14161_v60 = vld [vmem:[#allocation17_spill] sm:$0xff] }
  0xd2   : > { %v1881_v50 = vmul.f32 %v14161_v60, %v9688_v8  ;;  %v9735_v25 = vmul.f32 %v14162_v4, %v9688_v8  ;;  %v14164_v36 = vrot.slane %v14143_v28, 2  ;;  %v2259_v34 = vadd.f32 %v9596_v11, %v2123_v51  ;;  %8995 = vset.pattern.permute.xlu0 %v14112_v3  ;;  %v9767_v40 = vpop.permute.xlu1 %608 }
  0xd3   : > { %v9742_v44 = vmul.f32 %v14165_v5, %v9688_v8  ;;  %v1634_v21 = vmul.f32 %v14160_v35, %v9674_v42  ;;  %v572_v31 = vadd.f32 %v548_v7, %v9601_v0  ;;  %v935_v33 = vrot.slane %v885_v55, 1  ;;  %v14169_v0 = vld [vmem:[#allocation33_spill] sm:$0xff]  ;;  %14172 = vst [vmem:[#allocation51_spill] sm:$0xff] %v9767_v40 }
  0xd4   : > { %14163 = vst [vmem:[#allocation46_spill] sm:$0xff] %v9735_v25  ;;  %v2532_v14 = vadd.f32 %v14164_v36, %v2396_v32  ;;  %v696_v28 = vmul.f32 %v9351_v56, %v9720_v19  ;;  %v14167_v32 = vrot.slane %v9640_v22, 2  ;;  %v571_v51 = vadd.f32 %v547_v2, %v399_v23  ;;  %8982 = vset.pattern.permute.xlu1 %v14112_v3 }
  0xd5   : > { %14166 = vst [vmem:[#allocation47_spill] sm:$0xff] %v9742_v44  ;;  %v1657_v36 = vadd.f32 %v1633_v13, %v1597_v16  ;;  %v1882_v10 = vmul.f32 %v14161_v60, %v9674_v42  ;;  %v1930_v20 = vrot.slane %v1881_v50, 1  ;;  %v9761_v55 = vmul.f32 %v14169_v0, %v9688_v8 }
  0xd6   : > { %v9754_v11 = vsel %vm1200_vm1, %v2202_v39, %v14167_v32  ;;  %v9765_v7 = vmul.f32 %v14162_v4, %v9674_v42  ;;  %v720_v46 = vadd.f32 %v696_v28, %v572_v31  ;;  %v14173_v39 = vld [vmem:[#allocation6_spill] sm:$0xff]  ;;  %v2395_v13 = vadd.f32 %v9573_v30, %v2259_v34 }
  0xd7   : > { %14168 = vst [vmem:[#allocation48_spill] sm:$0xff] %v9754_v11  ;;  %14170 = vst [vmem:[#allocation49_spill] sm:$0xff] %v9761_v55  ;;  %373 = vperm.xlu1 %8982, %v14173_v39   ;;  %v1658_v16 = vadd.f32 %v1634_v21, %v9668_v29  ;;  %v1694_v23 = vmul.f32 %v9360_v59, %v9720_v19  ;;  %v9776_v50 = vadd.f32 %v9672_v15, %v2532_v14 }
  0xd8   : > { %14171 = vst [vmem:[#allocation50_spill] sm:$0xff] %v9765_v7  ;;  %v936_v31 = vsel %vm791_vm0, %v934_v43, %v935_v33  ;;  %v14175_v28 = vrot.slane %v9728_v17, 2  ;;  %v1931_v30 = vrot.slane %v1882_v10, 1  ;;  %v14176_v34 = vrot.slane %v9605_v9, 1 }
  0xd9   : > { %14174 = vst [vmem:[#allocation6_spill] sm:$0xff] %v9776_v50  ;;  %v1718_v29 = vadd.f32 %v1694_v23, %v1658_v16  ;;  %v695_v21 = vmul.f32 %v9351_v56, %v9767_v40  ;;  %v1021_v15 = vmul.f32 %v9354_v57, %v9720_v19  ;;  %v9794_v43 = vmul.f32 %v9357_v58, %v9720_v19 }
  0xda   : > { %v9783_v8 = vsel %vm1200_vm1, %v1343_v6, %v14175_v28  ;;  %v857_v2 = vadd.f32 %v14176_v34, %v720_v46  ;;  %v1020_v6 = vmul.f32 %v9354_v57, %v9767_v40  ;;  %v9800_v46 = vadd.f32 %v9654_v41, %v2395_v13  ;;  %v14179_v34 = vld [vmem:[#allocation7_spill] sm:$0xff] }
  0xdb   : > { %8983 = vset.pattern.permute.xlu1 %v14117_v37  ;;  %v14178_v10 = vrot.slane %v9632_v27, 1  ;;  %v719_v23 = vadd.f32 %v695_v21, %v571_v51  ;;  %v1693_v28 = vmul.f32 %v9360_v59, %v9767_v40  ;;  %v2018_v32 = vmul.f32 %v9364_v61, %v9720_v19 }
  0xdc   : > { %14177 = vst [vmem:[#allocation52_spill] sm:$0xff] %v9800_v46  ;;  %528 = vperm.xlu1 %8983, %v14179_v34   ;;  %v9811_v14 = vmul.f32 %v9367_v62, %v9720_v19  ;;  %v14181_v44 = vrot.slane %v9605_v9, 1  ;;  %v14182_v41 = vrot.slane %v9658_v12, 1  ;;  %v2017_v51 = vmul.f32 %v9364_v61, %v9767_v40 }
  0xdd   : > { %v1854_v16 = vadd.f32 %v14178_v10, %v1718_v29  ;;  %v993_v29 = vadd.f32 %v935_v33, %v857_v2  ;;  %v9822_v10 = vmul.f32 %v9357_v58, %v9767_v40  ;;  %v1717_v50 = vadd.f32 %v1693_v28, %v1657_v36  ;;  %v9834_v2 = vpop.permute.xlu0 %468 }
  0xde   : > { %14180 = vst [vmem:[#allocation7_spill] sm:$0xff] %v9811_v14  ;;  %v800_v13 = vsel %vm791_vm0, %v14182_v41, %v14181_v44  ;;  %v1932_v55 = vsel %vm791_vm0, %v1930_v20, %v1931_v30  ;;  %v1070_v42 = vrot.slane %v1020_v6, 1  ;;  %v14183_v9 = vrot.slane %v9632_v27, 1  ;;  %14186 = vst [vmem:[#allocation54_spill] sm:$0xff] %v9834_v2 }
  0xdf   : > { %v856_v21 = vadd.f32 %v800_v13, %v719_v23  ;;  %v1990_v19 = vadd.f32 %v1931_v30, %v1854_v16  ;;  %v14184_v12 = vrot.slane %v9662_v38, 1  ;;  %v1071_v41 = vrot.slane %v1021_v15, 1  ;;  %v9841_v30 = vpop.permute.xlu1 %472 }
  0xe0   : > { %v2066_v25 = vrot.slane %v2017_v51, 1  ;;  %v9832_v33 = vmul.f32 %v9367_v62, %v9767_v40  ;;  %8985 = vset.pattern.permute.xlu1 %v14123_v18  ;;  %v13768_v20 = vrot.slane %v9794_v43, 2  ;;  %v2067_v36 = vrot.slane %v2018_v32, 1  ;;  %14187 = vst [vmem:[#allocation55_spill] sm:$0xff] %v9841_v30 }
  0xe1   : > { %v1796_v44 = vsel %vm791_vm0, %v14184_v12, %v14183_v9  ;;  %v886_v38 = vmul.f32 %v14152_v26, %v9834_v2  ;;  %676 = vperm.xlu1 %8985, %v14179_v34   ;;  %v992_v15 = vadd.f32 %v936_v31, %v856_v21  ;;  %v9847_v16 = vmul.f32 %v14153_v52, %v9834_v2 }
  0xe2   : > { %v1853_v46 = vadd.f32 %v1796_v44, %v1717_v50  ;;  %14185 = vst [vmem:[#allocation53_spill] sm:$0xff] %v9832_v33  ;;  %v1129_v50 = vadd.f32 %v1071_v41, %v993_v29  ;;  %v2126_v23 = vadd.f32 %v2067_v36, %v1990_v19  ;;  %v1072_v32 = vsel %vm791_vm0, %v1070_v42, %v1071_v41 }
  0xe3   : > { %v1883_v13 = vmul.f32 %v14161_v60, %v9834_v2  ;;  %v2068_v51 = vsel %vm791_vm0, %v2066_v25, %v2067_v36  ;;  %v9856_v31 = vmul.f32 %v14158_v54, %v9834_v2  ;;  %v9860_v34 = vmul.f32 %v14152_v26, %v9841_v30 }
  0xe4   : > { %v1989_v28 = vadd.f32 %v1932_v55, %v1853_v46  ;;  %v937_v29 = vrot.slane %v886_v38, 1  ;;  %v9864_v42 = vmul.f32 %v14160_v35, %v9834_v2  ;;  %v9868_v19 = vmul.f32 %v14162_v4, %v9834_v2 }
  0xe5   : > { %v9872_v25 = vmul.f32 %v14161_v60, %v9841_v30  ;;  %672 = vperm.xlu1 %8985, %v14173_v39   ;;  %v1128_v55 = vadd.f32 %v1072_v32, %v992_v15  ;;  %v9878_v21 = vmul.f32 %v14169_v0, %v9834_v2  ;;  %v14190_v12 = vrot.slane %v9624_v24, 2  ;;  %v9890_v15 = vpop.permute.xlu0 %308  ;;  %v9892_v32 = vpop.permute.xlu1 %303 }
  0xe6   : > { %14188 = vst [vmem:[#allocation56_spill] sm:$0xff] %v9868_v19  ;;  %v9882_v41 = vadd.f32 %v2068_v51, %v1989_v28  ;;  %v1933_v36 = vrot.slane %v1883_v13, 1  ;;  %v9886_v38 = vmul.f32 %v14165_v5, %v9834_v2  ;;  %v14193_v9 = vrot.slane %v9640_v22, 2  ;;  %14194 = vst [vmem:[#allocation60_spill] sm:$0xff] %v9890_v15 }
  0xe7   : > { %14189 = vst [vmem:[#allocation57_spill] sm:$0xff] %v9878_v21  ;;  %v1266_v44 = vadd.f32 %v14190_v12, %v1129_v50  ;;  %14195 = vst [vmem:[#allocation61_spill] sm:$0xff] %v9892_v32  ;;  %v13776_v46 = vrot.slane %v9860_v34, 1  ;;  %v9897_v24 = vmul.f32 %v14153_v52, %v9841_v30  ;;  %v9901_v50 = vmul.f32 %v14162_v4, %v9841_v30 }
  0xe8   : > { %14191 = vst [vmem:[#allocation58_spill] sm:$0xff] %v9882_v41  ;;  %14192 = vst [vmem:[#allocation59_spill] sm:$0xff] %v9886_v38  ;;  %v2262_v39 = vadd.f32 %v14193_v9, %v2126_v23  ;;  %v14197_v28 = vrot.slane %v9728_v17, 2  ;;  %v14198_v51 = vrot.slane %v9765_v7, 2  ;;  %v1576_v12 = vmul.f32 %v9340_v53, %v9890_v15 }
  0xe9   : > { %14196 = vst [vmem:[#allocation62_spill] sm:$0xff] %v9901_v50  ;;  %8986 = vset.pattern.permute.xlu1 %v14117_v37  ;;  %v550_v6 = vmul.f32 %v14158_v54, %v9841_v30  ;;  %v402_v17 = vmul.f32 %v9326_v47, %v9890_v15  ;;  %v9928_v22 = vmul.f32 %v9332_v49, %v9890_v15  ;;  %v14200_v2 = vrot.slane %v9872_v25, 1 }
  0xea   : > { %v1402_v13 = vadd.f32 %v14197_v28, %v1266_v44  ;;  %v2398_v9 = vadd.f32 %v14198_v51, %v2262_v39  ;;  %v9920_v44 = vmul.f32 %v9329_v48, %v9890_v15  ;;  %v14199_v28 = vld [vmem:[#allocation8_spill] sm:$0xff]  ;;  %v1636_v51 = vmul.f32 %v14160_v35, %v9841_v30 }
  0xeb   : > { %536 = vperm.xlu1 %8986, %v14199_v28   ;;  %v9944_v38 = vsel %vm791_vm0, %v1933_v36, %v14200_v2  ;;  %v14201_v21 = vrot.slane %v9811_v14, 2  ;;  %v9950_v30 = vmul.f32 %v9373_v1, %v9890_v15  ;;  %v574_v23 = vadd.f32 %v550_v6, %v402_v17  ;;  %v14205_v2 = vld [vmem:[#allocation42_spill] sm:$0xff]  ;;  %v14207_v17 = vld [vmem:[#allocation9_spill] sm:$0xff] }
  0xec   : > { %v1538_v27 = vadd.f32 %v13768_v20, %v1402_v13  ;;  %v9932_v13 = vmul.f32 %v9370_v63, %v9890_v15  ;;  %v9937_v20 = vsel %vm791_vm0, %v937_v29, %v13776_v46  ;;  %v2572_v29 = vmul.f32 %v14147_v45, %v9890_v15  ;;  %v9954_v46 = vpop.permute.xlu1 %620 }
  0xed   : > { %v2534_v40 = vadd.f32 %v14201_v21, %v2398_v9  ;;  %14202 = vst [vmem:[#allocation8_spill] sm:$0xff] %v9954_v46  ;;  %v1265_v36 = vadd.f32 %v14205_v2, %v1128_v55  ;;  %v9964_v21 = vld [vmem:[%s9186_s9 + $0xd8] sm:$0xff]  ;;  %v1211_v9 = vrot.slane %v9928_v22, 2  ;;  %v1158_v14 = vmul.f32 %v9332_v49, %v9892_v32 }
  0xee   : > { %v1600_v19 = vadd.f32 %v1576_v12, %v1538_v27  ;;  %v14203_v12 = vld [vmem:[#allocation32_spill] sm:$0xff]  ;;  %14206 = vst [vmem:[#allocation42_spill] sm:$0xff] %v9964_v21  ;;  %v2155_v6 = vmul.f32 %v9373_v1, %v9892_v32  ;;  %2562 = vperm.xlu0 %8995, %v9964_v21   ;;  %v14208_v55 = vrot.slane %v9794_v43, 2  ;;  %v14209_v2 = vrot.slane %v9822_v10, 2 }
  0xef   : > { %v9959_v39 = vmul.f32 %v14203_v12, %v9890_v15  ;;  %8987 = vset.pattern.permute.xlu1 %v14112_v3  ;;  %v1401_v22 = vadd.f32 %v9783_v8, %v1265_v36  ;;  %v698_v33 = vmul.f32 %v9351_v56, %v9954_v46  ;;  %v2206_v7 = vrot.slane %v9950_v30, 2 }
  0xf0   : > { %383 = vperm.xlu1 %8987, %v14207_v17   ;;  %v1660_v27 = vadd.f32 %v1636_v51, %v1600_v19  ;;  %v1481_v15 = vsel %vm1200_vm1, %v14209_v2, %v14208_v55  ;;  %v9983_v11 = vadd.f32 %v2572_v29, %v2534_v40  ;;  %v401_v41 = vmul.f32 %v9326_v47, %v9892_v32 }
  0xf1   : > { %14204 = vst [vmem:[#allocation63_spill] sm:$0xff] %v9959_v39  ;;  %v749_v19 = vmul.f32 %v9329_v48, %v9892_v32  ;;  %v722_v10 = vadd.f32 %v698_v33, %v574_v23  ;;  %v9992_v8 = vmul.f32 %v9354_v57, %v9954_v46  ;;  %v1696_v51 = vmul.f32 %v9360_v59, %v9954_v46 }
  0xf2   : > { %14210 = vst [vmem:[#allocation9_spill] sm:$0xff] %v9983_v11  ;;  %v1210_v30 = vrot.slane %v1158_v14, 2  ;;  %v1537_v40 = vadd.f32 %v1481_v15, %v1401_v22  ;;  %v1747_v29 = vmul.f32 %v9370_v63, %v9892_v32  ;;  %v2205_v36 = vrot.slane %v2155_v6, 2  ;;  %8998 = vset.pattern.permute.xlu0 %v14117_v37  ;;  %v10012_v15 = vld [vmem:[%s9186_s9 + $0xd0] sm:$0xff]  ;;  %s217_s9 = scalar_lea.vmem [#allocation2], %s8228_s12 }
  0xf3   : > { %v14211_v55 = vrot.slane %v9920_v44, 1  ;;  %v10004_v23 = vmul.f32 %v9357_v58, %v9954_v46  ;;  %v1720_v2 = vadd.f32 %v1696_v51, %v1660_v27  ;;  %v10008_v14 = vmul.f32 %v9364_v61, %v9954_v46  ;;  %2618 = vperm.xlu0 %8998, %v10012_v15   ;;  %s8162_s13 = sshll.u32 %s217_s9, 4  ;;  %s13645_s13 = int_to_ptr.vmem [resolvable:$true] %s8162_s13 }
  0xf4   : > { %8989 = vset.pattern.permute.xlu1 %v14123_v18  ;;  %v573_v6 = vadd.f32 %v9856_v31, %v401_v41  ;;  %v801_v22 = vrot.slane %v749_v19, 1  ;;  %v1575_v43 = vmul.f32 %v9340_v53, %v9892_v32  ;;  %v14213_v27 = vrot.slane %v9860_v34, 1  ;;  %v10031_v41 = vpop.permute.xlu1 %616  ;;  %s9027_s25 = scalar_lea.vmem %s13645_s13, 64  ;;  %p9034_p0 = scmp.lt.s32.totalorder %s13645_s13, %s9032_s26 }
  0xf5   : > { %v859_v33 = vadd.f32 %v14211_v55, %v722_v10  ;;  %684 = vperm.xlu1 %8989, %v14199_v28   ;;  %v10019_v10 = vmul.f32 %v14147_v45, %v9892_v32  ;;  %v1074_v55 = vrot.slane %v9992_v8, 1  ;;  %v14214_v28 = vrot.slane %v9932_v13, 1  ;;  %p9028_p11 = scmp.ne.s32.totalorder %s13645_s13, %s9027_s25  ;;  %p9035_p1 = scmp.lt.s32.totalorder %s9033_s30, %s9027_s25 }
  0xf6   : > { %v10029_v31 = vmul.f32 %v9367_v62, %v9954_v46  ;;  %v10034_v19 = vsel %vm1200_vm1, %v1210_v30, %v1211_v9  ;;  %v1599_v32 = vadd.f32 %v1575_v43, %v1537_v40  ;;  %v10037_v11 = vsel %vm1200_vm1, %v2205_v36, %v2206_v7 }
  0xf7   : > { %14212 = vst [vmem:[#allocation64_spill] sm:$0xff] %v10019_v10  ;;  %v995_v51 = vadd.f32 %v14213_v27, %v859_v33  ;;  %v1856_v39 = vadd.f32 %v14214_v28, %v1720_v2  ;;  %v1797_v10 = vrot.slane %v1747_v29, 1  ;;  %14216 = vst [vmem:[#allocation66_spill] sm:$0xff] %v10037_v11  ;;  %v14217_v33 = vrot.slane %v9872_v25, 1  ;;  %v10043_v28 = vpop.permute.xlu0 %318  ;;  %9000 = vset.pattern.permute.xlu0 %v14112_v3  ;;  %p9029_p12 = pnand %p9028_p11, %p9169_p5  ;;  %p9036_p2 = por %p9035_p1, %p9034_p0 }
  0xf8   : > { %14215 = vst [vmem:[#allocation65_spill] sm:$0xff] %v10029_v31  ;;  %v2070_v27 = vrot.slane %v10008_v14, 1  ;;  %14218 = vst [vmem:[#allocation67_spill] sm:$0xff] %v10043_v28  ;;  %v10048_v30 = vmul.f32 %v9326_v47, %v10043_v28  ;;  %v10052_v43 = vmul.f32 %v9329_v48, %v10043_v28  ;;  %v10056_v40 = vmul.f32 %v9332_v49, %v10043_v28 }
  0xf9   : > { %v1131_v34 = vadd.f32 %v1074_v55, %v995_v51  ;;  %v1992_v2 = vadd.f32 %v14217_v33, %v1856_v39  ;;  %680 = vperm.xlu1 %8989, %v14207_v17   ;;  %v697_v25 = vmul.f32 %v9351_v56, %v10031_v41  ;;  %v1022_v36 = vmul.f32 %v9354_v57, %v10031_v41  ;;  %v10092_v17 = vpop.permute.xlu1 %313  ;;  %p9030_p13 = pneg %p9029_p12 }
  0xfa   : > { %v1578_v14 = vmul.f32 %v9340_v53, %v10043_v28  ;;  %v1659_v33 = vadd.f32 %v9864_v42, %v1599_v32  ;;  %v1695_v8 = vmul.f32 %v9360_v59, %v10031_v41  ;;  %v14219_v11 = vrot.slane %v9897_v24, 2 }
  0xfb   : > { %v2128_v39 = vadd.f32 %v2070_v27, %v1992_v2  ;;  %v1268_v29 = vadd.f32 %v1211_v9, %v1131_v34  ;;  %v721_v51 = vadd.f32 %v697_v25, %v573_v6  ;;  %v10073_v2 = vmul.f32 %v9370_v63, %v10043_v28  ;;  %p9037_p3 = pnand %p9036_p2, %p9030_p13 }
  0xfc   : > { %v14220_v9 = vrot.slane %v9920_v44, 1  ;;  %v10081_v42 = vmul.f32 %v9373_v1, %v10043_v28  ;;  %v1719_v6 = vadd.f32 %v1695_v8, %v1659_v33  ;;  %v14222_v25 = vrot.slane %v9901_v50, 2 }
  0xfd   : > { %v1404_v46 = vadd.f32 %v14219_v11, %v1268_v29  ;;  %v2264_v21 = vadd.f32 %v2206_v7, %v2128_v39  ;;  %8991 = vset.pattern.permute.xlu1 %v14112_v3  ;;  %v2019_v11 = vmul.f32 %v9364_v61, %v10031_v41  ;;  %v14221_v7 = vld [vmem:[#allocation35_spill] sm:$0xff]  ;;  %v1073_v29 = vrot.slane %v1022_v36, 1 }
  0xfe   : > { %v803_v34 = vsel %vm791_vm0, %v801_v22, %v14220_v9  ;;  %1559 = vperm.xlu1 %8991, %v14221_v7   ;;  %v14223_v22 = vrot.slane %v9932_v13, 1  ;;  %14224 = vst [vmem:[#allocation35_spill] sm:$0xff] %v10092_v17  ;;  %v10096_v8 = vmul.f32 %v14203_v12, %v10043_v28  ;;  %v1431_v33 = vmul.f32 %v9357_v58, %v10031_v41 }
  0xff   : > { %v858_v32 = vadd.f32 %v803_v34, %v721_v51  ;;  %v2400_v39 = vadd.f32 %v14222_v25, %v2264_v21  ;;  %v14226_v21 = vrot.slane %v10004_v23, 2  ;;  %v2574_v13 = vmul.f32 %v14147_v45, %v10043_v28 }
 0x100   : > { %v1799_v9 = vsel %vm791_vm0, %v1797_v10, %v14223_v22  ;;  %14225 = vst [vmem:[#allocation68_spill] sm:$0xff] %v10096_v8  ;;  %v10108_v10 = vmul.f32 %v9367_v62, %v10031_v41  ;;  %v14228_v22 = vrot.slane %v10029_v31, 2  ;;  %v10140_v31 = vpop.permute.xlu1 %480  ;;  %v14241_v8 = vrot.slane %v9847_v16, 2 }
 0x101   : > { %v994_v51 = vadd.f32 %v9937_v20, %v858_v32  ;;  %v1855_v34 = vadd.f32 %v1799_v9, %v1719_v6  ;;  %v1540_v25 = vadd.f32 %v14226_v21, %v1404_v46  ;;  %v2069_v6 = vrot.slane %v2019_v11, 1  ;;  %v10114_v9 = vpop.permute.xlu0 %328  ;;  %14233 = vst [vmem:[#allocation72_spill] sm:$0xff] %v10140_v31 }
 0x102   : > { %14227 = vst [vmem:[#allocation69_spill] sm:$0xff] %v10108_v10  ;;  %v2536_v44 = vadd.f32 %v14228_v22, %v2400_v39  ;;  %14229 = vst [vmem:[#allocation70_spill] sm:$0xff] %v10114_v9  ;;  %8992 = vset.pattern.permute.xlu1 %v14117_v37  ;;  %v1075_v46 = vsel %vm791_vm0, %v1073_v29, %v1074_v55  ;;  %v10121_v36 = vmul.f32 %v9329_v48, %v10114_v9  ;;  %v14231_v22 = vld [vmem:[#allocation38_spill] sm:$0xff] }
 0x103   : > { %v1991_v21 = vadd.f32 %v9944_v38, %v1855_v34  ;;  %v10125_v39 = vmul.f32 %v9332_v49, %v10114_v9  ;;  %1624 = vperm.xlu1 %8992, %v14231_v22   ;;  %v1130_v20 = vadd.f32 %v1075_v46, %v994_v51  ;;  %v1482_v32 = vrot.slane %v1431_v33, 2 }
 0x104   : > { %v10131_v28 = vmul.f32 %v9326_v47, %v10114_v9  ;;  %v1602_v55 = vadd.f32 %v1578_v14, %v1540_v25  ;;  %v10136_v29 = vmul.f32 %v9370_v63, %v10114_v9  ;;  %v1160_v34 = vmul.f32 %v9332_v49, %v10092_v17 }
 0x105   : > { %14230 = vst [vmem:[#allocation71_spill] sm:$0xff] %v10125_v39  ;;  %v10142_v50 = vadd.f32 %v2574_v13, %v2536_v44  ;;  %v2071_v51 = vsel %vm791_vm0, %v2069_v6, %v2070_v27  ;;  %v10147_v33 = vmul.f32 %v9373_v1, %v10114_v9  ;;  %v2157_v14 = vmul.f32 %v9373_v1, %v10092_v17 }
 0x106   : > { %14232 = vst [vmem:[#allocation38_spill] sm:$0xff] %v10136_v29  ;;  %v10151_v25 = vadd.f32 %v2071_v51, %v1991_v21  ;;  %v10157_v38 = vmul.f32 %v9340_v53, %v10114_v9  ;;  %v10162_v27 = vmul.f32 %v14147_v45, %v10114_v9  ;;  %v10166_v44 = vmul.f32 %v14203_v12, %v10114_v9  ;;  %v10173_v21 = vpop.permute.xlu0 %476 }
 0x107   : > { %14234 = vst [vmem:[#allocation73_spill] sm:$0xff] %v10142_v50  ;;  %14235 = vst [vmem:[#allocation74_spill] sm:$0xff] %v10147_v33  ;;  %8994 = vset.pattern.permute.xlu1 %v14123_v18  ;;  %v10170_v13 = vmul.f32 %v9329_v48, %v10092_v17  ;;  %v1267_v6 = vadd.f32 %v10034_v19, %v1130_v20  ;;  %v1213_v11 = vrot.slane %v1160_v34, 2  ;;  %v14240_v9 = vrot.slane %v9897_v24, 2 }
 0x108   : > { %14236 = vst [vmem:[#allocation75_spill] sm:$0xff] %v10151_v25  ;;  %14237 = vst [vmem:[#allocation76_spill] sm:$0xff] %v10162_v27  ;;  %1684 = vperm.xlu1 %8994, %v14231_v22   ;;  %v10179_v46 = vmul.f32 %v9370_v63, %v10092_v17  ;;  %v1577_v19 = vmul.f32 %v9340_v53, %v10092_v17  ;;  %v2208_v20 = vrot.slane %v2157_v14, 2  ;;  %v14242_v51 = vrot.slane %v10004_v23, 2  ;;  %v14307_v63 = vld [vmem:[#allocation59_spill] sm:$0xff] }
 0x109   : > { %14238 = vst [vmem:[#allocation77_spill] sm:$0xff] %v10166_v44  ;;  %14239 = vst [vmem:[#allocation78_spill] sm:$0xff] %v10173_v21  ;;  %v1348_v27 = vsel %vm1200_vm1, %v14241_v8, %v14240_v9  ;;  %v403_v34 = vmul.f32 %v9326_v47, %v10092_v17  ;;  %v551_v24 = vmul.f32 %v14158_v54, %v10173_v21  ;;  %v10198_v8 = vpop.permute.xlu1 %628  ;;  %v804_v14 = vrot.slane %v10170_v13, 1 }
 0x10a   : > { %v1403_v22 = vadd.f32 %v1348_v27, %v1267_v6  ;;  %v1484_v10 = vsel %vm1200_vm1, %v1482_v32, %v14242_v51  ;;  %v888_v16 = vmul.f32 %v14152_v26, %v10173_v21  ;;  %14243 = vst [vmem:[#allocation79_spill] sm:$0xff] %v10198_v8  ;;  %v1297_v6 = vmul.f32 %v14153_v52, %v10173_v21 }
 0x10b   : > { %v14244_v23 = vrot.slane %v10056_v40, 2  ;;  %v10213_v50 = vmul.f32 %v14147_v45, %v10092_v17  ;;  %v552_v13 = vmul.f32 %v14158_v54, %v10140_v31  ;;  %v575_v9 = vadd.f32 %v551_v24, %v403_v34 }
 0x10c   : > { %v1539_v27 = vadd.f32 %v1484_v10, %v1403_v22  ;;  %1680 = vperm.xlu1 %8994, %v14221_v7   ;;  %v14247_v10 = vrot.slane %v10081_v42, 2  ;;  %v1885_v7 = vmul.f32 %v14161_v60, %v10173_v21  ;;  %v940_v51 = vrot.slane %v888_v16, 1 }
 0x10d   : > { %v10208_v32 = vsel %vm1200_vm1, %v1213_v11, %v14244_v23  ;;  %14246 = vst [vmem:[#allocation81_spill] sm:$0xff] %v10213_v50  ;;  %v10226_v11 = vmul.f32 %v14162_v4, %v10173_v21  ;;  %v1638_v23 = vmul.f32 %v14160_v35, %v10140_v31  ;;  %v1637_v44 = vmul.f32 %v14160_v35, %v10173_v21 }
 0x10e   : > { %14245 = vst [vmem:[#allocation80_spill] sm:$0xff] %v10208_v32  ;;  %v10220_v22 = vsel %vm1200_vm1, %v2208_v20, %v14247_v10  ;;  %v10234_v50 = vmul.f32 %v14165_v5, %v10173_v21  ;;  %v1601_v20 = vadd.f32 %v1577_v19, %v1539_v27  ;;  %v1349_v10 = vrot.slane %v1297_v6, 2  ;;  %v10246_v32 = vpop.permute.xlu1 %624 }
 0x10f   : > { %14248 = vst [vmem:[#allocation82_spill] sm:$0xff] %v10220_v22  ;;  %14249 = vst [vmem:[#allocation83_spill] sm:$0xff] %v10226_v11  ;;  %v889_v17 = vmul.f32 %v14152_v26, %v10140_v31  ;;  %v1662_v22 = vadd.f32 %v1638_v23, %v1602_v55  ;;  %v576_v25 = vadd.f32 %v552_v13, %v10048_v30  ;;  %v1936_v19 = vrot.slane %v1885_v7, 1 }
 0x110   : > { %14250 = vst [vmem:[#allocation84_spill] sm:$0xff] %v10234_v50  ;;  %8996 = vset.pattern.permute.xlu1 %v14112_v3  ;;  %v1298_v34 = vmul.f32 %v14153_v52, %v10140_v31  ;;  %v1886_v24 = vmul.f32 %v14161_v60, %v10140_v31  ;;  %v700_v16 = vmul.f32 %v9351_v56, %v10198_v8  ;;  %14251 = vst [vmem:[#allocation85_spill] sm:$0xff] %v10246_v32 }
 0x111   : > { %2557 = vperm.xlu1 %8996, %v10012_v15   ;;  %v10252_v27 = vmul.f32 %v14169_v0, %v10173_v21  ;;  %v1698_v30 = vmul.f32 %v9360_v59, %v10198_v8  ;;  %v10259_v13 = vmul.f32 %v14162_v4, %v10140_v31  ;;  %v1025_v33 = vmul.f32 %v9354_v57, %v10198_v8  ;;  %v14284_v31 = vld [vmem:[#allocation5_spill] sm:$0xff] }
 0x112   : > { %v724_v23 = vadd.f32 %v700_v16, %v576_v25  ;;  %v1661_v7 = vadd.f32 %v1637_v44, %v1601_v20  ;;  %v941_v45 = vrot.slane %v889_v17, 1  ;;  %v699_v21 = vmul.f32 %v9351_v56, %v10246_v32  ;;  %v14257_v20 = vld [vmem:[#allocation42_spill] sm:$0xff] }
 0x113   : > { %14252 = vst [vmem:[#allocation86_spill] sm:$0xff] %v10252_v27  ;;  %14253 = vst [vmem:[#allocation87_spill] sm:$0xff] %v10259_v13  ;;  %v1722_v55 = vadd.f32 %v1698_v30, %v1662_v22  ;;  %v1350_v27 = vrot.slane %v1298_v34, 2  ;;  %v1937_v11 = vrot.slane %v1886_v24, 1  ;;  %v14254_v39 = vrot.slane %v10052_v43, 1  ;;  %v14289_v13 = vld [vmem:[#allocation45_spill] sm:$0xff] }
 0x114   : > { %v10269_v6 = vmul.f32 %v9357_v58, %v10198_v8  ;;  %v14256_v25 = vrot.slane %v10073_v2, 1  ;;  %v2022_v17 = vmul.f32 %v9364_v61, %v10198_v8  ;;  %v723_v44 = vadd.f32 %v699_v21, %v575_v9 }
 0x115   : > { %v861_v1 = vadd.f32 %v14254_v39, %v724_v23  ;;  %8997 = vset.pattern.permute.xlu1 %v14117_v37  ;;  %v1024_v22 = vmul.f32 %v9354_v57, %v10246_v32  ;;  %v1077_v39 = vrot.slane %v1025_v33, 1  ;;  %v14258_v24 = vrot.slane %v10052_v43, 1 }
 0x116   : > { %14255 = vst [vmem:[#allocation88_spill] sm:$0xff] %v10269_v6  ;;  %v1858_v16 = vadd.f32 %v14256_v25, %v1722_v55  ;;  %2622 = vperm.xlu1 %8997, %v14257_v20   ;;  %v1697_v23 = vmul.f32 %v9360_v59, %v10246_v32  ;;  %v2021_v21 = vmul.f32 %v9364_v61, %v10246_v32  ;;  %v14308_v53 = vrot.slane %v14307_v63, 1  ;;  %v14309_v63 = vld [vmem:[#allocation40_spill] sm:$0xff] }
 0x117   : > { %v997_v34 = vadd.f32 %v941_v45, %v861_v1  ;;  %v806_v30 = vsel %vm791_vm0, %v804_v14, %v14258_v24  ;;  %v942_v9 = vsel %vm791_vm0, %v940_v51, %v941_v45  ;;  %v10290_v1 = vmul.f32 %v9367_v62, %v10198_v8  ;;  %v14280_v8 = vld [vmem:[#allocation7_spill] sm:$0xff] }
 0x118   : > { %v1994_v25 = vadd.f32 %v1937_v11, %v1858_v16  ;;  %v860_v37 = vadd.f32 %v806_v30, %v723_v44  ;;  %v1721_v43 = vadd.f32 %v1697_v23, %v1661_v7  ;;  %v10293_v33 = vsel %vm1200_vm1, %v1349_v10, %v1350_v27  ;;  %v10299_v44 = vpop.permute.xlu1 %488 }
 0x119   : > { %v1133_v50 = vadd.f32 %v1077_v39, %v997_v34  ;;  %14259 = vst [vmem:[#allocation42_spill] sm:$0xff] %v10290_v1  ;;  %14260 = vst [vmem:[#allocation89_spill] sm:$0xff] %v10293_v33  ;;  %v2073_v14 = vrot.slane %v2022_v17, 1  ;;  %v1076_v24 = vrot.slane %v1024_v22, 1  ;;  %v10297_v16 = vmul.f32 %v9357_v58, %v10246_v32  ;;  %v14305_v58 = vld [vmem:[#allocation47_spill] sm:$0xff] }
 0x11a   : > { %14262 = vst [vmem:[#allocation91_spill] sm:$0xff] %v10299_v44  ;;  %8999 = vset.pattern.permute.xlu1 %v14123_v18  ;;  %v1938_v45 = vsel %vm791_vm0, %v1936_v19, %v1937_v11  ;;  %v14263_v51 = vrot.slane %v10056_v40, 2  ;;  %v13811_v7 = vrot.slane %v10269_v6, 2  ;;  %v10308_v10 = vmul.f32 %v9367_v62, %v10246_v32  ;;  %v10316_v19 = vpop.permute.xlu0 %484 }
 0x11b   : > { %14261 = vst [vmem:[#allocation90_spill] sm:$0xff] %v10297_v16  ;;  %2682 = vperm.xlu1 %8999, %v14257_v20   ;;  %v2130_v17 = vadd.f32 %v2073_v14, %v1994_v25  ;;  %v996_v22 = vadd.f32 %v942_v9, %v860_v37  ;;  %v14265_v30 = vrot.slane %v10073_v2, 1  ;;  %v14266_v23 = vrot.slane %v10179_v46, 1  ;;  %14267 = vst [vmem:[#allocation93_spill] sm:$0xff] %v10316_v19  ;;  %v14274_v46 = vld [vmem:[#allocation50_spill] sm:$0xff] }
 0x11c   : > { %v1270_v34 = vadd.f32 %v14263_v51, %v1133_v50  ;;  %14264 = vst [vmem:[#allocation92_spill] sm:$0xff] %v10308_v10  ;;  %v2072_v11 = vrot.slane %v2021_v21, 1  ;;  %v10321_v51 = vmul.f32 %v14152_v26, %v10299_v44  ;;  %v10325_v20 = vmul.f32 %v14153_v52, %v10299_v44  ;;  %v14287_v10 = vld [vmem:[#allocation39_spill] sm:$0xff] }
 0x11d   : > { %v1802_v55 = vsel %vm791_vm0, %v14266_v23, %v14265_v30  ;;  %v1078_v2 = vsel %vm791_vm0, %v1076_v24, %v1077_v39  ;;  %v10331_v25 = vmul.f32 %v14161_v60, %v10299_v44  ;;  %v10340_v9 = vmul.f32 %v14162_v4, %v10299_v44 }
 0x11e   : > { %v1857_v40 = vadd.f32 %v1802_v55, %v1721_v43  ;;  %v1406_v37 = vadd.f32 %v1350_v27, %v1270_v34  ;;  %v10336_v55 = vmul.f32 %v14158_v54, %v10299_v44  ;;  %v10344_v27 = vmul.f32 %v14152_v26, %v10316_v19 }
 0x11f   : > { %2678 = vperm.xlu1 %8999, %v10012_v15   ;;  %v14268_v39 = vrot.slane %v10081_v42, 2  ;;  %v10351_v24 = vadd.f32 %v1078_v2, %v996_v22  ;;  %v10354_v34 = vsel %vm791_vm0, %v2072_v11, %v2073_v14  ;;  %v10358_v30 = vmul.f32 %v14153_v52, %v10316_v19  ;;  %v14273_v22 = vld [vmem:[#allocation48_spill] sm:$0xff]  ;;  %v14279_v2 = vld [vmem:[#allocation37_spill] sm:$0xff] }
 0x120   : > { %v10360_v23 = vadd.f32 %v1938_v45, %v1857_v40  ;;  %v10366_v15 = vmul.f32 %v14160_v35, %v10299_v44  ;;  %v10370_v42 = vadd.f32 %v13811_v7, %v1406_v37  ;;  %v14272_v45 = vld [vmem:[#allocation58_spill] sm:$0xff]  ;;  %v14275_v37 = vrot.slane %v14274_v46, 2  ;;  %v14278_v40 = vld [vmem:[#allocation52_spill] sm:$0xff]  ;;  %v14282_v44 = vld [vmem:[#allocation53_spill] sm:$0xff] }
 0x121   : > { %v10349_v43 = vadd.f32 %v14268_v39, %v2130_v17  ;;  %14270 = vst [vmem:[#allocation95_spill] sm:$0xff] %v10351_v24  ;;  %v10375_v17 = vmul.f32 %v14158_v54, %v10316_v19  ;;  %v2261_v11 = vadd.f32 %v14273_v22, %v14272_v45  ;;  %v10383_v39 = vmul.f32 %v14161_v60, %v10316_v19  ;;  %v14276_v7 = vld [vmem:[#allocation46_spill] sm:$0xff]  ;;  %v14293_v52 = vld [vmem:[#allocation44_spill] sm:$0xff] }
 0x122   : > { %v14277_v50 = vrot.slane %v14276_v7, 2  ;;  %v10394_v45 = vmul.f32 %v14162_v4, %v10316_v19  ;;  %v2593_v18 = vadd.f32 %v14279_v2, %v14278_v40  ;;  %v14281_v32 = vrot.slane %v14280_v8, 2  ;;  %v14291_v2 = vld [vmem:[#allocation9_spill] sm:$0xff]  ;;  %v14292_v4 = vld [vmem:[#allocation8_spill] sm:$0xff] }
 0x123   : > { %14269 = vst [vmem:[#allocation94_spill] sm:$0xff] %v10349_v43  ;;  %14271 = vst [vmem:[#allocation96_spill] sm:$0xff] %v10375_v17  ;;  %9001 = vset.pattern.permute.xlu1 %v14112_v3  ;;  %v14283_v46 = vrot.slane %v14282_v44, 2  ;;  %v14286_v3 = vld [vmem:[#allocation51_spill] sm:$0xff]  ;;  %v2690_v40 = vmul.f32 %v14287_v10, %v14289_v13  ;;  %v2691_v8 = vmul.f32 %v14287_v10, %v10031_v41  ;;  %v14290_v44 = vld [vmem:[#allocation6_spill] sm:$0xff] }
 0x124   : > { %v2340_v14 = vsel %vm1200_vm1, %v14277_v50, %v14275_v37  ;;  %v2630_v50 = vmul.f32 %v14169_v0, %v14284_v31  ;;  %v14285_v37 = vld [vmem:[#allocation55_spill] sm:$0xff]  ;;  %v2689_v1 = vmul.f32 %v14287_v10, %v14286_v3  ;;  %v2692_v60 = vmul.f32 %v14287_v10, %v14292_v4  ;;  %v14294_v54 = vld [vmem:[#allocation64_spill] sm:$0xff] }
 0x125   : > { %v2397_v22 = vadd.f32 %v2340_v14, %v2261_v11  ;;  %v2476_v7 = vsel %vm1200_vm1, %v14283_v46, %v14281_v32  ;;  %v2632_v21 = vmul.f32 %v14169_v0, %v14285_v37  ;;  %v14288_v14 = vld [vmem:[#allocation49_spill] sm:$0xff]  ;;  %v2741_v26 = vmul.f32 %v14203_v12, %v14293_v52 }
 0x126   : > { %v2653_v11 = vadd.f32 %v14288_v14, %v2593_v18  ;;  %v2654_v32 = vadd.f32 %v2630_v50, %v14290_v44  ;;  %v14295_v18 = vld [vmem:[#allocation61_spill] sm:$0xff]  ;;  %v2878_v16 = vmul.f32 %v14165_v5, %v14284_v31 }
 0x127   : > { %v2533_v43 = vadd.f32 %v2476_v7, %v2397_v22  ;;  %v2656_v46 = vadd.f32 %v2632_v21, %v14291_v2  ;;  %v2743_v14 = vmul.f32 %v14203_v12, %v14295_v18  ;;  %v2789_v50 = vrot.slane %v2741_v26, 1  ;;  %v14296_v44 = vld [vmem:[#allocation57_spill] sm:$0xff] }
 0x128   : > { %v2713_v7 = vadd.f32 %v2689_v1, %v2653_v11  ;;  %v2714_v6 = vadd.f32 %v2690_v40, %v2654_v32  ;;  %v2880_v21 = vmul.f32 %v14165_v5, %v14285_v37  ;;  %v2926_v17 = vrot.slane %v2878_v16, 1  ;;  %v14297_v1 = vld [vmem:[#allocation16_spill] sm:$0xff]  ;;  %v14302_v32 = vld [vmem:[#allocation63_spill] sm:$0xff] }
 0x129   : > { %v2595_v22 = vadd.f32 %v14294_v54, %v2533_v43  ;;  %v2716_v33 = vadd.f32 %v2692_v60, %v2656_v46  ;;  %v2792_v24 = vrot.slane %v2743_v14, 1  ;;  %v9023_v54 = vld [vmem:[%s13694_s1 + $0x1c] sm:$0x7]  ;;  %v14299_v11 = vld [vmem:[#allocation36_spill] sm:$0xff]  ;;  %v14303_v46 = vrot.slane %v14302_v32, 1 }
 0x12a   : > { %v10432_v43 = vrot.slane %v9023_v54, %v14297_v1  ;;  %v14300_v12 = vrot.slane %v14299_v11, 1  ;;  %v14306_v54 = vrot.slane %v14305_v58, 1 }
 0x12b   : > { %v2655_v2 = vadd.f32 %v14296_v44, %v2595_v22  ;;  %v2852_v10 = vadd.f32 %v14303_v46, %v2716_v33  ;;  %v2929_v22 = vrot.slane %v2880_v21, 1  ;;  %v14304_v16 = vmov %v14303_v46 }
 0x12c   : > { %14298 = vst [vmem:[#allocation58_spill] sm:$0xff] %v10432_v43  ;;  %v2791_v40 = vsel %vm791_vm0, %v2789_v50, %v14300_v12  ;;  %v14301_v26 = vmov %v14300_v12  ;;  %v2794_v44 = vsel %vm791_vm0, %v2792_v24, %v14304_v16  ;;  %v2927_v29 = vsel %vm791_vm0, %v14306_v54, %v2926_v17  ;;  %v14312_v54 = vld [vmem:[#allocation11_spill] sm:$0xff] }
 0x12d   : > { %v2850_v60 = vadd.f32 %v14301_v26, %v2714_v6  ;;  %v2715_v14 = vadd.f32 %v2691_v8, %v2655_v2  ;;  %v2849_v62 = vadd.f32 %v2791_v40, %v2713_v7  ;;  %v2930_v12 = vsel %vm791_vm0, %v14308_v53, %v2929_v22 }
 0x12e   : > { %v2988_v6 = vadd.f32 %v2929_v22, %v2852_v10  ;;  %v3013_v33 = vmul.f32 %v10432_v43, %v14286_v3  ;;  %v3014_v2 = vmul.f32 %v10432_v43, %v14289_v13  ;;  %v3015_v24 = vmul.f32 %v10432_v43, %v10031_v41 }
 0x12f   : > { %v2986_v50 = vadd.f32 %v2926_v17, %v2850_v60  ;;  %v2851_v21 = vadd.f32 %v2794_v44, %v2715_v14  ;;  %v2985_v8 = vadd.f32 %v2927_v29, %v2849_v62  ;;  %v3016_v58 = vmul.f32 %v10432_v43, %v14292_v4  ;;  %v14310_v17 = vld [vmem:[#allocation43_spill] sm:$0xff]  ;;  %v14311_v60 = vld [vmem:[#allocation60_spill] sm:$0xff] }
 0x130   : > { %v3061_v7 = vrot.slane %v3013_v33, 1  ;;  %v3149_v53 = vmul.f32 %v14309_v63, %v14293_v52  ;;  %v3150_v10 = vmul.f32 %v14309_v63, %v14310_v17  ;;  %v3062_v40 = vrot.slane %v3014_v2, 1  ;;  %v9024_v52 = vld [vmem:[%s13694_s1 + $0x20] sm:$0x7]  ;;  %v14314_v17 = vld [vmem:[#allocation41_spill] sm:$0xff] }
 0x131   : > { %v2987_v11 = vadd.f32 %v2930_v12, %v2851_v21  ;;  %v3064_v26 = vrot.slane %v3015_v24, 1  ;;  %v3151_v62 = vmul.f32 %v14309_v63, %v14295_v18  ;;  %v3065_v29 = vrot.slane %v3016_v58, 1 }
 0x132   : > { %v3152_v32 = vmul.f32 %v14309_v63, %v14311_v60  ;;  %v3197_v46 = vrot.slane %v3149_v53, 2  ;;  %v3198_v22 = vrot.slane %v3150_v10, 2  ;;  %v3063_v14 = vsel %vm791_vm0, %v3061_v7, %v3062_v40 }
 0x133   : > { %v3122_v16 = vadd.f32 %v3062_v40, %v2986_v50  ;;  %v3200_v44 = vrot.slane %v3151_v62, 2  ;;  %v10471_v12 = vrot.slane %v9024_v52, %v14312_v54  ;;  %v3066_v33 = vsel %vm791_vm0, %v3064_v26, %v3065_v29  ;;  %v14315_v40 = vld [vmem:[#allocation54_spill] sm:$0xff] }
 0x134   : > { %v3121_v18 = vadd.f32 %v3063_v14, %v2985_v8  ;;  %v3124_v21 = vadd.f32 %v3065_v29, %v2988_v6  ;;  %v3199_v2 = vsel %vm1200_vm1, %v3197_v46, %v3198_v22  ;;  %v3123_v24 = vadd.f32 %v3066_v33, %v2987_v11 }
 0x135   : > { %14313 = vst [vmem:[#allocation48_spill] sm:$0xff] %v10471_v12  ;;  %v3201_v58 = vrot.slane %v3152_v32, 2  ;;  %v3258_v53 = vadd.f32 %v3198_v22, %v3122_v16  ;;  %v3285_v50 = vmul.f32 %v10471_v12, %v14314_v17  ;;  %v3286_v10 = vmul.f32 %v10471_v12, %v14284_v31 }
 0x136   : > { %v3257_v7 = vadd.f32 %v3199_v2, %v3121_v18  ;;  %v3287_v62 = vmul.f32 %v10471_v12, %v14315_v40  ;;  %v3288_v26 = vmul.f32 %v10471_v12, %v14285_v37  ;;  %v10485_v11 = vrot.slane %v9024_v52, %v14297_v1 }
 0x137   : > { %v3202_v6 = vsel %vm1200_vm1, %v3200_v44, %v3201_v58  ;;  %v3260_v8 = vadd.f32 %v3201_v58, %v3124_v21  ;;  %v3333_v29 = vrot.slane %v3285_v50, 2  ;;  %v3334_v32 = vrot.slane %v3286_v10, 2 }
 0x138   : > { %14316 = vst [vmem:[#allocation50_spill] sm:$0xff] %v10485_v11  ;;  %v3259_v60 = vadd.f32 %v3202_v6, %v3123_v24  ;;  %v3336_v46 = vrot.slane %v3287_v62, 2  ;;  %v3337_v22 = vrot.slane %v3288_v26, 2  ;;  %v3421_v31 = vmul.f32 %v10485_v11, %v14286_v3  ;;  %v10497_v3 = vpop.permute.xlu1 %323 }
 0x139   : > { %v3422_v14 = vmul.f32 %v10485_v11, %v14289_v13  ;;  %v3423_v37 = vmul.f32 %v10485_v11, %v10031_v41  ;;  %v3424_v16 = vmul.f32 %v10485_v11, %v14292_v4  ;;  %v3335_v44 = vsel %vm1200_vm1, %v3333_v29, %v3334_v32  ;;  %14317 = vst [vmem:[#allocation46_spill] sm:$0xff] %v10497_v3  ;;  %v10502_v13 = vld [vmem:[%s13695_s2] ss:$0 sm:$0xff] }
 0x13a   : > { %v3338_v52 = vsel %vm1200_vm1, %v3336_v46, %v3337_v22  ;;  %v3394_v33 = vadd.f32 %v3334_v32, %v3258_v53  ;;  %v3396_v18 = vadd.f32 %v3337_v22, %v3260_v8  ;;  %v3393_v21 = vadd.f32 %v3335_v44, %v3257_v7  ;;  %14318 = vst [vmem:[#allocation52_spill] sm:$0xff] %v10502_v13  ;;  %v14348_v11 = vld [vmem:[#allocation28_spill] sm:$0xff] }
 0x13b   : > { %v3395_v2 = vadd.f32 %v3338_v52, %v3259_v60  ;;  %v3469_v24 = vrot.slane %v3421_v31, 2  ;;  %v3470_v58 = vrot.slane %v3422_v14, 2  ;;  %v3472_v41 = vrot.slane %v3423_v37, 2 }
 0x13c   : > { %v3473_v17 = vrot.slane %v3424_v16, 2  ;;  %v1939_v4 = vrot.slane %v10383_v39, 1  ;;  %v10507_v50 = vmul.f32 %v14165_v5, %v10316_v19  ;;  %v13847_v10 = vmov 0.0  }
 0x13d   : > { %v3471_v53 = vsel %vm1200_vm1, %v3469_v24, %v3470_v58  ;;  %v3530_v7 = vadd.f32 %v3470_v58, %v3394_v33  ;;  %8400 = vmatprep.mubr.msk.f32.mxu0 %vm9095_vm2, %v13847_v10  ;;  %v2347_v40 = vrot.slane %v10394_v45, 2  ;;  %8442 = vmatprep.mubr.msk.f32.mxu1 %vm9095_vm2, %v13847_v10  ;;  %v10518_v39 = vadd.f32 %v10354_v34, %v10360_v23  ;;  %v10552_v33 = vpop.permute.xlu1 %636 }
 0x13e   : > { %14319 = vst [vmem:[#allocation37_spill] sm:$0xff] %v10507_v50  ;;  %v3474_v62 = vsel %vm1200_vm1, %v3472_v41, %v3473_v17  ;;  %v3529_v26 = vadd.f32 %v3471_v53, %v3393_v21  ;;  %v3532_v6 = vadd.f32 %v3473_v17, %v3396_v18  ;;  %v10522_v8 = vmul.f32 %v14160_v35, %v10316_v19  ;;  %v14331_v53 = vld [vmem:[#allocation10_spill] sm:$0xff] }
 0x13f   : > { %14320 = vst [vmem:[#allocation7_spill] sm:$0xff] %v10518_v39  ;;  %v3531_v29 = vadd.f32 %v3474_v62, %v3395_v2  ;;  %v3560_v60 = vadd.f32 %v10502_v13, %v3530_v7  ;;  %v14321_v45 = vrot.slane %v10321_v51, 1  ;;  %v14322_v32 = vrot.slane %v10344_v27, 1  ;;  %14327 = vst [vmem:[#allocation5_spill] sm:$0xff] %v10552_v33  ;;  %v14356_v39 = vld [vmem:[#allocation74_spill] sm:$0xff] }
 0x140   : > { %v10534_v22 = vmul.f32 %v14169_v0, %v10316_v19  ;;  %v3559_v34 = vadd.f32 %v10502_v13, %v3529_v26  ;;  %v3562_v23 = vadd.f32 %v10502_v13, %v3532_v6  ;;  %v14324_v31 = vrot.slane %v10325_v20, 2 }
 0x141   : > { %v10530_v46 = vsel %vm791_vm0, %v14322_v32, %v14321_v45  ;;  %v14325_v14 = vrot.slane %v10358_v30, 2  ;;  %v14326_v27 = vrot.slane %v10331_v25, 1  ;;  %v3561_v52 = vadd.f32 %v10502_v13, %v3531_v29 }
 0x142   : > { %14323 = vst [vmem:[#allocation53_spill] sm:$0xff] %v10534_v22  ;;  %v14328_v18 = vrot.slane %v10340_v9, 2  ;;  %v3584_v30 = vmax.f32 %v3560_v60, 0.0  ;;  %v3586_v2 = vmax.f32 %v3562_v23, 0.0  ;;  %v14330_v24 = vlaneseq  ;;  %v10672_v22 = vpop.permute.xlu1 %632 }
 0x143   : > { %v10543_v37 = vsel %vm1200_vm1, %v14325_v14, %v14324_v31  ;;  %v10548_v16 = vsel %vm791_vm0, %v1939_v4, %v14326_v27  ;;  %v3583_v41 = vmax.f32 %v3559_v34, 0.0  ;;  %v3585_v17 = vmax.f32 %v3561_v52, 0.0  ;;  %14354 = vst [vmem:[#allocation64_spill] sm:$0xff] %v10672_v22 }
 0x144   : > { %v10557_v21 = vsel %vm1200_vm1, %v2347_v40, %v14328_v18  ;;  %v3622_v58 = vand.u32 127, %v14330_v24  ;;  %v10562_v4 = vmul.f32 %v9326_v47, %v10497_v3  ;;  %v3623_v7 = vmul.u32 2, %v14331_v53 }
 0x145   : > { %14329 = vst [vmem:[#allocation55_spill] sm:$0xff] %v10557_v21  ;;  %v3608_v62 = vadd.f32 %v3586_v2, %v3584_v30  ;;  %v578_v26 = vadd.f32 %v10336_v55, %v10131_v28  ;;  %v702_v40 = vmul.f32 %v9351_v56, %v10552_v33  ;;  %v10571_v6 = vmul.f32 %v9354_v57, %v10552_v33 }
 0x146   : > { %v3607_v29 = vadd.f32 %v3585_v17, %v3583_v41  ;;  %v10575_v60 = vmul.f32 %v9329_v48, %v10497_v3  ;;  %vm3624_vm3 = vcmp.eq.s32.totalorder %v3622_v58, %v3623_v7  ;;  %v3625_v45 = vadd.s32 1, %v3623_v7 }
 0x147   : > { %v3634_v32 = vsel %vm1200_vm1, %v3608_v62, 0  ;;  %v10580_v34 = vmul.f32 %v9332_v49, %v10497_v3  ;;  %v726_v28 = vadd.f32 %v702_v40, %v578_v26  ;;  %v1604_v55 = vadd.f32 %v10157_v38, %v10370_v42  ;;  %v14335_v26 = vld [vmem:[#allocation23_spill] sm:$0xff] }
 0x148   : > { %v3637_v23 = vand.u32 4294901760, %v3607_v29  ;;  %v3640_v31 = vand.u32 4294901760, %v3634_v32  ;;  %vm3626_vm4 = vcmp.eq.s32.totalorder %v3622_v58, %v3625_v45  ;;  %v14332_v14 = vrot.slane %v10121_v36, 1 }
 0x149   : > { %vm3627_vm6 = vmor %vm3624_vm3, %vm3626_vm4  ;;  %v13846_v52 = vrot.slane %v10571_v6, 1  ;;  %v1664_v18 = vadd.f32 %v10366_v15, %v1604_v55  ;;  %v1700_v30 = vmul.f32 %v9360_v59, %v10552_v33  ;;  %v14334_v41 = vrot.slane %v10321_v51, 1  ;;  %v14337_v51 = vld [vmem:[#allocation29_spill] sm:$0xff]  ;;  %v14338_v55 = vld [vmem:[#allocation38_spill] sm:$0xff] }
 0x14a   : > { %v863_v27 = vadd.f32 %v14332_v14, %v726_v28  ;;  %v10590_v2 = vpack.c.bf16 %v3640_v31, %v3637_v23  ;;  %v10592_v24 = vsub.f32 %v3607_v29, %v3637_v23  ;;  %v10594_v38 = vsub.f32 %v3634_v32, %v3640_v31 }
 0x14b   : > { %v10597_v42 = vsel %vm3627_vm6, 0.25, %v13847_v10  ;;  %v1724_v7 = vadd.f32 %v1700_v30, %v1664_v18  ;;  %v10605_v15 = vmul.f32 %v9364_v61, %v10552_v33  ;;  %v807_v62 = vrot.slane %v10575_v60, 1 }
 0x14c   : > { %14333 = vst [vmem:[#allocation51_spill] sm:$0xff] %v10597_v42  ;;  %v3631_v58 = vsel %vm3629_vm5, %v10597_v42, 0  ;;  %v999_v17 = vadd.f32 %v14334_v41, %v863_v27  ;;  %8710 = vmatpush3.bf16.msra.mxu0 %v10590_v2  ;;  %v10611_v40 = vmul.f32 %v14335_v26, %v10497_v3  ;;  %v13854_v45 = vand.u32 4294901760, %v10592_v24  ;;  %v14341_v27 = vld [vmem:[#allocation30_spill] sm:$0xff] }
 0x14d   : > { %v10613_v29 = vsub.f32 %v3631_v58, %v3631_v58  ;;  %v10618_v32 = vmul.f32 %v14337_v51, %v10497_v3  ;;  %v14339_v23 = vrot.slane %v14338_v55, 1  ;;  %v14340_v14 = vmov 0.0|0.0   ;;  %v14343_v58 = vld [vmem:[#allocation26_spill] sm:$0xff] }
 0x14e   : > { %v1135_v28 = vadd.f32 %v13846_v52, %v999_v17  ;;  %8711 = vmatprep.subr.bf16.mxu0 %v14340_v14  ;;  %v10628_v18 = vmul.f32 %v14341_v27, %v10497_v3  ;;  %v10635_v41 = vmul.f32 %v14343_v58, %v10552_v33  ;;  %v3717_v17 = vsub.f32 %v10592_v24, %v13854_v45 }
 0x14f   : > { %14336 = vst [vmem:[#allocation49_spill] sm:$0xff] %v10613_v29  ;;  %v1860_v31 = vadd.f32 %v14339_v23, %v1724_v7  ;;  %v10631_v30 = vand.u32 4294901760, %v10613_v29  ;;  %v14344_v7 = vld [vmem:[#allocation71_spill] sm:$0xff]  ;;  %v14346_v52 = vrot.slane %v10331_v25, 1  ;;  %v13861_v60 = vrot.slane %v10605_v15, 1 }
 0x150   : > { %v14345_v23 = vrot.slane %v14344_v7, 2  ;;  %v14347_v1 = vand.u32 4294901760, %v10594_v38  ;;  %v10653_v45 = vmul.f32 %v14348_v11, %v10552_v33  ;;  %v3718_v19 = vand.u32 4294901760, %v3717_v17  ;;  %v14350_v25 = vld [vmem:[#allocation31_spill] sm:$0xff] }
 0x151   : > { %14342 = vst [vmem:[#allocation45_spill] sm:$0xff] %v10631_v30  ;;  %v1996_v10 = vadd.f32 %v14346_v52, %v1860_v31  ;;  %v3706_v13 = vsub.f32 %v10613_v29, %v10631_v30  ;;  %v10659_v52 = vmul.f32 %v14350_v25, %v10497_v3  ;;  %v1803_v54 = vrot.slane %v10618_v32, 1  ;;  %v14358_v32 = vld [vmem:[#allocation39_spill] sm:$0xff]  ;;  %v14373_v30 = vld [vmem:[#allocation90_spill] sm:$0xff] }
 0x152   : > { %v1272_v44 = vadd.f32 %v14345_v23, %v1135_v28  ;;  %v3724_v53 = vsub.f32 %v10594_v38, %v14347_v1  ;;  %v10655_v28 = vpop.permute.xlu0 %338  ;;  %v10686_v12 = vmul.f32 %v14358_v32, %v10552_v33  ;;  %v14363_v17 = vrot.slane %v10340_v9, 2  ;;  %v14364_v33 = vld [vmem:[#allocation95_spill] sm:$0xff] }
 0x153   : > { %14349 = vst [vmem:[#allocation6_spill] sm:$0xff] %v10655_v28  ;;  %14351 = vst [vmem:[#allocation9_spill] sm:$0xff] %v10659_v52  ;;  %v2132_v31 = vadd.f32 %v13861_v60, %v1996_v10  ;;  %v10665_v23 = vmul.f32 %v9329_v48, %v10655_v28  ;;  %v10669_v50 = vand.u32 4294901760, %v3706_v13  ;;  %v14355_v52 = vrot.slane %v10325_v20, 2 }
 0x154   : > { %v3725_v1 = vand.u32 4294901760, %v3724_v53  ;;  %v14357_v10 = vrot.slane %v14356_v39, 2  ;;  %v10680_v43 = vmul.f32 %v9332_v49, %v10655_v28  ;;  %14359 = vst [vmem:[#allocation61_spill] sm:$0xff] %v10686_v12  ;;  %v10690_v20 = vmul.f32 %v9326_v47, %v10655_v28  ;;  %v14365_v12 = vld [vmem:[#allocation80_spill] sm:$0xff] }
 0x155   : > { %14352 = vst [vmem:[#allocation8_spill] sm:$0xff] %v10665_v23  ;;  %14353 = vst [vmem:[#allocation44_spill] sm:$0xff] %v10669_v50  ;;  %v1408_v3 = vadd.f32 %v14355_v52, %v1272_v44  ;;  %8401 = vmatmul.mubr.f32.vlgmr.msra.gmra.mrb[0].mxu0 %v10669_v50  ;;  %v1582_v44 = vmul.f32 %v14335_v26, %v10655_v28  ;;  %v10697_v52 = vmul.f32 %v14337_v51, %v10655_v28 }
 0x156   : > { %v2268_v53 = vadd.f32 %v14357_v10, %v2132_v31  ;;  %v8712_v60 = vpack.c.bf16 %v3725_v1, %v3718_v19  ;;  %14360 = vst [vmem:[#allocation57_spill] sm:$0xff] %v10690_v20  ;;  %v14361_v31 = vmov 0.0   ;;  %v14362_v1 = vld [vmem:[#allocation96_spill] sm:$0xff]  ;;  %v701_v13 = vmul.f32 %v9351_v56, %v10672_v22 }
 0x157   : > { %8407 = vmatprep.mubr.msk.f32.mxu0 %vm9095_vm2, %v14361_v31  ;;  %v577_v10 = vadd.f32 %v14362_v1, %v10562_v4  ;;  %v1026_v19 = vmul.f32 %v9354_v57, %v10672_v22  ;;  %v1269_v23 = vadd.f32 %v14365_v12, %v14364_v33  ;;  %v14366_v4 = vrot.slane %v10635_v41, 2  ;;  %v14370_v12 = vld [vmem:[#allocation89_spill] sm:$0xff] }
 0x158   : > { %8713 = vmatpush3.bf16.msra.mxu0 %v8712_v60  ;;  %v2404_v50 = vadd.f32 %v14363_v17, %v2268_v53  ;;  %v10709_v60 = vmul.f32 %v14341_v27, %v10655_v28  ;;  %v2578_v9 = vmul.f32 %v14350_v25, %v10655_v28  ;;  %v14367_v53 = vld [vmem:[#allocation32_spill] sm:$0xff]  ;;  %v14369_v57 = vrot.slane %v10121_v36, 1 }
 0x159   : > { %8714 = vmatprep.subr.bf16.mxu0 %v14340_v14  ;;  %v1544_v1 = vadd.f32 %v14366_v4, %v1408_v3  ;;  %v725_v17 = vadd.f32 %v701_v13, %v577_v10  ;;  %v10723_v20 = vmul.f32 %v14367_v53, %v10655_v28  ;;  %v1405_v33 = vadd.f32 %v14370_v12, %v1269_v23  ;;  %v14371_v4 = vld [vmem:[#allocation88_spill] sm:$0xff] }
 0x15a   : > { %v809_v0 = vsel %vm791_vm0, %v807_v62, %v14369_v57  ;;  %v2023_v5 = vmul.f32 %v9364_v61, %v10672_v22  ;;  %v14372_v56 = vrot.slane %v14371_v4, 2  ;;  %v14374_v35 = vrot.slane %v14373_v30, 2  ;;  %v334_v4 = vpop.permute.xlu1 %333 }
 0x15b   : > { %14368 = vst [vmem:[#allocation36_spill] sm:$0xff] %v10723_v20  ;;  %v862_v10 = vadd.f32 %v809_v0, %v725_v17  ;;  %v1079_v28 = vrot.slane %v1026_v19, 1  ;;  %v14375_v21 = vrot.slane %v10653_v45, 2  ;;  %v1435_v62 = vmul.f32 %v14343_v58, %v10672_v22  ;;  %v14404_v20 = vld [vmem:[#allocation19_spill] sm:$0xff] }
 0x15c   : > { %v1487_v13 = vsel %vm1200_vm1, %v14374_v35, %v14372_v56  ;;  %v10742_v12 = vadd.f32 %v1582_v44, %v1544_v1  ;;  %v2431_v30 = vmul.f32 %v14348_v11, %v10672_v22  ;;  %v8715_v56 = vpack.c.bf16 %v10594_v38, %v10592_v24 }
 0x15d   : > { %v2540_v36 = vadd.f32 %v14375_v21, %v2404_v50  ;;  %v1541_v23 = vadd.f32 %v1487_v13, %v1405_v33  ;;  %v998_v3 = vadd.f32 %v10530_v46, %v862_v10  ;;  %v1699_v0 = vmul.f32 %v9360_v59, %v10672_v22  ;;  %8408 = vmatmul.mubr.msk.f32.vlgmr.msra.gmra.mrb[0].mxu0 %vm3629_vm5, %v10597_v42  ;;  %v10757_v46 = vpop.permute.xlu0 %348 }
 0x15e   : > { %v14376_v50 = vrot.slane %v14338_v55, 1  ;;  %v2075_v19 = vrot.slane %v2023_v5, 1  ;;  %14377 = vst [vmem:[#allocation63_spill] sm:$0xff] %v10757_v46  ;;  %v14378_v1 = vrot.slane %v10571_v6, 1  ;;  %8716 = vmatpush3.bf16.msra.mxu0 %v8715_v56  ;;  %8414 = vmatprep.mubr.msk.f32.mxu0 %vm9095_vm2, %v14361_v31  ;;  %v1488_v33 = vrot.slane %v1435_v62, 2 }
 0x15f   : > { %v1603_v35 = vadd.f32 %v10611_v40, %v1541_v23  ;;  %v10765_v40 = vmul.f32 %v9329_v48, %v10757_v46  ;;  %v10773_v5 = vadd.f32 %v2578_v9, %v2540_v36  ;;  %8717 = vmatprep.subr.bf16.mxu0 %v14340_v14  ;;  %v10779_v13 = vmul.f32 %v14358_v32, %v10672_v22 }
 0x160   : > { %v1805_v21 = vsel %vm791_vm0, %v1803_v54, %v14376_v50  ;;  %v1081_v17 = vsel %vm791_vm0, %v1079_v28, %v14378_v1  ;;  %v10769_v54 = vmul.f32 %v9332_v49, %v10757_v46  ;;  %v2483_v28 = vrot.slane %v2431_v30, 2 }
 0x161   : > { %14379 = vst [vmem:[#allocation47_spill] sm:$0xff] %v10765_v40  ;;  %v1134_v55 = vadd.f32 %v1081_v17, %v998_v3  ;;  %v1663_v6 = vadd.f32 %v10522_v8, %v1603_v35  ;;  %14381 = vst [vmem:[#allocation43_spill] sm:$0xff] %v10779_v13  ;;  %v10783_v10 = vmul.f32 %v14337_v51, %v10757_v46  ;;  %v14384_v36 = vrot.slane %v10605_v15, 1  ;;  %v14409_v40 = vld [vmem:[#allocation34_spill] sm:$0xff] }
 0x162   : > { %14380 = vst [vmem:[#allocation59_spill] sm:$0xff] %v10769_v54  ;;  %v10787_v9 = vmul.f32 %v14341_v27, %v10757_v46  ;;  %v10794_v62 = vmul.f32 %v9326_v47, %v10757_v46  ;;  %v10798_v23 = vmul.f32 %v14335_v26, %v10757_v46  ;;  %v1164_v35 = vmul.f32 %v9332_v49, %v334_v4  ;;  %v14413_v49 = vld [vmem:[#allocation24_spill] sm:$0xff] }
 0x163   : > { %14382 = vst [vmem:[#allocation60_spill] sm:$0xff] %v10783_v10  ;;  %v1723_v3 = vadd.f32 %v1699_v0, %v1663_v6  ;;  %v2077_v8 = vsel %vm791_vm0, %v2075_v19, %v14384_v36  ;;  %v14385_v0 = vrot.slane %v14344_v7, 2  ;;  %v14386_v15 = vrot.slane %v10580_v34, 2 }
 0x164   : > { %14383 = vst [vmem:[#allocation41_spill] sm:$0xff] %v10787_v9  ;;  %v10810_v1 = vmul.f32 %v14367_v53, %v10757_v46  ;;  %v2161_v6 = vmul.f32 %v14341_v27, %v334_v4  ;;  %v10817_v30 = vmul.f32 %v14350_v25, %v10757_v46  ;;  %v10820_v34 = vmul.f32 %v9329_v48, %v334_v4  ;;  %v14403_v46 = vld [vmem:[#allocation14_spill] sm:$0xff]  ;;  %v14412_v48 = vld [vmem:[#allocation57_spill] sm:$0xff] }
 0x165   : > { %v1218_v50 = vsel %vm1200_vm1, %v14386_v15, %v14385_v0  ;;  %v1859_v19 = vadd.f32 %v1805_v21, %v1723_v3  ;;  %v14388_v21 = vrot.slane %v10635_v41, 2  ;;  %v10828_v0 = vmul.f32 %v14337_v51, %v334_v4  ;;  %8415 = vmatmul.mubr.f32.vlgmr.msra.gmra.mrb[0].mxu0 %v10613_v29  ;;  %v14405_v29 = vld [vmem:[#allocation17_spill] sm:$0xff]  ;;  %v14408_v9 = vld [vmem:[#allocation18_spill] sm:$0xff] }
 0x166   : > { %14387 = vst [vmem:[#allocation54_spill] sm:$0xff] %v10810_v1  ;;  %v1271_v17 = vadd.f32 %v1218_v50, %v1134_v55  ;;  %v14389_v15 = vrot.slane %v10653_v45, 2  ;;  %v1219_v44 = vrot.slane %v1164_v35, 2  ;;  %v2214_v36 = vrot.slane %v2161_v6, 2  ;;  %8719 = vmatpush3.bf16.msra.mxu0 %v10590_v2  ;;  %8421 = vmatprep.mubr.msk.f32.mxu0 %vm9095_vm2, %v14361_v31 }
 0x167   : > { %v1995_v7 = vadd.f32 %v10548_v16, %v1859_v19  ;;  %v1490_v3 = vsel %vm1200_vm1, %v1488_v33, %v14388_v21  ;;  %v10835_v56 = vmul.f32 %v14367_v53, %v334_v4  ;;  %v10837_v16 = vpop.permute.xlu0 %492  ;;  %v407_v33 = vmul.f32 %v9326_v47, %v334_v4  ;;  %8720 = vmatprep.subr.bf16.mxu0 %v14340_v14 }
 0x168   : > { %v1407_v55 = vadd.f32 %v10543_v37, %v1271_v17  ;;  %v2485_v50 = vsel %vm1200_vm1, %v2483_v28, %v14389_v15  ;;  %14391 = vst [vmem:[#allocation71_spill] sm:$0xff] %v10837_v16  ;;  %v10842_v17 = vpop.permute.xlu1 %496  ;;  %v1581_v28 = vmul.f32 %v14335_v26, %v334_v4  ;;  %v14393_v35 = vrot.slane %v14356_v39, 2  ;;  %v14396_v15 = vld [vmem:[#allocation15_spill] sm:$0xff] }
 0x169   : > { %14390 = vst [vmem:[#allocation38_spill] sm:$0xff] %v10835_v56  ;;  %v2131_v41 = vadd.f32 %v2077_v8, %v1995_v7  ;;  %14392 = vst [vmem:[#allocation74_spill] sm:$0xff] %v10842_v17  ;;  %v14394_v8 = vrot.slane %v10628_v18, 2  ;;  %v10855_v7 = vmul.f32 %v14309_v63, %v334_v4  ;;  %v555_v37 = vmul.f32 %v14396_v15, %v10837_v16 }
 0x16a   : > { %v1543_v19 = vadd.f32 %v1490_v3, %v1407_v55  ;;  %v2577_v55 = vmul.f32 %v14350_v25, %v334_v4  ;;  %v14397_v45 = vrot.slane %v10680_v43, 2  ;;  %v14399_v39 = vrot.slane %v10709_v60, 2  ;;  %v14402_v4 = vld [vmem:[#allocation55_spill] sm:$0xff] }
 0x16b   : > { %v2213_v6 = vsel %vm1200_vm1, %v14394_v8, %v14393_v35  ;;  %14395 = vst [vmem:[#allocation96_spill] sm:$0xff] %v10855_v7  ;;  %v14401_v8 = vld [vmem:[#allocation12_spill] sm:$0xff]  ;;  %v1301_v1 = vmul.f32 %v14403_v46, %v10837_v16  ;;  %v10886_v35 = vmul.f32 %v14403_v46, %v10842_v17  ;;  %v2297_v10 = vmul.f32 %v14408_v9, %v10837_v16 }
 0x16c   : > { %v2267_v3 = vadd.f32 %v2213_v6, %v2131_v41  ;;  %v10864_v57 = vsel %vm1200_vm1, %v1219_v44, %v14397_v45  ;;  %v10869_v18 = vsel %vm1200_vm1, %v2214_v36, %v14399_v39  ;;  %v892_v41 = vmul.f32 %v14401_v8, %v10837_v16  ;;  %v10892_v56 = vpop.permute.xlu1 %644  ;;  %v14407_v45 = vld [vmem:[#allocation45_spill] sm:$0xff] }
 0x16d   : > { %14398 = vst [vmem:[#allocation95_spill] sm:$0xff] %v10864_v57  ;;  %14400 = vst [vmem:[#allocation80_spill] sm:$0xff] %v10869_v18  ;;  %v1605_v6 = vadd.f32 %v1581_v28, %v1543_v19  ;;  %v1641_v44 = vmul.f32 %v14404_v20, %v10837_v16  ;;  %v1889_v36 = vmul.f32 %v14405_v29, %v10837_v16  ;;  %8422 = vmatmul.mubr.f32.vlgmr.msra.gmra.mrb[0].mxu0 %v14407_v45 }
 0x16e   : > { %v2403_v21 = vadd.f32 %v14402_v4, %v2267_v3  ;;  %v893_v39 = vmul.f32 %v14401_v8, %v10842_v17  ;;  %v579_v28 = vadd.f32 %v555_v37, %v407_v33  ;;  %v556_v3 = vmul.f32 %v14396_v15, %v10842_v17  ;;  %14406 = vst [vmem:[#allocation89_spill] sm:$0xff] %v10892_v56 }
 0x16f   : > { %v1890_v4 = vmul.f32 %v14405_v29, %v10842_v17  ;;  %v946_v7 = vrot.slane %v892_v41, 1  ;;  %v10899_v25 = vmul.f32 %v14409_v40, %v10837_v16  ;;  %8428 = vmatprep.mubr.msk.f32.mxu0 %vm9095_vm2, %v14361_v31  ;;  %v1355_v37 = vrot.slane %v1301_v1, 2 }
 0x170   : > { %v2539_v19 = vadd.f32 %v2485_v50, %v2403_v21  ;;  %v1642_v50 = vmul.f32 %v14404_v20, %v10842_v17  ;;  %v1665_v33 = vadd.f32 %v1641_v44, %v1605_v6  ;;  %v14411_v21 = vld [vmem:[#allocation33_spill] sm:$0xff]  ;;  %v947_v45 = vrot.slane %v893_v39, 1 }
 0x171   : > { %14410 = vst [vmem:[#allocation88_spill] sm:$0xff] %v10899_v25  ;;  %v2637_v27 = vmul.f32 %v14411_v21, %v10837_v16  ;;  %v1942_v41 = vrot.slane %v1889_v36, 1  ;;  %v1356_v54 = vrot.slane %v10886_v35, 2  ;;  %v2298_v26 = vmul.f32 %v14408_v9, %v10842_v17  ;;  %v14415_v39 = vld [vmem:[#allocation25_spill] sm:$0xff] }
 0x172   : > { %v1666_v51 = vadd.f32 %v1642_v50, %v10742_v12  ;;  %v2601_v18 = vadd.f32 %v2577_v55, %v2539_v19  ;;  %v580_v47 = vadd.f32 %v556_v3, %v14412_v48  ;;  %v1943_v57 = vrot.slane %v1890_v4, 1 }
 0x173   : > { %v704_v1 = vmul.f32 %v14413_v49, %v10892_v56  ;;  %v2350_v6 = vrot.slane %v2297_v10, 2  ;;  %v10917_v36 = vmul.f32 %v14409_v40, %v10842_v17  ;;  %v1702_v12 = vmul.f32 %v9360_v59, %v10892_v56  ;;  %v10928_v10 = vpop.permute.xlu1 %640 }
 0x174   : > { %v948_v35 = vsel %vm791_vm0, %v946_v7, %v947_v45  ;;  %v2638_v55 = vmul.f32 %v14411_v21, %v10842_v17  ;;  %v10926_v19 = vmul.f32 %v14415_v39, %v10892_v56  ;;  %14416 = vst [vmem:[#allocation55_spill] sm:$0xff] %v10928_v10  ;;  %v10931_v3 = vsel %vm1200_vm1, %v1355_v37, %v1356_v54 }
 0x175   : > { %14414 = vst [vmem:[#allocation90_spill] sm:$0xff] %v10917_v36  ;;  %v728_v48 = vadd.f32 %v704_v1, %v580_v47  ;;  %v2351_v4 = vrot.slane %v2298_v26, 2  ;;  %v1726_v50 = vadd.f32 %v1702_v12, %v1666_v51  ;;  %v2026_v44 = vmul.f32 %v9364_v61, %v10892_v56  ;;  %v14417_v47 = vld [vmem:[#allocation8_spill] sm:$0xff] }
 0x176   : > { %v2661_v16 = vadd.f32 %v2637_v27, %v2601_v18  ;;  %v1944_v7 = vsel %vm791_vm0, %v1942_v41, %v1943_v57  ;;  %v2662_v17 = vadd.f32 %v2638_v55, %v10773_v5  ;;  %v14418_v1 = vrot.slane %v14417_v47, 1 }
 0x177   : > { %v14419_v22 = vrot.slane %v10697_v52, 1  ;;  %v14420_v37 = vand.u32 4294901760, %v10592_v24  ;;  %v14421_v26 = vand.u32 4294901760, %v10594_v38  ;;  %v703_v27 = vmul.f32 %v14413_v49, %v10928_v10 }
 0x178   : > { %v865_v25 = vadd.f32 %v14418_v1, %v728_v48  ;;  %v1083_v41 = vrot.slane %v10926_v19, 1  ;;  %v10951_v5 = vmul.f32 %v14343_v58, %v10892_v56  ;;  %v1701_v12 = vmul.f32 %v9360_v59, %v10928_v10 }
 0x179   : > { %v1862_v13 = vadd.f32 %v14419_v22, %v1726_v50  ;;  %v8721_v51 = vpack.c.bf16 %v14421_v26, %v14420_v37  ;;  %v2079_v22 = vrot.slane %v2026_v44, 1  ;;  %v10957_v24 = vmul.f32 %v14348_v11, %v10892_v56 }
 0x17a   : > { %v1001_v18 = vadd.f32 %v947_v45, %v865_v25  ;;  %v727_v38 = vadd.f32 %v703_v27, %v579_v28  ;;  %v1028_v25 = vmul.f32 %v14415_v39, %v10928_v10  ;;  %v1725_v45 = vadd.f32 %v1701_v12, %v1665_v33 }
 0x17b   : > { %v1998_v55 = vadd.f32 %v1943_v57, %v1862_v13  ;;  %8722 = vmatpush3.bf16.msra.mxu0 %v8721_v51  ;;  %v2025_v19 = vmul.f32 %v9364_v61, %v10928_v10  ;;  %v2698_v57 = vmul.f32 %v14358_v32, %v10892_v56  ;;  %v14422_v13 = vmov %v14418_v1 }
 0x17c   : > { %v1137_v48 = vadd.f32 %v1083_v41, %v1001_v18  ;;  %8723 = vmatprep.subr.bf16.mxu0 %v14340_v14  ;;  %v14423_v44 = vrot.slane %v10820_v34, 1  ;;  %v14424_v1 = vrot.slane %v10697_v52, 1  ;;  %v14425_v37 = vrot.slane %v10828_v0, 1 }
 0x17d   : > { %v2134_v50 = vadd.f32 %v2079_v22, %v1998_v55  ;;  %v14426_v26 = vrot.slane %v10680_v43, 2  ;;  %v10980_v18 = vmul.f32 %v14343_v58, %v10928_v10  ;;  %v10985_v34 = vsel %vm1200_vm1, %v2350_v6, %v2351_v4  ;;  %v14428_v43 = vld [vmem:[#allocation58_spill] sm:$0xff] }
 0x17e   : > { %v812_v28 = vsel %vm791_vm0, %v14423_v44, %v14422_v13  ;;  %v1808_v33 = vsel %vm791_vm0, %v14425_v37, %v14424_v1  ;;  %8429 = vmatmul.mubr.msk.f32.vlgmr.msra.gmra.mrb[0].mxu0 %vm3629_vm5, %v10597_v42  ;;  %v13914_v52 = vrot.slane %v10951_v5, 2  ;;  %v14427_v0 = vrot.slane %v10709_v60, 2  ;;  %v10998_v13 = vpop.permute.xlu1 %504 }
 0x17f   : > { %v1274_v51 = vadd.f32 %v14426_v26, %v1137_v48  ;;  %v864_v27 = vadd.f32 %v812_v28, %v727_v38  ;;  %v1861_v12 = vadd.f32 %v1808_v33, %v1725_v45  ;;  %v10992_v55 = vmul.f32 %v14428_v43, %v10892_v56  ;;  %8725 = vmatpush3.bf16.msra.mxu0 %v10590_v2  ;;  %v14441_v26 = vld [vmem:[#allocation62_spill] sm:$0xff]  ;;  %v14452_v56 = vld [vmem:[#allocation65_spill] sm:$0xff] }
 0x180   : > { %v2270_v47 = vadd.f32 %v14427_v0, %v2134_v50  ;;  %8435 = vmatprep.mubr.msk.f32.mxu0 %vm9095_vm2, %v14361_v31  ;;  %v13913_v48 = vrot.slane %v10957_v24, 2  ;;  %v1082_v45 = vrot.slane %v1028_v25, 1  ;;  %v2078_v6 = vrot.slane %v2025_v19, 1  ;;  %14430 = vst [vmem:[#allocation8_spill] sm:$0xff] %v10998_v13  ;;  %8744 = vmatprep.subr.bf16.mxu0 %v14340_v14  ;;  %v14443_v25 = vld [vmem:[#allocation56_spill] sm:$0xff] }
 0x181   : > { %14429 = vst [vmem:[#allocation57_spill] sm:$0xff] %v10992_v55  ;;  %v1410_v38 = vadd.f32 %v1356_v54, %v1274_v51  ;;  %v11001_v50 = vadd.f32 %v2698_v57, %v2662_v17  ;;  %v11005_v44 = vmul.f32 %v14348_v11, %v10928_v10  ;;  %v2697_v2 = vmul.f32 %v14358_v32, %v10928_v10 }
 0x182   : > { %v2406_v60 = vadd.f32 %v2351_v4, %v2270_v47  ;;  %v1000_v28 = vadd.f32 %v948_v35, %v864_v27  ;;  %v1997_v19 = vadd.f32 %v1944_v7, %v1861_v12  ;;  %v11016_v17 = vmul.f32 %v14428_v43, %v10928_v10 }
 0x183   : > { %14431 = vst [vmem:[#allocation97_spill] sm:$0xff] %v11001_v50  ;;  %v1546_v54 = vadd.f32 %v13914_v52, %v1410_v38  ;;  %v558_v4 = vmul.f32 %v14396_v15, %v10998_v13  ;;  %v11022_v57 = vmul.f32 %v14401_v8, %v10998_v13  ;;  %v1084_v37 = vsel %vm791_vm0, %v1082_v45, %v1083_v41 }
 0x184   : > { %v2542_v1 = vadd.f32 %v13913_v48, %v2406_v60  ;;  %14432 = vst [vmem:[#allocation98_spill] sm:$0xff] %v11016_v17  ;;  %v2080_v35 = vsel %vm791_vm0, %v2078_v6, %v2079_v22  ;;  %v11028_v7 = vmul.f32 %v14403_v46, %v10998_v13  ;;  %v11032_v51 = vadd.f32 %v2697_v2, %v2661_v16  ;;  %v11060_v6 = vpop.permute.xlu0 %500 }
 0x185   : > { %v1608_v33 = vadd.f32 %v10798_v23, %v1546_v54  ;;  %v11036_v27 = vmul.f32 %v14405_v29, %v10998_v13  ;;  %v11040_v12 = vmul.f32 %v14408_v9, %v10998_v13  ;;  %v11042_v41 = vadd.f32 %v1084_v37, %v1000_v28  ;;  %14435 = vst [vmem:[#allocation101_spill] sm:$0xff] %v11060_v6  ;;  %v14438_v37 = vld [vmem:[#allocation7_spill] sm:$0xff] }
 0x186   : > { %14433 = vst [vmem:[#allocation99_spill] sm:$0xff] %v11032_v51  ;;  %v1644_v22 = vmul.f32 %v14404_v20, %v10998_v13  ;;  %v2604_v0 = vadd.f32 %v10817_v30, %v2542_v1  ;;  %v11049_v23 = vmul.f32 %v14409_v40, %v10998_v13  ;;  %8436 = vmatmul.mubr.msk.f32.vlgmr.msra.gmra.mrb[0].mxu0 %vm3629_vm5, %v10597_v42  ;;  %v14437_v1 = vld [vmem:[#allocation66_spill] sm:$0xff]  ;;  %v14442_v48 = vrot.slane %v14441_v26, 2  ;;  %v14465_v51 = vld [vmem:[#allocation79_spill] sm:$0xff]  ;;  %v14472_v42 = vld [vmem:[#allocation53_spill] sm:$0xff] }
 0x187   : > { %v11053_v16 = vadd.f32 %v2080_v35, %v1997_v19  ;;  %v11057_v38 = vadd.f32 %v558_v4, %v10794_v62  ;;  %8484 = vmatprep.mubr.msk.f32.mxu0 %vm9095_vm2, %v14361_v31  ;;  %v2640_v2 = vmul.f32 %v14411_v21, %v10998_v13  ;;  %v11071_v54 = vmul.f32 %v14396_v15, %v11060_v6  ;;  %v14436_v19 = vld [vmem:[#allocation75_spill] sm:$0xff]  ;;  %v14439_v35 = vld [vmem:[#allocation82_spill] sm:$0xff]  ;;  %v14454_v13 = vld [vmem:[#allocation69_spill] sm:$0xff] }
 0x188   : > { %14434 = vst [vmem:[#allocation100_spill] sm:$0xff] %v11049_v23  ;;  %v11065_v60 = vadd.f32 %v1644_v22, %v1608_v33  ;;  %v2263_v4 = vadd.f32 %v14437_v1, %v14436_v19  ;;  %v2265_v47 = vadd.f32 %v14439_v35, %v14438_v37  ;;  %v11084_v22 = vmul.f32 %v14401_v8, %v11060_v6  ;;  %v14448_v37 = vld [vmem:[#allocation83_spill] sm:$0xff]  ;;  %v14450_v26 = vld [vmem:[#allocation94_spill] sm:$0xff]  ;;  %v14460_v23 = vld [vmem:[#allocation72_spill] sm:$0xff] }
 0x189   : > { %v11079_v63 = vadd.f32 %v2640_v2, %v2604_v0  ;;  %v14444_v52 = vrot.slane %v14443_v25, 2  ;;  %v11093_v19 = vmul.f32 %v14403_v46, %v11060_v6  ;;  %v11097_v0 = vmul.f32 %v14404_v20, %v11060_v6  ;;  %v14446_v2 = vld [vmem:[#allocation87_spill] sm:$0xff]  ;;  %v14468_v20 = vld [vmem:[#allocation81_spill] sm:$0xff]  ;;  %v14471_v8 = vld [vmem:[#allocation86_spill] sm:$0xff] }
 0x18a   : > { %v14447_v1 = vrot.slane %v14446_v2, 2  ;;  %v14449_v35 = vrot.slane %v14448_v37, 2  ;;  %v11106_v25 = vmul.f32 %v14405_v29, %v11060_v6  ;;  %v14453_v10 = vrot.slane %v14452_v56, 2 }
 0x18b   : > { %14440 = vst [vmem:[#allocation75_spill] sm:$0xff] %v11079_v63  ;;  %v2343_v28 = vsel %vm1200_vm1, %v14444_v52, %v14442_v48  ;;  %14445 = vst [vmem:[#allocation66_spill] sm:$0xff] %v11097_v0  ;;  %v11110_v52 = vmul.f32 %v14408_v9, %v11060_v6  ;;  %v14455_v37 = vrot.slane %v14454_v13, 2  ;;  %v2634_v36 = vmul.f32 %v14411_v21, %v14460_v23  ;;  %v14463_v13 = vld [vmem:[#allocation85_spill] sm:$0xff]  ;;  %v14467_v9 = vld [vmem:[#allocation46_spill] sm:$0xff] }
 0x18c   : > { %v2346_v33 = vsel %vm1200_vm1, %v14449_v35, %v14447_v1  ;;  %v2399_v62 = vadd.f32 %v2343_v28, %v2263_v4  ;;  %v14451_v30 = vmov %v14447_v1  ;;  %v14456_v28 = vld [vmem:[#allocation42_spill] sm:$0xff]  ;;  %v14458_v35 = vld [vmem:[#allocation92_spill] sm:$0xff]  ;;  %v2747_v29 = vmul.f32 %v14367_v53, %v14467_v9 }
 0x18d   : > { %v2401_v48 = vadd.f32 %v2346_v33, %v2265_v47  ;;  %v2402_v45 = vadd.f32 %v14451_v30, %v14450_v26  ;;  %v2479_v1 = vsel %vm1200_vm1, %v14455_v37, %v14453_v10  ;;  %v14457_v4 = vrot.slane %v14456_v28, 2  ;;  %v14461_v47 = vld [vmem:[#allocation91_spill] sm:$0xff]  ;;  %v14464_v37 = vld [vmem:[#allocation73_spill] sm:$0xff] }
 0x18e   : > { %v14459_v17 = vrot.slane %v14458_v35, 2  ;;  %v2636_v33 = vmul.f32 %v14411_v21, %v14461_v47  ;;  %v2535_v2 = vadd.f32 %v2479_v1, %v2399_v62  ;;  %v2693_v10 = vmul.f32 %v14358_v32, %v14463_v13  ;;  %v14470_v1 = vld [vmem:[#allocation76_spill] sm:$0xff] }
 0x18f   : > { %v14462_v56 = vmov %v14457_v4  ;;  %v2658_v50 = vadd.f32 %v2634_v36, %v14464_v37  ;;  %v2694_v35 = vmul.f32 %v14358_v32, %v14465_v51  ;;  %v2882_v28 = vmul.f32 %v14409_v40, %v14460_v23  ;;  %v14478_v32 = vld [vmem:[#allocation43_spill] sm:$0xff] }
 0x190   : > { %v2482_v55 = vsel %vm1200_vm1, %v14459_v17, %v14457_v4  ;;  %v2538_v26 = vadd.f32 %v14462_v56, %v2402_v45  ;;  %v14466_v17 = vld [vmem:[#allocation35_spill] sm:$0xff]  ;;  %v2597_v62 = vadd.f32 %v14468_v20, %v2535_v2  ;;  %v2798_v37 = vrot.slane %v2747_v29, 1  ;;  %v14473_v20 = vld [vmem:[#allocation68_spill] sm:$0xff] }
 0x191   : > { %v2537_v30 = vadd.f32 %v2482_v55, %v2401_v48  ;;  %v2745_v4 = vmul.f32 %v14367_v53, %v14466_v17  ;;  %v14469_v55 = vld [vmem:[#allocation9_spill] sm:$0xff]  ;;  %v2718_v56 = vadd.f32 %v2694_v35, %v2658_v50  ;;  %v2884_v46 = vmul.f32 %v14409_v40, %v14461_v47 }
 0x192   : > { %v2600_v45 = vadd.f32 %v14470_v1, %v2538_v26  ;;  %v2657_v15 = vadd.f32 %v14471_v8, %v2597_v62  ;;  %v2932_v31 = vrot.slane %v2882_v28, 1  ;;  %v14474_v2 = vrot.slane %v14473_v20, 1  ;;  %v14475_v26 = vld [vmem:[#allocation77_spill] sm:$0xff] }
 0x193   : > { %v2599_v48 = vadd.f32 %v14469_v55, %v2537_v30  ;;  %v2795_v36 = vrot.slane %v2745_v4, 1  ;;  %v14476_v55 = vrot.slane %v14475_v26, 1  ;;  %v2935_v35 = vrot.slane %v2884_v46, 1  ;;  %v14479_v8 = vld [vmem:[#allocation61_spill] sm:$0xff] }
 0x194   : > { %v2660_v63 = vadd.f32 %v2636_v33, %v2600_v45  ;;  %v14477_v50 = vmov %v14474_v2  ;;  %v2717_v4 = vadd.f32 %v2693_v10, %v2657_v15  ;;  %v14482_v45 = vld [vmem:[#allocation37_spill] sm:$0xff]  ;;  %v3018_v46 = vmul.f32 %v14428_v43, %v14465_v51 }
 0x195   : > { %v2659_v0 = vadd.f32 %v14472_v42, %v2599_v48  ;;  %v2797_v30 = vsel %vm791_vm0, %v2795_v36, %v14474_v2  ;;  %v2800_v1 = vsel %vm791_vm0, %v2798_v37, %v14476_v55  ;;  %v2854_v29 = vadd.f32 %v14477_v50, %v2718_v56  ;;  %v14480_v42 = vld [vmem:[#allocation84_spill] sm:$0xff]  ;;  %v14486_v20 = vld [vmem:[#allocation5_spill] sm:$0xff] }
 0x196   : > { %v2720_v62 = vadd.f32 %v14479_v8, %v2660_v63  ;;  %v14481_v33 = vrot.slane %v14480_v42, 1  ;;  %v14483_v28 = vrot.slane %v14482_v45, 1  ;;  %v3017_v37 = vmul.f32 %v14428_v43, %v14463_v13 }
 0x197   : > { %v2719_v11 = vadd.f32 %v14478_v32, %v2659_v0  ;;  %v2990_v2 = vadd.f32 %v2932_v31, %v2854_v29  ;;  %v2853_v15 = vadd.f32 %v2797_v30, %v2717_v4  ;;  %v14484_v32 = vmov %v14476_v55  ;;  %v14485_v0 = vld [vmem:[#allocation64_spill] sm:$0xff] }
 0x198   : > { %v2933_v48 = vsel %vm791_vm0, %v14481_v33, %v2932_v31  ;;  %v2936_v36 = vsel %vm791_vm0, %v14483_v28, %v2935_v35  ;;  %v2856_v63 = vadd.f32 %v14484_v32, %v2720_v62  ;;  %v3019_v56 = vmul.f32 %v14428_v43, %v14485_v0  ;;  %v14487_v31 = vld [vmem:[#allocation40_spill] sm:$0xff] }
 0x199   : > { %v2855_v10 = vadd.f32 %v2800_v1, %v2719_v11  ;;  %v3020_v55 = vmul.f32 %v14428_v43, %v14486_v20  ;;  %v3067_v50 = vrot.slane %v3017_v37, 1  ;;  %v3068_v8 = vrot.slane %v3018_v46, 1  ;;  %v14488_v1 = vld [vmem:[#allocation67_spill] sm:$0xff]  ;;  %v14489_v37 = vld [vmem:[#allocation70_spill] sm:$0xff] }
 0x19a   : > { %v3153_v29 = vmul.f32 %v14487_v31, %v14466_v17  ;;  %v2989_v42 = vadd.f32 %v2933_v48, %v2853_v15  ;;  %v2992_v45 = vadd.f32 %v2935_v35, %v2856_v63  ;;  %v3070_v28 = vrot.slane %v3019_v56, 1  ;;  %v14491_v15 = vld [vmem:[#allocation48_spill] sm:$0xff] }
 0x19b   : > { %v2991_v33 = vadd.f32 %v2936_v36, %v2855_v10  ;;  %v3069_v11 = vsel %vm791_vm0, %v3067_v50, %v3068_v8  ;;  %v3071_v30 = vrot.slane %v3020_v55, 1  ;;  %v3126_v26 = vadd.f32 %v3068_v8, %v2990_v2  ;;  %v14490_v36 = vld [vmem:[#allocation78_spill] sm:$0xff]  ;;  %v14492_v8 = vld [vmem:[#allocation93_spill] sm:$0xff] }
 0x19c   : > { %v3154_v4 = vmul.f32 %v14487_v31, %v14488_v1  ;;  %v3125_v62 = vadd.f32 %v3069_v11, %v2989_v42  ;;  %v3155_v32 = vmul.f32 %v14487_v31, %v14467_v9  ;;  %v3156_v46 = vmul.f32 %v14487_v31, %v14489_v37 }
 0x19d   : > { %v3203_v43 = vrot.slane %v3153_v29, 2  ;;  %v3072_v17 = vsel %vm791_vm0, %v3070_v28, %v3071_v30  ;;  %v3128_v48 = vadd.f32 %v3071_v30, %v2992_v45  ;;  %v3289_v10 = vmul.f32 %v14491_v15, %v14490_v36 }
 0x19e   : > { %v3204_v35 = vrot.slane %v3154_v4, 2  ;;  %v3127_v63 = vadd.f32 %v3072_v17, %v2991_v33  ;;  %v3206_v2 = vrot.slane %v3155_v32, 2  ;;  %v3207_v56 = vrot.slane %v3156_v46, 2 }
 0x19f   : > { %v3290_v55 = vmul.f32 %v14491_v15, %v14460_v23  ;;  %v3291_v42 = vmul.f32 %v14491_v15, %v14492_v8  ;;  %v3292_v29 = vmul.f32 %v14491_v15, %v14461_v47  ;;  %v3339_v30 = vrot.slane %v3289_v10, 2  ;;  %v14493_v23 = vld [vmem:[#allocation50_spill] sm:$0xff] }
 0x1a0   : > { %v3205_v50 = vsel %vm1200_vm1, %v3203_v43, %v3204_v35  ;;  %v3262_v9 = vadd.f32 %v3204_v35, %v3126_v26  ;;  %v3208_v45 = vsel %vm1200_vm1, %v3206_v2, %v3207_v56  ;;  %v3264_v11 = vadd.f32 %v3207_v56, %v3128_v48  ;;  %v344_v56 = vpop.permute.xlu1 %343 }
 0x1a1   : > { %v3261_v28 = vadd.f32 %v3205_v50, %v3125_v62  ;;  %v3263_v33 = vadd.f32 %v3208_v45, %v3127_v63  ;;  %v3340_v1 = vrot.slane %v3290_v55, 2  ;;  %v3342_v4 = vrot.slane %v3291_v42, 2 }
 0x1a2   : > { %v3343_v32 = vrot.slane %v3292_v29, 2  ;;  %v3425_v37 = vmul.f32 %v14493_v23, %v14463_v13  ;;  %v3426_v43 = vmul.f32 %v14493_v23, %v14465_v51  ;;  %v3427_v26 = vmul.f32 %v14493_v23, %v14485_v0 }
 0x1a3   : > { %v3428_v47 = vmul.f32 %v14493_v23, %v14486_v20  ;;  %v3341_v62 = vsel %vm1200_vm1, %v3339_v30, %v3340_v1  ;;  %v3398_v17 = vadd.f32 %v3340_v1, %v3262_v9  ;;  %v949_v13 = vrot.slane %v11084_v22, 1 }
 0x1a4   : > { %v3344_v46 = vsel %vm1200_vm1, %v3342_v4, %v3343_v32  ;;  %v3400_v48 = vadd.f32 %v3343_v32, %v3264_v11  ;;  %v3397_v35 = vadd.f32 %v3341_v62, %v3261_v28  ;;  %v3475_v10 = vrot.slane %v3425_v37, 2  ;;  %v14495_v11 = vld [vmem:[#allocation52_spill] sm:$0xff]  ;;  %v14498_v37 = vld [vmem:[#allocation95_spill] sm:$0xff] }
 0x1a5   : > { %v3399_v36 = vadd.f32 %v3344_v46, %v3263_v33  ;;  %v3476_v63 = vrot.slane %v3426_v43, 2  ;;  %v11208_v51 = vmul.f32 %v14411_v21, %v11060_v6  ;;  %v3478_v0 = vrot.slane %v3427_v26, 2  ;;  %v14496_v33 = vld [vmem:[#allocation22_spill] sm:$0xff]  ;;  %v14500_v62 = vld [vmem:[#allocation20_spill] sm:$0xff] }
 0x1a6   : > { %v3479_v2 = vrot.slane %v3428_v47, 2  ;;  %v1358_v20 = vrot.slane %v11093_v19, 2  ;;  %v11213_v55 = vmul.f32 %v14409_v40, %v11060_v6  ;;  %v1945_v8 = vrot.slane %v11106_v25, 1 }
 0x1a7   : > { %v3477_v50 = vsel %vm1200_vm1, %v3475_v10, %v3476_v63  ;;  %v3534_v9 = vadd.f32 %v3476_v63, %v3398_v17  ;;  %v2353_v45 = vrot.slane %v11110_v52, 2  ;;  %v1166_v19 = vmul.f32 %v14496_v33, %v344_v56  ;;  %v14501_v17 = vld [vmem:[#allocation21_spill] sm:$0xff] }
 0x1a8   : > { %14494 = vst [vmem:[#allocation7_spill] sm:$0xff] %v11213_v55  ;;  %v3480_v22 = vsel %vm1200_vm1, %v3478_v0, %v3479_v2  ;;  %v3533_v42 = vadd.f32 %v3477_v50, %v3397_v35  ;;  %v3536_v29 = vadd.f32 %v3479_v2, %v3400_v48  ;;  %v14497_v1 = vrot.slane %v11022_v57, 1  ;;  %v14532_v55 = vld [vmem:[#allocation58_spill] sm:$0xff] }
 0x1a9   : > { %v3535_v28 = vadd.f32 %v3480_v22, %v3399_v36  ;;  %v3564_v30 = vadd.f32 %v14495_v11, %v3534_v9  ;;  %v1273_v43 = vadd.f32 %v14498_v37, %v11042_v41  ;;  %v14499_v26 = vrot.slane %v11028_v7, 2  ;;  %v11251_v9 = vpop.permute.xlu1 %652  ;;  %v14510_v37 = vld [vmem:[#allocation23_spill] sm:$0xff] }
 0x1aa   : > { %v11224_v4 = vsel %vm791_vm0, %v949_v13, %v14497_v1  ;;  %v3563_v32 = vadd.f32 %v14495_v11, %v3533_v42  ;;  %v3566_v25 = vadd.f32 %v14495_v11, %v3536_v29  ;;  %v409_v46 = vmul.f32 %v14500_v62, %v344_v56  ;;  %14504 = vst [vmem:[#allocation82_spill] sm:$0xff] %v11251_v9 }
 0x1ab   : > { %v11233_v52 = vsel %vm1200_vm1, %v1358_v20, %v14499_v26  ;;  %v3565_v47 = vadd.f32 %v14495_v11, %v3535_v28  ;;  %v11238_v48 = vmul.f32 %v14501_v17, %v344_v56  ;;  %v14502_v35 = vrot.slane %v11036_v27, 1 }
 0x1ac   : > { %v3588_v41 = vmax.f32 %v3564_v30, 0.0  ;;  %v3590_v63 = vmax.f32 %v3566_v25, 0.0  ;;  %v14503_v13 = vrot.slane %v11040_v12, 2  ;;  %v3587_v2 = vmax.f32 %v3563_v32, 0.0  ;;  %v14521_v32 = vld [vmem:[#allocation44_spill] sm:$0xff] }
 0x1ad   : > { %v11243_v36 = vsel %vm791_vm0, %v1945_v8, %v14502_v35  ;;  %v3589_v20 = vmax.f32 %v3565_v47, 0.0  ;;  %v1222_v50 = vrot.slane %v1166_v19, 2  ;;  %v14505_v42 = vrot.slane %v10951_v5, 2  ;;  %v14509_v5 = vld [vmem:[#allocation80_spill] sm:$0xff]  ;;  %v14512_v35 = vld [vmem:[#allocation59_spill] sm:$0xff]  ;;  %v11354_v10 = vpop.permute.xlu1 %648 }
 0x1ae   : > { %v11249_v0 = vsel %vm1200_vm1, %v2353_v45, %v14503_v13  ;;  %v3610_v22 = vadd.f32 %v3590_v63, %v3588_v41  ;;  %v14506_v8 = vrot.slane %v10980_v18, 2  ;;  %v14507_v28 = vrot.slane %v10957_v24, 2  ;;  %v14511_v24 = vld [vmem:[#allocation29_spill] sm:$0xff]  ;;  %v14514_v41 = vld [vmem:[#allocation30_spill] sm:$0xff]  ;;  %14531 = vst [vmem:[#allocation83_spill] sm:$0xff] %v11354_v10 }
 0x1af   : > { %v14508_v11 = vrot.slane %v11005_v44, 2  ;;  %v1409_v45 = vadd.f32 %v10931_v3, %v1273_v43  ;;  %v3609_v1 = vadd.f32 %v3589_v20, %v3587_v2  ;;  %v11265_v19 = vadd.f32 %v11071_v54, %v409_v46 }
 0x1b0   : > { %v1493_v29 = vsel %vm1200_vm1, %v14506_v8, %v14505_v42  ;;  %v2269_v25 = vadd.f32 %v14509_v5, %v11053_v16  ;;  %v4096_v18 = vsel %vm1200_vm1, %v3610_v22, 0  ;;  %v1583_v26 = vmul.f32 %v14510_v37, %v344_v56 }
 0x1b1   : > { %v2488_v30 = vsel %vm1200_vm1, %v14508_v11, %v14507_v28  ;;  %v11273_v47 = vmul.f32 %v14511_v24, %v344_v56  ;;  %v706_v44 = vmul.f32 %v14413_v49, %v11251_v9  ;;  %v4099_v3 = vand.u32 4294901760, %v3609_v1 }
 0x1b2   : > { %v4102_v43 = vand.u32 4294901760, %v4096_v18  ;;  %v14513_v54 = vrot.slane %v14512_v35, 2  ;;  %v2163_v63 = vmul.f32 %v14514_v41, %v344_v56  ;;  %v1545_v16 = vadd.f32 %v1493_v29, %v1409_v45  ;;  %v14516_v29 = vld [vmem:[#allocation31_spill] sm:$0xff] }
 0x1b3   : > { %v11284_v13 = vmul.f32 %v14367_v53, %v344_v56  ;;  %v730_v2 = vadd.f32 %v706_v44, %v11057_v38  ;;  %v11289_v20 = vmul.f32 %v14415_v39, %v11251_v9  ;;  %v11293_v42 = vsub.f32 %v3609_v1, %v4099_v3  ;;  %v14517_v45 = vld [vmem:[#allocation47_spill] sm:$0xff] }
 0x1b4   : > { %v11280_v46 = vsel %vm1200_vm1, %v1222_v50, %v14513_v54  ;;  %v11291_v22 = vpack.c.bf16 %v4102_v43, %v4099_v3  ;;  %v11295_v8 = vsub.f32 %v4096_v18, %v4102_v43  ;;  %v2405_v50 = vadd.f32 %v10985_v34, %v2269_v25 }
 0x1b5   : > { %14515 = vst [vmem:[#allocation62_spill] sm:$0xff] %v11284_v13  ;;  %v2579_v11 = vmul.f32 %v14516_v29, %v344_v56  ;;  %v14518_v5 = vrot.slane %v14517_v45, 1  ;;  %v1704_v38 = vmul.f32 %v9360_v59, %v11251_v9  ;;  %v2217_v44 = vrot.slane %v2163_v63, 2 }
 0x1b6   : > { %8728 = vmatpush3.bf16.msra.mxu1 %v11291_v22  ;;  %v11306_v1 = vmul.f32 %v14487_v31, %v344_v56  ;;  %v13935_v18 = vrot.slane %v11289_v20, 1  ;;  %v11311_v34 = vmul.f32 %v9364_v61, %v11251_v9  ;;  %v14520_v25 = vrot.slane %v11022_v57, 1 }
 0x1b7   : > { %v867_v54 = vadd.f32 %v14518_v5, %v730_v2  ;;  %v1728_v43 = vadd.f32 %v1704_v38, %v11065_v60  ;;  %8729 = vmatprep.subr.bf16.mxu1 %v14340_v14  ;;  %v13936_v2 = vand.u32 4294901760, %v11293_v42  ;;  %v13937_v63 = vand.u32 4294901760, %v11295_v8  ;;  %v14522_v60 = vld [vmem:[#allocation60_spill] sm:$0xff] }
 0x1b8   : > { %14519 = vst [vmem:[#allocation56_spill] sm:$0xff] %v11306_v1  ;;  %v1607_v5 = vadd.f32 %v1583_v26, %v1545_v16  ;;  %v2541_v56 = vadd.f32 %v2488_v30, %v2405_v50  ;;  %v11322_v28 = vmul.f32 %v14343_v58, %v11251_v9  ;;  %v14524_v26 = vld [vmem:[#allocation41_spill] sm:$0xff]  ;;  %v2082_v23 = vrot.slane %v11311_v34, 1 }
 0x1b9   : > { %v1003_v3 = vadd.f32 %v14520_v25, %v867_v54  ;;  %8443 = vmatmul.mubr.f32.vlgmr.msra.gmra.mrb[0].mxu1 %v14521_v32  ;;  %v14523_v54 = vrot.slane %v14522_v60, 1  ;;  %v4179_v25 = vsub.f32 %v11293_v42, %v13936_v2  ;;  %v4186_v30 = vsub.f32 %v11295_v8, %v13937_v63 }
 0x1ba   : > { %v14525_v16 = vrot.slane %v14524_v26, 2  ;;  %v14528_v32 = vmov 0.0   ;;  %v14529_v2 = vrot.slane %v11036_v27, 1  ;;  %v2603_v1 = vadd.f32 %v2579_v11, %v2541_v56  ;;  %v14536_v56 = vld [vmem:[#allocation75_spill] sm:$0xff] }
 0x1bb   : > { %v1139_v57 = vadd.f32 %v13935_v18, %v1003_v3  ;;  %v1864_v38 = vadd.f32 %v14523_v54, %v1728_v43  ;;  %v14526_v3 = vld [vmem:[#allocation28_spill] sm:$0xff]  ;;  %v14527_v43 = vld [vmem:[#allocation39_spill] sm:$0xff]  ;;  %8449 = vmatprep.mubr.msk.f32.mxu1 %vm9095_vm2, %v14528_v32  ;;  %v4180_v6 = vand.u32 4294901760, %v4179_v25  ;;  %v11359_v13 = vmul.f32 %v14532_v55, %v11251_v9 }
 0x1bc   : > { %v11338_v50 = vsel %vm1200_vm1, %v2217_v44, %v14525_v16  ;;  %v11343_v18 = vmul.f32 %v14526_v3, %v11251_v9  ;;  %v2700_v54 = vmul.f32 %v14527_v43, %v11251_v9  ;;  %v4187_v44 = vand.u32 4294901760, %v4186_v30  ;;  %v11352_v16 = vpop.permute.xlu0 %358 }
 0x1bd   : > { %v2000_v63 = vadd.f32 %v14529_v2, %v1864_v38  ;;  %14530 = vst [vmem:[#allocation87_spill] sm:$0xff] %v11352_v16  ;;  %14533 = vst [vmem:[#allocation94_spill] sm:$0xff] %v11359_v13  ;;  %v11363_v40 = vmul.f32 %v14501_v17, %v11352_v16  ;;  %v14535_v27 = vrot.slane %v14512_v35, 2  ;;  %v11369_v25 = vmul.f32 %v14496_v33, %v11352_v16 }
 0x1be   : > { %v8730_v38 = vpack.c.bf16 %v4187_v44, %v4180_v6  ;;  %v11373_v30 = vadd.f32 %v2700_v54, %v14536_v56  ;;  %v11377_v15 = vmul.f32 %v14511_v24, %v11352_v16  ;;  %v705_v9 = vmul.f32 %v14413_v49, %v11354_v10  ;;  %v14539_v56 = vld [vmem:[#allocation66_spill] sm:$0xff] }
 0x1bf   : > { %14534 = vst [vmem:[#allocation65_spill] sm:$0xff] %v11363_v40  ;;  %v1276_v34 = vadd.f32 %v14535_v27, %v1139_v57  ;;  %v2136_v2 = vadd.f32 %v2082_v23, %v2000_v63  ;;  %v14538_v35 = vrot.slane %v14524_v26, 2  ;;  %v11385_v6 = vmul.f32 %v14500_v62, %v11352_v16 }
 0x1c0   : > { %14537 = vst [vmem:[#allocation69_spill] sm:$0xff] %v11373_v30  ;;  %8731 = vmatpush3.bf16.msra.mxu1 %v8730_v38  ;;  %v1586_v57 = vmul.f32 %v14510_v37, %v11352_v16  ;;  %v1030_v54 = vmul.f32 %v14415_v39, %v11354_v10  ;;  %v729_v27 = vadd.f32 %v705_v9, %v11265_v19  ;;  %v14542_v39 = vrot.slane %v14517_v45, 1 }
 0x1c1   : > { %v2272_v63 = vadd.f32 %v14538_v35, %v2136_v2  ;;  %v1667_v11 = vadd.f32 %v14539_v56, %v1607_v5  ;;  %v1703_v26 = vmul.f32 %v9360_v59, %v11354_v10  ;;  %8732 = vmatprep.subr.bf16.mxu1 %v14340_v14  ;;  %v14540_v2 = vrot.slane %v11028_v7, 2  ;;  %v14544_v7 = vld [vmem:[#allocation51_spill] sm:$0xff] }
 0x1c2   : > { %v14541_v35 = vrot.slane %v11040_v12, 2  ;;  %v14543_v44 = vrot.slane %v11238_v48, 1  ;;  %v2027_v40 = vmul.f32 %v9364_v61, %v11354_v10  ;;  %v11414_v12 = vmul.f32 %v14514_v41, %v11352_v16 }
 0x1c3   : > { %v1412_v38 = vadd.f32 %v14540_v2, %v1276_v34  ;;  %v1727_v56 = vadd.f32 %v1703_v26, %v1667_v11  ;;  %8450 = vmatmul.mubr.msk.f32.vlgmr.msra.gmra.mrb[0].mxu1 %vm3629_vm5, %v14544_v7  ;;  %v11418_v45 = vmul.f32 %v14367_v53, %v11352_v16  ;;  %v1085_v48 = vrot.slane %v1030_v54, 1 }
 0x1c4   : > { %v2408_v13 = vadd.f32 %v14541_v35, %v2272_v63  ;;  %v815_v9 = vsel %vm791_vm0, %v14543_v44, %v14542_v39  ;;  %v14546_v39 = vrot.slane %v14522_v60, 1  ;;  %v14547_v34 = vrot.slane %v11273_v47, 1  ;;  %8456 = vmatprep.mubr.msk.f32.mxu1 %vm9095_vm2, %v14528_v32 }
 0x1c5   : > { %v866_v5 = vadd.f32 %v815_v9, %v729_v27  ;;  %14545 = vst [vmem:[#allocation42_spill] sm:$0xff] %v11418_v45  ;;  %v2582_v63 = vmul.f32 %v14516_v29, %v11352_v16  ;;  %v2081_v26 = vrot.slane %v2027_v40, 1  ;;  %v14548_v2 = vrot.slane %v11322_v28, 2 }
 0x1c6   : > { %v1811_v11 = vsel %vm791_vm0, %v14547_v34, %v14546_v39  ;;  %v14549_v54 = vrot.slane %v11343_v18, 2  ;;  %v1439_v47 = vmul.f32 %v14343_v58, %v11354_v10  ;;  %v8733_v9 = vpack.c.bf16 %v11295_v8, %v11293_v42 }
 0x1c7   : > { %v1002_v44 = vadd.f32 %v11224_v4, %v866_v5  ;;  %v1863_v27 = vadd.f32 %v1811_v11, %v1727_v56  ;;  %v1548_v35 = vadd.f32 %v14548_v2, %v1412_v38  ;;  %v2435_v34 = vmul.f32 %v14526_v3, %v11354_v10 }
 0x1c8   : > { %v2544_v60 = vadd.f32 %v14549_v54, %v2408_v13  ;;  %v2663_v4 = vadd.f32 %v11208_v51, %v2603_v1  ;;  %v2699_v40 = vmul.f32 %v14527_v43, %v11354_v10  ;;  %v14550_v5 = vrot.slane %v11289_v20, 1  ;;  %8734 = vmatpush3.bf16.msra.mxu1 %v8733_v9  ;;  %v354_v20 = vpop.permute.xlu1 %353  ;;  %v14557_v13 = vld [vmem:[#allocation49_spill] sm:$0xff] }
 0x1c9   : > { %v1999_v39 = vadd.f32 %v11243_v36, %v1863_v27  ;;  %v11451_v11 = vmul.f32 %v14532_v55, %v11354_v10  ;;  %v11453_v36 = vpop.permute.xlu0 %368  ;;  %v2083_v51 = vsel %vm791_vm0, %v2081_v26, %v2082_v23  ;;  %8735 = vmatprep.subr.bf16.mxu1 %v14340_v14  ;;  %v1494_v54 = vrot.slane %v1439_v47, 2 }
 0x1ca   : > { %v1087_v56 = vsel %vm791_vm0, %v1085_v48, %v14550_v5  ;;  %14552 = vst [vmem:[#allocation72_spill] sm:$0xff] %v11453_v36  ;;  %v11458_v1 = vmul.f32 %v14501_v17, %v11453_v36  ;;  %v11462_v2 = vmul.f32 %v14496_v33, %v11453_v36  ;;  %v11465_v48 = vadd.f32 %v1586_v57, %v1548_v35 }
 0x1cb   : > { %14551 = vst [vmem:[#allocation92_spill] sm:$0xff] %v11451_v11  ;;  %v1138_v27 = vadd.f32 %v1087_v56, %v1002_v44  ;;  %v2135_v9 = vadd.f32 %v2083_v51, %v1999_v39  ;;  %v11469_v44 = vmul.f32 %v14511_v24, %v11453_v36  ;;  %v11471_v23 = vadd.f32 %v2582_v63, %v2544_v60 }
 0x1cc   : > { %14553 = vst [vmem:[#allocation91_spill] sm:$0xff] %v11458_v1  ;;  %14554 = vst [vmem:[#allocation85_spill] sm:$0xff] %v11462_v2  ;;  %v2489_v26 = vrot.slane %v2435_v34, 2  ;;  %v11473_v5 = vadd.f32 %v2699_v40, %v2663_v4  ;;  %v11477_v56 = vmul.f32 %v14514_v41, %v11453_v36  ;;  %8457 = vmatmul.mubr.f32.vlgmr.msra.gmra.mrb[0].mxu1 %v14557_v13  ;;  %v14567_v2 = vld [vmem:[#allocation45_spill] sm:$0xff]  ;;  %v14585_v11 = vand.u32 4294901760, %v11295_v8 }
 0x1cd   : > { %14555 = vst [vmem:[#allocation73_spill] sm:$0xff] %v11469_v44  ;;  %v11483_v35 = vmul.f32 %v14500_v62, %v11453_v36  ;;  %v11487_v47 = vmul.f32 %v14510_v37, %v11453_v36  ;;  %v1168_v63 = vmul.f32 %v14496_v33, %v354_v20  ;;  %8737 = vmatpush3.bf16.msra.mxu1 %v11291_v22  ;;  %v11508_v19 = vpop.permute.xlu0 %508 }
 0x1ce   : > { %14556 = vst [vmem:[#allocation79_spill] sm:$0xff] %v11477_v56  ;;  %8463 = vmatprep.mubr.msk.f32.mxu1 %vm9095_vm2, %v14528_v32  ;;  %v1275_v34 = vadd.f32 %v11280_v46, %v1138_v27  ;;  %v2165_v4 = vmul.f32 %v14514_v41, %v354_v20  ;;  %8738 = vmatprep.subr.bf16.mxu1 %v14340_v14  ;;  %14559 = vst [vmem:[#allocation46_spill] sm:$0xff] %v11508_v19  ;;  %v14566_v56 = vld [vmem:[#allocation12_spill] sm:$0xff] }
 0x1cf   : > { %v11501_v51 = vmul.f32 %v14516_v29, %v11453_v36  ;;  %v11505_v57 = vmul.f32 %v14367_v53, %v11453_v36  ;;  %v2271_v60 = vadd.f32 %v11338_v50, %v2135_v9  ;;  %v11512_v27 = vmul.f32 %v14501_v17, %v354_v20  ;;  %v11522_v50 = vpop.permute.xlu1 %512 }
 0x1d0   : > { %v1411_v39 = vadd.f32 %v11233_v52, %v1275_v34  ;;  %v11516_v40 = vmul.f32 %v14511_v24, %v354_v20  ;;  %v1225_v38 = vrot.slane %v1168_v63, 2  ;;  %v2220_v30 = vrot.slane %v2165_v4, 2  ;;  %14561 = vst [vmem:[#allocation9_spill] sm:$0xff] %v11522_v50  ;;  %v14564_v34 = vld [vmem:[#allocation15_spill] sm:$0xff] }
 0x1d1   : > { %14558 = vst [vmem:[#allocation35_spill] sm:$0xff] %v11505_v57  ;;  %v2407_v16 = vadd.f32 %v11249_v0, %v2271_v60  ;;  %v11520_v36 = vmul.f32 %v14367_v53, %v354_v20  ;;  %v14562_v9 = vrot.slane %v11322_v28, 2  ;;  %v411_v45 = vmul.f32 %v14500_v62, %v354_v20  ;;  %v14576_v57 = vld [vmem:[#allocation18_spill] sm:$0xff] }
 0x1d2   : > { %v11529_v52 = vmul.f32 %v14487_v31, %v354_v20  ;;  %v559_v63 = vmul.f32 %v14564_v34, %v11508_v19  ;;  %v14565_v0 = vrot.slane %v11343_v18, 2  ;;  %v1585_v44 = vmul.f32 %v14510_v37, %v354_v20  ;;  %v14573_v18 = vld [vmem:[#allocation19_spill] sm:$0xff] }
 0x1d3   : > { %14560 = vst [vmem:[#allocation81_spill] sm:$0xff] %v11520_v36  ;;  %v1496_v46 = vsel %vm1200_vm1, %v1494_v54, %v14562_v9  ;;  %v2581_v9 = vmul.f32 %v14516_v29, %v354_v20  ;;  %v896_v1 = vmul.f32 %v14566_v56, %v11508_v19  ;;  %v14568_v53 = vrot.slane %v11369_v25, 2  ;;  %v14575_v20 = vld [vmem:[#allocation17_spill] sm:$0xff]  ;;  %v14577_v36 = vld [vmem:[#allocation34_spill] sm:$0xff] }
 0x1d4   : > { %14563 = vst [vmem:[#allocation76_spill] sm:$0xff] %v11529_v52  ;;  %v2491_v60 = vsel %vm1200_vm1, %v2489_v26, %v14565_v0  ;;  %v1547_v13 = vadd.f32 %v1496_v46, %v1411_v39  ;;  %8464 = vmatmul.mubr.f32.vlgmr.msra.gmra.mrb[0].mxu1 %v14567_v2  ;;  %v14570_v26 = vrot.slane %v11414_v12, 2  ;;  %v583_v46 = vadd.f32 %v559_v63, %v411_v45  ;;  %v14572_v0 = vld [vmem:[#allocation14_spill] sm:$0xff] }
 0x1d5   : > { %v2543_v54 = vadd.f32 %v2491_v60, %v2407_v16  ;;  %v11546_v4 = vsel %vm1200_vm1, %v1225_v38, %v14568_v53  ;;  %8470 = vmatprep.mubr.msk.f32.mxu1 %vm9095_vm2, %v14528_v32  ;;  %v1305_v60 = vmul.f32 %v14572_v0, %v11508_v19  ;;  %v560_v53 = vmul.f32 %v14564_v34, %v11522_v50  ;;  %v11570_v16 = vpop.permute.xlu1 %660 }
 0x1d6   : > { %14569 = vst [vmem:[#allocation86_spill] sm:$0xff] %v11546_v4  ;;  %v11552_v39 = vsel %vm1200_vm1, %v2220_v30, %v14570_v26  ;;  %v1609_v38 = vadd.f32 %v1585_v44, %v1547_v13  ;;  %v1645_v28 = vmul.f32 %v14573_v18, %v11508_v19  ;;  %v897_v30 = vmul.f32 %v14566_v56, %v11522_v50 }
 0x1d7   : > { %14571 = vst [vmem:[#allocation53_spill] sm:$0xff] %v11552_v39  ;;  %v11568_v26 = vmul.f32 %v14572_v0, %v11522_v50  ;;  %14574 = vst [vmem:[#allocation68_spill] sm:$0xff] %v11570_v16  ;;  %v2605_v45 = vadd.f32 %v2581_v9, %v2543_v54  ;;  %v952_v63 = vrot.slane %v896_v1, 1  ;;  %v1893_v52 = vmul.f32 %v14575_v20, %v11508_v19 }
 0x1d8   : > { %v11576_v13 = vmul.f32 %v14576_v57, %v11508_v19  ;;  %v2641_v44 = vmul.f32 %v14411_v21, %v11508_v19  ;;  %v11582_v2 = vmul.f32 %v14577_v36, %v11508_v19  ;;  %v1646_v29 = vmul.f32 %v14573_v18, %v11522_v50 }
 0x1d9   : > { %v1894_v1 = vmul.f32 %v14575_v20, %v11522_v50  ;;  %v1361_v54 = vrot.slane %v1305_v60, 2  ;;  %v584_v9 = vadd.f32 %v560_v53, %v11385_v6  ;;  %v953_v39 = vrot.slane %v897_v30, 1  ;;  %v14579_v60 = vld [vmem:[#allocation25_spill] sm:$0xff] }
 0x1da   : > { %14578 = vst [vmem:[#allocation77_spill] sm:$0xff] %v11582_v2  ;;  %v708_v37 = vmul.f32 %v14413_v49, %v11570_v16  ;;  %v1669_v24 = vadd.f32 %v1645_v28, %v1609_v38  ;;  %v1362_v41 = vrot.slane %v11568_v26, 2  ;;  %v1670_v33 = vadd.f32 %v1646_v29, %v11465_v48 }
 0x1db   : > { %v2302_v19 = vmul.f32 %v14576_v57, %v11522_v50  ;;  %v1948_v17 = vrot.slane %v1893_v52, 1  ;;  %v2356_v62 = vrot.slane %v11576_v13, 2  ;;  %v11598_v10 = vmul.f32 %v14579_v60, %v11570_v16  ;;  %v14581_v52 = vld [vmem:[#allocation65_spill] sm:$0xff] }
 0x1dc   : > { %v732_v4 = vadd.f32 %v708_v37, %v584_v9  ;;  %v11600_v6 = vadd.f32 %v2641_v44, %v2605_v45  ;;  %v1949_v28 = vrot.slane %v1894_v1, 1  ;;  %v1706_v38 = vmul.f32 %v9360_v59, %v11570_v16  ;;  %v11614_v45 = vpop.permute.xlu1 %656 }
 0x1dd   : > { %v954_v29 = vsel %vm791_vm0, %v952_v63, %v953_v39  ;;  %v2642_v48 = vmul.f32 %v14411_v21, %v11522_v50  ;;  %v11610_v37 = vmul.f32 %v14577_v36, %v11522_v50  ;;  %v14582_v30 = vrot.slane %v14581_v52, 1  ;;  %14583 = vst [vmem:[#allocation61_spill] sm:$0xff] %v11614_v45 }
 0x1de   : > { %v11617_v13 = vsel %vm1200_vm1, %v1361_v54, %v1362_v41  ;;  %v2357_v44 = vrot.slane %v2302_v19, 2  ;;  %v1730_v1 = vadd.f32 %v1706_v38, %v1670_v33  ;;  %v2030_v63 = vmul.f32 %v9364_v61, %v11570_v16 }
 0x1df   : > { %14580 = vst [vmem:[#allocation43_spill] sm:$0xff] %v11610_v37  ;;  %v869_v26 = vadd.f32 %v14582_v30, %v732_v4  ;;  %v2666_v9 = vadd.f32 %v2642_v48, %v11471_v23  ;;  %v1089_v2 = vrot.slane %v11598_v10, 1  ;;  %v14584_v50 = vand.u32 4294901760, %v11293_v42 }
 0x1e0   : > { %v1950_v30 = vsel %vm791_vm0, %v1948_v17, %v1949_v28  ;;  %v11630_v54 = vmul.f32 %v14343_v58, %v11570_v16  ;;  %v14586_v33 = vrot.slane %v11377_v15, 1  ;;  %v707_v23 = vmul.f32 %v14413_v49, %v11614_v45 }
 0x1e1   : > { %v1005_v53 = vadd.f32 %v953_v39, %v869_v26  ;;  %v8739_v4 = vpack.c.bf16 %v14585_v11, %v14584_v50  ;;  %v11638_v10 = vmul.f32 %v14526_v3, %v11570_v16  ;;  %v1032_v42 = vmul.f32 %v14579_v60, %v11614_v45 }
 0x1e2   : > { %v1866_v19 = vadd.f32 %v14586_v33, %v1730_v1  ;;  %v1705_v17 = vmul.f32 %v9360_v59, %v11614_v45  ;;  %v2085_v11 = vrot.slane %v2030_v63, 1  ;;  %v2702_v50 = vmul.f32 %v14527_v43, %v11570_v16 }
 0x1e3   : > { %v1141_v39 = vadd.f32 %v1089_v2, %v1005_v53  ;;  %8740 = vmatpush3.bf16.msra.mxu1 %v8739_v4  ;;  %v731_v38 = vadd.f32 %v707_v23, %v583_v46  ;;  %v14587_v53 = vrot.slane %v11369_v25, 2  ;;  %v14588_v26 = vrot.slane %v14581_v52, 1 }
 0x1e4   : > { %v2002_v8 = vadd.f32 %v1949_v28, %v1866_v19  ;;  %8741 = vmatprep.subr.bf16.mxu1 %v14340_v14  ;;  %v14589_v1 = vrot.slane %v11512_v27, 1  ;;  %v1729_v33 = vadd.f32 %v1705_v17, %v1669_v24  ;;  %v2029_v28 = vmul.f32 %v9364_v61, %v11614_v45 }
 0x1e5   : > { %v1278_v48 = vadd.f32 %v14587_v53, %v1141_v39  ;;  %v13981_v63 = vrot.slane %v11630_v54, 2  ;;  %v14590_v46 = vrot.slane %v11377_v15, 1  ;;  %v14591_v23 = vrot.slane %v11516_v40, 1  ;;  %v11689_v53 = vpop.permute.xlu1 %520 }
 0x1e6   : > { %v818_v4 = vsel %vm791_vm0, %v14589_v1, %v14588_v26  ;;  %v2138_v19 = vadd.f32 %v2085_v11, %v2002_v8  ;;  %8471 = vmatmul.mubr.msk.f32.vlgmr.msra.gmra.mrb[0].mxu1 %vm3629_vm5, %v14544_v7  ;;  %v1088_v52 = vrot.slane %v1032_v42, 1  ;;  %v11666_v24 = vmul.f32 %v14343_v58, %v11614_v45  ;;  %14594 = vst [vmem:[#allocation37_spill] sm:$0xff] %v11689_v53 }
 0x1e7   : > { %v868_v59 = vadd.f32 %v818_v4, %v731_v38  ;;  %v1814_v25 = vsel %vm791_vm0, %v14591_v23, %v14590_v46  ;;  %v1414_v27 = vadd.f32 %v1362_v41, %v1278_v48  ;;  %8743 = vmatpush3.bf16.msra.mxu1 %v11291_v22  ;;  %8477 = vmatprep.mubr.msk.f32.mxu1 %vm9095_vm2, %v14528_v32  ;;  %v14592_v17 = vrot.slane %v11414_v12, 2  ;;  %v11720_v23 = vpop.permute.xlu0 %516 }
 0x1e8   : > { %v1865_v39 = vadd.f32 %v1814_v25, %v1729_v33  ;;  %v11672_v15 = vsel %vm1200_vm1, %v2356_v62, %v2357_v44  ;;  %v11679_v41 = vmul.f32 %v14532_v55, %v11570_v16  ;;  %8762 = vmatprep.subr.bf16.mxu1 %v14340_v14  ;;  %v13980_v42 = vrot.slane %v11638_v10, 2  ;;  %14597 = vst [vmem:[#allocation67_spill] sm:$0xff] %v11720_v23  ;;  %v14611_v16 = vld [vmem:[#allocation69_spill] sm:$0xff] }
 0x1e9   : > { %v2274_v8 = vadd.f32 %v14592_v17, %v2138_v19  ;;  %v1550_v22 = vadd.f32 %v13981_v63, %v1414_v27  ;;  %v2084_v38 = vrot.slane %v2029_v28, 1  ;;  %v11687_v62 = vmul.f32 %v14526_v3, %v11614_v45  ;;  %v14606_v63 = vld [vmem:[#allocation62_spill] sm:$0xff] }
 0x1ea   : > { %14593 = vst [vmem:[#allocation84_spill] sm:$0xff] %v11679_v41  ;;  %v11691_v48 = vadd.f32 %v2702_v50, %v2666_v9  ;;  %v1004_v26 = vadd.f32 %v954_v29, %v868_v59  ;;  %v2701_v1 = vmul.f32 %v14527_v43, %v11614_v45  ;;  %v1090_v4 = vsel %vm791_vm0, %v1088_v52, %v1089_v2  ;;  %v14619_v41 = vld [vmem:[#allocation7_spill] sm:$0xff] }
 0x1eb   : > { %v2410_v12 = vadd.f32 %v2357_v44, %v2274_v8  ;;  %v2001_v19 = vadd.f32 %v1950_v30, %v1865_v39  ;;  %v11699_v28 = vmul.f32 %v14532_v55, %v11614_v45  ;;  %v562_v44 = vmul.f32 %v14564_v34, %v11689_v53 }
 0x1ec   : > { %14595 = vst [vmem:[#allocation64_spill] sm:$0xff] %v11691_v48  ;;  %v11707_v59 = vmul.f32 %v14566_v56, %v11689_v53  ;;  %v11711_v2 = vmul.f32 %v14572_v0, %v11689_v53  ;;  %v2086_v29 = vsel %vm791_vm0, %v2084_v38, %v2085_v11  ;;  %v1612_v30 = vadd.f32 %v11487_v47, %v1550_v22 }
 0x1ed   : > { %14596 = vst [vmem:[#allocation5_spill] sm:$0xff] %v11699_v28  ;;  %v2546_v46 = vadd.f32 %v13980_v42, %v2410_v12  ;;  %v11718_v50 = vmul.f32 %v14575_v20, %v11689_v53  ;;  %v11722_v25 = vadd.f32 %v1090_v4, %v1004_v26  ;;  %v11725_v27 = vadd.f32 %v2701_v1, %v11600_v6  ;;  %v14604_v42 = vld [vmem:[#allocation54_spill] sm:$0xff]  ;;  %v14608_v1 = vld [vmem:[#allocation99_spill] sm:$0xff] }
 0x1ee   : > { %v11729_v52 = vmul.f32 %v14576_v57, %v11689_v53  ;;  %v11733_v11 = vmul.f32 %v14577_v36, %v11689_v53  ;;  %8478 = vmatmul.mubr.msk.f32.vlgmr.msra.gmra.mrb[0].mxu1 %vm3629_vm5, %v14544_v7  ;;  %v11737_v47 = vadd.f32 %v2086_v29, %v2001_v19  ;;  %v1648_v17 = vmul.f32 %v14573_v18, %v11689_v53 }
 0x1ef   : > { %14598 = vst [vmem:[#allocation70_spill] sm:$0xff] %v11725_v27  ;;  %v2608_v6 = vadd.f32 %v11501_v51, %v2546_v46  ;;  %8526 = vmatprep.mubr.msk.f32.mxu1 %vm9095_vm2, %v14528_v32  ;;  %v11746_v8 = vadd.f32 %v562_v44, %v11483_v35  ;;  %v11752_v12 = vmul.f32 %v14566_v56, %v11720_v23  ;;  %v14600_v44 = vld [vmem:[#allocation36_spill] sm:$0xff]  ;;  %v14605_v33 = vrot.slane %v14604_v42, 1  ;;  %v14625_v27 = vld [vmem:[#allocation98_spill] sm:$0xff] }
 0x1f0   : > { %14599 = vst [vmem:[#allocation78_spill] sm:$0xff] %v11733_v11  ;;  %v11754_v26 = vadd.f32 %v1648_v17, %v1612_v30  ;;  %v2644_v51 = vmul.f32 %v14411_v21, %v11689_v53  ;;  %v11761_v4 = vmul.f32 %v14564_v34, %v11720_v23  ;;  %v11767_v46 = vmul.f32 %v14572_v0, %v11720_v23  ;;  %v14602_v30 = vld [vmem:[#allocation38_spill] sm:$0xff] }
 0x1f1   : > { %v14601_v29 = vrot.slane %v14600_v44, 1  ;;  %v14603_v17 = vrot.slane %v14602_v30, 1  ;;  %v11778_v9 = vmul.f32 %v14575_v20, %v11720_v23  ;;  %v14607_v19 = vrot.slane %v14606_v63, 1  ;;  %v14613_v53 = vld [vmem:[#allocation90_spill] sm:$0xff]  ;;  %v14621_v44 = vld [vmem:[#allocation57_spill] sm:$0xff] }
 0x1f2   : > { %v11774_v40 = vadd.f32 %v2644_v51, %v2608_v6  ;;  %v955_v22 = vrot.slane %v11752_v12, 1  ;;  %v11789_v30 = vmul.f32 %v14576_v57, %v11720_v23  ;;  %v14609_v6 = vld [vmem:[#allocation97_spill] sm:$0xff]  ;;  %v14612_v45 = vmov %v14605_v33  ;;  %v14627_v34 = vld [vmem:[#allocation6_spill] sm:$0xff] }
 0x1f3   : > { %v2803_v39 = vsel %vm791_vm0, %v14603_v17, %v14601_v29  ;;  %v2806_v35 = vsel %vm791_vm0, %v14607_v19, %v14605_v33  ;;  %v14610_v51 = vmov %v14601_v29  ;;  %v2860_v63 = vadd.f32 %v14612_v45, %v14611_v16  ;;  %v14615_v19 = vld [vmem:[#allocation88_spill] sm:$0xff]  ;;  %v14623_v16 = vld [vmem:[#allocation94_spill] sm:$0xff] }
 0x1f4   : > { %v2857_v38 = vadd.f32 %v2803_v39, %v14608_v1  ;;  %v2858_v29 = vadd.f32 %v14610_v51, %v14609_v6  ;;  %v2859_v17 = vadd.f32 %v2806_v35, %v11473_v5  ;;  %v14614_v33 = vrot.slane %v14613_v53, 1  ;;  %v14617_v1 = vld [vmem:[#allocation100_spill] sm:$0xff]  ;;  %v14641_v0 = vld [vmem:[#allocation50_spill] sm:$0xff] }
 0x1f5   : > { %v14616_v39 = vrot.slane %v14615_v19, 1  ;;  %v14618_v28 = vrot.slane %v14617_v1, 1  ;;  %v14620_v11 = vrot.slane %v14619_v41, 1  ;;  %v3074_v6 = vrot.slane %v14621_v44, 1  ;;  %v14632_v44 = vld [vmem:[#allocation48_spill] sm:$0xff] }
 0x1f6   : > { %v14622_v5 = vmov %v14614_v33  ;;  %v3077_v45 = vrot.slane %v14623_v16, 1  ;;  %v3158_v41 = vmul.f32 %v14487_v31, %v14627_v34  ;;  %v14633_v16 = vld [vmem:[#allocation74_spill] sm:$0xff]  ;;  %v14634_v34 = vld [vmem:[#allocation101_spill] sm:$0xff] }
 0x1f7   : > { %v2939_v12 = vsel %vm791_vm0, %v14616_v39, %v14614_v33  ;;  %v2942_v37 = vsel %vm791_vm0, %v14620_v11, %v14618_v28  ;;  %v2994_v35 = vadd.f32 %v14622_v5, %v2858_v29  ;;  %v14624_v48 = vmov %v14618_v28  ;;  %v14628_v28 = vld [vmem:[#allocation63_spill] sm:$0xff] }
 0x1f8   : > { %v2993_v51 = vadd.f32 %v2939_v12, %v2857_v38  ;;  %v2995_v42 = vadd.f32 %v2942_v37, %v2859_v17  ;;  %v2996_v19 = vadd.f32 %v14624_v48, %v2860_v63  ;;  %v14626_v33 = vrot.slane %v14625_v27, 1  ;;  %v14629_v38 = vld [vmem:[#allocation92_spill] sm:$0xff]  ;;  %v14631_v17 = vld [vmem:[#allocation71_spill] sm:$0xff] }
 0x1f9   : > { %v3160_v11 = vmul.f32 %v14487_v31, %v14628_v28  ;;  %v14630_v12 = vrot.slane %v14629_v38, 1  ;;  %v3130_v29 = vadd.f32 %v3074_v6, %v2994_v35  ;;  %v3293_v1 = vmul.f32 %v14632_v44, %v14631_v17  ;;  %v14635_v28 = vld [vmem:[#allocation8_spill] sm:$0xff] }
 0x1fa   : > { %v3075_v39 = vsel %vm791_vm0, %v14626_v33, %v3074_v6  ;;  %v3132_v63 = vadd.f32 %v3077_v45, %v2996_v19  ;;  %v3210_v27 = vrot.slane %v3158_v41, 2  ;;  %v3294_v33 = vmul.f32 %v14632_v44, %v14633_v16  ;;  %v14638_v35 = vld [vmem:[#allocation56_spill] sm:$0xff] }
 0x1fb   : > { %v3078_v53 = vsel %vm791_vm0, %v14630_v12, %v3077_v45  ;;  %v3129_v37 = vadd.f32 %v3075_v39, %v2993_v51  ;;  %v3213_v5 = vrot.slane %v3160_v11, 2  ;;  %v3295_v57 = vmul.f32 %v14632_v44, %v14634_v34  ;;  %v14636_v12 = vld [vmem:[#allocation96_spill] sm:$0xff]  ;;  %v14640_v34 = vld [vmem:[#allocation55_spill] sm:$0xff] }
 0x1fc   : > { %v3131_v48 = vadd.f32 %v3078_v53, %v2995_v42  ;;  %v3296_v38 = vmul.f32 %v14632_v44, %v14635_v28  ;;  %v3345_v20 = vrot.slane %v3293_v1, 2  ;;  %v14637_v51 = vrot.slane %v14636_v12, 2  ;;  %v14642_v28 = vld [vmem:[#allocation89_spill] sm:$0xff]  ;;  %v14643_v12 = vld [vmem:[#allocation83_spill] sm:$0xff] }
 0x1fd   : > { %v14639_v39 = vrot.slane %v14638_v35, 2  ;;  %v3266_v45 = vadd.f32 %v3210_v27, %v3130_v29  ;;  %v3268_v19 = vadd.f32 %v3213_v5, %v3132_v63  ;;  %v3346_v53 = vrot.slane %v3294_v33, 2  ;;  %v14644_v63 = vld [vmem:[#allocation82_spill] sm:$0xff]  ;;  %v14668_v44 = vld [vmem:[#allocation85_spill] sm:$0xff] }
 0x1fe   : > { %v3211_v6 = vsel %vm1200_vm1, %v14637_v51, %v3210_v27  ;;  %v3348_v17 = vrot.slane %v3295_v57, 2  ;;  %v3349_v16 = vrot.slane %v3296_v38, 2  ;;  %v3429_v56 = vmul.f32 %v14641_v0, %v14640_v34 }
 0x1ff   : > { %v3214_v42 = vsel %vm1200_vm1, %v14639_v39, %v3213_v5  ;;  %v3265_v41 = vadd.f32 %v3211_v6, %v3129_v37  ;;  %v3430_v1 = vmul.f32 %v14641_v0, %v14642_v28  ;;  %v3431_v51 = vmul.f32 %v14641_v0, %v14643_v12 }
 0x200   : > { %v3267_v11 = vadd.f32 %v3214_v42, %v3131_v48  ;;  %v1364_v35 = vrot.slane %v11767_v46, 2  ;;  %v3347_v39 = vsel %vm1200_vm1, %v3345_v20, %v3346_v53  ;;  %v3402_v29 = vadd.f32 %v3346_v53, %v3266_v45 }
 0x201   : > { %v3432_v37 = vmul.f32 %v14641_v0, %v14644_v63  ;;  %v3350_v57 = vsel %vm1200_vm1, %v3348_v17, %v3349_v16  ;;  %v3401_v48 = vadd.f32 %v3347_v39, %v3265_v41  ;;  %v3404_v27 = vadd.f32 %v3349_v16, %v3268_v19  ;;  %v364_v19 = vpop.permute.xlu1 %363  ;;  %v11878_v39 = vld [vmem:[%s13695_s2] ss:$0 sm:$0xff] }
 0x202   : > { %v3481_v5 = vrot.slane %v3429_v56, 2  ;;  %v3403_v33 = vadd.f32 %v3350_v57, %v3267_v11  ;;  %v3482_v38 = vrot.slane %v3430_v1, 2  ;;  %v3484_v6 = vrot.slane %v3431_v51, 2  ;;  %14648 = vst [vmem:[#allocation52_spill] sm:$0xff] %v11878_v39 }
 0x203   : > { %v3485_v42 = vrot.slane %v3432_v37, 2  ;;  %v11851_v34 = vmul.f32 %v14573_v18, %v11720_v23  ;;  %v1951_v46 = vrot.slane %v11778_v9, 1  ;;  %v11856_v20 = vmul.f32 %v14411_v21, %v11720_v23 }
 0x204   : > { %v11860_v45 = vmul.f32 %v14577_v36, %v11720_v23  ;;  %v3483_v56 = vsel %vm1200_vm1, %v3481_v5, %v3482_v38  ;;  %v3538_v11 = vadd.f32 %v3482_v38, %v3402_v29  ;;  %v14646_v17 = vrot.slane %v11707_v59, 1 }
 0x205   : > { %v3486_v41 = vsel %vm1200_vm1, %v3484_v6, %v3485_v42  ;;  %v3540_v53 = vadd.f32 %v3485_v42, %v3404_v27  ;;  %v2359_v9 = vrot.slane %v11789_v30, 2  ;;  %v3537_v28 = vadd.f32 %v3483_v56, %v3401_v48  ;;  %v14650_v48 = vld [vmem:[#allocation20_spill] sm:$0xff]  ;;  %v14652_v42 = vld [vmem:[#allocation22_spill] sm:$0xff] }
 0x206   : > { %14645 = vst [vmem:[#allocation93_spill] sm:$0xff] %v11860_v45  ;;  %v11867_v16 = vsel %vm791_vm0, %v955_v22, %v14646_v17  ;;  %v3539_v1 = vadd.f32 %v3486_v41, %v3403_v33  ;;  %v14647_v12 = vrot.slane %v11711_v2, 2  ;;  %v3568_v29 = vadd.f32 %v11878_v39, %v3538_v11  ;;  %v14649_v22 = vld [vmem:[#allocation86_spill] sm:$0xff] }
 0x207   : > { %v3570_v63 = vadd.f32 %v11878_v39, %v3540_v53  ;;  %v1277_v37 = vadd.f32 %v14649_v22, %v11722_v25  ;;  %v3567_v30 = vadd.f32 %v11878_v39, %v3537_v28  ;;  %v413_v27 = vmul.f32 %v14650_v48, %v364_v19 }
 0x208   : > { %v11873_v51 = vsel %vm1200_vm1, %v1364_v35, %v14647_v12  ;;  %v3569_v57 = vadd.f32 %v11878_v39, %v3539_v1  ;;  %v14651_v35 = vld [vmem:[#allocation21_spill] sm:$0xff]  ;;  %v3592_v38 = vmax.f32 %v3568_v29, 0.0  ;;  %v1170_v56 = vmul.f32 %v14652_v42, %v364_v19  ;;  %v11902_v1 = vpop.permute.xlu1 %668 }
 0x209   : > { %v11888_v5 = vmul.f32 %v14651_v35, %v364_v19  ;;  %v3594_v6 = vmax.f32 %v3570_v63, 0.0  ;;  %v14653_v41 = vrot.slane %v11718_v50, 1  ;;  %v14654_v25 = vrot.slane %v11729_v52, 2  ;;  %14656 = vst [vmem:[#allocation80_spill] sm:$0xff] %v11902_v1 }
 0x20a   : > { %v3591_v17 = vmax.f32 %v3567_v30, 0.0  ;;  %v3593_v28 = vmax.f32 %v3569_v57, 0.0  ;;  %v14657_v29 = vrot.slane %v11630_v54, 2  ;;  %v14658_v63 = vrot.slane %v11666_v24, 2 }
 0x20b   : > { %v11895_v11 = vsel %vm791_vm0, %v1951_v46, %v14653_v41  ;;  %v11900_v53 = vsel %vm1200_vm1, %v2359_v9, %v14654_v25  ;;  %v3612_v12 = vadd.f32 %v3594_v6, %v3592_v38  ;;  %v1413_v33 = vadd.f32 %v11617_v13, %v1277_v37  ;;  %v14659_v46 = vld [vmem:[#allocation30_spill] sm:$0xff]  ;;  %v14662_v6 = vld [vmem:[#allocation29_spill] sm:$0xff] }
 0x20c   : > { %14655 = vst [vmem:[#allocation95_spill] sm:$0xff] %v11900_v53  ;;  %v1499_v22 = vsel %vm1200_vm1, %v14658_v63, %v14657_v29  ;;  %v2167_v41 = vmul.f32 %v14659_v46, %v364_v19  ;;  %v3611_v39 = vadd.f32 %v3593_v28, %v3591_v17  ;;  %v14660_v0 = vrot.slane %v11638_v10, 2  ;;  %v14663_v10 = vld [vmem:[#allocation23_spill] sm:$0xff] }
 0x20d   : > { %v14661_v9 = vrot.slane %v11687_v62, 2  ;;  %v585_v57 = vadd.f32 %v11761_v4, %v413_v27  ;;  %v819_v38 = vrot.slane %v11888_v5, 1  ;;  %v4558_v54 = vsel %vm1200_vm1, %v3612_v12, 0  ;;  %v14664_v62 = vld [vmem:[#allocation53_spill] sm:$0xff] }
 0x20e   : > { %v1228_v24 = vrot.slane %v1170_v56, 2  ;;  %v11920_v25 = vmul.f32 %v14662_v6, %v364_v19  ;;  %v710_v13 = vmul.f32 %v14413_v49, %v11902_v1  ;;  %v4561_v37 = vand.u32 4294901760, %v3611_v39 }
 0x20f   : > { %v2494_v30 = vsel %vm1200_vm1, %v14661_v9, %v14660_v0  ;;  %v4564_v17 = vand.u32 4294901760, %v4558_v54  ;;  %v1587_v28 = vmul.f32 %v14663_v10, %v364_v19  ;;  %v2273_v0 = vadd.f32 %v14664_v62, %v11737_v47  ;;  %v14666_v9 = vld [vmem:[#allocation32_spill] sm:$0xff] }
 0x210   : > { %v1549_v29 = vadd.f32 %v1499_v22, %v1413_v33  ;;  %v2223_v4 = vrot.slane %v2167_v41, 2  ;;  %v734_v27 = vadd.f32 %v710_v13, %v11746_v8  ;;  %v11930_v5 = vmul.f32 %v14579_v60, %v11902_v1  ;;  %v14670_v33 = vld [vmem:[#allocation91_spill] sm:$0xff] }
 0x211   : > { %v11932_v56 = vpack.c.bf16 %v4564_v17, %v4561_v37  ;;  %v11934_v12 = vsub.f32 %v3611_v39, %v4561_v37  ;;  %v11936_v63 = vsub.f32 %v4558_v54, %v4564_v17  ;;  %v11939_v23 = vmul.f32 %v14666_v9, %v364_v19  ;;  %v14672_v13 = vld [vmem:[#allocation27_spill] sm:$0xff] }
 0x212   : > { %v14669_v45 = vrot.slane %v14668_v44, 2  ;;  %v1815_v8 = vrot.slane %v11920_v25, 1  ;;  %v14671_v22 = vrot.slane %v14670_v33, 1  ;;  %v1708_v62 = vmul.f32 %v14672_v13, %v11902_v1  ;;  %v14673_v54 = vld [vmem:[#allocation31_spill] sm:$0xff] }
 0x213   : > { %14665 = vst [vmem:[#allocation59_spill] sm:$0xff] %v11932_v56  ;;  %14667 = vst [vmem:[#allocation47_spill] sm:$0xff] %v11939_v23  ;;  %8746 = vmatpush3.bf16.msra.mxu0 %v11932_v56  ;;  %v2409_v39 = vadd.f32 %v11672_v15, %v2273_v0  ;;  %v2583_v37 = vmul.f32 %v14673_v54, %v364_v19  ;;  %v11955_v17 = vmul.f32 %v14487_v31, %v364_v19  ;;  %v14677_v19 = vld [vmem:[#allocation79_spill] sm:$0xff] }
 0x214   : > { %v11944_v47 = vsel %vm1200_vm1, %v1228_v24, %v14669_v45  ;;  %v871_v41 = vadd.f32 %v14671_v22, %v734_v27  ;;  %v11959_v45 = vmul.f32 %v9364_v61, %v11902_v1  ;;  %v11961_v24 = vpop.permute.xlu1 %664  ;;  %v14676_v25 = vrot.slane %v11707_v59, 1  ;;  %8747 = vmatprep.subr.bf16.mxu0 %v14340_v14  ;;  %v14679_v59 = vld [vmem:[#allocation44_spill] sm:$0xff] }
 0x215   : > { %14674 = vst [vmem:[#allocation60_spill] sm:$0xff] %v11955_v17  ;;  %14675 = vst [vmem:[#allocation41_spill] sm:$0xff] %v11961_v24  ;;  %v1092_v22 = vrot.slane %v11930_v5, 1  ;;  %v1732_v9 = vadd.f32 %v1708_v62, %v11754_v26  ;;  %v14004_v15 = vand.u32 4294901760, %v11934_v12  ;;  %v1611_v0 = vadd.f32 %v1587_v28, %v1549_v29  ;;  %v14680_v5 = vld [vmem:[#allocation73_spill] sm:$0xff] }
 0x216   : > { %v1007_v27 = vadd.f32 %v14676_v25, %v871_v41  ;;  %v14678_v31 = vrot.slane %v14677_v19, 2  ;;  %v14006_v56 = vand.u32 4294901760, %v11936_v63  ;;  %8485 = vmatmul.mubr.f32.vlgmr.msra.gmra.mrb[2].mxu0 %v14679_v59  ;;  %v14681_v25 = vrot.slane %v14680_v5, 1 }
 0x217   : > { %v4641_v62 = vsub.f32 %v11934_v12, %v14004_v15  ;;  %v709_v28 = vmul.f32 %v14413_v49, %v11961_v24  ;;  %v2545_v29 = vadd.f32 %v2494_v30, %v2409_v39  ;;  %8491 = vmatprep.mubr.msk.f32.mxu0 %vm9095_vm2, %v14528_v32  ;;  %v1034_v30 = vmul.f32 %v14579_v60, %v11961_v24 }
 0x218   : > { %v11972_v54 = vsel %vm1200_vm1, %v2223_v4, %v14678_v31  ;;  %v1143_v41 = vadd.f32 %v1092_v22, %v1007_v27  ;;  %v1868_v26 = vadd.f32 %v14681_v25, %v1732_v9  ;;  %v11986_v31 = vmul.f32 %v14343_v58, %v11902_v1 }
 0x219   : > { %v2088_v4 = vrot.slane %v11959_v45, 1  ;;  %v4648_v27 = vsub.f32 %v11936_v63, %v14006_v56  ;;  %v14682_v9 = vrot.slane %v11718_v50, 1  ;;  %v4642_v46 = vand.u32 4294901760, %v4641_v62 }
 0x21a   : > { %v733_v15 = vadd.f32 %v709_v28, %v585_v57  ;;  %v14683_v45 = vrot.slane %v14670_v33, 1  ;;  %v1671_v56 = vadd.f32 %v11851_v34, %v1611_v0  ;;  %v14684_v49 = vrot.slane %v14668_v44, 2 }
 0x21b   : > { %v2004_v25 = vadd.f32 %v14682_v9, %v1868_v26  ;;  %v4649_v59 = vand.u32 4294901760, %v4648_v27  ;;  %v1707_v57 = vmul.f32 %v14672_v13, %v11961_v24  ;;  %v2607_v26 = vadd.f32 %v2583_v37, %v2545_v29 }
 0x21c   : > { %v821_v23 = vsel %vm791_vm0, %v819_v38, %v14683_v45  ;;  %v1280_v53 = vadd.f32 %v14684_v49, %v1143_v41  ;;  %v1501_v62 = vrot.slane %v11986_v31, 2  ;;  %v2031_v27 = vmul.f32 %v9364_v61, %v11961_v24 }
 0x21d   : > { %v2140_v10 = vadd.f32 %v2088_v4, %v2004_v25  ;;  %v870_v50 = vadd.f32 %v821_v23, %v733_v15  ;;  %v8748_v28 = vpack.c.bf16 %v4649_v59, %v4642_v46  ;;  %v14685_v33 = vrot.slane %v14677_v19, 2 }
 0x21e   : > { %v12014_v34 = vmul.f32 %v14526_v3, %v11902_v1  ;;  %v1091_v49 = vrot.slane %v1034_v30, 1  ;;  %v1731_v44 = vadd.f32 %v1707_v57, %v1671_v56  ;;  %v2704_v23 = vmul.f32 %v14527_v43, %v11902_v1 }
 0x21f   : > { %v2276_v38 = vadd.f32 %v14685_v33, %v2140_v10  ;;  %8749 = vmatpush3.bf16.msra.mxu0 %v8748_v28  ;;  %v1006_v37 = vadd.f32 %v11867_v16, %v870_v50  ;;  %v14686_v46 = vrot.slane %v14680_v5, 1  ;;  %v2087_v0 = vrot.slane %v2031_v27, 1  ;;  %v374_v28 = vpop.permute.xlu1 %373  ;;  %v14694_v33 = vld [vmem:[#allocation12_spill] sm:$0xff] }
 0x220   : > { %v14687_v19 = vrot.slane %v11711_v2, 2  ;;  %v1443_v59 = vmul.f32 %v14343_v58, %v11961_v24  ;;  %v2439_v56 = vmul.f32 %v14526_v3, %v11961_v24  ;;  %8750 = vmatprep.subr.bf16.mxu0 %v14340_v14  ;;  %v12031_v16 = vmul.f32 %v14532_v55, %v11902_v1 }
 0x221   : > { %v1817_v15 = vsel %vm791_vm0, %v1815_v8, %v14686_v46  ;;  %v2667_v5 = vadd.f32 %v11856_v20, %v2607_v26  ;;  %v2703_v8 = vmul.f32 %v14527_v43, %v11961_v24  ;;  %v8751_v2 = vpack.c.bf16 %v11936_v63, %v11934_v12  ;;  %v12053_v26 = vpop.permute.xlu0 %524 }
 0x222   : > { %v1416_v10 = vadd.f32 %v14687_v19, %v1280_v53  ;;  %v1867_v41 = vadd.f32 %v1817_v15, %v1731_v44  ;;  %14688 = vst [vmem:[#allocation39_spill] sm:$0xff] %v12031_v16  ;;  %v14689_v53 = vrot.slane %v11729_v52, 2  ;;  %v1093_v31 = vsel %vm791_vm0, %v1091_v49, %v1092_v22  ;;  %8492 = vmatmul.mubr.msk.f32.vlgmr.msra.gmra.mrb[2].mxu0 %vm3629_vm5, %v14544_v7 }
 0x223   : > { %v12044_v25 = vmul.f32 %v14532_v55, %v11961_v24  ;;  %v2496_v20 = vrot.slane %v12014_v34, 2  ;;  %v12050_v30 = vadd.f32 %v2704_v23, %v11774_v40  ;;  %v1142_v45 = vadd.f32 %v1093_v31, %v1006_v37  ;;  %8752 = vmatpush3.bf16.msra.mxu0 %v8751_v2  ;;  %14692 = vst [vmem:[#allocation25_spill] sm:$0xff] %v12053_v26  ;;  %v14696_v34 = vld [vmem:[#allocation17_spill] sm:$0xff]  ;;  %v14697_v37 = vld [vmem:[#allocation18_spill] sm:$0xff]  ;;  %v14702_v31 = vld [vmem:[#allocation23_spill] sm:$0xff] }
 0x224   : > { %v2412_v29 = vadd.f32 %v14689_v53, %v2276_v38  ;;  %v2003_v9 = vadd.f32 %v11895_v11, %v1867_v41  ;;  %v2089_v52 = vsel %vm791_vm0, %v2087_v0, %v2088_v4  ;;  %v1552_v50 = vadd.f32 %v1501_v62, %v1416_v10  ;;  %8498 = vmatprep.mubr.msk.f32.mxu0 %vm9095_vm2, %v14528_v32  ;;  %v14695_v38 = vld [vmem:[#allocation14_spill] sm:$0xff]  ;;  %v14699_v0 = vld [vmem:[#allocation15_spill] sm:$0xff] }
 0x225   : > { %14690 = vst [vmem:[#allocation75_spill] sm:$0xff] %v12044_v25  ;;  %14691 = vst [vmem:[#allocation66_spill] sm:$0xff] %v12050_v30  ;;  %v1500_v22 = vrot.slane %v1443_v59, 2  ;;  %v2495_v11 = vrot.slane %v2439_v56, 2  ;;  %v12057_v27 = vadd.f32 %v2703_v8, %v2667_v5  ;;  %v12061_v40 = vmul.f32 %v14694_v33, %v12053_v26  ;;  %8753 = vmatprep.subr.bf16.mxu0 %v14340_v14  ;;  %v12110_v23 = vpop.permute.xlu0 %378 }
 0x226   : > { %v2139_v57 = vadd.f32 %v2089_v52, %v2003_v9  ;;  %v12065_v4 = vmul.f32 %v14695_v38, %v12053_v26  ;;  %v12069_v49 = vmul.f32 %v14696_v34, %v12053_v26  ;;  %v12072_v44 = vadd.f32 %v2496_v20, %v2412_v29  ;;  %14700 = vst [vmem:[#allocation38_spill] sm:$0xff] %v12110_v23 }
 0x227   : > { %14693 = vst [vmem:[#allocation65_spill] sm:$0xff] %v12057_v27  ;;  %v12077_v46 = vmul.f32 %v14697_v37, %v12053_v26  ;;  %v12081_v15 = vmul.f32 %v14577_v36, %v12053_v26  ;;  %v563_v19 = vmul.f32 %v14699_v0, %v12053_v26  ;;  %v12087_v10 = vmul.f32 %v14573_v18, %v12053_v26 }
 0x228   : > { %v415_v59 = vmul.f32 %v14650_v48, %v374_v28  ;;  %v1279_v41 = vadd.f32 %v11944_v47, %v1142_v45  ;;  %v12093_v56 = vmul.f32 %v14411_v21, %v12053_v26  ;;  %v12096_v5 = vmul.f32 %v14651_v35, %v374_v28  ;;  %v14704_v47 = vld [vmem:[#allocation59_spill] sm:$0xff]  ;;  %v12119_v45 = vpop.permute.xlu1 %528  ;;  %v14706_v26 = vld [vmem:[#allocation30_spill] sm:$0xff] }
 0x229   : > { %14698 = vst [vmem:[#allocation36_spill] sm:$0xff] %v12081_v15  ;;  %v1172_v8 = vmul.f32 %v14652_v42, %v374_v28  ;;  %v2275_v2 = vadd.f32 %v11972_v54, %v2139_v57  ;;  %v1502_v52 = vsel %vm1200_vm1, %v1500_v22, %v1501_v62  ;;  %v12108_v39 = vmul.f32 %v14662_v6, %v374_v28  ;;  %v14701_v54 = vld [vmem:[#allocation49_spill] sm:$0xff]  ;;  %v14710_v62 = vld [vmem:[#allocation40_spill] sm:$0xff] }
 0x22a   : > { %v1415_v9 = vadd.f32 %v11873_v51, %v1279_v41  ;;  %8499 = vmatmul.mubr.f32.vlgmr.msra.gmra.mrb[2].mxu0 %v14701_v54  ;;  %v2497_v57 = vsel %vm1200_vm1, %v2495_v11, %v2496_v20  ;;  %v12114_v29 = vadd.f32 %v563_v19, %v415_v59  ;;  %v1589_v53 = vmul.f32 %v14702_v31, %v374_v28  ;;  %v14703_v51 = vld [vmem:[#allocation95_spill] sm:$0xff]  ;;  %v14708_v59 = vld [vmem:[#allocation32_spill] sm:$0xff] }
 0x22b   : > { %v2411_v41 = vadd.f32 %v14703_v51, %v2275_v2  ;;  %8755 = vmatpush3.bf16.msra.mxu0 %v14704_v47  ;;  %14705 = vst [vmem:[#allocation54_spill] sm:$0xff] %v12119_v45  ;;  %v1231_v22 = vrot.slane %v1172_v8, 2  ;;  %v2169_v15 = vmul.f32 %v14706_v26, %v374_v28  ;;  %v1590_v54 = vmul.f32 %v14702_v31, %v12110_v23  ;;  %v14707_v11 = vld [vmem:[#allocation31_spill] sm:$0xff] }
 0x22c   : > { %8505 = vmatprep.mubr.msk.f32.mxu0 %vm9095_vm2, %v14528_v32  ;;  %8756 = vmatprep.subr.bf16.mxu0 %v14340_v14  ;;  %v1551_v20 = vadd.f32 %v1502_v52, %v1415_v9  ;;  %v2585_v19 = vmul.f32 %v14707_v11, %v374_v28  ;;  %v12130_v2 = vmul.f32 %v14708_v59, %v374_v28 }
 0x22d   : > { %v12134_v51 = vmul.f32 %v14652_v42, %v12110_v23  ;;  %v12138_v1 = vmul.f32 %v14710_v62, %v374_v28  ;;  %v416_v24 = vmul.f32 %v14650_v48, %v12110_v23  ;;  %v12144_v9 = vmul.f32 %v14651_v35, %v12110_v23 }
 0x22e   : > { %14709 = vst [vmem:[#allocation62_spill] sm:$0xff] %v12130_v2  ;;  %v2547_v52 = vadd.f32 %v2497_v57, %v2411_v41  ;;  %v12148_v17 = vmul.f32 %v14662_v6, %v12110_v23  ;;  %v12152_v25 = vmul.f32 %v14706_v26, %v12110_v23  ;;  %v564_v28 = vmul.f32 %v14699_v0, %v12119_v45  ;;  %v12166_v26 = vpop.permute.xlu1 %676 }
 0x22f   : > { %14711 = vst [vmem:[#allocation99_spill] sm:$0xff] %v12138_v1  ;;  %v2226_v8 = vrot.slane %v2169_v15, 2  ;;  %v1614_v62 = vadd.f32 %v1590_v54, %v1552_v50  ;;  %v901_v16 = vmul.f32 %v14694_v33, %v12119_v45  ;;  %v12160_v30 = vmul.f32 %v14695_v38, %v12119_v45  ;;  %14712 = vst [vmem:[#allocation97_spill] sm:$0xff] %v12166_v26 }
 0x230   : > { %v1613_v57 = vadd.f32 %v1589_v53, %v1551_v20  ;;  %v1232_v27 = vrot.slane %v12134_v51, 2  ;;  %v2586_v48 = vmul.f32 %v14707_v11, %v12110_v23  ;;  %v823_v50 = vrot.slane %v12144_v9, 1  ;;  %v14714_v20 = vld [vmem:[#allocation45_spill] sm:$0xff] }
 0x231   : > { %v12172_v54 = vmul.f32 %v14708_v59, %v12110_v23  ;;  %v1650_v53 = vmul.f32 %v14573_v18, %v12119_v45  ;;  %v12177_v41 = vadd.f32 %v2585_v19, %v2547_v52  ;;  %v1819_v51 = vrot.slane %v12148_v17, 1  ;;  %v14715_v23 = vld [vmem:[#allocation24_spill] sm:$0xff] }
 0x232   : > { %8506 = vmatmul.mubr.f32.vlgmr.msra.gmra.mrb[2].mxu0 %v14714_v20  ;;  %v2227_v2 = vrot.slane %v12152_v25, 2  ;;  %v588_v38 = vadd.f32 %v564_v28, %v416_v24  ;;  %v959_v9 = vrot.slane %v901_v16, 1  ;;  %v1368_v15 = vrot.slane %v12160_v30, 2 }
 0x233   : > { %14713 = vst [vmem:[#allocation69_spill] sm:$0xff] %v12172_v54  ;;  %8512 = vmatprep.mubr.msk.f32.mxu0 %vm9095_vm2, %v14528_v32  ;;  %v1674_v1 = vadd.f32 %v1650_v53, %v1614_v62  ;;  %v712_v33 = vmul.f32 %v14715_v23, %v12166_v26  ;;  %v12187_v18 = vsel %vm1200_vm1, %v1231_v22, %v1232_v27 }
 0x234   : > { %14716 = vst [vmem:[#allocation90_spill] sm:$0xff] %v12187_v18  ;;  %v2610_v19 = vadd.f32 %v2586_v48, %v12072_v44  ;;  %v1898_v17 = vmul.f32 %v14696_v34, %v12119_v45  ;;  %v2306_v24 = vmul.f32 %v14697_v37, %v12119_v45  ;;  %v1037_v30 = vmul.f32 %v14579_v60, %v12166_v26 }
 0x235   : > { %v736_v16 = vadd.f32 %v712_v33, %v588_v38  ;;  %v1710_v62 = vmul.f32 %v14672_v13, %v12166_v26  ;;  %v12200_v22 = vsel %vm1200_vm1, %v2226_v8, %v2227_v2  ;;  %v2646_v48 = vmul.f32 %v14411_v21, %v12119_v45  ;;  %v12212_v33 = vpop.permute.xlu1 %672 }
 0x236   : > { %14717 = vst [vmem:[#allocation88_spill] sm:$0xff] %v12200_v22  ;;  %v12206_v44 = vmul.f32 %v14577_v36, %v12119_v45  ;;  %v12210_v52 = vmul.f32 %v9364_v61, %v12166_v26  ;;  %14719 = vst [vmem:[#allocation7_spill] sm:$0xff] %v12212_v33  ;;  %v14720_v38 = vrot.slane %v12061_v40, 1  ;;  %v14721_v8 = vrot.slane %v12065_v4, 2 }
 0x237   : > { %v873_v25 = vadd.f32 %v823_v50, %v736_v16  ;;  %v1734_v54 = vadd.f32 %v1710_v62, %v1674_v1  ;;  %v1955_v20 = vrot.slane %v1898_v17, 1  ;;  %v2363_v45 = vrot.slane %v2306_v24, 2 }
 0x238   : > { %14718 = vst [vmem:[#allocation100_spill] sm:$0xff] %v12206_v44  ;;  %v960_v28 = vsel %vm791_vm0, %v14720_v38, %v959_v9  ;;  %v12220_v53 = vsel %vm1200_vm1, %v14721_v8, %v1368_v15  ;;  %v2670_v37 = vadd.f32 %v2646_v48, %v2610_v19  ;;  %v14722_v22 = vand.u32 4294901760, %v11934_v12  ;;  %v14757_v44 = vld [vmem:[#allocation64_spill] sm:$0xff] }
 0x239   : > { %v14723_v18 = vand.u32 4294901760, %v11936_v63  ;;  %v1009_v21 = vadd.f32 %v959_v9, %v873_v25  ;;  %v1095_v34 = vrot.slane %v1037_v30, 1  ;;  %v1870_v40 = vadd.f32 %v1819_v51, %v1734_v54 }
 0x23a   : > { %v711_v38 = vmul.f32 %v14715_v23, %v12212_v33  ;;  %v12230_v4 = vmul.f32 %v14343_v58, %v12166_v26  ;;  %v2091_v1 = vrot.slane %v12210_v52, 1  ;;  %v1036_v19 = vmul.f32 %v14579_v60, %v12212_v33 }
 0x23b   : > { %v8757_v36 = vpack.c.bf16 %v14723_v18, %v14722_v22  ;;  %v1673_v12 = vadd.f32 %v12087_v10, %v1613_v57  ;;  %v1145_v63 = vadd.f32 %v1095_v34, %v1009_v21  ;;  %v2006_v18 = vadd.f32 %v1955_v20, %v1870_v40 }
 0x23c   : > { %v735_v9 = vadd.f32 %v711_v38, %v12114_v29  ;;  %v1709_v54 = vmul.f32 %v14672_v13, %v12212_v33  ;;  %v12242_v17 = vmul.f32 %v14526_v3, %v12166_v26  ;;  %v14724_v24 = vrot.slane %v12096_v5, 1 }
 0x23d   : > { %8758 = vmatpush3.bf16.msra.mxu0 %v8757_v36  ;;  %v2706_v36 = vmul.f32 %v14527_v43, %v12166_v26  ;;  %v12251_v21 = vmul.f32 %v14343_v58, %v12212_v33  ;;  %v1282_v29 = vadd.f32 %v1232_v27, %v1145_v63  ;;  %v2142_v57 = vadd.f32 %v2091_v1, %v2006_v18 }
 0x23e   : > { %8759 = vmatprep.subr.bf16.mxu0 %v14340_v14  ;;  %v824_v10 = vsel %vm791_vm0, %v14724_v24, %v823_v50  ;;  %v1094_v25 = vrot.slane %v1036_v19, 1  ;;  %v1733_v16 = vadd.f32 %v1709_v54, %v1673_v12  ;;  %v14725_v22 = vrot.slane %v12108_v39, 1 }
 0x23f   : > { %v872_v62 = vadd.f32 %v824_v10, %v735_v9  ;;  %v2033_v50 = vmul.f32 %v9364_v61, %v12212_v33  ;;  %v14726_v27 = vrot.slane %v12069_v49, 1  ;;  %v1418_v52 = vadd.f32 %v1368_v15, %v1282_v29  ;;  %v14736_v29 = vld [vmem:[#allocation30_spill] sm:$0xff]  ;;  %v14750_v15 = vld [vmem:[#allocation81_spill] sm:$0xff] }
 0x240   : > { %8513 = vmatmul.mubr.msk.f32.vlgmr.msra.gmra.mrb[2].mxu0 %vm3629_vm5, %v14544_v7  ;;  %v1820_v5 = vsel %vm791_vm0, %v14725_v22, %v1819_v51  ;;  %v2278_v8 = vadd.f32 %v2227_v2, %v2142_v57  ;;  %v14727_v39 = vrot.slane %v12077_v46, 2  ;;  %v14030_v38 = vrot.slane %v12230_v4, 2  ;;  %v14739_v22 = vld [vmem:[#allocation20_spill] sm:$0xff] }
 0x241   : > { %8761 = vmatpush3.bf16.msra.mxu0 %v14704_v47  ;;  %8519 = vmatprep.mubr.msk.f32.mxu0 %vm9095_vm2, %v14528_v32  ;;  %v1956_v48 = vsel %vm791_vm0, %v14726_v27, %v1955_v20  ;;  %v1869_v40 = vadd.f32 %v1820_v5, %v1733_v16  ;;  %v14029_v47 = vrot.slane %v12242_v17, 2  ;;  %v12277_v19 = vmul.f32 %v14532_v55, %v12166_v26  ;;  %v14740_v27 = vld [vmem:[#allocation12_spill] sm:$0xff] }
 0x242   : > { %8780 = vmatprep.subr.bf16.mxu0 %v14340_v14  ;;  %v12271_v51 = vsel %vm1200_vm1, %v14727_v39, %v2363_v45  ;;  %v2414_v49 = vadd.f32 %v2363_v45, %v2278_v8  ;;  %v12279_v20 = vadd.f32 %v2706_v36, %v2670_v37  ;;  %v1096_v2 = vsel %vm791_vm0, %v1094_v25, %v1095_v34  ;;  %v12297_v45 = vpop.permute.xlu0 %388  ;;  %v14754_v8 = vld [vmem:[#allocation47_spill] sm:$0xff] }
 0x243   : > { %14728 = vst [vmem:[#allocation57_spill] sm:$0xff] %v12277_v19  ;;  %v1008_v12 = vadd.f32 %v960_v28, %v872_v62  ;;  %v2090_v46 = vrot.slane %v2033_v50, 1  ;;  %v12285_v63 = vmul.f32 %v14526_v3, %v12212_v33  ;;  %v2669_v18 = vadd.f32 %v12093_v56, %v12177_v41  ;;  %14731 = vst [vmem:[#allocation6_spill] sm:$0xff] %v12297_v45  ;;  %v12299_v28 = vpop.permute.xlu1 %536  ;;  %v14775_v3 = vld [vmem:[#allocation87_spill] sm:$0xff] }
 0x244   : > { %14729 = vst [vmem:[#allocation94_spill] sm:$0xff] %v12279_v20  ;;  %v1554_v9 = vadd.f32 %v14030_v38, %v1418_v52  ;;  %v2005_v54 = vadd.f32 %v1956_v48, %v1869_v40  ;;  %v2705_v37 = vmul.f32 %v14527_v43, %v12212_v33  ;;  %v12295_v34 = vmul.f32 %v14532_v55, %v12212_v33  ;;  %v14785_v55 = vld [vmem:[#allocation67_spill] sm:$0xff] }
 0x245   : > { %14732 = vst [vmem:[#allocation63_spill] sm:$0xff] %v12299_v28  ;;  %v2550_v36 = vadd.f32 %v14029_v47, %v2414_v49  ;;  %v12305_v56 = vmul.f32 %v14651_v35, %v12297_v45  ;;  %v12309_v41 = vmul.f32 %v14652_v42, %v12297_v45  ;;  %v1592_v24 = vmul.f32 %v14702_v31, %v12297_v45 }
 0x246   : > { %14730 = vst [vmem:[#allocation98_spill] sm:$0xff] %v12295_v34  ;;  %v12315_v10 = vmul.f32 %v14662_v6, %v12297_v45  ;;  %v12319_v57 = vmul.f32 %v14736_v29, %v12297_v45  ;;  %v2588_v25 = vmul.f32 %v14707_v11, %v12297_v45  ;;  %v12325_v16 = vmul.f32 %v14708_v59, %v12297_v45 }
 0x247   : > { %14733 = vst [vmem:[#allocation92_spill] sm:$0xff] %v12305_v56  ;;  %14734 = vst [vmem:[#allocation71_spill] sm:$0xff] %v12309_v41  ;;  %v2092_v62 = vsel %vm791_vm0, %v2090_v46, %v2091_v1  ;;  %v418_v5 = vmul.f32 %v14739_v22, %v12297_v45  ;;  %v566_v50 = vmul.f32 %v14699_v0, %v12299_v28  ;;  %v14751_v46 = vrot.slane %v14750_v15, 1  ;;  %v14756_v45 = vld [vmem:[#allocation70_spill] sm:$0xff]  ;;  %v14763_v41 = vld [vmem:[#allocation43_spill] sm:$0xff] }
 0x248   : > { %14735 = vst [vmem:[#allocation74_spill] sm:$0xff] %v12315_v10  ;;  %14737 = vst [vmem:[#allocation101_spill] sm:$0xff] %v12319_v57  ;;  %8520 = vmatmul.mubr.msk.f32.vlgmr.msra.gmra.mrb[2].mxu0 %vm3629_vm5, %v14544_v7  ;;  %v12336_v48 = vmul.f32 %v14740_v27, %v12299_v28  ;;  %v12340_v52 = vadd.f32 %v1096_v2, %v1008_v12  ;;  %v12343_v40 = vadd.f32 %v2705_v37, %v2669_v18  ;;  %v12372_v2 = vpop.permute.xlu0 %532  ;;  %v14752_v18 = vld [vmem:[#allocation35_spill] sm:$0xff]  ;;  %v14767_v10 = vld [vmem:[#allocation78_spill] sm:$0xff] }
 0x249   : > { %14738 = vst [vmem:[#allocation8_spill] sm:$0xff] %v12325_v16  ;;  %8568 = vmatprep.mubr.msk.f32.mxu0 %vm9095_vm2, %v14528_v32  ;;  %v12346_v39 = vadd.f32 %v2092_v62, %v2005_v54  ;;  %v1616_v30 = vadd.f32 %v1592_v24, %v1554_v9  ;;  %v12352_v38 = vadd.f32 %v2588_v25, %v2550_v36  ;;  %v14743_v54 = vld [vmem:[#allocation19_spill] sm:$0xff]  ;;  %v14744_v62 = vld [vmem:[#allocation17_spill] sm:$0xff]  ;;  %v14746_v36 = vld [vmem:[#allocation34_spill] sm:$0xff]  ;;  %v14753_v49 = vrot.slane %v14752_v18, 1 }
 0x24a   : > { %14741 = vst [vmem:[#allocation96_spill] sm:$0xff] %v12336_v48  ;;  %14742 = vst [vmem:[#allocation56_spill] sm:$0xff] %v12343_v40  ;;  %v12355_v12 = vadd.f32 %v566_v50, %v418_v5  ;;  %v1652_v37 = vmul.f32 %v14743_v54, %v12299_v28  ;;  %v12362_v1 = vmul.f32 %v14744_v62, %v12299_v28  ;;  %v14745_v9 = vld [vmem:[#allocation33_spill] sm:$0xff]  ;;  %v14748_v5 = vld [vmem:[#allocation42_spill] sm:$0xff]  ;;  %v14755_v26 = vrot.slane %v14754_v8, 1 }
 0x24b   : > { %v12366_v24 = vmul.f32 %v14745_v9, %v12299_v28  ;;  %v12370_v25 = vmul.f32 %v14746_v36, %v12299_v28  ;;  %v14749_v50 = vrot.slane %v14748_v5, 1  ;;  %v12386_v34 = vmul.f32 %v14699_v0, %v12372_v2  ;;  %v14759_v16 = vld [vmem:[#allocation65_spill] sm:$0xff]  ;;  %v14777_v56 = vld [vmem:[#allocation72_spill] sm:$0xff] }
 0x24c   : > { %v2812_v33 = vsel %vm791_vm0, %v14755_v26, %v14753_v49  ;;  %v12393_v57 = vadd.f32 %v1652_v37, %v1616_v30  ;;  %v14764_v26 = vrot.slane %v14763_v41, 1  ;;  %v14772_v37 = vld [vmem:[#allocation84_spill] sm:$0xff]  ;;  %v14778_v28 = vld [vmem:[#allocation5_spill] sm:$0xff] }
 0x24d   : > { %14747 = vst [vmem:[#allocation55_spill] sm:$0xff] %v12370_v25  ;;  %v2809_v47 = vsel %vm791_vm0, %v14751_v46, %v14749_v50  ;;  %v14758_v20 = vmov %v14749_v50  ;;  %v2863_v15 = vadd.f32 %v2812_v33, %v14759_v16  ;;  %v14761_v46 = vld [vmem:[#allocation66_spill] sm:$0xff]  ;;  %v14762_v50 = vmov %v14753_v49  ;;  %v14765_v49 = vld [vmem:[#allocation77_spill] sm:$0xff]  ;;  %v14789_v32 = vld [vmem:[#allocation60_spill] sm:$0xff] }
 0x24e   : > { %v2861_v19 = vadd.f32 %v2809_v47, %v14756_v45  ;;  %v2862_v40 = vadd.f32 %v14758_v20, %v14757_v44  ;;  %14760 = vst [vmem:[#allocation89_spill] sm:$0xff] %v12393_v57  ;;  %v2864_v8 = vadd.f32 %v14762_v50, %v14761_v46  ;;  %v14766_v7 = vrot.slane %v14765_v49, 1  ;;  %v14769_v45 = vld [vmem:[#allocation93_spill] sm:$0xff]  ;;  %v14774_v50 = vld [vmem:[#allocation39_spill] sm:$0xff] }
 0x24f   : > { %v14768_v47 = vrot.slane %v14767_v10, 1  ;;  %v14770_v48 = vrot.slane %v14769_v45, 1  ;;  %v14771_v33 = vmov %v14764_v26  ;;  %v3080_v18 = vrot.slane %v14772_v37, 1 }
 0x250   : > { %v2945_v0 = vsel %vm791_vm0, %v14766_v7, %v14764_v26  ;;  %v2998_v30 = vadd.f32 %v14771_v33, %v2862_v40  ;;  %v3083_v49 = vrot.slane %v14774_v50, 1  ;;  %v14776_v7 = vld [vmem:[#allocation40_spill] sm:$0xff]  ;;  %v14780_v40 = vld [vmem:[#allocation46_spill] sm:$0xff] }
 0x251   : > { %v2948_v44 = vsel %vm791_vm0, %v14770_v48, %v14768_v47  ;;  %v2997_v20 = vadd.f32 %v2945_v0, %v2861_v19  ;;  %v14773_v5 = vmov %v14768_v47  ;;  %v3162_v26 = vmul.f32 %v14776_v7, %v14775_v3  ;;  %v14782_v47 = vld [vmem:[#allocation9_spill] sm:$0xff] }
 0x252   : > { %v2999_v16 = vadd.f32 %v2948_v44, %v2863_v15  ;;  %v3000_v46 = vadd.f32 %v14773_v5, %v2864_v8  ;;  %v3164_v45 = vmul.f32 %v14776_v7, %v14777_v56  ;;  %v14779_v48 = vrot.slane %v14778_v28, 1  ;;  %v14781_v15 = vld [vmem:[#allocation48_spill] sm:$0xff]  ;;  %v14783_v8 = vld [vmem:[#allocation75_spill] sm:$0xff] }
 0x253   : > { %v3134_v41 = vadd.f32 %v3080_v18, %v2998_v30  ;;  %v3297_v0 = vmul.f32 %v14781_v15, %v14780_v40  ;;  %v3298_v10 = vmul.f32 %v14781_v15, %v14782_v47  ;;  %v14784_v44 = vrot.slane %v14783_v8, 1 }
 0x254   : > { %v3081_v19 = vsel %vm791_vm0, %v14779_v48, %v3080_v18  ;;  %v3136_v3 = vadd.f32 %v3083_v49, %v3000_v46  ;;  %v3216_v5 = vrot.slane %v3162_v26, 2  ;;  %v3219_v56 = vrot.slane %v3164_v45, 2  ;;  %v14786_v48 = vld [vmem:[#allocation37_spill] sm:$0xff]  ;;  %v14787_v18 = vld [vmem:[#allocation76_spill] sm:$0xff]  ;;  %v14810_v26 = vld [vmem:[#allocation26_spill] sm:$0xff] }
 0x255   : > { %v3084_v33 = vsel %vm791_vm0, %v14784_v44, %v3083_v49  ;;  %v3133_v37 = vadd.f32 %v3081_v19, %v2997_v20  ;;  %v3299_v28 = vmul.f32 %v14781_v15, %v14785_v55  ;;  %v3300_v30 = vmul.f32 %v14781_v15, %v14786_v48  ;;  %v14791_v48 = vld [vmem:[#allocation61_spill] sm:$0xff] }
 0x256   : > { %v3135_v50 = vadd.f32 %v3084_v33, %v2999_v16  ;;  %v14788_v40 = vrot.slane %v14787_v18, 2  ;;  %v3270_v47 = vadd.f32 %v3216_v5, %v3134_v41  ;;  %v3351_v57 = vrot.slane %v3297_v0, 2  ;;  %v14792_v18 = vld [vmem:[#allocation50_spill] sm:$0xff]  ;;  %v14793_v41 = vld [vmem:[#allocation68_spill] sm:$0xff] }
 0x257   : > { %v3352_v8 = vrot.slane %v3298_v10, 2  ;;  %v14790_v44 = vrot.slane %v14789_v32, 2  ;;  %v3272_v16 = vadd.f32 %v3219_v56, %v3136_v3  ;;  %v3354_v49 = vrot.slane %v3299_v28, 2  ;;  %v14794_v10 = vld [vmem:[#allocation41_spill] sm:$0xff] }
 0x258   : > { %v3217_v58 = vsel %vm1200_vm1, %v14788_v40, %v3216_v5  ;;  %v3355_v19 = vrot.slane %v3300_v30, 2  ;;  %v3433_v40 = vmul.f32 %v14792_v18, %v14791_v48  ;;  %v3434_v0 = vmul.f32 %v14792_v18, %v14793_v41  ;;  %v14795_v5 = vld [vmem:[#allocation80_spill] sm:$0xff] }
 0x259   : > { %v3220_v20 = vsel %vm1200_vm1, %v14790_v44, %v3219_v56  ;;  %v3269_v46 = vadd.f32 %v3217_v58, %v3133_v37  ;;  %v3353_v45 = vsel %vm1200_vm1, %v3351_v57, %v3352_v8  ;;  %v3406_v33 = vadd.f32 %v3352_v8, %v3270_v47 }
 0x25a   : > { %v3271_v55 = vadd.f32 %v3220_v20, %v3135_v50  ;;  %v3435_v32 = vmul.f32 %v14792_v18, %v14794_v10  ;;  %v3356_v58 = vsel %vm1200_vm1, %v3354_v49, %v3355_v19  ;;  %v3408_v3 = vadd.f32 %v3355_v19, %v3272_v16 }
 0x25b   : > { %v3405_v37 = vadd.f32 %v3353_v45, %v3269_v46  ;;  %v3436_v50 = vmul.f32 %v14792_v18, %v14795_v5  ;;  %v3487_v57 = vrot.slane %v3433_v40, 2  ;;  %v3488_v28 = vrot.slane %v3434_v0, 2  ;;  %v384_v46 = vpop.permute.xlu1 %383 }
 0x25c   : > { %v3407_v56 = vadd.f32 %v3356_v58, %v3271_v55  ;;  %v3490_v30 = vrot.slane %v3435_v32, 2  ;;  %v12451_v47 = vmul.f32 %v14740_v27, %v12372_v2  ;;  %v12455_v8 = vmul.f32 %v14743_v54, %v12372_v2  ;;  %v14797_v27 = vld [vmem:[#allocation90_spill] sm:$0xff]  ;;  %v14798_v58 = vld [vmem:[#allocation52_spill] sm:$0xff] }
 0x25d   : > { %v12459_v44 = vmul.f32 %v14744_v62, %v12372_v2  ;;  %v3491_v20 = vrot.slane %v3436_v50, 2  ;;  %v12463_v16 = vmul.f32 %v14746_v36, %v12372_v2  ;;  %v3489_v49 = vsel %vm1200_vm1, %v3487_v57, %v3488_v28 }
 0x25e   : > { %v3542_v55 = vadd.f32 %v3488_v28, %v3406_v33  ;;  %v1281_v45 = vadd.f32 %v14797_v27, %v12340_v52  ;;  %v12470_v19 = vadd.f32 %v12366_v24, %v12352_v38  ;;  %v3541_v40 = vadd.f32 %v3489_v49, %v3405_v37 }
 0x25f   : > { %14796 = vst [vmem:[#allocation83_spill] sm:$0xff] %v12463_v16  ;;  %v3492_v48 = vsel %vm1200_vm1, %v3490_v30, %v3491_v20  ;;  %v3544_v41 = vadd.f32 %v3491_v20, %v3408_v3  ;;  %v12476_v10 = vmul.f32 %v14745_v9, %v12372_v2  ;;  %v417_v50 = vmul.f32 %v14739_v22, %v384_v46  ;;  %v14799_v20 = vld [vmem:[#allocation88_spill] sm:$0xff] }
 0x260   : > { %v3543_v32 = vadd.f32 %v3492_v48, %v3407_v56  ;;  %v3572_v33 = vadd.f32 %v14798_v58, %v3542_v55  ;;  %v3571_v38 = vadd.f32 %v14798_v58, %v3541_v40  ;;  %v1417_v57 = vadd.f32 %v12220_v53, %v1281_v45  ;;  %v12492_v55 = vpop.permute.xlu1 %684 }
 0x261   : > { %v3574_v24 = vadd.f32 %v14798_v58, %v3544_v41  ;;  %v12488_v30 = vmul.f32 %v14651_v35, %v384_v46  ;;  %v2277_v49 = vadd.f32 %v14799_v20, %v12346_v39  ;;  %14800 = vst [vmem:[#allocation82_spill] sm:$0xff] %v12492_v55  ;;  %v14801_v40 = vrot.slane %v12230_v4, 2 }
 0x262   : > { %v3573_v3 = vadd.f32 %v14798_v58, %v3543_v32  ;;  %v3596_v28 = vmax.f32 %v3572_v33, 0.0  ;;  %v3595_v27 = vmax.f32 %v3571_v38, 0.0  ;;  %v14802_v41 = vrot.slane %v12251_v21, 2 }
 0x263   : > { %v3598_v56 = vmax.f32 %v3574_v24, 0.0  ;;  %v12500_v53 = vmul.f32 %v14652_v42, %v384_v46  ;;  %v12503_v35 = vmul.f32 %v14662_v6, %v384_v46  ;;  %v12506_v32 = vmul.f32 %v14736_v29, %v384_v46 }
 0x264   : > { %v3597_v48 = vmax.f32 %v3573_v3, 0.0  ;;  %v1505_v22 = vsel %vm1200_vm1, %v14802_v41, %v14801_v40  ;;  %v2413_v39 = vadd.f32 %v12271_v51, %v2277_v49  ;;  %v14803_v33 = vrot.slane %v12242_v17, 2  ;;  %v14809_v49 = vld [vmem:[#allocation89_spill] sm:$0xff] }
 0x265   : > { %v3614_v45 = vadd.f32 %v3598_v56, %v3596_v28  ;;  %v14804_v4 = vrot.slane %v12285_v63, 2  ;;  %v589_v38 = vadd.f32 %v12386_v34, %v417_v50  ;;  %v1553_v42 = vadd.f32 %v1505_v22, %v1417_v57  ;;  %v12528_v57 = vpop.permute.xlu1 %680 }
 0x266   : > { %v3613_v58 = vadd.f32 %v3597_v48, %v3595_v27  ;;  %v825_v3 = vrot.slane %v12488_v30, 1  ;;  %v12518_v56 = vmul.f32 %v14708_v59, %v384_v46  ;;  %v1591_v17 = vmul.f32 %v14702_v31, %v384_v46  ;;  %14806 = vst [vmem:[#allocation21_spill] sm:$0xff] %v12528_v57 }
 0x267   : > { %v2500_v21 = vsel %vm1200_vm1, %v14804_v4, %v14803_v33  ;;  %v5020_v24 = vsel %vm1200_vm1, %v3614_v45, 0  ;;  %v2587_v34 = vmul.f32 %v14707_v11, %v384_v46  ;;  %v12526_v50 = vmul.f32 %v14776_v7, %v384_v46 }
 0x268   : > { %v2549_v28 = vadd.f32 %v2500_v21, %v2413_v39  ;;  %v5023_v20 = vand.u32 4294901760, %v3613_v58  ;;  %v5026_v51 = vand.u32 4294901760, %v5020_v24  ;;  %v1615_v41 = vadd.f32 %v1591_v17, %v1553_v42  ;;  %v14807_v42 = vld [vmem:[#allocation44_spill] sm:$0xff] }
 0x269   : > { %14805 = vst [vmem:[#allocation86_spill] sm:$0xff] %v12526_v50  ;;  %v714_v39 = vmul.f32 %v14715_v23, %v12492_v55  ;;  %v12541_v33 = vmul.f32 %v14579_v60, %v12492_v55  ;;  %v1712_v46 = vmul.f32 %v14672_v13, %v12492_v55  ;;  %v1038_v21 = vmul.f32 %v14579_v60, %v12528_v57 }
 0x26a   : > { %v12530_v30 = vpack.c.bf16 %v5026_v51, %v5023_v20  ;;  %v12532_v48 = vsub.f32 %v3613_v58, %v5023_v20  ;;  %v12534_v40 = vsub.f32 %v5020_v24, %v5026_v51  ;;  %v2611_v22 = vadd.f32 %v2587_v34, %v2549_v28 }
 0x26b   : > { %v12553_v24 = vmul.f32 %v9364_v61, %v12492_v55  ;;  %v2708_v28 = vmul.f32 %v14527_v43, %v12492_v55  ;;  %v713_v20 = vmul.f32 %v14715_v23, %v12528_v57  ;;  %v1675_v17 = vadd.f32 %v12455_v8, %v1615_v41 }
 0x26c   : > { %8764 = vmatpush3.bf16.msra.mxu1 %v12530_v30  ;;  %v14056_v58 = vand.u32 4294901760, %v12532_v48  ;;  %v14057_v4 = vand.u32 4294901760, %v12534_v40  ;;  %v1711_v34 = vmul.f32 %v14672_v13, %v12528_v57  ;;  %v738_v37 = vadd.f32 %v714_v39, %v12355_v12 }
 0x26d   : > { %8765 = vmatprep.subr.bf16.mxu1 %v14340_v14  ;;  %v2035_v23 = vmul.f32 %v9364_v61, %v12528_v57  ;;  %v2671_v0 = vadd.f32 %v12476_v10, %v2611_v22  ;;  %v2707_v45 = vmul.f32 %v14527_v43, %v12528_v57  ;;  %v14808_v8 = vmov 0.0   ;;  %v14812_v22 = vld [vmem:[#allocation58_spill] sm:$0xff] }
 0x26e   : > { %v5103_v51 = vsub.f32 %v12532_v48, %v14056_v58  ;;  %v5110_v60 = vsub.f32 %v12534_v40, %v14057_v4  ;;  %v1097_v41 = vrot.slane %v1038_v21, 1  ;;  %v1736_v52 = vadd.f32 %v1712_v46, %v14809_v49  ;;  %v14816_v21 = vld [vmem:[#allocation63_spill] sm:$0xff] }
 0x26f   : > { %8527 = vmatmul.mubr.f32.vlgmr.msra.gmra.mrb[2].mxu1 %v14807_v42  ;;  %v737_v39 = vadd.f32 %v713_v20, %v589_v38  ;;  %v1447_v63 = vmul.f32 %v14810_v26, %v12528_v57  ;;  %v12584_v10 = vadd.f32 %v2708_v28, %v12470_v19  ;;  %v12588_v5 = vmul.f32 %v14812_v22, %v12492_v55  ;;  %v14817_v28 = vld [vmem:[#allocation14_spill] sm:$0xff] }
 0x270   : > { %v5104_v4 = vand.u32 4294901760, %v5103_v51  ;;  %v5111_v27 = vand.u32 4294901760, %v5110_v60  ;;  %8533 = vmatprep.mubr.msk.f32.mxu1 %vm9095_vm2, %v14808_v8  ;;  %v1735_v60 = vadd.f32 %v1711_v34, %v1675_v17  ;;  %v2093_v58 = vrot.slane %v2035_v23, 1  ;;  %v14820_v34 = vld [vmem:[#allocation18_spill] sm:$0xff] }
 0x271   : > { %14811 = vst [vmem:[#allocation22_spill] sm:$0xff] %v12584_v10  ;;  %14813 = vst [vmem:[#allocation29_spill] sm:$0xff] %v12588_v5  ;;  %v12590_v42 = vadd.f32 %v2707_v45, %v2671_v0  ;;  %v12594_v49 = vmul.f32 %v14812_v22, %v12528_v57  ;;  %v8769_v38 = vpack.c.bf16 %v12534_v40, %v12532_v48  ;;  %v14815_v19 = vrot.slane %v12541_v33, 1 }
 0x272   : > { %v8766_v51 = vpack.c.bf16 %v5111_v27, %v5104_v4  ;;  %v12603_v20 = vmul.f32 %v14817_v28, %v14816_v21  ;;  %v12607_v0 = vmul.f32 %v14810_v26, %v12492_v55  ;;  %v14818_v27 = vld [vmem:[#allocation92_spill] sm:$0xff]  ;;  %v1506_v17 = vrot.slane %v1447_v63, 2 }
 0x273   : > { %14814 = vst [vmem:[#allocation53_spill] sm:$0xff] %v12594_v49  ;;  %v1099_v46 = vsel %vm791_vm0, %v1097_v41, %v14815_v19  ;;  %v14819_v45 = vrot.slane %v14818_v27, 1  ;;  %v12615_v23 = vmul.f32 %v14820_v34, %v14816_v21  ;;  %v14821_v41 = vld [vmem:[#allocation28_spill] sm:$0xff]  ;;  %v14824_v5 = vrot.slane %v12451_v47, 1 }
 0x274   : > { %8767 = vmatpush3.bf16.msra.mxu1 %v8766_v51  ;;  %v2443_v51 = vmul.f32 %v14821_v41, %v12528_v57  ;;  %v12621_v12 = vmul.f32 %v14821_v41, %v12492_v55  ;;  %v14822_v26 = vld [vmem:[#allocation96_spill] sm:$0xff]  ;;  %v1311_v63 = vmul.f32 %v14817_v28, %v12372_v2  ;;  %v14827_v16 = vrot.slane %v12503_v35, 1 }
 0x275   : > { %v827_v4 = vsel %vm791_vm0, %v825_v3, %v14819_v45  ;;  %8768 = vmatprep.subr.bf16.mxu1 %v14340_v14  ;;  %v14823_v50 = vrot.slane %v14822_v26, 1  ;;  %v14825_v45 = vld [vmem:[#allocation74_spill] sm:$0xff]  ;;  %v14829_v55 = vrot.slane %v12553_v24, 1  ;;  %v14066_v28 = vrot.slane %v12607_v0, 2 }
 0x276   : > { %v874_v19 = vadd.f32 %v827_v4, %v737_v39  ;;  %v14826_v21 = vrot.slane %v14825_v45, 1  ;;  %v14828_v4 = vld [vmem:[#allocation51_spill] sm:$0xff]  ;;  %v1370_v10 = vrot.slane %v1311_v63, 2  ;;  %v14830_v35 = vrot.slane %v12362_v1, 1  ;;  %v12650_v39 = vpop.f32.mrb[0].mxu0 }
 0x277   : > { %v963_v3 = vsel %vm791_vm0, %v14824_v5, %v14823_v50  ;;  %8534 = vmatmul.mubr.msk.f32.vlgmr.msra.gmra.mrb[2].mxu1 %vm3629_vm5, %v14828_v4  ;;  %v2095_v47 = vsel %vm791_vm0, %v2093_v58, %v14829_v55  ;;  %v1371_v50 = vrot.slane %v12603_v20, 2  ;;  %v2366_v55 = vrot.slane %v12615_v23, 2  ;;  %v8437_v20 = vpop.f32.mrb[1].mxu0  ;;  %v14832_v63 = vld [vmem:[#allocation71_spill] sm:$0xff]  ;;  %6407 = vperm.xlu0 %9000, %v12650_v39  }
 0x278   : > { %v1823_v57 = vsel %vm791_vm0, %v14827_v16, %v14826_v21  ;;  %v1010_v25 = vadd.f32 %v963_v3, %v874_v19  ;;  %8770 = vmatpush3.bf16.msra.mxu1 %v8769_v38  ;;  %v14831_v16 = vrot.slane %v12459_v44, 1  ;;  %8540 = vmatprep.mubr.msk.f32.mxu1 %vm9095_vm2, %v14808_v8  ;;  %v2307_v38 = vmul.f32 %v14820_v34, %v12372_v2 }
 0x279   : > { %v1871_v5 = vadd.f32 %v1823_v57, %v1735_v60  ;;  %v1560_v57 = vpop.permute.xlu1 %1559  ;;  %8771 = vmatprep.subr.bf16.mxu1 %v14340_v14  ;;  %v1508_v44 = vsel %vm1200_vm1, %v1506_v17, %v14066_v28  ;;  %v2501_v19 = vrot.slane %v2443_v51, 2  ;;  %v2502_v3 = vrot.slane %v12621_v12, 2  ;;  %v14836_v12 = vld [vmem:[#allocation101_spill] sm:$0xff] }
 0x27a   : > { %v1959_v21 = vsel %vm791_vm0, %v14831_v16, %v14830_v35  ;;  %v1146_v58 = vadd.f32 %v1099_v46, %v1010_v25  ;;  %v14833_v35 = vrot.slane %v14832_v63, 2  ;;  %v14834_v23 = vrot.slane %v12500_v53, 2 }
 0x27b   : > { %v2007_v60 = vadd.f32 %v1959_v21, %v1871_v5  ;;  %v2365_v16 = vrot.slane %v2307_v38, 2  ;;  %v14835_v21 = vrot.slane %v14818_v27, 1  ;;  %v1372_v49 = vsel %vm1200_vm1, %v1370_v10, %v1371_v50  ;;  %v1565_v10 = vpop.permute.xlu0 %1564 }
 0x27c   : > { %v1236_v25 = vsel %vm1200_vm1, %v14834_v23, %v14833_v35  ;;  %v12670_v17 = vmul.f32 %v14662_v6, %v1560_v57  ;;  %v14837_v51 = vrot.slane %v14836_v12, 2  ;;  %v14838_v28 = vrot.slane %v12506_v32, 2 }
 0x27d   : > { %v1283_v46 = vadd.f32 %v1236_v25, %v1146_v58  ;;  %v2143_v5 = vadd.f32 %v2095_v47, %v2007_v60  ;;  %v875_v20 = vadd.f32 %v14835_v21, %v738_v37  ;;  %v14839_v35 = vrot.slane %v14825_v45, 1 }
 0x27e   : > { %v2231_v53 = vsel %vm1200_vm1, %v14838_v28, %v14837_v51  ;;  %v1593_v47 = vmul.f32 %v14702_v31, %v1560_v57  ;;  %v14840_v37 = vrot.slane %v14822_v26, 1  ;;  %v2503_v38 = vsel %vm1200_vm1, %v2501_v19, %v2502_v3  ;;  %v14844_v19 = vld [vmem:[#allocation49_spill] sm:$0xff] }
 0x27f   : > { %v1872_v23 = vadd.f32 %v14839_v35, %v1736_v52  ;;  %v1419_v58 = vadd.f32 %v1372_v49, %v1283_v46  ;;  %v2279_v60 = vadd.f32 %v2231_v53, %v2143_v5  ;;  %v12684_v25 = vmul.f32 %v14736_v29, %v1560_v57  ;;  %8541 = vmatmul.mubr.f32.vlgmr.msra.gmra.mrb[2].mxu1 %v14844_v19 }
 0x280   : > { %v1011_v27 = vadd.f32 %v14840_v37, %v875_v20  ;;  %v2367_v32 = vsel %vm1200_vm1, %v2365_v16, %v2366_v55  ;;  %v14841_v28 = vrot.slane %v12362_v1, 1  ;;  %v14842_v45 = vmov 1   ;;  %v1625_v20 = vpop.permute.xlu1 %1624  ;;  %8773 = vmatpush3.bf16.msra.mxu1 %v12530_v30  ;;  %8547 = vmatprep.mubr.msk.f32.mxu1 %vm9095_vm2, %v14808_v8 }
 0x281   : > { %9003 = vset.pattern.permute.xlu0 %v14842_v45  ;;  %v2415_v52 = vadd.f32 %v2367_v32, %v2279_v60  ;;  %v12691_v49 = vmul.f32 %v14708_v59, %v1560_v57  ;;  %v3169_v26 = vmul.f32 %v14776_v7, %v1560_v57  ;;  %v14843_v46 = vrot.slane %v12541_v33, 1  ;;  %8774 = vmatprep.subr.bf16.mxu1 %v14340_v14 }
 0x282   : > { %v2008_v21 = vadd.f32 %v14841_v28, %v1872_v23  ;;  %v14845_v16 = vrot.slane %v12553_v24, 1  ;;  %v12701_v53 = vmul.f32 %v14662_v6, %v1565_v10  ;;  %v12704_v35 = vmul.f32 %v14736_v29, %v1565_v10 }
 0x283   : > { %v1147_v5 = vadd.f32 %v14843_v46, %v1011_v27  ;;  %v1555_v33 = vadd.f32 %v1508_v44, %v1419_v58  ;;  %v2589_v23 = vmul.f32 %v14707_v11, %v1560_v57  ;;  %v14846_v60 = vrot.slane %v14832_v63, 2 }
 0x284   : > { %v2144_v1 = vadd.f32 %v14845_v16, %v2008_v21  ;;  %v12713_v24 = vmul.f32 %v14776_v7, %v1565_v10  ;;  %v2551_v29 = vadd.f32 %v2503_v38, %v2415_v52  ;;  %v14847_v27 = vmov %v14837_v51 }
 0x285   : > { %v1284_v37 = vadd.f32 %v14846_v60, %v1147_v5  ;;  %v12720_v28 = vmul.f32 %v14708_v59, %v1565_v10  ;;  %v3227_v57 = vrot.slane %v3169_v26, 2  ;;  %v1594_v63 = vmul.f32 %v14702_v31, %v1565_v10  ;;  %v1621_v26 = vpop.permute.xlu0 %1620 }
 0x286   : > { %v2280_v32 = vadd.f32 %v14847_v27, %v2144_v1  ;;  %v1825_v46 = vrot.slane %v12701_v53, 1  ;;  %v2590_v16 = vmul.f32 %v14707_v11, %v1565_v10  ;;  %v1617_v38 = vadd.f32 %v1593_v47, %v1555_v33  ;;  %v14849_v33 = vld [vmem:[#allocation45_spill] sm:$0xff] }
 0x287   : > { %v1420_v58 = vadd.f32 %v1371_v50, %v1284_v37  ;;  %v14848_v12 = vrot.slane %v12607_v0, 2  ;;  %v14067_v1 = vrot.slane %v12713_v24, 2  ;;  %v12731_v60 = vmul.f32 %v14744_v62, %v1625_v20  ;;  %v1685_v50 = vpop.permute.xlu1 %1684  ;;  %8548 = vmatmul.mubr.f32.vlgmr.msra.gmra.mrb[2].mxu1 %v14849_v33 }
 0x288   : > { %v2416_v21 = vadd.f32 %v2366_v55, %v2280_v32  ;;  %v2613_v37 = vadd.f32 %v2589_v23, %v2551_v29  ;;  %v2820_v55 = vrot.slane %v12720_v28, 1  ;;  %v1654_v53 = vmul.f32 %v14743_v54, %v1625_v20  ;;  %8554 = vmatprep.mubr.msk.f32.mxu1 %vm9095_vm2, %v14808_v8 }
 0x289   : > { %v1556_v52 = vadd.f32 %v14848_v12, %v1420_v58  ;;  %v12736_v10 = vmul.f32 %v14820_v34, %v1625_v20  ;;  %v12739_v0 = vmul.f32 %v14746_v36, %v1625_v20  ;;  %v12742_v47 = vmul.f32 %v14781_v15, %v1625_v20 }
 0x28a   : > { %v2552_v31 = vadd.f32 %v2502_v3, %v2416_v21  ;;  %v2650_v23 = vmul.f32 %v14745_v9, %v1625_v20  ;;  %v1653_v3 = vmul.f32 %v14743_v54, %v1621_v26  ;;  %v1901_v29 = vmul.f32 %v14744_v62, %v1621_v26 }
 0x28b   : > { %v1618_v27 = vadd.f32 %v1594_v63, %v1556_v52  ;;  %v12753_v28 = vsel %vm1200_vm1, %v3227_v57, %v14067_v1  ;;  %v1961_v58 = vrot.slane %v12731_v60, 1  ;;  %v2649_v63 = vmul.f32 %v14745_v9, %v1621_v26  ;;  %v1681_v60 = vpop.permute.xlu1 %1680 }
 0x28c   : > { %v2614_v32 = vadd.f32 %v2590_v16, %v2552_v31  ;;  %v2897_v21 = vmul.f32 %v14746_v36, %v1621_v26  ;;  %v3305_v54 = vmul.f32 %v14781_v15, %v1621_v26  ;;  %v1714_v62 = vmul.f32 %v14672_v13, %v1685_v50 }
 0x28d   : > { %v1678_v16 = vadd.f32 %v1654_v53, %v1618_v27  ;;  %v2956_v12 = vrot.slane %v12739_v0, 1  ;;  %v12763_v31 = vmul.f32 %v14820_v34, %v1621_v26  ;;  %v2710_v57 = vmul.f32 %v14527_v43, %v1685_v50 }
 0x28e   : > { %v2674_v20 = vadd.f32 %v2650_v23, %v2614_v32  ;;  %v1677_v6 = vadd.f32 %v1653_v3, %v1617_v38  ;;  %v1960_v5 = vrot.slane %v1901_v29, 1  ;;  %v2038_v1 = vmul.f32 %v9364_v61, %v1685_v50 }
 0x28f   : > { %v3034_v53 = vmul.f32 %v14812_v22, %v1685_v50  ;;  %v2673_v27 = vadd.f32 %v2649_v63, %v2613_v37  ;;  %v2955_v32 = vrot.slane %v2897_v21, 1  ;;  %v12769_v23 = vmul.f32 %v14821_v41, %v1685_v50 }
 0x290   : > { %v2734_v0 = vadd.f32 %v2710_v57, %v2674_v20  ;;  %v3363_v44 = vrot.slane %v3305_v54, 2  ;;  %v1738_v52 = vadd.f32 %v1714_v62, %v1678_v16  ;;  %v14850_v34 = vand.u32 4294901760, %v12532_v48 }
 0x291   : > { %v14851_v26 = vand.u32 4294901760, %v12534_v40  ;;  %v1713_v38 = vmul.f32 %v14672_v13, %v1681_v60  ;;  %v2037_v29 = vmul.f32 %v9364_v61, %v1681_v60  ;;  %v2445_v33 = vmul.f32 %v14821_v41, %v1681_v60 }
 0x292   : > { %v2870_v3 = vadd.f32 %v2820_v55, %v2734_v0  ;;  %v2709_v37 = vmul.f32 %v14527_v43, %v1681_v60  ;;  %v2097_v63 = vrot.slane %v2038_v1, 1  ;;  %v3092_v21 = vrot.slane %v3034_v53, 1 }
 0x293   : > { %v8775_v51 = vpack.c.bf16 %v14851_v26, %v14850_v34  ;;  %v1737_v20 = vadd.f32 %v1713_v38, %v1677_v6  ;;  %v3033_v16 = vmul.f32 %v14812_v22, %v1681_v60  ;;  %v14852_v48 = vrot.slane %v12670_v17, 1  ;;  %v2558_v26 = vpop.permute.xlu1 %2557 }
 0x294   : > { %v3006_v54 = vadd.f32 %v2956_v12, %v2870_v3  ;;  %v2096_v62 = vrot.slane %v2037_v29, 1  ;;  %v2733_v13 = vadd.f32 %v2709_v37, %v2673_v27  ;;  %v1874_v61 = vadd.f32 %v1825_v46, %v1738_v52 }
 0x295   : > { %8776 = vmatpush3.bf16.msra.mxu1 %v8775_v51  ;;  %v1826_v40 = vsel %vm791_vm0, %v14852_v48, %v1825_v46  ;;  %v12785_v41 = vmul.f32 %v14792_v18, %v1685_v50  ;;  %v14853_v1 = vrot.slane %v12691_v49, 1  ;;  %v2504_v53 = vrot.slane %v2445_v33, 2 }
 0x296   : > { %8777 = vmatprep.subr.bf16.mxu1 %v14340_v14  ;;  %v1873_v57 = vadd.f32 %v1826_v40, %v1737_v20  ;;  %v3142_v6 = vadd.f32 %v3092_v21, %v3006_v54  ;;  %v12791_v0 = vmul.f32 %v14792_v18, %v1681_v60  ;;  %v1962_v17 = vsel %vm791_vm0, %v1960_v5, %v1961_v58 }
 0x297   : > { %v2821_v51 = vsel %vm791_vm0, %v14853_v1, %v2820_v55  ;;  %v2369_v46 = vrot.slane %v12736_v10, 2  ;;  %v3091_v50 = vrot.slane %v3033_v16, 1  ;;  %v2368_v49 = vrot.slane %v12763_v31, 2 }
 0x298   : > { %8555 = vmatmul.mubr.msk.f32.vlgmr.msra.gmra.mrb[2].mxu1 %vm3629_vm5, %v14828_v4  ;;  %v2869_v52 = vadd.f32 %v2821_v51, %v2733_v13  ;;  %v2009_v27 = vadd.f32 %v1962_v17, %v1873_v57  ;;  %v2957_v55 = vsel %vm791_vm0, %v2955_v32, %v2956_v12  ;;  %v2505_v33 = vrot.slane %v12769_v23, 2  ;;  %v14863_v51 = vld [vmem:[#allocation8_spill] sm:$0xff] }
 0x299   : > { %8779 = vmatpush3.bf16.msra.mxu1 %v12530_v30  ;;  %v2098_v60 = vsel %vm791_vm0, %v2096_v62, %v2097_v63  ;;  %8561 = vmatprep.mubr.msk.f32.mxu1 %vm9095_vm2, %v14808_v8  ;;  %v14854_v5 = vrot.slane %v12742_v47, 2  ;;  %v3500_v34 = vrot.slane %v12785_v41, 2  ;;  %v2010_v38 = vadd.f32 %v1961_v58, %v1874_v61  ;;  %v14859_v61 = vld [vmem:[#allocation69_spill] sm:$0xff] }
 0x29a   : > { %v2145_v30 = vadd.f32 %v2098_v60, %v2009_v27  ;;  %8798 = vmatprep.subr.bf16.mxu1 %v14340_v14  ;;  %v14855_v12 = vrot.slane %v12713_v24, 2  ;;  %v3499_v32 = vrot.slane %v12791_v0, 2  ;;  %v2506_v23 = vsel %vm1200_vm1, %v2504_v53, %v2505_v33  ;;  %v12847_v27 = vpop.permute.xlu0 %2562 }
 0x29b   : > { %v12807_v10 = vsel %vm1200_vm1, %v3363_v44, %v14854_v5  ;;  %v14856_v3 = vrot.slane %v12704_v35, 2  ;;  %v14857_v29 = vrot.slane %v12684_v25, 2  ;;  %v3005_v37 = vadd.f32 %v2957_v55, %v2869_v52  ;;  %v14867_v35 = vld [vmem:[#allocation56_spill] sm:$0xff]  ;;  %v14868_v55 = vld [vmem:[#allocation94_spill] sm:$0xff] }
 0x29c   : > { %v3278_v31 = vadd.f32 %v14855_v12, %v3142_v6  ;;  %v3093_v20 = vsel %vm791_vm0, %v3091_v50, %v3092_v21  ;;  %v2146_v58 = vadd.f32 %v2097_v63, %v2010_v38  ;;  %v2370_v54 = vsel %vm1200_vm1, %v2368_v49, %v2369_v46  ;;  %v14861_v21 = vld [vmem:[#allocation62_spill] sm:$0xff] }
 0x29d   : > { %v2234_v44 = vsel %vm1200_vm1, %v14857_v29, %v14856_v3  ;;  %v12823_v24 = vmul.f32 %v14707_v11, %v2558_v26  ;;  %v12826_v48 = vmul.f32 %v14708_v59, %v2558_v26  ;;  %v12829_v40 = vmul.f32 %v14776_v7, %v2558_v26  ;;  %v14870_v38 = vld [vmem:[#allocation22_spill] sm:$0xff]  ;;  %v14872_v29 = vld [vmem:[#allocation100_spill] sm:$0xff] }
 0x29e   : > { %v2281_v16 = vadd.f32 %v2234_v44, %v2145_v30  ;;  %v14858_v25 = vmov %v14856_v3  ;;  %v14860_v57 = vrot.slane %v14859_v61, 1  ;;  %v14862_v1 = vrot.slane %v14861_v21, 1 }
 0x29f   : > { %v2282_v13 = vadd.f32 %v14858_v25, %v2146_v58  ;;  %v14864_v6 = vrot.slane %v14863_v51, 1  ;;  %v14865_v53 = vrot.slane %v12518_v56, 1  ;;  %v14866_v52 = vmov %v14854_v5  ;;  %v14883_v51 = vld [vmem:[#allocation29_spill] sm:$0xff] }
 0x2a0   : > { %v2417_v62 = vadd.f32 %v2370_v54, %v2281_v16  ;;  %v2815_v63 = vsel %vm791_vm0, %v14862_v1, %v14860_v57  ;;  %v12845_v50 = vadd.f32 %v14866_v52, %v3278_v31  ;;  %v14869_v60 = vmov %v14860_v57  ;;  %8562 = vmatmul.mubr.msk.f32.vlgmr.msra.gmra.mrb[2].mxu1 %vm3629_vm5, %v14828_v4  ;;  %v14882_v1 = vld [vmem:[#allocation57_spill] sm:$0xff]  ;;  %v14885_v52 = vld [vmem:[#allocation6_spill] sm:$0xff] }
 0x2a1   : > { %v2818_v17 = vsel %vm791_vm0, %v14865_v53, %v14864_v6  ;;  %v2865_v49 = vadd.f32 %v2815_v63, %v14867_v35  ;;  %v2866_v5 = vadd.f32 %v14869_v60, %v14868_v55  ;;  %v12856_v56 = vadd.f32 %v3093_v20, %v3005_v37  ;;  %8610 = vmatprep.mubr.msk.f32.mxu1 %vm9095_vm2, %v14808_v8  ;;  %v14876_v37 = vld [vmem:[#allocation55_spill] sm:$0xff]  ;;  %v14884_v53 = vld [vmem:[#allocation38_spill] sm:$0xff]  ;;  %v14886_v60 = vld [vmem:[#allocation25_spill] sm:$0xff] }
 0x2a2   : > { %v2867_v26 = vadd.f32 %v2818_v17, %v12590_v42  ;;  %v2418_v30 = vadd.f32 %v2369_v46, %v2282_v13  ;;  %v2592_v47 = vmul.f32 %v14707_v11, %v12847_v27  ;;  %v14871_v12 = vmov %v14864_v6  ;;  %v14874_v42 = vld [vmem:[#allocation36_spill] sm:$0xff]  ;;  %v14878_v46 = vld [vmem:[#allocation83_spill] sm:$0xff] }
 0x2a3   : > { %v2868_v31 = vadd.f32 %v14871_v12, %v14870_v38  ;;  %v2553_v3 = vadd.f32 %v2506_v23, %v2417_v62  ;;  %v14873_v44 = vrot.slane %v14872_v29, 1  ;;  %v14875_v16 = vrot.slane %v14874_v42, 1 }
 0x2a4   : > { %v14877_v20 = vrot.slane %v14876_v37, 1  ;;  %v14879_v54 = vrot.slane %v14878_v46, 1  ;;  %v2554_v61 = vadd.f32 %v2505_v33, %v2418_v30  ;;  %v3086_v63 = vrot.slane %v14882_v1, 1  ;;  %v14887_v33 = vld [vmem:[#allocation54_spill] sm:$0xff]  ;;  %v12897_v46 = vpop.permute.xlu1 %2622 }
 0x2a5   : > { %v2951_v58 = vsel %vm791_vm0, %v14875_v16, %v14873_v44  ;;  %v14880_v25 = vmov %v14873_v44  ;;  %v3089_v6 = vrot.slane %v14883_v51, 1  ;;  %v3166_v17 = vmul.f32 %v14776_v7, %v14884_v53  ;;  %v14888_v30 = vld [vmem:[#allocation98_spill] sm:$0xff] }
 0x2a6   : > { %v2954_v11 = vsel %vm791_vm0, %v14879_v54, %v14877_v20  ;;  %v3002_v13 = vadd.f32 %v14880_v25, %v2866_v5  ;;  %v3001_v57 = vadd.f32 %v2951_v58, %v2865_v49  ;;  %v14881_v23 = vmov %v14877_v20  ;;  %v14892_v54 = vld [vmem:[#allocation63_spill] sm:$0xff]  ;;  %v14895_v53 = vld [vmem:[#allocation86_spill] sm:$0xff] }
 0x2a7   : > { %v3003_v21 = vadd.f32 %v2954_v11, %v2867_v26  ;;  %v3004_v62 = vadd.f32 %v14881_v23, %v2868_v31  ;;  %v3168_v35 = vmul.f32 %v14776_v7, %v14885_v52  ;;  %v2616_v55 = vadd.f32 %v2592_v47, %v2554_v61  ;;  %v14890_v31 = vld [vmem:[#allocation53_spill] sm:$0xff]  ;;  %v14893_v23 = vld [vmem:[#allocation99_spill] sm:$0xff] }
 0x2a8   : > { %v3301_v5 = vmul.f32 %v14781_v15, %v14886_v60  ;;  %v3302_v49 = vmul.f32 %v14781_v15, %v14887_v33  ;;  %v3303_v26 = vmul.f32 %v14781_v15, %v12372_v2  ;;  %v14889_v38 = vrot.slane %v14888_v30, 1  ;;  %v14897_v60 = vld [vmem:[#allocation7_spill] sm:$0xff]  ;;  %v14898_v33 = vld [vmem:[#allocation97_spill] sm:$0xff] }
 0x2a9   : > { %v14891_v29 = vrot.slane %v14890_v31, 1  ;;  %v3138_v42 = vadd.f32 %v3086_v63, %v3002_v13  ;;  %v3140_v16 = vadd.f32 %v3089_v6, %v3004_v62  ;;  %v3222_v37 = vrot.slane %v3166_v17, 2 }
 0x2aa   : > { %v3087_v12 = vsel %vm791_vm0, %v14889_v38, %v3086_v63  ;;  %v3225_v20 = vrot.slane %v3168_v35, 2  ;;  %v3304_v11 = vmul.f32 %v14781_v15, %v14892_v54  ;;  %v3357_v2 = vrot.slane %v3301_v5, 2 }
 0x2ab   : > { %v3090_v44 = vsel %vm791_vm0, %v14891_v29, %v3089_v6  ;;  %v3137_v47 = vadd.f32 %v3087_v12, %v3001_v57  ;;  %v3358_v25 = vrot.slane %v3302_v49, 2  ;;  %v3360_v61 = vrot.slane %v3303_v26, 2  ;;  %v14899_v26 = vld [vmem:[#allocation21_spill] sm:$0xff]  ;;  %v14900_v29 = vld [vmem:[#allocation82_spill] sm:$0xff] }
 0x2ac   : > { %v3139_v58 = vadd.f32 %v3090_v44, %v3003_v21  ;;  %v14894_v1 = vrot.slane %v14893_v23, 2  ;;  %v14896_v52 = vrot.slane %v14895_v53, 2  ;;  %v3274_v57 = vadd.f32 %v3222_v37, %v3138_v42 }
 0x2ad   : > { %v3276_v21 = vadd.f32 %v3225_v20, %v3140_v16  ;;  %v3359_v6 = vsel %vm1200_vm1, %v3357_v2, %v3358_v25  ;;  %v3361_v17 = vrot.slane %v3304_v11, 2  ;;  %v3437_v5 = vmul.f32 %v14792_v18, %v14897_v60 }
 0x2ae   : > { %v3223_v51 = vsel %vm1200_vm1, %v14894_v1, %v3222_v37  ;;  %v3226_v13 = vsel %vm1200_vm1, %v14896_v52, %v3225_v20  ;;  %v3410_v35 = vadd.f32 %v3358_v25, %v3274_v57  ;;  %v3438_v49 = vmul.f32 %v14792_v18, %v14898_v33  ;;  %v2683_v37 = vpop.permute.xlu1 %2682 }
 0x2af   : > { %v3273_v62 = vadd.f32 %v3223_v51, %v3137_v47  ;;  %v3275_v63 = vadd.f32 %v3226_v13, %v3139_v58  ;;  %v3439_v30 = vmul.f32 %v14792_v18, %v14899_v26  ;;  %v3362_v38 = vsel %vm1200_vm1, %v3360_v61, %v3361_v17  ;;  %v2619_v51 = vpop.permute.xlu0 %2618 }
 0x2b0   : > { %v3412_v31 = vadd.f32 %v3361_v17, %v3276_v21  ;;  %v3440_v44 = vmul.f32 %v14792_v18, %v14900_v29  ;;  %v3493_v16 = vrot.slane %v3437_v5, 2  ;;  %v3494_v47 = vrot.slane %v3438_v49, 2 }
 0x2b1   : > { %v3409_v12 = vadd.f32 %v3359_v6, %v3273_v62  ;;  %v3411_v42 = vadd.f32 %v3362_v38, %v3275_v63  ;;  %v3496_v58 = vrot.slane %v3439_v30, 2  ;;  %v2822_v20 = vrot.slane %v12826_v48, 1 }
 0x2b2   : > { %v3230_v54 = vrot.slane %v12829_v40, 2  ;;  %v2764_v11 = vmul.f32 %v14708_v59, %v12847_v27  ;;  %v3497_v2 = vrot.slane %v3440_v44, 2  ;;  %v2615_v25 = vadd.f32 %v12823_v24, %v2553_v3  ;;  %v12935_v24 = vld [vmem:[%s13695_s2] ss:$0 sm:$0xff]  ;;  %v2679_v5 = vpop.permute.xlu1 %2678 }
 0x2b3   : > { %v3495_v61 = vsel %vm1200_vm1, %v3493_v16, %v3494_v47  ;;  %v3546_v23 = vadd.f32 %v3494_v47, %v3410_v35  ;;  %v2652_v1 = vmul.f32 %v14745_v9, %v12897_v46  ;;  %v2651_v48 = vmul.f32 %v14745_v9, %v2619_v51 }
 0x2b4   : > { %v3498_v53 = vsel %vm1200_vm1, %v3496_v58, %v3497_v2  ;;  %v3545_v52 = vadd.f32 %v3495_v61, %v3409_v12  ;;  %v3548_v13 = vadd.f32 %v3497_v2, %v3412_v31  ;;  %v12930_v59 = vadd.f32 %v3500_v34, %v12845_v50 }
 0x2b5   : > { %v3547_v57 = vadd.f32 %v3498_v53, %v3411_v42  ;;  %v3576_v3 = vadd.f32 %v12935_v24, %v3546_v23  ;;  %v2676_v21 = vadd.f32 %v2652_v1, %v2616_v55  ;;  %v2900_v9 = vmul.f32 %v14746_v36, %v12897_v46 }
 0x2b6   : > { %v3575_v62 = vadd.f32 %v12935_v24, %v3545_v52  ;;  %v3578_v63 = vadd.f32 %v12935_v24, %v3548_v13  ;;  %v2899_v6 = vmul.f32 %v14746_v36, %v2619_v51  ;;  %v2823_v50 = vrot.slane %v2764_v11, 1 }
 0x2b7   : > { %v3172_v17 = vmul.f32 %v14776_v7, %v12847_v27  ;;  %v3577_v35 = vadd.f32 %v12935_v24, %v3547_v57  ;;  %v2712_v60 = vmul.f32 %v14527_v43, %v2683_v37  ;;  %v3600_v33 = vmax.f32 %v3576_v3, 0.0 }
 0x2b8   : > { %v3602_v55 = vmax.f32 %v3578_v63, 0.0  ;;  %v2675_v49 = vadd.f32 %v2651_v48, %v2615_v25  ;;  %v3036_v26 = vmul.f32 %v14812_v22, %v2683_v37  ;;  %v3277_v30 = vadd.f32 %v12753_v28, %v12856_v56 }
 0x2b9   : > { %v3599_v38 = vmax.f32 %v3575_v62, 0.0  ;;  %v3601_v12 = vmax.f32 %v3577_v35, 0.0  ;;  %v2736_v36 = vadd.f32 %v2712_v60, %v2676_v21  ;;  %v2959_v29 = vrot.slane %v2900_v9, 1 }
 0x2ba   : > { %v3616_v31 = vadd.f32 %v3602_v55, %v3600_v33  ;;  %v2958_v44 = vrot.slane %v2899_v6, 1  ;;  %v2711_v7 = vmul.f32 %v14527_v43, %v2679_v5  ;;  %v3231_v27 = vrot.slane %v3172_v17, 2 }
 0x2bb   : > { %v3615_v42 = vadd.f32 %v3601_v12, %v3599_v38  ;;  %v3308_v16 = vmul.f32 %v14781_v15, %v12897_v46  ;;  %v2872_v47 = vadd.f32 %v2823_v50, %v2736_v36  ;;  %v3095_v11 = vrot.slane %v3036_v26, 1 }
 0x2bc   : > { %v5482_v58 = vsel %vm1200_vm1, %v3616_v31, 0  ;;  %v2735_v2 = vadd.f32 %v2711_v7, %v2675_v49  ;;  %v2824_v28 = vsel %vm791_vm0, %v2822_v20, %v2823_v50  ;;  %v3035_v23 = vmul.f32 %v14812_v22, %v2679_v5 }
 0x2bd   : > { %v5485_v56 = vand.u32 4294901760, %v3615_v42  ;;  %v5488_v25 = vand.u32 4294901760, %v5482_v58  ;;  %v3008_v61 = vadd.f32 %v2959_v29, %v2872_v47  ;;  %v2960_v1 = vsel %vm791_vm0, %v2958_v44, %v2959_v29 }
 0x2be   : > { %v3307_v43 = vmul.f32 %v14781_v15, %v2619_v51  ;;  %v3444_v53 = vmul.f32 %v14792_v18, %v2683_v37  ;;  %v2871_v52 = vadd.f32 %v2824_v28, %v2735_v2  ;;  %v3094_v3 = vrot.slane %v3035_v23, 1 }
 0x2bf   : > { %v12959_v46 = vpack.c.bf16 %v5488_v25, %v5485_v56  ;;  %v12961_v13 = vsub.f32 %v3615_v42, %v5485_v56  ;;  %v12963_v48 = vsub.f32 %v5482_v58, %v5488_v25  ;;  %v3144_v57 = vadd.f32 %v3095_v11, %v3008_v61 }
 0x2c0   : > { %v3007_v20 = vadd.f32 %v2960_v1, %v2871_v52  ;;  %v3443_v21 = vmul.f32 %v14792_v18, %v2679_v5  ;;  %v3413_v22 = vadd.f32 %v12807_v10, %v3277_v30  ;;  %v3367_v62 = vrot.slane %v3308_v16, 2 }
 0x2c1   : > { %8782 = vmatpush3.bf16.msra.mxu0 %v12959_v46  ;;  %v3280_v15 = vadd.f32 %v3231_v27, %v3144_v57  ;;  %v5564_v37 = vand.u32 4294901760, %v12961_v13  ;;  %v5571_v51 = vand.u32 4294901760, %v12963_v48  ;;  %v3501_v63 = vsel %vm1200_vm1, %v3499_v32, %v3500_v34  ;;  %v14901_v34 = vld [vmem:[#allocation44_spill] sm:$0xff]  ;;  %v13005_v25 = vpop.f32.mrb[0].mxu1 }
 0x2c2   : > { %v3366_v9 = vrot.slane %v3307_v43, 2  ;;  %v3503_v6 = vrot.slane %v3444_v53, 2  ;;  %8783 = vmatprep.subr.bf16.mxu0 %v14340_v14  ;;  %v3096_v18 = vsel %vm791_vm0, %v3094_v3, %v3095_v11  ;;  %v3232_v0 = vsel %vm1200_vm1, %v3230_v54, %v3231_v27  ;;  %6442 = vperm.xlu0 %9003, %v13005_v25   ;;  %v8479_v61 = vpop.f32.mrb[1].mxu1 }
 0x2c3   : > { %v3416_v10 = vadd.f32 %v3367_v62, %v3280_v15  ;;  %v5565_v50 = vsub.f32 %v12961_v13, %v5564_v37  ;;  %v5572_v17 = vsub.f32 %v12963_v48, %v5571_v51  ;;  %v3143_v41 = vadd.f32 %v3096_v18, %v3007_v20  ;;  %6412 = vperm.xlu1 %9001, %v13005_v25   ;;  %v14905_v18 = vld [vmem:[#allocation11_spill] sm:$0xff] }
 0x2c4   : > { %8569 = vmatmul.mubr.f32.vlgmr.msra.gmra.mrb[4].mxu0 %v14901_v34  ;;  %v3580_v32 = vadd.f32 %v12935_v24, %v12930_v59  ;;  %v3502_v35 = vrot.slane %v3443_v21, 2  ;;  %v3549_v60 = vadd.f32 %v3501_v63, %v3413_v22  ;;  %v3368_v26 = vsel %vm1200_vm1, %v3366_v9, %v3367_v62  ;;  %v14903_v21 = vld [vmem:[#allocation45_spill] sm:$0xff] }
 0x2c5   : > { %v3552_v5 = vadd.f32 %v3503_v6, %v3416_v10  ;;  %v5566_v33 = vand.u32 4294901760, %v5565_v50  ;;  %v5573_v55 = vand.u32 4294901760, %v5572_v17  ;;  %8575 = vmatprep.mubr.msk.f32.mxu0 %vm9095_vm2, %v14808_v8  ;;  %v3279_v49 = vadd.f32 %v3232_v0, %v3143_v41  ;;  %v14906_v41 = vld [vmem:[#allocation13_spill] sm:$0xff] }
 0x2c6   : > { %v3504_v38 = vsel %vm1200_vm1, %v3502_v35, %v3503_v6  ;;  %v3604_v12 = vmax.f32 %v3580_v32, 0.0  ;;  %v3579_v31 = vadd.f32 %v12935_v24, %v3549_v60  ;;  %v8787_v7 = vpack.c.bf16 %v12963_v48, %v12961_v13  ;;  %v261_v6 = vld [vmem:[%s13696_s3] sm:$0xf]  ;;  %v262_v60 = vld [vmem:[%s13696_s3 + $0x4] sm:$0xf] }
 0x2c7   : > { %v3582_v40 = vadd.f32 %v12935_v24, %v3552_v5  ;;  %v8784_v30 = vpack.c.bf16 %v5573_v55, %v5566_v33  ;;  %v3415_v54 = vadd.f32 %v3368_v26, %v3279_v49  ;;  %v14902_v53 = vmov 2   ;;  %9002 = vset.pattern.permute.xlu1 %v14842_v45  ;;  %v14908_v33 = vld [vmem:[#allocation16_spill] sm:$0xff] }
 0x2c8   : > { %v3603_v42 = vmax.f32 %v3579_v31, 0.0  ;;  %9004 = vset.pattern.permute.xlu0 %v14902_v53  ;;  %v8793_v20 = vpack.c.bf16 %v5571_v51, %v5564_v37  ;;  %6438 = vperm.xlu1 %9002, %v12650_v39   ;;  %v14904_v13 = vmov 0   ;;  %v9097_v22 = vmov 3  }
 0x2c9   : > { %v3606_v36 = vmax.f32 %v3582_v40, 0.0  ;;  %8785 = vmatpush3.bf16.msra.mxu0 %v8784_v30  ;;  %v3551_v59 = vadd.f32 %v3504_v38, %v3415_v54  ;;  %6466 = vperm.xlu0 %9004, %v12650_v39   ;;  %v13087_v10 = vrot.slane %v261_v6, %v14905_v18  ;;  %v13094_v0 = vrot.slane %v261_v6, %v14906_v41 }
 0x2ca   : > { %8786 = vmatprep.subr.bf16.mxu0 %v14340_v14  ;;  %v13105_v55 = vrot.slane %v261_v6, %v14908_v33  ;;  %v13111_v30 = vrot.slane %v262_v60, %v14906_v41 }
 0x2cb   : > { %v3618_v29 = vadd.f32 %v3606_v36, %v3604_v12  ;;  %v3581_v44 = vadd.f32 %v12935_v24, %v3551_v59 }
 0x2cc   : > { %8576 = vmatmul.mubr.msk.f32.vlgmr.msra.gmra.mrb[4].mxu0 %vm3629_vm5, %v14828_v4  ;;  %9005 = vset.pattern.permute.xlu1 %v14902_v53 }
 0x2cd   : > { %v3605_v27 = vmax.f32 %v3581_v44, 0.0  ;;  %8788 = vmatpush3.bf16.msra.mxu0 %v8787_v7  ;;  %8582 = vmatprep.mubr.msk.f32.mxu0 %vm9095_vm2, %v14808_v8  ;;  %v5944_v16 = vsel %vm1200_vm1, %v3618_v29, 0  ;;  %v13117_v29 = vrot.slane %v262_v60, %v14905_v18 }
 0x2ce   : > { %8789 = vmatprep.subr.bf16.mxu0 %v14340_v14  ;;  %v5950_v47 = vand.u32 4294901760, %v5944_v16  ;;  %9008 = vset.pattern.permute.xlu0 %v14904_v13 }
 0x2cf   : > { %v3617_v58 = vadd.f32 %v3605_v27, %v3603_v42  ;;  %6470 = vperm.xlu1 %9005, %v13005_v25   ;;  %14909 = vst [vmem:[#allocation85_spill] sm:$0xff] %v13117_v29 }
 0x2d0   : > { %v6032_v11 = vsub.f32 %v5944_v16, %v5950_v47  ;;  %v13123_v16 = vrot.slane %v262_v60, %v14908_v33 }
 0x2d1   : > { %v5947_v24 = vand.u32 4294901760, %v3617_v58 }
 0x2d2   : > { %v6033_v2 = vand.u32 4294901760, %v6032_v11 }
 0x2d3   : > { %v8799_v28 = vpack.c.bf16 %v5950_v47, %v5947_v24  ;;  %v6025_v56 = vsub.f32 %v3617_v58, %v5947_v24  ;;  %9006 = vset.pattern.permute.xlu1 %v9097_v22 }
 0x2d4   : > { %8583 = vmatmul.mubr.f32.vlgmr.msra.gmra.mrb[4].mxu0 %v14844_v19  ;;  %v6034_v1 = vsub.f32 %v6032_v11, %v6033_v2  ;;  %6494 = vperm.xlu1 %9006, %v12650_v39  }
 0x2d5   : > { %8791 = vmatpush3.bf16.msra.mxu0 %v12959_v46  ;;  %8589 = vmatprep.mubr.msk.f32.mxu0 %vm9095_vm2, %v14808_v8  ;;  %v6026_v23 = vand.u32 4294901760, %v6025_v56  ;;  %v8805_v48 = vpack.c.bf16 %v6032_v11, %v6025_v56 }
 0x2d6   : > { %8792 = vmatprep.subr.bf16.mxu0 %v14340_v14  ;;  %8800 = vmatpush3.bf16.msra.mxu1 %v8799_v28  ;;  %v6035_v57 = vand.u32 4294901760, %v6034_v1 }
 0x2d7   : > { %8801 = vmatprep.subr.bf16.mxu1 %v14340_v14  ;;  %v6027_v43 = vsub.f32 %v6025_v56, %v6026_v23 }
 0x2d8   : > { %9007 = vset.pattern.permute.xlu1 %v14904_v13 }
 0x2d9   : > { %8611 = vmatmul.mubr.f32.vlgmr.msra.gmra.mrb[4].mxu1 %v14901_v34  ;;  %v6028_v52 = vand.u32 4294901760, %v6027_v43  ;;  %v14907_v34 = vld [vmem:[#allocation10_spill] sm:$0xff] }
 0x2da   : > { %8617 = vmatprep.mubr.msk.f32.mxu1 %vm9095_vm2, %v14808_v8  ;;  %v13097_v32 = vsub.s32 3, %v14907_v34 }
 0x2db   : > { %v8802_v3 = vpack.c.bf16 %v6035_v57, %v6028_v52 }
 0x2dc   : > { %8590 = vmatmul.mubr.f32.vlgmr.msra.gmra.mrb[4].mxu0 %v14903_v21  ;;  %v13108_v49 = vrot.slane %v261_v6, %v13097_v32  ;;  %v13128_v24 = vrot.slane %v262_v60, %v13097_v32 }
 0x2dd   : > { %8794 = vmatpush3.bf16.msra.mxu0 %v8793_v20  ;;  %8596 = vmatprep.mubr.msk.f32.mxu0 %vm9095_vm2, %v14808_v8 }
 0x2de   : > { %8795 = vmatprep.subr.bf16.mxu0 %v14340_v14  ;;  %8803 = vmatpush3.bf16.msra.mxu1 %v8802_v3  ;;  %14910 = vst [vmem:[#allocation91_spill] sm:$0xff] %v13128_v24 }
 0x2df   : > { %8804 = vmatprep.subr.bf16.mxu1 %v14340_v14 }
 0x2e1   : > { %8618 = vmatmul.mubr.msk.f32.vlgmr.msra.gmra.mrb[4].mxu1 %vm3629_vm5, %v14828_v4 }
 0x2e2   : > { %8806 = vmatpush3.bf16.msra.mxu1 %v8805_v48  ;;  %8624 = vmatprep.mubr.msk.f32.mxu1 %vm9095_vm2, %v14808_v8 }
 0x2e3   : > { %8807 = vmatprep.subr.bf16.mxu1 %v14340_v14 }
 0x2e4   : > { %8597 = vmatmul.mubr.msk.f32.vlgmr.msra.gmra.mrb[4].mxu0 %vm3629_vm5, %v14828_v4 }
 0x2e5   : > { %8797 = vmatpush3.bf16.msra.mxu0 %v12959_v46  ;;  %8603 = vmatprep.mubr.msk.f32.mxu0 %vm9095_vm2, %v14808_v8  ;;  %v8811_v46 = vpack.c.bf16 %v6033_v2, %v6026_v23 }
 0x2e6   : > { %8648 = vmatprep.subr.mxu0 %v14808_v8 }
 0x2e9   : > { %8625 = vmatmul.mubr.f32.vlgmr.msra.gmra.mrb[4].mxu1 %v14844_v19 }
 0x2ea   : > { %8809 = vmatpush3.bf16.msra.mxu1 %v8799_v28  ;;  %8631 = vmatprep.mubr.msk.f32.mxu1 %vm9095_vm2, %v14808_v8 }
 0x2eb   : > { %8810 = vmatprep.subr.bf16.mxu1 %v14340_v14 }
 0x2ec   : > { %8604 = vmatmul.mubr.msk.f32.vlgmr.msra.gmra.mrb[4].mxu0 %vm3629_vm5, %v14828_v4 }
 0x2ed   : > { %8650 = vmatprep.mubr.msk.f32.mxu0 %vm9095_vm2, %v14808_v8 }
 0x2f1   : > { %8632 = vmatmul.mubr.f32.vlgmr.msra.gmra.mrb[4].mxu1 %v14903_v21 }
 0x2f2   : > { %8812 = vmatpush3.bf16.msra.mxu1 %v8811_v46  ;;  %8638 = vmatprep.mubr.msk.f32.mxu1 %vm9095_vm2, %v14808_v8 }
 0x2f3   : > { %8813 = vmatprep.subr.bf16.mxu1 %v14340_v14 }
 0x2f6   : > { %v6408_v63 = vpop.permute.xlu0 %6407 }
 0x2f7   : > { %v6429_v5 = vmul.f32 %v13094_v0, %v6408_v63  ;;  %v6525_v31 = vmul.f32 %v13111_v30, %v6408_v63 }
 0x2f9   : > { %8639 = vmatmul.mubr.msk.f32.vlgmr.msra.gmra.mrb[4].mxu1 %vm3629_vm5, %v14828_v4  ;;  %v6533_v27 = vrot.slane %v6525_v31, 1 }
 0x2fa   : > { %8815 = vmatpush3.bf16.msra.mxu1 %v8799_v28  ;;  %8645 = vmatprep.mubr.msk.f32.mxu1 %vm9095_vm2, %v14808_v8 }
 0x2fb   : > { %8678 = vmatprep.subr.mxu1 %v14808_v8 }
 0x301   : > { %8646 = vmatmul.mubr.msk.f32.vlgmr.msra.gmra.mrb[4].mxu1 %vm3629_vm5, %v14828_v4 }
 0x302   : > { %8680 = vmatprep.mubr.msk.f32.mxu1 %vm9095_vm2, %v14808_v8 }
 0x31b   : > { %v5015_v39 = vpop.f32.mrb[2].mxu0 }
 0x31c   : > { %6417 = vperm.xlu1 %9007, %v5015_v39   ;;  %v8521_v19 = vpop.f32.mrb[3].mxu0 }
 0x320   : > { %9009 = vset.pattern.permute.xlu1 %v14842_v45 }
 0x321   : > { %6446 = vperm.xlu1 %9009, %v5015_v39  }
 0x341   : > { %v13089_v50 = vpop.permute.xlu0 %6442 }
 0x342   : > { %v13077_v51 = vpop.permute.xlu1 %6412 }
 0x347   : > { %v6439_v9 = vpop.permute.xlu1 %6438 }
 0x348   : > { %v6457_v35 = vmul.f32 %v13087_v10, %v6439_v9  ;;  %v6467_v26 = vpop.permute.xlu0 %6466  ;;  %v6549_v42 = vmul.f32 %v13117_v29, %v6439_v9 }
 0x349   : > { %v6485_v12 = vmul.f32 %v13105_v55, %v6467_v26  ;;  %v6573_v11 = vmul.f32 %v13123_v16, %v6467_v26 }
 0x34a   : > { %v6461_v54 = vadd.f32 %v6457_v35, %v6429_v5  ;;  %v6557_v58 = vrot.slane %v6549_v42, 1 }
 0x34b   : > { %v6581_v56 = vrot.slane %v6573_v11, 1 }
 0x34c   : > { %v6489_v44 = vadd.f32 %v6485_v12, %v6461_v54 }
 0x34e   : > { %v13091_v17 = vpop.permute.xlu1 %6470 }
 0x353   : > { %v6495_v40 = vpop.permute.xlu1 %6494 }
 0x354   : > { %v6513_v36 = vmul.f32 %v13108_v49, %v6495_v40 }
 0x356   : > { %v6517_v7 = vadd.f32 %v6513_v36, %v6489_v44  ;;  %v6458_v36 = vmul.f32 %v13087_v10, %v13089_v50 }
 0x358   : > { %v6541_v47 = vadd.f32 %v6533_v27, %v6517_v7 }
 0x35a   : > { %v6565_v2 = vadd.f32 %v6557_v58, %v6541_v47 }
 0x35c   : > { %v6589_v61 = vadd.f32 %v6581_v56, %v6565_v2 }
 0x373   : > { %v5477_v14 = vpop.f32.mrb[2].mxu1 }
 0x374   : > { %6450 = vperm.xlu1 %9009, %v5477_v14   ;;  %6422 = vperm.xlu0 %9008, %v5477_v14   ;;  %v8563_v62 = vpop.f32.mrb[3].mxu1 }
 0x375   : > { %v265_v62 = vld [vmem:[%s13696_s3 + $0x10] sm:$0xf] }
 0x376   : > { %v13215_v11 = vrot.slane %v265_v62, %v14908_v33 }
 0x378   : > { %9010 = vset.pattern.permute.xlu1 %v14902_v53  ;;  %9011 = vset.pattern.permute.xlu0 %v14902_v53 }
 0x379   : > { %6474 = vperm.xlu1 %9010, %v5015_v39   ;;  %6478 = vperm.xlu0 %9011, %v5477_v14  }
 0x37d   : > { %9013 = vset.pattern.permute.xlu1 %v9097_v22  ;;  %9012 = vset.pattern.permute.xlu0 %v9097_v22 }
 0x37e   : > { %6502 = vperm.xlu1 %9013, %v5015_v39   ;;  %6498 = vperm.xlu0 %9012, %v13005_v25   ;;  %v6597_v25 = vmul.f32 %v13128_v24, %v6495_v40 }
 0x380   : > { %v6605_v43 = vrot.slane %v6597_v25, 1  ;;  %v6550_v25 = vmul.f32 %v13117_v29, %v13089_v50 }
 0x382   : > { %6506 = vperm.xlu1 %9013, %v5477_v14   ;;  %9014 = vset.pattern.permute.xlu0 %v14904_v13 }
 0x386   : > { %9015 = vset.pattern.permute.xlu1 %v14842_v45 }
 0x39b   : > { %v13145_v21 = vpop.permute.xlu1 %6417 }
 0x39c   : > { %v6431_v7 = vmul.f32 %v13094_v0, %v13145_v21 }
 0x3a0   : > { %v13152_v14 = vpop.permute.xlu1 %6446 }
 0x3a1   : > { %v6459_v27 = vmul.f32 %v13087_v10, %v13152_v14 }
 0x3bf   : > { %v5939_v15 = vpop.f32.mrb[4].mxu0 }
 0x3c0   : > { %6731 = vperm.xlu1 %9015, %v5939_v15   ;;  %6715 = vperm.xlu0 %9014, %v5939_v15   ;;  %v8605_v37 = vpop.f32.mrb[5].mxu0 }
 0x3c1   : > { %v13163_v37 = vld [vmem:[%s13696_s3 + $0x14] sm:$0xf] }
 0x3c2   : > { %v13177_v5 = vrot.slane %v13163_v37, %v14905_v18  ;;  %v13197_v31 = vrot.slane %v13163_v37, %v14906_v41 }
 0x3c4   : > { %9016 = vset.pattern.permute.xlu1 %v14902_v53  ;;  %9017 = vset.pattern.permute.xlu0 %v9097_v22  ;;  %14912 = vst [vmem:[#allocation79_spill] sm:$0xff] %v13197_v31  ;;  %v13201_v44 = vmul.f32 %v13177_v5, %v13089_v50 }
 0x3c5   : > { %6747 = vperm.xlu1 %9016, %v5939_v15   ;;  %6763 = vperm.xlu0 %9017, %v5939_v15   ;;  %v264_v15 = vld [vmem:[%s13696_s3 + $0xc] sm:$0xf] }
 0x3c6   : > { %v13169_v6 = vrot.slane %v264_v15, %v14906_v41  ;;  %v13183_v54 = vrot.slane %v264_v15, %v14905_v18  ;;  %v13212_v58 = vrot.slane %v264_v15, %v14908_v33 }
 0x3c8   : > { %v6738_v56 = vmul.f32 %v13183_v54, %v13089_v50 }
 0x3c9   : > { %9018 = vset.pattern.permute.xlu1 %v14904_v13  ;;  %9020 = vset.pattern.permute.xlu0 %v14902_v53  ;;  %v6613_v53 = vadd.f32 %v6605_v43, %v6589_v61  ;;  %v6526_v43 = vmul.f32 %v13111_v30, %v13077_v51 }
 0x3d4   : > { %v6401_v38 = vpop.f32.mrb[4].mxu1 }
 0x3d5   : > { %7004 = vperm.xlu0 %9020, %v6401_v38   ;;  %6972 = vperm.xlu1 %9018, %v6401_v38   ;;  %v8647_v59 = vpop.f32.mrb[5].mxu1 }
 0x3d6   : > { %v6722_v59 = vmul.f32 %v13169_v6, %v13077_v51 }
 0x3d9   : > { %9019 = vset.pattern.permute.xlu1 %v14842_v45  ;;  %9022 = vset.pattern.permute.xlu0 %v9097_v22  ;;  %v263_v45 = vld [vmem:[%s13696_s3 + $0x8] sm:$0xf] }
 0x3da   : > { %6988 = vperm.xlu1 %9019, %v6401_v38   ;;  %v13134_v28 = vrot.slane %v263_v45, %v14906_v41  ;;  %v13139_v1 = vrot.slane %v263_v45, %v14905_v18  ;;  %v13143_v20 = vrot.slane %v263_v45, %v14908_v33 }
 0x3dc   : > { %14911 = vst [vmem:[#allocation27_spill] sm:$0xff] %v13134_v28  ;;  %v6621_v23 = vmul.f32 %v13134_v28, %v6408_v63  ;;  %v6645_v57 = vmul.f32 %v13139_v1, %v6439_v9  ;;  %v6669_v48 = vmul.f32 %v13143_v20, %v6467_v26  ;;  %v13166_v9 = vrot.slane %v265_v62, %v14905_v18 }
 0x3dd   : > { %v13227_v61 = vmul.f32 %v13139_v1, %v13089_v50 }
 0x3de   : > { %9021 = vset.pattern.permute.xlu1 %v9097_v22  ;;  %v6629_v52 = vrot.slane %v6621_v23, 2  ;;  %v6653_v13 = vrot.slane %v6645_v57, 2  ;;  %v13149_v22 = vrot.slane %v263_v45, %v13097_v32  ;;  %v6677_v39 = vrot.slane %v6669_v48, 2 }
 0x3df   : > { %7020 = vperm.xlu1 %9021, %v6401_v38   ;;  %v6430_v38 = vmul.f32 %v13094_v0, %v13077_v51  ;;  %v13189_v12 = vmul.f32 %v13166_v9, %v13089_v50  ;;  %v13219_v45 = vrot.slane %v13163_v37, %v14908_v33  ;;  %v6486_v57 = vmul.f32 %v13105_v55, %v13091_v17 }
 0x3e0   : > { %v6637_v3 = vadd.f32 %v6629_v52, %v6613_v53  ;;  %v6693_v19 = vmul.f32 %v13149_v22, %v6495_v40  ;;  %v13180_v40 = vrot.slane %v265_v62, %v14906_v41  ;;  %v6527_v50 = vmul.f32 %v13111_v30, %v13145_v21 }
 0x3e1   : > { %v6814_v53 = vrot.slane %v13189_v12, 1  ;;  %v6462_v52 = vadd.f32 %v6458_v36, %v6430_v38  ;;  %v6463_v48 = vadd.f32 %v6459_v27, %v6431_v7  ;;  %v6558_v38 = vrot.slane %v6550_v25, 1 }
 0x3e2   : > { %v6661_v46 = vadd.f32 %v6653_v13, %v6637_v3  ;;  %v6701_v34 = vrot.slane %v6693_v19, 2  ;;  %v13238_v3 = vmul.f32 %v13134_v28, %v13077_v51  ;;  %v6551_v12 = vmul.f32 %v13117_v29, %v13152_v14 }
 0x3e3   : > { %v6534_v7 = vrot.slane %v6526_v43, 1  ;;  %v6490_v27 = vadd.f32 %v6486_v57, %v6462_v52 }
 0x3e4   : > { %v6685_v63 = vadd.f32 %v6677_v39, %v6661_v46  ;;  %v6782_v46 = vmul.f32 %v13180_v40, %v13077_v51  ;;  %v13247_v39 = vmul.f32 %v13197_v31, %v13077_v51  ;;  %v6754_v51 = vmul.f32 %v13212_v58, %v13091_v17 }
 0x3e5   : > { %v6559_v8 = vrot.slane %v6551_v12, 1 }
 0x3e6   : > { %v6709_v26 = vadd.f32 %v6701_v34, %v6685_v63  ;;  %v13252_v34 = vrot.slane %v264_v15, %v13097_v32  ;;  %v6574_v15 = vmul.f32 %v13123_v16, %v13091_v17  ;;  %v6790_v57 = vrot.slane %v6782_v46, 1 }
 0x3e8   : > { %v6726_v2 = vadd.f32 %v6722_v59, %v6709_v26  ;;  %v6582_v12 = vrot.slane %v6574_v15, 1  ;;  %v6630_v15 = vrot.slane %v13238_v3, 2 }
 0x3ea   : > { %v6742_v19 = vadd.f32 %v6738_v56, %v6726_v2  ;;  %v6535_v56 = vrot.slane %v6527_v50, 1  ;;  %v6830_v50 = vmul.f32 %v13215_v11, %v13091_v17 }
 0x3f3   : > { %v13171_v35 = vpop.permute.xlu1 %6450  ;;  %v13173_v60 = vpop.permute.xlu0 %6422 }
 0x3f8   : > { %v13207_v42 = vpop.permute.xlu1 %6474  ;;  %v13209_v47 = vpop.permute.xlu0 %6478 }
 0x3f9   : > { %v6487_v23 = vmul.f32 %v13105_v55, %v13207_v42  ;;  %v6575_v25 = vmul.f32 %v13123_v16, %v13207_v42 }
 0x3fb   : > { %v6491_v36 = vadd.f32 %v6487_v23, %v6463_v48  ;;  %v6758_v23 = vadd.f32 %v6754_v51, %v6742_v19  ;;  %v13269_v48 = vrot.slane %v265_v62, %v13097_v32  ;;  %v6654_v62 = vrot.slane %v13227_v61, 2 }
 0x3fc   : > { %v6838_v61 = vrot.slane %v6830_v50, 1 }
 0x3fd   : > { %v13249_v63 = vpop.permute.xlu1 %6502  ;;  %v13254_v26 = vpop.permute.xlu0 %6498 }
 0x3fe   : > { %v6515_v59 = vmul.f32 %v13108_v49, %v13249_v63  ;;  %v6514_v2 = vmul.f32 %v13108_v49, %v13254_v26  ;;  %v6770_v52 = vmul.f32 %v13252_v34, %v13254_v26  ;;  %v6599_v29 = vmul.f32 %v13128_v24, %v13249_v63 }
 0x3ff   : > { %v6598_v19 = vmul.f32 %v13128_v24, %v13254_v26  ;;  %v6694_v3 = vmul.f32 %v13149_v22, %v13254_v26 }
 0x400   : > { %v6519_v13 = vadd.f32 %v6515_v59, %v6491_v36  ;;  %v6518_v43 = vadd.f32 %v6514_v2, %v6490_v27  ;;  %v6774_v36 = vadd.f32 %v6770_v52, %v6758_v23  ;;  %v6623_v59 = vmul.f32 %v13134_v28, %v13145_v21 }
 0x401   : > { %v6583_v27 = vrot.slane %v6575_v25, 1  ;;  %v6854_v2 = vmul.f32 %v13269_v48, %v13254_v26  ;;  %v6606_v24 = vrot.slane %v6598_v19, 1 }
 0x402   : > { %v6543_v4 = vadd.f32 %v6535_v56, %v6519_v13  ;;  %v6542_v33 = vadd.f32 %v6534_v7, %v6518_v43  ;;  %v6798_v51 = vadd.f32 %v6790_v57, %v6774_v36  ;;  %v6670_v7 = vmul.f32 %v13143_v20, %v13091_v17 }
 0x403   : > { %v6647_v56 = vmul.f32 %v13139_v1, %v13152_v14  ;;  %v6607_v43 = vrot.slane %v6599_v29, 1  ;;  %v6862_v36 = vrot.slane %v6854_v2, 1 }
 0x404   : > { %v6567_v46 = vadd.f32 %v6559_v8, %v6543_v4  ;;  %v6566_v13 = vadd.f32 %v6558_v38, %v6542_v33  ;;  %v6822_v28 = vadd.f32 %v6814_v53, %v6798_v51  ;;  %v6926_v8 = vmul.f32 %v13219_v45, %v13091_v17  ;;  %v13299_v17 = vld [vmem:[%s13696_s3 + $0x18] sm:$0xf] }
 0x405   : > { %v6631_v4 = vrot.slane %v6623_v59, 2  ;;  %v6671_v33 = vmul.f32 %v13143_v20, %v13207_v42  ;;  %v6655_v29 = vrot.slane %v6647_v56, 2  ;;  %v6695_v53 = vmul.f32 %v13149_v22, %v13249_v63 }
 0x406   : > { %v6591_v23 = vadd.f32 %v6583_v27, %v6567_v46  ;;  %v6590_v52 = vadd.f32 %v6582_v12, %v6566_v13  ;;  %v6846_v57 = vadd.f32 %v6838_v61, %v6822_v28  ;;  %v6886_v27 = vrot.slane %v13247_v39, 2  ;;  %v13306_v28 = vld [vmem:[%s13696_s3 + $0x1c] sm:$0xf] }
 0x407   : > { %v6678_v19 = vrot.slane %v6670_v7, 2  ;;  %v6934_v39 = vrot.slane %v6926_v8, 2  ;;  %v6679_v46 = vrot.slane %v6671_v33, 2  ;;  %v13310_v13 = vrot.slane %v13163_v37, %v13097_v32 }
 0x408   : > { %v6615_v38 = vadd.f32 %v6607_v43, %v6591_v23  ;;  %v6614_v25 = vadd.f32 %v6606_v24, %v6590_v52  ;;  %v6870_v24 = vadd.f32 %v6862_v36, %v6846_v57  ;;  %v6783_v51 = vmul.f32 %v13180_v40, %v13145_v21 }
 0x409   : > { %v13316_v56 = vrot.slane %v13299_v17, %v14906_v41  ;;  %v6703_v43 = vrot.slane %v6695_v53, 2  ;;  %v13320_v61 = vrot.slane %v13306_v28, %v14906_v41  ;;  %v13324_v52 = vrot.slane %v13299_v17, %v14905_v18 }
 0x40a   : > { %v6639_v50 = vadd.f32 %v6631_v4, %v6615_v38  ;;  %v6638_v59 = vadd.f32 %v6630_v15, %v6614_v25  ;;  %v6894_v7 = vadd.f32 %v6886_v27, %v6870_v24  ;;  %v6702_v8 = vrot.slane %v6694_v3, 2 }
 0x40b   : > { %v14913_v4 = vrot.slane %v13201_v44, 2  ;;  %v13330_v33 = vrot.slane %v13306_v28, %v14905_v18  ;;  %v13334_v38 = vmul.f32 %v13197_v31, %v13145_v21  ;;  %v6724_v15 = vmul.f32 %v13169_v6, %v13173_v60 }
 0x40c   : > { %v6663_v12 = vadd.f32 %v6655_v29, %v6639_v50  ;;  %v6662_v2 = vadd.f32 %v6654_v62, %v6638_v59  ;;  %v6950_v57 = vmul.f32 %v13310_v13, %v13254_v26  ;;  %v6791_v36 = vrot.slane %v6783_v51, 1 }
 0x40d   : > { %v6918_v62 = vadd.f32 %v14913_v4, %v6894_v7  ;;  %v6723_v44 = vmul.f32 %v13169_v6, %v13145_v21  ;;  %v6979_v29 = vmul.f32 %v13316_v56, %v13145_v21  ;;  %v6807_v50 = vmul.f32 %v13166_v9, %v13152_v14 }
 0x40e   : > { %v6687_v23 = vadd.f32 %v6679_v46, %v6663_v12  ;;  %v6686_v37 = vadd.f32 %v6678_v19, %v6662_v2  ;;  %v6740_v53 = vmul.f32 %v13183_v54, %v13171_v35  ;;  %v6460_v3 = vmul.f32 %v13087_v10, %v13171_v35  ;;  %v13354_v12 = vpop.permute.xlu1 %6506 }
 0x40f   : > { %v6942_v59 = vadd.f32 %v6934_v39, %v6918_v62  ;;  %v6432_v26 = vmul.f32 %v13094_v0, %v13173_v60  ;;  %v6739_v24 = vmul.f32 %v13183_v54, %v13152_v14  ;;  %v6784_v51 = vmul.f32 %v13180_v40, %v13173_v60 }
 0x410   : > { %v6711_v25 = vadd.f32 %v6703_v43, %v6687_v23  ;;  %v6710_v27 = vadd.f32 %v6702_v8, %v6686_v37  ;;  %v6756_v2 = vmul.f32 %v13212_v58, %v13209_v47  ;;  %v6958_v7 = vrot.slane %v6950_v57, 2 }
 0x411   : > { %v13362_v10 = vmul.f32 %v13177_v5, %v13152_v14  ;;  %v6808_v0 = vmul.f32 %v13166_v9, %v13171_v35  ;;  %v6755_v23 = vmul.f32 %v13212_v58, %v13207_v42  ;;  %v6488_v37 = vmul.f32 %v13105_v55, %v13209_v47 }
 0x412   : > { %v6728_v19 = vadd.f32 %v6724_v15, %v6711_v25  ;;  %v6727_v46 = vadd.f32 %v6723_v44, %v6710_v27  ;;  %v6966_v8 = vadd.f32 %v6958_v7, %v6942_v59  ;;  %v6772_v62 = vmul.f32 %v13252_v34, %v13354_v12 }
 0x413   : > { %v6464_v15 = vadd.f32 %v6460_v3, %v6432_v26  ;;  %v6771_v25 = vmul.f32 %v13252_v34, %v13249_v63  ;;  %v6995_v44 = vmul.f32 %v13324_v52, %v13152_v14  ;;  %v6792_v27 = vrot.slane %v6784_v51, 1 }
 0x414   : > { %v6744_v39 = vadd.f32 %v6740_v53, %v6728_v19  ;;  %v6743_v43 = vadd.f32 %v6739_v24, %v6727_v46  ;;  %v6832_v53 = vmul.f32 %v13215_v11, %v13209_v47  ;;  %v6516_v55 = vmul.f32 %v13108_v49, %v13354_v12 }
 0x415   : > { %v6816_v59 = vrot.slane %v6808_v0, 1  ;;  %v6528_v24 = vmul.f32 %v13111_v30, %v13173_v60  ;;  %v6831_v3 = vmul.f32 %v13215_v11, %v13207_v42  ;;  %v6492_v46 = vadd.f32 %v6488_v37, %v6464_v15  ;;  %v14915_v37 = vld [vmem:[#allocation85_spill] sm:$0xff] }
 0x416   : > { %v6760_v4 = vadd.f32 %v6756_v2, %v6744_v39  ;;  %v6759_v57 = vadd.f32 %v6755_v23, %v6743_v43  ;;  %v6856_v51 = vmul.f32 %v13269_v48, %v13354_v12  ;;  %v6983_v7 = vadd.f32 %v6979_v29, %v6966_v8 }
 0x417   : > { %v6815_v39 = vrot.slane %v6807_v50, 1  ;;  %v6880_v23 = vmul.f32 %v13197_v31, %v13173_v60  ;;  %v6855_v49 = vmul.f32 %v13269_v48, %v13249_v63  ;;  %v6840_v43 = vrot.slane %v6832_v53, 1 }
 0x418   : > { %v6776_v19 = vadd.f32 %v6772_v62, %v6760_v4  ;;  %v6775_v26 = vadd.f32 %v6771_v25, %v6759_v57  ;;  %v6520_v30 = vadd.f32 %v6516_v55, %v6492_v46  ;;  %v14914_v62 = vld [vmem:[#allocation16_spill] sm:$0xff]  ;;  %v6552_v15 = vmul.f32 %v14915_v37, %v13171_v35 }
 0x419   : > { %v13392_v25 = vrot.slane %v13299_v17, %v14914_v62  ;;  %v6904_v29 = vmul.f32 %v13177_v5, %v13171_v35  ;;  %v6839_v50 = vrot.slane %v6831_v3, 1  ;;  %v6536_v57 = vrot.slane %v6528_v24, 1 }
 0x41a   : > { %v6800_v2 = vadd.f32 %v6792_v27, %v6776_v19  ;;  %v6799_v0 = vadd.f32 %v6791_v36, %v6775_v26  ;;  %v6864_v19 = vrot.slane %v6856_v51, 1  ;;  %v6999_v31 = vadd.f32 %v6995_v44, %v6983_v7 }
 0x41b   : > { %v6888_v36 = vrot.slane %v6880_v23, 2  ;;  %v6863_v53 = vrot.slane %v6855_v49, 1  ;;  %v6928_v26 = vmul.f32 %v13219_v45, %v13209_v47  ;;  %v6544_v46 = vadd.f32 %v6536_v57, %v6520_v30 }
 0x41c   : > { %v6824_v4 = vadd.f32 %v6816_v59, %v6800_v2  ;;  %v6823_v8 = vadd.f32 %v6815_v39, %v6799_v0  ;;  %v13400_v59 = vrot.slane %v13299_v17, %v13097_v32  ;;  %v7011_v3 = vmul.f32 %v13392_v25, %v13207_v42 }
 0x41d   : > { %v6887_v24 = vrot.slane %v13334_v38, 2  ;;  %v6560_v39 = vrot.slane %v6552_v15, 1  ;;  %v6927_v44 = vmul.f32 %v13219_v45, %v13207_v42  ;;  %v6912_v7 = vrot.slane %v6904_v29, 2 }
 0x41e   : > { %v6848_v27 = vadd.f32 %v6840_v43, %v6824_v4  ;;  %v6847_v55 = vadd.f32 %v6839_v50, %v6823_v8  ;;  %v6576_v17 = vmul.f32 %v13123_v16, %v13209_v47  ;;  %v7015_v49 = vadd.f32 %v7011_v3, %v6999_v31  ;;  %v14916_v31 = vld [vmem:[#allocation91_spill] sm:$0xff] }
 0x41f   : > { %v6911_v0 = vrot.slane %v13362_v10, 2  ;;  %v6951_v43 = vmul.f32 %v13310_v13, %v13249_v63  ;;  %v7039_v30 = vmul.f32 %v13320_v61, %v13145_v21  ;;  %v6936_v4 = vrot.slane %v6928_v26, 2 }
 0x420   : > { %v6872_v2 = vadd.f32 %v6864_v19, %v6848_v27  ;;  %v6871_v51 = vadd.f32 %v6863_v53, %v6847_v55  ;;  %v6568_v37 = vadd.f32 %v6560_v39, %v6544_v46  ;;  %v7027_v29 = vmul.f32 %v13400_v59, %v13249_v63  ;;  %v14917_v39 = vld [vmem:[#allocation27_spill] sm:$0xff] }
 0x421   : > { %v6935_v50 = vrot.slane %v6927_v44, 2  ;;  %v6584_v16 = vrot.slane %v6576_v17, 1  ;;  %v6600_v57 = vmul.f32 %v14916_v31, %v13354_v12  ;;  %v6959_v19 = vrot.slane %v6951_v43, 2 }
 0x422   : > { %v6896_v23 = vadd.f32 %v6888_v36, %v6872_v2  ;;  %v6895_v38 = vadd.f32 %v6887_v24, %v6871_v51  ;;  %v7031_v27 = vadd.f32 %v7027_v29, %v7015_v49  ;;  %v7047_v55 = vrot.slane %v7039_v30, 1  ;;  %v269_v49 = vld [vmem:[%s13696_s3 + $0x20] sm:$0xf] }
 0x423   : > { %v6592_v53 = vadd.f32 %v6584_v16, %v6568_v37  ;;  %v13424_v26 = vrot.slane %v13306_v28, %v14914_v62  ;;  %v7063_v46 = vmul.f32 %v13330_v33, %v13152_v14  ;;  %v6980_v3 = vmul.f32 %v13316_v56, %v13173_v60 }
 0x424   : > { %v6920_v15 = vadd.f32 %v6912_v7, %v6896_v23  ;;  %v6919_v8 = vadd.f32 %v6911_v0, %v6895_v38  ;;  %v6608_v24 = vrot.slane %v6600_v57, 1  ;;  %v6624_v44 = vmul.f32 %v14917_v39, %v13173_v60 }
 0x425   : > { %v7055_v51 = vadd.f32 %v7047_v55, %v7031_v27  ;;  %v6996_v17 = vmul.f32 %v13324_v52, %v13171_v35  ;;  %v7087_v0 = vmul.f32 %v13424_v26, %v13207_v42  ;;  %v7071_v43 = vrot.slane %v7063_v46, 1 }
 0x426   : > { %v13420_v10 = vadd.f32 %v6936_v4, %v6920_v15  ;;  %v6943_v36 = vadd.f32 %v6935_v50, %v6919_v8  ;;  %v6616_v23 = vadd.f32 %v6608_v24, %v6592_v53  ;;  %v13441_v30 = vrot.slane %v13306_v28, %v13097_v32 }
 0x427   : > { %v7040_v38 = vmul.f32 %v13320_v61, %v13173_v60  ;;  %v7012_v4 = vmul.f32 %v13392_v25, %v13209_v47  ;;  %v6632_v15 = vrot.slane %v6624_v44, 2  ;;  %v6648_v29 = vmul.f32 %v13139_v1, %v13171_v35 }
 0x428   : > { %v6967_v2 = vadd.f32 %v6959_v19, %v6943_v36  ;;  %v7079_v50 = vadd.f32 %v7071_v43, %v7055_v51  ;;  %v13450_v8 = vrot.slane %v269_v49, %v14906_v41  ;;  %v7028_v16 = vmul.f32 %v13400_v59, %v13354_v12 }
 0x429   : > { %v6640_v31 = vadd.f32 %v6632_v15, %v6616_v23  ;;  %v7095_v57 = vrot.slane %v7087_v0, 1  ;;  %v7064_v27 = vmul.f32 %v13330_v33, %v13171_v35  ;;  %v7111_v19 = vmul.f32 %v13441_v30, %v13249_v63 }
 0x42a   : > { %v6984_v7 = vadd.f32 %v6980_v3, %v6967_v2  ;;  %v7048_v36 = vrot.slane %v7040_v38, 1  ;;  %v6656_v55 = vrot.slane %v6648_v29, 2  ;;  %v6672_v1 = vmul.f32 %v13143_v20, %v13209_v47 }
 0x42b   : > { %v7103_v41 = vadd.f32 %v7095_v57, %v7079_v50  ;;  %v7135_v46 = vmul.f32 %v13450_v8, %v13145_v21  ;;  %v13463_v2 = vrot.slane %v269_v49, %v14905_v18  ;;  %v7088_v39 = vmul.f32 %v13424_v26, %v13209_v47 }
 0x42c   : > { %v7000_v37 = vadd.f32 %v6996_v17, %v6984_v7  ;;  %v6664_v24 = vadd.f32 %v6656_v55, %v6640_v31  ;;  %v7072_v44 = vrot.slane %v7064_v27, 1  ;;  %v7119_v51 = vrot.slane %v7111_v19, 1 }
 0x42d   : > { %v6680_v7 = vrot.slane %v6672_v1, 2  ;;  %v6696_v17 = vmul.f32 %v13149_v22, %v13354_v12  ;;  %v6952_v0 = vmul.f32 %v13310_v13, %v13354_v12  ;;  %v7143_v21 = vrot.slane %v7135_v46, 2 }
 0x42e   : > { %v7016_v28 = vadd.f32 %v7012_v4, %v7000_v37  ;;  %v7127_v20 = vadd.f32 %v7119_v51, %v7103_v41  ;;  %v7159_v18 = vmul.f32 %v13463_v2, %v13152_v14  ;;  %v7096_v38 = vrot.slane %v7088_v39, 1  ;;  %v14918_v51 = vld [vmem:[#allocation51_spill] sm:$0xff] }
 0x42f   : > { %v6688_v43 = vadd.f32 %v6680_v7, %v6664_v24  ;;  %v13474_v4 = vrot.slane %v269_v49, %v14914_v62  ;;  %v7112_v37 = vmul.f32 %v13441_v30, %v13354_v12  ;;  %v6704_v15 = vrot.slane %v6696_v17, 2 }
 0x430   : > { %v7032_v53 = vadd.f32 %v7028_v16, %v7016_v28  ;;  %v7151_v22 = vadd.f32 %v7143_v21, %v7127_v20  ;;  %v6960_v50 = vrot.slane %v6952_v0, 2  ;;  %v7136_v31 = vmul.f32 %v13450_v8, %v13173_v60 }
 0x431   : > { %v7167_v14 = vrot.slane %v7159_v18, 2  ;;  %v13485_v57 = vrot.slane %v269_v49, %v13097_v32  ;;  %v6712_v62 = vadd.f32 %v6704_v15, %v6688_v43  ;;  %v7183_v19 = vmul.f32 %v13474_v4, %v13207_v42 }
 0x432   : > { %v7056_v3 = vadd.f32 %v7048_v36, %v7032_v53  ;;  %v7120_v36 = vrot.slane %v7112_v37, 1  ;;  %v6968_v53 = vadd.f32 %v6960_v50, %v13420_v10  ;;  %v7184_v55 = vmul.f32 %v13474_v4, %v13209_v47 }
 0x433   : > { %v7175_v49 = vadd.f32 %v7167_v14, %v7151_v22  ;;  %v7160_v42 = vmul.f32 %v13463_v2, %v13171_v35  ;;  %v7191_v24 = vrot.slane %v7183_v19, 2  ;;  %v7244_v7 = vsel %vm7243_vm7, %v14918_v51, 0 }
 0x434   : > { %v7080_v23 = vadd.f32 %v7072_v44, %v7056_v3 }
 0x435   : > { %v7168_v21 = vrot.slane %v7160_v42, 2 }
 0x436   : > { %v7104_v29 = vadd.f32 %v7096_v38, %v7080_v23  ;;  %v7199_v23 = vadd.f32 %v7191_v24, %v7175_v49  ;;  %v13520_v38 = vsub.f32 %v7244_v7, %v7244_v7 }
 0x438   : > { %v7128_v32 = vadd.f32 %v7120_v36, %v7104_v29 }
 0x43f   : > { %v13478_v16 = vpop.permute.xlu1 %6731  ;;  %v13480_v28 = vpop.permute.xlu0 %6715 }
 0x440   : > { %v6725_v27 = vmul.f32 %v13169_v6, %v13480_v28  ;;  %v6741_v60 = vmul.f32 %v13183_v54, %v13478_v16  ;;  %v6981_v41 = vmul.f32 %v13316_v56, %v13480_v28  ;;  %v7144_v6 = vrot.slane %v7136_v31, 2 }
 0x441   : > { %v6785_v10 = vmul.f32 %v13180_v40, %v13480_v28  ;;  %v7207_v54 = vmul.f32 %v13485_v57, %v13249_v63  ;;  %v6809_v35 = vmul.f32 %v13166_v9, %v13478_v16  ;;  %v7192_v40 = vrot.slane %v7184_v55, 2  ;;  %v14919_v55 = vld [vmem:[#allocation79_spill] sm:$0xff] }
 0x442   : > { %v6729_v1 = vadd.f32 %v6725_v27, %v6712_v62  ;;  %v6985_v44 = vadd.f32 %v6981_v41, %v6968_v53  ;;  %v7152_v17 = vadd.f32 %v7144_v6, %v7128_v32  ;;  %v6997_v63 = vmul.f32 %v13324_v52, %v13478_v16  ;;  %v13533_v62 = vld [vmem:[%s13697_s4] ss:$0 sm:$0xff] }
 0x443   : > { %v6793_v18 = vrot.slane %v6785_v10, 1  ;;  %v7215_v43 = vrot.slane %v7207_v54, 2  ;;  %v7041_v22 = vmul.f32 %v13320_v61, %v13480_v28  ;;  %v13538_v53 = vand.u32 4294901760, %v13520_v38 }
 0x444   : > { %v13502_v46 = vpop.permute.xlu1 %6747  ;;  %v6745_v47 = vadd.f32 %v6741_v60, %v6729_v1  ;;  %v13504_v3 = vpop.permute.xlu0 %6763  ;;  %v7001_v29 = vadd.f32 %v6997_v63, %v6985_v44  ;;  %v7176_v50 = vadd.f32 %v7168_v21, %v7152_v17  ;;  %v6881_v60 = vmul.f32 %v14919_v55, %v13480_v28 }
 0x445   : > { %v6757_v39 = vmul.f32 %v13212_v58, %v13502_v46  ;;  %v6773_v0 = vmul.f32 %v13252_v34, %v13504_v3  ;;  %v7208_v58 = vmul.f32 %v13485_v57, %v13354_v12  ;;  %v6833_v9 = vmul.f32 %v13215_v11, %v13502_v46 }
 0x446   : > { %v7013_v15 = vmul.f32 %v13392_v25, %v13502_v46  ;;  %v6817_v34 = vrot.slane %v6809_v35, 1  ;;  %v7223_v31 = vadd.f32 %v7215_v43, %v7199_v23  ;;  %v6857_v12 = vmul.f32 %v13269_v48, %v13504_v3 }
 0x447   : > { %v6761_v20 = vadd.f32 %v6757_v39, %v6745_v47  ;;  %v7029_v27 = vmul.f32 %v13400_v59, %v13504_v3  ;;  %v7200_v19 = vadd.f32 %v7192_v40, %v7176_v50  ;;  %v7216_v36 = vrot.slane %v7208_v58, 2 }
 0x448   : > { %v7017_v11 = vadd.f32 %v7013_v15, %v7001_v29  ;;  %v6841_v1 = vrot.slane %v6833_v9, 1  ;;  %v6905_v49 = vmul.f32 %v13177_v5, %v13478_v16  ;;  %v7233_v6 = vadd.f32 %v13533_v62, %v7223_v31 }
 0x449   : > { %v6777_v37 = vadd.f32 %v6773_v0, %v6761_v20  ;;  %v7224_v41 = vadd.f32 %v7216_v36, %v7200_v19  ;;  %v6865_v10 = vrot.slane %v6857_v12, 1  ;;  %v7049_v47 = vrot.slane %v7041_v22, 1 }
 0x44a   : > { %v7033_v48 = vadd.f32 %v7029_v27, %v7017_v11  ;;  %v7065_v24 = vmul.f32 %v13330_v33, %v13478_v16  ;;  %v7319_v39 = vsub.f32 %v13520_v38, %v13538_v53  ;;  %v6889_v44 = vrot.slane %v6881_v60, 2 }
 0x44b   : > { %v6801_v14 = vadd.f32 %v6793_v18, %v6777_v37  ;;  %v7234_v54 = vadd.f32 %v13533_v62, %v7224_v41  ;;  %v6929_v7 = vmul.f32 %v13219_v45, %v13502_v46  ;;  %v6953_v40 = vmul.f32 %v13310_v13, %v13504_v3 }
 0x44c   : > { %v7057_v5 = vadd.f32 %v7049_v47, %v7033_v48  ;;  %v7089_v17 = vmul.f32 %v13424_v26, %v13502_v46  ;;  %v7237_v23 = vmax.f32 %v7233_v6, 0.0  ;;  %v6913_v0 = vrot.slane %v6905_v49, 2 }
 0x44d   : > { %v6825_v32 = vadd.f32 %v6817_v34, %v6801_v14  ;;  %v7238_v20 = vmax.f32 %v7234_v54, 0.0  ;;  %v7073_v21 = vrot.slane %v7065_v24, 1  ;;  %v6937_v43 = vrot.slane %v6929_v7, 2 }
 0x44e   : > { %v6961_v45 = vrot.slane %v6953_v40, 2  ;;  %v7097_v15 = vrot.slane %v7089_v17, 1  ;;  %v13556_v29 = vand.u32 4294901760, %v7319_v39  ;;  %v7113_v22 = vmul.f32 %v13441_v30, %v13504_v3 }
 0x44f   : > { %v6849_v42 = vadd.f32 %v6841_v1, %v6825_v32  ;;  %v7241_v58 = vadd.f32 %v7238_v20, %v7237_v23  ;;  %v7081_v37 = vadd.f32 %v7073_v21, %v7057_v5  ;;  %v7137_v27 = vmul.f32 %v13450_v8, %v13480_v28 }
 0x450   : > { %v14920_v1 = vmov 0.0   ;;  %v7185_v7 = vmul.f32 %v13474_v4, %v13502_v46 }
 0x451   : > { %v6873_v35 = vadd.f32 %v6865_v10, %v6849_v42  ;;  %v7248_v50 = vsel %vm7246_vm8, %v7241_v58, 0  ;;  %v7105_v11 = vadd.f32 %v7097_v15, %v7081_v37  ;;  %v7145_v41 = vrot.slane %v7137_v27, 2 }
 0x452   : > { %v13562_v31 = vand.u32 4294901760, %v7248_v50  ;;  %v7161_v42 = vmul.f32 %v13463_v2, %v13478_v16  ;;  %v7193_v46 = vrot.slane %v7185_v7, 2 }
 0x453   : > { %v6897_v63 = vadd.f32 %v6889_v44, %v6873_v35 }
 0x454   : > { %v6973_v18 = vpop.permute.xlu1 %6972  ;;  %v7005_v19 = vpop.permute.xlu0 %7004  ;;  %8649 = vmatpush3.msra.mxu0 %v13562_v31  ;;  %v13569_v60 = vsub.f32 %v7248_v50, %v13562_v31  ;;  %v7169_v40 = vrot.slane %v7161_v42, 2 }
 0x455   : > { %v6921_v9 = vadd.f32 %v6913_v0, %v6897_v63  ;;  %v6982_v13 = vmul.f32 %v13316_v56, %v6973_v18  ;;  %v7121_v56 = vrot.slane %v7113_v22, 1  ;;  %8651 = vmatmul.mubr.f32.vlgmr.msra.gmra.mrb[6].mxu0 %v13556_v29  ;;  %8653 = vmatprep.subr.mxu0 %v14920_v1  ;;  %v7042_v32 = vmul.f32 %v13320_v61, %v6973_v18 }
 0x456   : > { %8655 = vmatprep.mubr.msk.f32.mxu0 %vm9095_vm2, %v14920_v1  ;;  %v7014_v28 = vmul.f32 %v13392_v25, %v7005_v19  ;;  %v7329_v49 = vand.u32 4294901760, %v13569_v60  ;;  %v7090_v39 = vmul.f32 %v13424_v26, %v7005_v19  ;;  %v7209_v26 = vmul.f32 %v13485_v57, %v13504_v3 }
 0x457   : > { %v6945_v34 = vadd.f32 %v6937_v43, %v6921_v9  ;;  %v7050_v54 = vrot.slane %v7042_v32, 1  ;;  %v7186_v21 = vmul.f32 %v13474_v4, %v7005_v19 }
 0x458   : > { %v7330_v61 = vsub.f32 %v13569_v60, %v7329_v49  ;;  %v7217_v37 = vrot.slane %v7209_v26, 2 }
 0x459   : > { %v6969_v14 = vadd.f32 %v6961_v45, %v6945_v34  ;;  %v6989_v12 = vpop.permute.xlu1 %6988  ;;  %v7194_v45 = vrot.slane %v7186_v21, 2 }
 0x45a   : > { %v6998_v36 = vmul.f32 %v13324_v52, %v6989_v12  ;;  %v7129_v52 = vadd.f32 %v7121_v56, %v7105_v11  ;;  %v7066_v10 = vmul.f32 %v13330_v33, %v6989_v12  ;;  %v7331_v35 = vand.u32 4294901760, %v7330_v61 }
 0x45b   : > { %v6986_v55 = vadd.f32 %v6982_v13, %v6969_v14  ;;  %v7138_v33 = vmul.f32 %v13450_v8, %v6973_v18 }
 0x45c   : > { %v7153_v44 = vadd.f32 %v7145_v41, %v7129_v52  ;;  %v7074_v5 = vrot.slane %v7066_v10, 1  ;;  %8654 = vmatpush3.msra.mxu0 %v7331_v35 }
 0x45d   : > { %v7002_v48 = vadd.f32 %v6998_v36, %v6986_v55  ;;  %8656 = vmatmul.mubr.msk.f32.vlgmr.msra.gmra.mrb[6].mxu0 %vm7243_vm7, %v14918_v51  ;;  %8658 = vmatprep.subr.mxu0 %v14920_v1  ;;  %v7146_v63 = vrot.slane %v7138_v33, 2 }
 0x45e   : > { %v7021_v6 = vpop.permute.xlu1 %7020  ;;  %v7177_v20 = vadd.f32 %v7169_v40, %v7153_v44  ;;  %8659 = vmatpush3.msra.mxu0 %v13569_v60  ;;  %8660 = vmatprep.mubr.msk.f32.mxu0 %vm9095_vm2, %v14920_v1 }
 0x45f   : > { %v7018_v47 = vadd.f32 %v7014_v28, %v7002_v48  ;;  %v7030_v24 = vmul.f32 %v13400_v59, %v7021_v6  ;;  %v7114_v16 = vmul.f32 %v13441_v30, %v7021_v6  ;;  %v7098_v59 = vrot.slane %v7090_v39, 1  ;;  %8663 = vmatprep.subr.mxu0 %v14920_v1 }
 0x460   : > { %v7162_v30 = vmul.f32 %v13463_v2, %v6989_v12  ;;  %v7201_v58 = vadd.f32 %v7193_v46, %v7177_v20  ;;  %v7210_v3 = vmul.f32 %v13485_v57, %v7021_v6 }
 0x461   : > { %v7034_v25 = vadd.f32 %v7030_v24, %v7018_v47  ;;  %v7122_v0 = vrot.slane %v7114_v16, 1 }
 0x462   : > { %v7170_v43 = vrot.slane %v7162_v30, 2  ;;  %v7225_v34 = vadd.f32 %v7217_v37, %v7201_v58  ;;  %v7218_v13 = vrot.slane %v7210_v3, 2 }
 0x463   : > { %v7058_v17 = vadd.f32 %v7050_v54, %v7034_v25 }
 0x464   : > { %v7235_v22 = vadd.f32 %v13533_v62, %v7225_v34 }
 0x465   : > { %v7082_v23 = vadd.f32 %v7074_v5, %v7058_v17  ;;  %8661 = vmatmul.mubr.f32.vlgmr.msra.gmra.mrb[6].mxu0 %v13520_v38 }
 0x466   : > { %8664 = vmatpush3.msra.mxu0 %v13562_v31  ;;  %8665 = vmatprep.mubr.msk.f32.mxu0 %vm9095_vm2, %v14920_v1  ;;  %v7239_v50 = vmax.f32 %v7235_v22, 0.0 }
 0x467   : > { %v7106_v8 = vadd.f32 %v7098_v59, %v7082_v23  ;;  %8668 = vmatprep.subr.mxu0 %v14920_v1 }
 0x469   : > { %v7130_v18 = vadd.f32 %v7122_v0, %v7106_v8 }
 0x46b   : > { %v7154_v9 = vadd.f32 %v7146_v63, %v7130_v18 }
 0x46d   : > { %v7178_v15 = vadd.f32 %v7170_v43, %v7154_v9  ;;  %8666 = vmatmul.mubr.f32.vlgmr.msra.gmra.mrb[6].mxu0 %v13538_v53 }
 0x46e   : > { %8669 = vmatpush3.msra.mxu0 %v7329_v49  ;;  %8670 = vmatprep.mubr.msk.f32.mxu0 %vm9095_vm2, %v14920_v1 }
 0x46f   : > { %v7202_v2 = vadd.f32 %v7194_v45, %v7178_v15  ;;  %8673 = vmatprep.subr.mxu0 %v14920_v1 }
 0x471   : > { %v7226_v4 = vadd.f32 %v7218_v13, %v7202_v2 }
 0x473   : > { %v7236_v57 = vadd.f32 %v13533_v62, %v7226_v4 }
 0x475   : > { %v7240_v14 = vmax.f32 %v7236_v57, 0.0  ;;  %8671 = vmatmul.mubr.msk.f32.vlgmr.msra.gmra.mrb[6].mxu0 %vm7243_vm7, %v14918_v51 }
 0x476   : > { %8674 = vmatpush3.msra.mxu0 %v13562_v31  ;;  %8675 = vmatprep.mubr.msk.f32.mxu0 %vm9095_vm2, %v14920_v1 }
 0x477   : > { %v7242_v12 = vadd.f32 %v7240_v14, %v7239_v50 }
 0x479   : > { %v7697_v11 = vsel %vm7246_vm8, %v7242_v12, 0 }
 0x47a   : > { %v7700_v27 = vand.u32 4294901760, %v7697_v11 }
 0x47c   : > { %8679 = vmatpush3.msra.mxu1 %v7700_v27  ;;  %v7777_v19 = vsub.f32 %v7697_v11, %v7700_v27 }
 0x47d   : > { %8681 = vmatmul.mubr.f32.vlgmr.msra.gmra.mrb[6].mxu1 %v13556_v29  ;;  %8683 = vmatprep.subr.mxu1 %v14920_v1 }
 0x47e   : > { %v7778_v62 = vand.u32 4294901760, %v7777_v19  ;;  %8685 = vmatprep.mubr.msk.f32.mxu1 %vm9095_vm2, %v14920_v1  ;;  %8676 = vmatmul.mubr.msk.f32.vlgmr.msra.gmra.mrb[6].mxu0 %vm7243_vm7, %v14918_v51 }
 0x480   : > { %v7779_v36 = vsub.f32 %v7777_v19, %v7778_v62 }
 0x482   : > { %v7780_v55 = vand.u32 4294901760, %v7779_v36 }
 0x484   : > { %8684 = vmatpush3.msra.mxu1 %v7780_v55 }
 0x485   : > { %8686 = vmatmul.mubr.msk.f32.vlgmr.msra.gmra.mrb[6].mxu1 %vm7243_vm7, %v14918_v51  ;;  %8688 = vmatprep.subr.mxu1 %v14920_v1 }
 0x486   : > { %8689 = vmatpush3.msra.mxu1 %v7777_v19  ;;  %8690 = vmatprep.mubr.msk.f32.mxu1 %vm9095_vm2, %v14920_v1 }
 0x487   : > { %8693 = vmatprep.subr.mxu1 %v14920_v1 }
 0x48d   : > { %8691 = vmatmul.mubr.f32.vlgmr.msra.gmra.mrb[6].mxu1 %v13520_v38 }
 0x48e   : > { %8694 = vmatpush3.msra.mxu1 %v7700_v27  ;;  %8695 = vmatprep.mubr.msk.f32.mxu1 %vm9095_vm2, %v14920_v1 }
 0x48f   : > { %8698 = vmatprep.subr.mxu1 %v14920_v1 }
 0x495   : > { %8696 = vmatmul.mubr.f32.vlgmr.msra.gmra.mrb[6].mxu1 %v13538_v53 }
 0x496   : > { %8699 = vmatpush3.msra.mxu1 %v7778_v62  ;;  %8700 = vmatprep.mubr.msk.f32.mxu1 %vm9095_vm2, %v14920_v1 }
 0x497   : > { %8703 = vmatprep.subr.mxu1 %v14920_v1 }
 0x49d   : > { %8701 = vmatmul.mubr.msk.f32.vlgmr.msra.gmra.mrb[6].mxu1 %vm7243_vm7, %v14918_v51 }
 0x49e   : > { %8704 = vmatpush3.msra.mxu1 %v7700_v27  ;;  %8705 = vmatprep.mubr.msk.f32.mxu1 %vm9095_vm2, %v14920_v1 }
 0x4a5   : > { %8706 = vmatmul.mubr.msk.f32.vlgmr.msra.gmra.mrb[6].mxu1 %vm7243_vm7, %v14918_v51 }
 0x551   : > { %v7692_v38 = vpop.f32.mrb[6].mxu0 }
 0x552   : > { %8146 = vst.msk [vmem:[%s217_s9] sm:$0x3] %vm8145_vm9, %v7692_v38  ;;  %v8677_v53 = vpop.f32.mrb[7].mxu0 }
 0x578   : > { %v8141_v51 = vpop.f32.mrb[6].mxu1 }
 0x579   : > { %8147 = vst.msk [vmem:[%s217_s9 + $0x2] sm:$0x3] %vm8145_vm9, %v8141_v51  ;;  %v8707_v29 = vpop.f32.mrb[7].mxu1 }
 0x57a   : > { %9040 = shalt.err (!%p9037_p3)
}
 0x57b   : > { %s9041_s6 = scalar_lea.hbm %s13650_s17, 64  ;;  %s9045_s10 = scalar_lea.hbm %s13698_s5, 128 }
 0x57c   : > { %p9042_p4 = scmp.ne.s32.totalorder %s13650_s17, %s9041_s6  ;;  %p9046_p9 = scmp.lt.u32.totalorder %s13650_s17, %s13698_s5 }
 0x57d   : > { %p9047_p10 = scmp.lt.u32.totalorder %s9045_s10, %s9041_s6  ;;  %p9049_p12 = scmp.lt.u32.totalorder %s9041_s6, %s13650_s17 }
 0x57e   : > { %p9043_p7 = pnand %p9042_p4, %p9169_p5 }
 0x57f   : > { %p9048_p11 = por %p9047_p10, %p9046_p9 }
 0x580   : > { %p9044_p8 = pneg %p9043_p7 }
 0x581   : > { %p9050_p13 = por %p9049_p12, %p9048_p11 }
 0x583   : > { %p9051_p0 = pnand %p9050_p13, %p9044_p8 }
 0x585   : > { %9054 = shalt.err (!%p9051_p0)
}
 0x586   : > { %s9099_s9 = smov 32   ;;  %s9100_s14 = smov 2  }
 0x587   : > { %8896 = dma.vmem_to_hbm [thread:$0]  (%p9169_p5), %s13645_s13, 64, %s13650_s17, %s13652_s23, %s9099_s9, %s9099_s9, %s9100_s14  }
 0x588 PF: > { %p8902_p1 = scmp.ge.s32.totalorder %s9089_s21, 2  ;;  %s8177_s15 = sand.u32 1, %s9077_s18  }
 0x589   : > { %s8178_s16 = scalar_lea.sflag [#allocation3], %s8177_s15 }
 0x58a   : > { %p8899_p2 = pnand %p8902_p1, %p9173_p6 }
 0x58c   : > { %9072 = dma.done.wait (!%p8899_p2), %s8178_s16, 64  }
 0x58d   : > { %9074 = vsyncadd (!%p8899_p2), %s8178_s16, 4294967232  ;;  %p15_p3 = scmp.ge.s32.totalorder %s9156_s24, 4   ;;  %s14921_s18 = smov %s9081_s19 }
 0x58e   : > { %s14922_s19 = smov %s9085_s20  ;;  %s14923_s20 = smov %s9167_s27 }
 0x58f   : > { %s14924_s21 = smov %s9156_s24  ;;  %17 = sbr.rel (!%p15_p3) target bundleno = 3 (0x3), region = 75 }
 0x596   :  { %8183 = vsyncpa [#allocation3], 1 }
 0x597   :  { %8185 = vsyncpa [#allocation3 + $0x1], 1 }

</bundles_post_ra>
